<compile_context>
chip_gen: v7x
topology: tpu7x:2x2x1
jax: 0.10.0
libtpu: 0.0.40
codegen_flags: <defaults>
</compile_context>

<pallas_src>
import functools
import math

import jax
import jax.numpy as jnp
from jax.experimental import pallas as pl
from jax.experimental.pallas import tpu as pltpu

_EPS = 1e-5          # PyTorch BatchNorm default eps
_CPAD = 128          # padded conv channel width (lane-dense loads/stores)


def _round_up(a, b):
    return (a + b - 1) // b * b


# ----------------------------------------------------------------------------
# Fused matmul + folded-(bias+BN) shift + ReLU kernel (per conv layer)
# ----------------------------------------------------------------------------
def _fused_matmul_kernel(x_ref, w_ref, t_ref, o_ref, *, relu):
    # bf16 x bf16 -> f32 accumulation on the MXU; shift/ReLU epilogue in f32.
    y = jnp.dot(x_ref[...], w_ref[...], preferred_element_type=jnp.float32)
    y = y + t_ref[...]
    if relu:
        y = jnp.maximum(y, 0.0)
    o_ref[...] = y.astype(o_ref.dtype)


def fused_matmul(x, w, shift, *, relu=False, out_dtype=jnp.bfloat16, tm=1024):
    """y = maybe_relu((x @ w) + shift); grid tiles rows of x only."""
    M, K = x.shape
    Kw, N = w.shape
    assert K == Kw, (K, Kw)

    if M <= tm:
        tm_eff, m_pad = M, M                     # single tile (full-dim block is legal)
    else:
        tm_eff = tm
        m_pad = pl.cdiv(M, tm) * tm
        if m_pad != M:                           # cheap activation-row padding only
            x = jnp.pad(x, ((0, m_pad - M), (0, 0)))
    grid = (m_pad // tm_eff,)

    t2 = shift.reshape(1, N).astype(jnp.float32)

    cost = pl.CostEstimate(
        flops=2 * m_pad * K * N,
        transcendentals=0,
        bytes_accessed=int(m_pad * K * x.dtype.itemsize
                           + K * N * w.dtype.itemsize
                           + N * 4
                           + m_pad * N * jnp.dtype(out_dtype).itemsize),
    )

    out = pl.pallas_call(
        functools.partial(_fused_matmul_kernel, relu=relu),
        out_shape=jax.ShapeDtypeStruct((m_pad, N), out_dtype),
        grid_spec=pltpu.PrefetchScalarGridSpec(
            num_scalar_prefetch=0,
            grid=grid,
            in_specs=[
                pl.BlockSpec((tm_eff, K), lambda i: (i, 0)),   # activation row tile (bf16)
                pl.BlockSpec((K, N), lambda i: (0, 0)),        # folded weights (resident)
                pl.BlockSpec((1, N), lambda i: (0, 0)),        # folded bias+BN shift
            ],
            out_specs=pl.BlockSpec((tm_eff, N), lambda i: (i, 0)),
        ),
        compiler_params=pltpu.CompilerParams(
            dimension_semantics=("parallel",),
        ),
        cost_estimate=cost,
    )(x, w, t2)

    if m_pad != M:
        out = out[:M]
    return out


# ----------------------------------------------------------------------------
# Fused dense head: Linear(6272->256) + BN1 + ReLU + Linear(256->2*latent)
# ----------------------------------------------------------------------------
def _dense_head_kernel(x_ref, w1_ref, t1_ref, w2_ref, t2_ref, o_ref):
    h = jnp.dot(x_ref[...], w1_ref[...], preferred_element_type=jnp.float32)
    h = jnp.maximum(h + t1_ref[...], 0.0).astype(jnp.bfloat16)
    y = jnp.dot(h, w2_ref[...], preferred_element_type=jnp.float32) + t2_ref[...]
    o_ref[...] = y.astype(o_ref.dtype)


def dense_head(x, w1, t1, w2, t2):
    M, K1 = x.shape
    K1w, N1 = w1.shape
    N1w, N2 = w2.shape
    assert K1 == K1w and N1 == N1w
    t1 = t1.reshape(1, N1).astype(jnp.float32)
    t2 = t2.reshape(1, N2).astype(jnp.float32)

    cost = pl.CostEstimate(
        flops=2 * M * K1 * N1 + 2 * M * N1 * N2,
        transcendentals=0,
        bytes_accessed=int(M * K1 * 2 + K1 * N1 * 2 + N1 * N2 * 2
                           + (N1 + N2) * 4 + M * N2 * 4),
    )

    return pl.pallas_call(
        _dense_head_kernel,
        out_shape=jax.ShapeDtypeStruct((M, N2), jnp.float32),
        grid_spec=pltpu.PrefetchScalarGridSpec(
            num_scalar_prefetch=0,
            grid=(1,),
            in_specs=[
                pl.BlockSpec((M, K1), lambda i: (0, 0)),
                pl.BlockSpec((K1, N1), lambda i: (0, 0)),
                pl.BlockSpec((1, N1), lambda i: (0, 0)),
                pl.BlockSpec((N1, N2), lambda i: (0, 0)),
                pl.BlockSpec((1, N2), lambda i: (0, 0)),
            ],
            out_specs=pl.BlockSpec((M, N2), lambda i: (0, 0)),
        ),
        compiler_params=pltpu.CompilerParams(
            dimension_semantics=("arbitrary",),
        ),
        cost_estimate=cost,
    )(x, w1, t1, w2, t2)


# ----------------------------------------------------------------------------
# Patch extraction (layout plumbing in the JAX wrapper, all in bf16)
# ----------------------------------------------------------------------------
def _conv1_patches(h, cin_pad):
    """k=4, s=2, p=1 im2col; channels zero-padded to cin_pad so K = 16*cin_pad."""
    n, H, W, c = h.shape
    hp = jnp.pad(h, ((0, 0), (1, 1), (1, 1), (0, cin_pad - c)))
    oh = (H + 2 - 4) // 2 + 1
    ow = (W + 2 - 4) // 2 + 1
    taps = []
    for i in range(4):
        for j in range(4):
            taps.append(hp[:, i:i + 2 * (oh - 1) + 1:2,
                           j:j + 2 * (ow - 1) + 1:2, :])
    p = jnp.stack(taps, axis=3)                       # (N, oh, ow, 16, cin_pad)
    return p.reshape(n * oh * ow, 16 * cin_pad), oh, ow


def _s2d_patches(h):
    """k=2, s=2, p=1: pad + space-to-depth (non-overlapping 2x2 windows)."""
    n, H, W, c = h.shape
    hp = jnp.pad(h, ((0, 0), (1, 1), (1, 1), (0, 0)))
    oh, ow = (H + 2) // 2, (W + 2) // 2
    hp = hp.reshape(n, oh, 2, ow, 2, c).transpose(0, 1, 3, 2, 4, 5)
    return hp.reshape(n * oh * ow, 4 * c), oh, ow     # (di, dj, c) ordering, c fastest


# ----------------------------------------------------------------------------
# Parameters (PyTorch-style init) and one-time preparation
# ----------------------------------------------------------------------------
def init_params(key, num_channels, latent_dim):
    keys = jax.random.split(key, 12)

    def conv(kw_key, kb_key, kh_, kw_, cin, cout):
        fan_in = cin * kh_ * kw_
        bound = 1.0 / math.sqrt(fan_in)
        w = jax.random.uniform(kw_key, (kh_, kw_, cin, cout), jnp.float32, -bound, bound)
        b = jax.random.uniform(kb_key, (cout,), jnp.float32, -bound, bound)
        return w, b

    def lin(kw_key, kb_key, fi, fo):
        bound = 1.0 / math.sqrt(fi)
        w = jax.random.uniform(kw_key, (fi, fo), jnp.float32, -bound, bound)
        b = jax.random.uniform(kb_key, (fo,), jnp.float32, -bound, bound)
        return w, b

    p = {}
    p["conv1_w"], p["conv1_b"] = conv(keys[0], keys[1], 4, 4, num_channels, 32)
    p["conv2_w"], p["conv2_b"] = conv(keys[2], keys[3], 2, 2, 32, 32)
    p["conv3_w"], p["conv3_b"] = conv(keys[4], keys[5], 2, 2, 32, 64)
    p["conv4_w"], p["conv4_b"] = conv(keys[6], keys[7], 2, 2, 64, 64)
    p["dense1_w"], p["dense1_b"] = lin(keys[8], keys[9], 3136, 256)
    p["dense2_w"], p["dense2_b"] = lin(keys[10], keys[11], 256, latent_dim * 2)
    for name, c in [("bn2", 32), ("bn3", 32), ("bn4", 64), ("bn5", 64), ("bn1", 256)]:
        p[name + "_gamma"] = jnp.ones((c,), jnp.float32)
        p[name + "_beta"] = jnp.zeros((c,), jnp.float32)
        p[name + "_mean"] = jnp.zeros((c,), jnp.float32)
        p[name + "_var"] = jnp.ones((c,), jnp.float32)
    return p


def prepare_params(p):
    """One-time prep (hoisted out of the forward path):
       * fold conv/linear bias + inference-mode BatchNorm into per-channel
         scale/shift, then fold the scale into the weight columns,
       * zero-pad conv channels (cin and cout) to 128 lanes,
       * permute + pad dense1 rows so the NHWC-padded conv4 output can be
         flattened directly (no transpose in the forward path),
       * cast all weights to bf16."""
    def fold(bias, gamma, beta, mean, var):
        s = gamma * jax.lax.rsqrt(var + _EPS)
        t = beta + (bias - mean) * s
        return s, t

    q = {}
    cin = p["conv1_w"].shape[2]
    cin_pad = _round_up(cin, 8)            # 16 taps * cin_pad -> multiple of 128

    def conv_pack(w, bias, bn, cin_to):
        s, t = fold(bias, p[bn + "_gamma"], p[bn + "_beta"],
                    p[bn + "_mean"], p[bn + "_var"])
        w = w * s                                              # fold BN scale into weights
        kh_, kw_, ci, co = w.shape
        w = jnp.pad(w, ((0, 0), (0, 0), (0, cin_to - ci), (0, _CPAD - co)))
        t = jnp.pad(t, (0, _CPAD - co))                        # padded channels: shift = 0
        return (w.reshape(kh_ * kw_ * cin_to, _CPAD).astype(jnp.bfloat16),
                t.astype(jnp.float32))

    q["w1"], q["t1"] = conv_pack(p["conv1_w"], p["conv1_b"], "bn2", cin_pad)
    q["w2"], q["t2"] = conv_pack(p["conv2_w"], p["conv2_b"], "bn3", _CPAD)
    q["w3"], q["t3"] = conv_pack(p["conv3_w"], p["conv3_b"], "bn4", _CPAD)
    q["w4"], q["t4"] = conv_pack(p["conv4_w"], p["conv4_b"], "bn5", _CPAD)

    # dense1: rows are in PyTorch (C=64, H=7, W=7) flatten order; reorder to
    # (H, W, C_padded) so the NHWC conv4 output flattens directly.
    s, t = fold(p["dense1_b"], p["bn1_gamma"], p["bn1_beta"],
                p["bn1_mean"], p["bn1_var"])
    w = p["dense1_w"] * s                                      # (3136, 256)
    w = w.reshape(64, 7, 7, 256).transpose(1, 2, 0, 3)         # (7, 7, 64, 256)
    w = jnp.pad(w, ((0, 0), (0, 0), (0, _CPAD - 64), (0, 0)))  # (7, 7, 128, 256)
    q["w5"] = w.reshape(7 * 7 * _CPAD, 256).astype(jnp.bfloat16)
    q["t5"] = t.astype(jnp.float32)

    q["w6"] = p["dense2_w"].astype(jnp.bfloat16)
    q["t6"] = p["dense2_b"].astype(jnp.float32)
    return q


# ----------------------------------------------------------------------------
# Forward pass
# ----------------------------------------------------------------------------
def encoder_forward(q, x):
    """x: (N, C, H, W) as in PyTorch. Returns (N, latent_dim*2)."""
    n, c, _, _ = x.shape
    cin_pad = _round_up(c, 8)
    h = jnp.transpose(x, (0, 2, 3, 1)).astype(jnp.bfloat16)    # NHWC bf16, once

    # conv1 (k=4, s=2, p=1): 2 row tiles of 1792 (megacore-friendly on v7x).
    patches, oh, ow = _conv1_patches(h, cin_pad)
    y = fused_matmul(patches, q["w1"], q["t1"], relu=True, tm=1792)
    h = y.reshape(n, oh, ow, _CPAD)

    # conv2..conv4 (k=2, s=2, p=1): space-to-depth + single-tile fused matmul.
    for wk, tk in (("w2", "t2"), ("w3", "t3"), ("w4", "t4")):
        patches, oh, ow = _s2d_patches(h)
        y = fused_matmul(patches, q[wk], q[tk], relu=True)
        h = y.reshape(n, oh, ow, _CPAD)

    # Flatten NHWC directly (dense1 rows were permuted/padded at prepare time).
    flat = h.reshape(n, oh * ow * _CPAD)                       # (N, 6272)
    return dense_head(flat, q["w5"], q["t5"], q["w6"], q["t6"])


# ----------------------------------------------------------------------------
# Pure-JAX reference (f32 end to end) for correctness checking
# ----------------------------------------------------------------------------
def encoder_ref(p, x):
    dn = ("NHWC", "HWIO", "NHWC")

    def block(h, w, b, g, bt, m, v, stride, pad):
        h = jax.lax.conv_general_dilated(h, w, (stride, stride),
                                         ((pad, pad), (pad, pad)),
                                         dimension_numbers=dn) + b
        h = (h - m) * jax.lax.rsqrt(v + _EPS) * g + bt
        return jax.nn.relu(h)

    h = jnp.transpose(x, (0, 2, 3, 1))
    h = block(h, p["conv1_w"], p["conv1_b"], p["bn2_gamma"], p["bn2_beta"],
              p["bn2_mean"], p["bn2_var"], 2, 1)
    h = block(h, p["conv2_w"], p["conv2_b"], p["bn3_gamma"], p["bn3_beta"],
              p["bn3_mean"], p["bn3_var"], 2, 1)
    h = block(h, p["conv3_w"], p["conv3_b"], p["bn4_gamma"], p["bn4_beta"],
              p["bn4_mean"], p["bn4_var"], 2, 1)
    h = block(h, p["conv4_w"], p["conv4_b"], p["bn5_gamma"], p["bn5_beta"],
              p["bn5_mean"], p["bn5_var"], 2, 1)
    h = jnp.transpose(h, (0, 3, 1, 2)).reshape(x.shape[0], -1)
    h = h @ p["dense1_w"] + p["dense1_b"]
    h = (h - p["bn1_mean"]) * jax.lax.rsqrt(p["bn1_var"] + _EPS) * p["bn1_gamma"] + p["bn1_beta"]
    h = jax.nn.relu(h)
    return h @ p["dense2_w"] + p["dense2_b"]


if __name__ == "__main__":
    # Spatial must be 84x84 because Linear(3136, 256) is hard-coded
    # (84 -> 42 -> 22 -> 12 -> 7, and 7*7*64 = 3136).
    batch, num_channels, latent_dim = 2, 3, 32
    H = W = 84

    key = jax.random.PRNGKey(0)
    pkey, xkey = jax.random.split(key)
    params = init_params(pkey, num_channels, latent_dim)
    fast_params = prepare_params(params)

    x = jax.random.normal(xkey, (batch, num_channels, H, W), jnp.float32)

    fwd = jax.jit(encoder_forward)
    out = fwd(fast_params, x)
    jax.block_until_ready(out)

    ref = encoder_ref(params, x)

    assert out.shape == (batch, latent_dim * 2), out.shape
    assert bool(jnp.all(jnp.isfinite(out)))
    # bf16 weights + bf16 activation chain vs f32 reference.
    assert bool(jnp.allclose(out, ref, rtol=3e-2, atol=3e-2)), \
        float(jnp.max(jnp.abs(out - ref)))

    print("KERNEL_OK")
</pallas_src>

<mosaic_0001>
module attributes {stable_mosaic.version = 11 : i64} {
  func.func @_fused_matmul_kernel(%arg0: i32, %arg1: memref<1792x128xbf16, #tpu.memory_space<vmem>>, %arg2: memref<128x128xbf16, #tpu.memory_space<vmem>>, %arg3: memref<1x128xf32, #tpu.memory_space<vmem>>, %arg4: memref<1792x128xbf16, #tpu.memory_space<vmem>>) attributes {dimension_semantics = [#tpu.dimension_semantics<parallel>], iteration_bounds = array<i64: 2>, scalar_prefetch = 0 : i64, scratch_operands = 0 : i64, tpu.core_type = #tpu.core_type<tc>, window_params = [{transform_indices = @transform_0, window_bounds = array<i64: 1792, 128>}, {pipeline_mode = #tpu.pipeline_mode<synchronous>, transform_indices = @transform_1, window_bounds = array<i64: 128, 128>}, {pipeline_mode = #tpu.pipeline_mode<synchronous>, transform_indices = @transform_2, window_bounds = array<i64: 1, 128>}, {transform_indices = @transform_3, window_bounds = array<i64: 1792, 128>}]} {
    %c0 = arith.constant 0 : index
    %c0_0 = arith.constant 0 : index
    %0 = vector.load %arg1[%c0, %c0_0] : memref<1792x128xbf16, #tpu.memory_space<vmem>>, vector<1792x128xbf16>
    %c0_1 = arith.constant 0 : index
    %c0_2 = arith.constant 0 : index
    %1 = vector.load %arg2[%c0_1, %c0_2] : memref<128x128xbf16, #tpu.memory_space<vmem>>, vector<128x128xbf16>
    %cst = arith.constant dense<0.000000e+00> : vector<1792x128xf32>
    %2 = tpu.matmul %0, %1, %cst {dimension_numbers = #tpu.dot_dimension_numbers<[1], [0], [0], [1], [0, 0, 1, 1], [], []>} : vector<1792x128xbf16>, vector<128x128xbf16>, vector<1792x128xf32> -> vector<1792x128xf32>
    %c0_3 = arith.constant 0 : index
    %c0_4 = arith.constant 0 : index
    %3 = vector.load %arg3[%c0_3, %c0_4] : memref<1x128xf32, #tpu.memory_space<vmem>>, vector<1x128xf32>
    %4 = vector.broadcast %3 : vector<1x128xf32> to vector<1792x128xf32>
    %5 = arith.addf %2, %4 : vector<1792x128xf32>
    %cst_5 = arith.constant 0.000000e+00 : f32
    %6 = vector.broadcast %cst_5 : f32 to vector<1792x128xf32>
    %7 = arith.maximumf %5, %6 : vector<1792x128xf32>
    %8 = arith.truncf %7 : vector<1792x128xf32> to vector<1792x128xbf16>
    %c0_6 = arith.constant 0 : index
    %c0_7 = arith.constant 0 : index
    %9 = vector.load %arg4[%c0_6, %c0_7] : memref<1792x128xbf16, #tpu.memory_space<vmem>>, vector<1792x128xbf16>
    tpu.vector_store %arg4[%c0_6, %c0_7], %8 {strides = array<i32>} : memref<1792x128xbf16, #tpu.memory_space<vmem>>, vector<1792x128xbf16>,
    return
  }
  func.func @transform_0(%arg0: i32) -> (i32, i32) {
    %c0_i32 = arith.constant 0 : i32
    %c0_i32_0 = arith.constant 0 : i32
    return %arg0, %c0_i32 : i32, i32
  }
  func.func @transform_1(%arg0: i32) -> (i32, i32) {
    %c0_i32 = arith.constant 0 : i32
    %c0_i32_0 = arith.constant 0 : i32
    %c0_i32_1 = arith.constant 0 : i32
    return %c0_i32, %c0_i32_0 : i32, i32
  }
  func.func @transform_2(%arg0: i32) -> (i32, i32) {
    %c0_i32 = arith.constant 0 : i32
    %c0_i32_0 = arith.constant 0 : i32
    %c0_i32_1 = arith.constant 0 : i32
    return %c0_i32, %c0_i32_0 : i32, i32
  }
  func.func @transform_3(%arg0: i32) -> (i32, i32) {
    %c0_i32 = arith.constant 0 : i32
    %c0_i32_0 = arith.constant 0 : i32
    return %arg0, %c0_i32 : i32, i32
  }
}

module attributes {stable_mosaic.version = 11 : i64} {
  func.func @_fused_matmul_kernel(%arg0: i32, %arg1: memref<968x512xbf16, #tpu.memory_space<vmem>>, %arg2: memref<512x128xbf16, #tpu.memory_space<vmem>>, %arg3: memref<1x128xf32, #tpu.memory_space<vmem>>, %arg4: memref<968x128xbf16, #tpu.memory_space<vmem>>) attributes {dimension_semantics = [#tpu.dimension_semantics<parallel>], iteration_bounds = array<i64: 1>, scalar_prefetch = 0 : i64, scratch_operands = 0 : i64, tpu.core_type = #tpu.core_type<tc>, window_params = [{transform_indices = @transform_0, window_bounds = array<i64: 968, 512>}, {pipeline_mode = #tpu.pipeline_mode<synchronous>, transform_indices = @transform_1, window_bounds = array<i64: 512, 128>}, {pipeline_mode = #tpu.pipeline_mode<synchronous>, transform_indices = @transform_2, window_bounds = array<i64: 1, 128>}, {transform_indices = @transform_3, window_bounds = array<i64: 968, 128>}]} {
    %c0 = arith.constant 0 : index
    %c0_0 = arith.constant 0 : index
    %0 = vector.load %arg1[%c0, %c0_0] : memref<968x512xbf16, #tpu.memory_space<vmem>>, vector<968x512xbf16>
    %c0_1 = arith.constant 0 : index
    %c0_2 = arith.constant 0 : index
    %1 = vector.load %arg2[%c0_1, %c0_2] : memref<512x128xbf16, #tpu.memory_space<vmem>>, vector<512x128xbf16>
    %cst = arith.constant dense<0.000000e+00> : vector<968x128xf32>
    %2 = tpu.matmul %0, %1, %cst {dimension_numbers = #tpu.dot_dimension_numbers<[1], [0], [0], [1], [0, 0, 1, 1], [], []>} : vector<968x512xbf16>, vector<512x128xbf16>, vector<968x128xf32> -> vector<968x128xf32>
    %c0_3 = arith.constant 0 : index
    %c0_4 = arith.constant 0 : index
    %3 = vector.load %arg3[%c0_3, %c0_4] : memref<1x128xf32, #tpu.memory_space<vmem>>, vector<1x128xf32>
    %4 = vector.broadcast %3 : vector<1x128xf32> to vector<968x128xf32>
    %5 = arith.addf %2, %4 : vector<968x128xf32>
    %cst_5 = arith.constant 0.000000e+00 : f32
    %6 = vector.broadcast %cst_5 : f32 to vector<968x128xf32>
    %7 = arith.maximumf %5, %6 : vector<968x128xf32>
    %8 = arith.truncf %7 : vector<968x128xf32> to vector<968x128xbf16>
    %c0_6 = arith.constant 0 : index
    %c0_7 = arith.constant 0 : index
    %9 = vector.load %arg4[%c0_6, %c0_7] : memref<968x128xbf16, #tpu.memory_space<vmem>>, vector<968x128xbf16>
    tpu.vector_store %arg4[%c0_6, %c0_7], %8 {strides = array<i32>} : memref<968x128xbf16, #tpu.memory_space<vmem>>, vector<968x128xbf16>,
    return
  }
  func.func @transform_0(%arg0: i32) -> (i32, i32) {
    %c0_i32 = arith.constant 0 : i32
    %c0_i32_0 = arith.constant 0 : i32
    return %arg0, %c0_i32 : i32, i32
  }
  func.func @transform_1(%arg0: i32) -> (i32, i32) {
    %c0_i32 = arith.constant 0 : i32
    %c0_i32_0 = arith.constant 0 : i32
    %c0_i32_1 = arith.constant 0 : i32
    return %c0_i32, %c0_i32_0 : i32, i32
  }
  func.func @transform_2(%arg0: i32) -> (i32, i32) {
    %c0_i32 = arith.constant 0 : i32
    %c0_i32_0 = arith.constant 0 : i32
    %c0_i32_1 = arith.constant 0 : i32
    return %c0_i32, %c0_i32_0 : i32, i32
  }
  func.func @transform_3(%arg0: i32) -> (i32, i32) {
    %c0_i32 = arith.constant 0 : i32
    %c0_i32_0 = arith.constant 0 : i32
    return %arg0, %c0_i32 : i32, i32
  }
}

module attributes {stable_mosaic.version = 11 : i64} {
  func.func @_fused_matmul_kernel(%arg0: i32, %arg1: memref<288x512xbf16, #tpu.memory_space<vmem>>, %arg2: memref<512x128xbf16, #tpu.memory_space<vmem>>, %arg3: memref<1x128xf32, #tpu.memory_space<vmem>>, %arg4: memref<288x128xbf16, #tpu.memory_space<vmem>>) attributes {dimension_semantics = [#tpu.dimension_semantics<parallel>], iteration_bounds = array<i64: 1>, scalar_prefetch = 0 : i64, scratch_operands = 0 : i64, tpu.core_type = #tpu.core_type<tc>, window_params = [{transform_indices = @transform_0, window_bounds = array<i64: 288, 512>}, {pipeline_mode = #tpu.pipeline_mode<synchronous>, transform_indices = @transform_1, window_bounds = array<i64: 512, 128>}, {pipeline_mode = #tpu.pipeline_mode<synchronous>, transform_indices = @transform_2, window_bounds = array<i64: 1, 128>}, {transform_indices = @transform_3, window_bounds = array<i64: 288, 128>}]} {
    %c0 = arith.constant 0 : index
    %c0_0 = arith.constant 0 : index
    %0 = vector.load %arg1[%c0, %c0_0] : memref<288x512xbf16, #tpu.memory_space<vmem>>, vector<288x512xbf16>
    %c0_1 = arith.constant 0 : index
    %c0_2 = arith.constant 0 : index
    %1 = vector.load %arg2[%c0_1, %c0_2] : memref<512x128xbf16, #tpu.memory_space<vmem>>, vector<512x128xbf16>
    %cst = arith.constant dense<0.000000e+00> : vector<288x128xf32>
    %2 = tpu.matmul %0, %1, %cst {dimension_numbers = #tpu.dot_dimension_numbers<[1], [0], [0], [1], [0, 0, 1, 1], [], []>} : vector<288x512xbf16>, vector<512x128xbf16>, vector<288x128xf32> -> vector<288x128xf32>
    %c0_3 = arith.constant 0 : index
    %c0_4 = arith.constant 0 : index
    %3 = vector.load %arg3[%c0_3, %c0_4] : memref<1x128xf32, #tpu.memory_space<vmem>>, vector<1x128xf32>
    %4 = vector.broadcast %3 : vector<1x128xf32> to vector<288x128xf32>
    %5 = arith.addf %2, %4 : vector<288x128xf32>
    %cst_5 = arith.constant 0.000000e+00 : f32
    %6 = vector.broadcast %cst_5 : f32 to vector<288x128xf32>
    %7 = arith.maximumf %5, %6 : vector<288x128xf32>
    %8 = arith.truncf %7 : vector<288x128xf32> to vector<288x128xbf16>
    %c0_6 = arith.constant 0 : index
    %c0_7 = arith.constant 0 : index
    %9 = vector.load %arg4[%c0_6, %c0_7] : memref<288x128xbf16, #tpu.memory_space<vmem>>, vector<288x128xbf16>
    tpu.vector_store %arg4[%c0_6, %c0_7], %8 {strides = array<i32>} : memref<288x128xbf16, #tpu.memory_space<vmem>>, vector<288x128xbf16>,
    return
  }
  func.func @transform_0(%arg0: i32) -> (i32, i32) {
    %c0_i32 = arith.constant 0 : i32
    %c0_i32_0 = arith.constant 0 : i32
    return %arg0, %c0_i32 : i32, i32
  }
  func.func @transform_1(%arg0: i32) -> (i32, i32) {
    %c0_i32 = arith.constant 0 : i32
    %c0_i32_0 = arith.constant 0 : i32
    %c0_i32_1 = arith.constant 0 : i32
    return %c0_i32, %c0_i32_0 : i32, i32
  }
  func.func @transform_2(%arg0: i32) -> (i32, i32) {
    %c0_i32 = arith.constant 0 : i32
    %c0_i32_0 = arith.constant 0 : i32
    %c0_i32_1 = arith.constant 0 : i32
    return %c0_i32, %c0_i32_0 : i32, i32
  }
  func.func @transform_3(%arg0: i32) -> (i32, i32) {
    %c0_i32 = arith.constant 0 : i32
    %c0_i32_0 = arith.constant 0 : i32
    return %arg0, %c0_i32 : i32, i32
  }
}

module attributes {stable_mosaic.version = 11 : i64} {
  func.func @_fused_matmul_kernel(%arg0: i32, %arg1: memref<98x512xbf16, #tpu.memory_space<vmem>>, %arg2: memref<512x128xbf16, #tpu.memory_space<vmem>>, %arg3: memref<1x128xf32, #tpu.memory_space<vmem>>, %arg4: memref<98x128xbf16, #tpu.memory_space<vmem>>) attributes {dimension_semantics = [#tpu.dimension_semantics<parallel>], iteration_bounds = array<i64: 1>, scalar_prefetch = 0 : i64, scratch_operands = 0 : i64, tpu.core_type = #tpu.core_type<tc>, window_params = [{transform_indices = @transform_0, window_bounds = array<i64: 98, 512>}, {pipeline_mode = #tpu.pipeline_mode<synchronous>, transform_indices = @transform_1, window_bounds = array<i64: 512, 128>}, {pipeline_mode = #tpu.pipeline_mode<synchronous>, transform_indices = @transform_2, window_bounds = array<i64: 1, 128>}, {transform_indices = @transform_3, window_bounds = array<i64: 98, 128>}]} {
    %c0 = arith.constant 0 : index
    %c0_0 = arith.constant 0 : index
    %0 = vector.load %arg1[%c0, %c0_0] : memref<98x512xbf16, #tpu.memory_space<vmem>>, vector<98x512xbf16>
    %c0_1 = arith.constant 0 : index
    %c0_2 = arith.constant 0 : index
    %1 = vector.load %arg2[%c0_1, %c0_2] : memref<512x128xbf16, #tpu.memory_space<vmem>>, vector<512x128xbf16>
    %cst = arith.constant dense<0.000000e+00> : vector<98x128xf32>
    %2 = tpu.matmul %0, %1, %cst {dimension_numbers = #tpu.dot_dimension_numbers<[1], [0], [0], [1], [0, 0, 1, 1], [], []>} : vector<98x512xbf16>, vector<512x128xbf16>, vector<98x128xf32> -> vector<98x128xf32>
    %c0_3 = arith.constant 0 : index
    %c0_4 = arith.constant 0 : index
    %3 = vector.load %arg3[%c0_3, %c0_4] : memref<1x128xf32, #tpu.memory_space<vmem>>, vector<1x128xf32>
    %4 = vector.broadcast %3 : vector<1x128xf32> to vector<98x128xf32>
    %5 = arith.addf %2, %4 : vector<98x128xf32>
    %cst_5 = arith.constant 0.000000e+00 : f32
    %6 = vector.broadcast %cst_5 : f32 to vector<98x128xf32>
    %7 = arith.maximumf %5, %6 : vector<98x128xf32>
    %8 = arith.truncf %7 : vector<98x128xf32> to vector<98x128xbf16>
    %c0_6 = arith.constant 0 : index
    %c0_7 = arith.constant 0 : index
    %9 = vector.load %arg4[%c0_6, %c0_7] : memref<98x128xbf16, #tpu.memory_space<vmem>>, vector<98x128xbf16>
    tpu.vector_store %arg4[%c0_6, %c0_7], %8 {strides = array<i32>} : memref<98x128xbf16, #tpu.memory_space<vmem>>, vector<98x128xbf16>,
    return
  }
  func.func @transform_0(%arg0: i32) -> (i32, i32) {
    %c0_i32 = arith.constant 0 : i32
    %c0_i32_0 = arith.constant 0 : i32
    return %arg0, %c0_i32 : i32, i32
  }
  func.func @transform_1(%arg0: i32) -> (i32, i32) {
    %c0_i32 = arith.constant 0 : i32
    %c0_i32_0 = arith.constant 0 : i32
    %c0_i32_1 = arith.constant 0 : i32
    return %c0_i32, %c0_i32_0 : i32, i32
  }
  func.func @transform_2(%arg0: i32) -> (i32, i32) {
    %c0_i32 = arith.constant 0 : i32
    %c0_i32_0 = arith.constant 0 : i32
    %c0_i32_1 = arith.constant 0 : i32
    return %c0_i32, %c0_i32_0 : i32, i32
  }
  func.func @transform_3(%arg0: i32) -> (i32, i32) {
    %c0_i32 = arith.constant 0 : i32
    %c0_i32_0 = arith.constant 0 : i32
    return %arg0, %c0_i32 : i32, i32
  }
}

module attributes {stable_mosaic.version = 11 : i64} {
  func.func @_dense_head_kernel(%arg0: i32, %arg1: memref<2x6272xbf16, #tpu.memory_space<vmem>>, %arg2: memref<6272x256xbf16, #tpu.memory_space<vmem>>, %arg3: memref<1x256xf32, #tpu.memory_space<vmem>>, %arg4: memref<256x64xbf16, #tpu.memory_space<vmem>>, %arg5: memref<1x64xf32, #tpu.memory_space<vmem>>, %arg6: memref<2x64xf32, #tpu.memory_space<vmem>>) attributes {dimension_semantics = [#tpu.dimension_semantics<arbitrary>], iteration_bounds = array<i64: 1>, scalar_prefetch = 0 : i64, scratch_operands = 0 : i64, tpu.core_type = #tpu.core_type<tc>, window_params = [{pipeline_mode = #tpu.pipeline_mode<synchronous>, transform_indices = @transform_0, window_bounds = array<i64: 2, 6272>}, {pipeline_mode = #tpu.pipeline_mode<synchronous>, transform_indices = @transform_1, window_bounds = array<i64: 6272, 256>}, {pipeline_mode = #tpu.pipeline_mode<synchronous>, transform_indices = @transform_2, window_bounds = array<i64: 1, 256>}, {pipeline_mode = #tpu.pipeline_mode<synchronous>, transform_indices = @transform_3, window_bounds = array<i64: 256, 64>}, {pipeline_mode = #tpu.pipeline_mode<synchronous>, transform_indices = @transform_4, window_bounds = array<i64: 1, 64>}, {pipeline_mode = #tpu.pipeline_mode<synchronous>, transform_indices = @transform_5, window_bounds = array<i64: 2, 64>}]} {
    %c0 = arith.constant 0 : index
    %c0_0 = arith.constant 0 : index
    %0 = vector.load %arg1[%c0, %c0_0] : memref<2x6272xbf16, #tpu.memory_space<vmem>>, vector<2x6272xbf16>
    %c0_1 = arith.constant 0 : index
    %c0_2 = arith.constant 0 : index
    %1 = vector.load %arg2[%c0_1, %c0_2] : memref<6272x256xbf16, #tpu.memory_space<vmem>>, vector<6272x256xbf16>
    %cst = arith.constant dense<0.000000e+00> : vector<2x256xf32>
    %2 = tpu.matmul %0, %1, %cst {dimension_numbers = #tpu.dot_dimension_numbers<[1], [0], [0], [1], [0, 0, 1, 1], [], []>} : vector<2x6272xbf16>, vector<6272x256xbf16>, vector<2x256xf32> -> vector<2x256xf32>
    %c0_3 = arith.constant 0 : index
    %c0_4 = arith.constant 0 : index
    %3 = vector.load %arg3[%c0_3, %c0_4] : memref<1x256xf32, #tpu.memory_space<vmem>>, vector<1x256xf32>
    %4 = vector.broadcast %3 : vector<1x256xf32> to vector<2x256xf32>
    %5 = arith.addf %2, %4 : vector<2x256xf32>
    %cst_5 = arith.constant 0.000000e+00 : f32
    %6 = vector.broadcast %cst_5 : f32 to vector<2x256xf32>
    %7 = arith.maximumf %5, %6 : vector<2x256xf32>
    %8 = arith.truncf %7 : vector<2x256xf32> to vector<2x256xbf16>
    %c0_6 = arith.constant 0 : index
    %c0_7 = arith.constant 0 : index
    %9 = vector.load %arg4[%c0_6, %c0_7] : memref<256x64xbf16, #tpu.memory_space<vmem>>, vector<256x64xbf16>
    %cst_8 = arith.constant dense<0.000000e+00> : vector<2x64xf32>
    %10 = tpu.matmul %8, %9, %cst_8 {dimension_numbers = #tpu.dot_dimension_numbers<[1], [0], [0], [1], [0, 0, 1, 1], [], []>} : vector<2x256xbf16>, vector<256x64xbf16>, vector<2x64xf32> -> vector<2x64xf32>
    %c0_9 = arith.constant 0 : index
    %c0_10 = arith.constant 0 : index
    %11 = vector.load %arg5[%c0_9, %c0_10] : memref<1x64xf32, #tpu.memory_space<vmem>>, vector<1x64xf32>
    %12 = vector.broadcast %11 : vector<1x64xf32> to vector<2x64xf32>
    %13 = arith.addf %10, %12 : vector<2x64xf32>
    %c0_11 = arith.constant 0 : index
    %c0_12 = arith.constant 0 : index
    %14 = vector.load %arg6[%c0_11, %c0_12] : memref<2x64xf32, #tpu.memory_space<vmem>>, vector<2x64xf32>
    tpu.vector_store %arg6[%c0_11, %c0_12], %13 {strides = array<i32>} : memref<2x64xf32, #tpu.memory_space<vmem>>, vector<2x64xf32>,
    return
  }
  func.func @transform_0(%arg0: i32) -> (i32, i32) {
    %c0_i32 = arith.constant 0 : i32
    %c0_i32_0 = arith.constant 0 : i32
    %c0_i32_1 = arith.constant 0 : i32
    return %c0_i32, %c0_i32_0 : i32, i32
  }
  func.func @transform_1(%arg0: i32) -> (i32, i32) {
    %c0_i32 = arith.constant 0 : i32
    %c0_i32_0 = arith.constant 0 : i32
    %c0_i32_1 = arith.constant 0 : i32
    return %c0_i32, %c0_i32_0 : i32, i32
  }
  func.func @transform_2(%arg0: i32) -> (i32, i32) {
    %c0_i32 = arith.constant 0 : i32
    %c0_i32_0 = arith.constant 0 : i32
    %c0_i32_1 = arith.constant 0 : i32
    return %c0_i32, %c0_i32_0 : i32, i32
  }
  func.func @transform_3(%arg0: i32) -> (i32, i32) {
    %c0_i32 = arith.constant 0 : i32
    %c0_i32_0 = arith.constant 0 : i32
    %c0_i32_1 = arith.constant 0 : i32
    return %c0_i32, %c0_i32_0 : i32, i32
  }
  func.func @transform_4(%arg0: i32) -> (i32, i32) {
    %c0_i32 = arith.constant 0 : i32
    %c0_i32_0 = arith.constant 0 : i32
    %c0_i32_1 = arith.constant 0 : i32
    return %c0_i32, %c0_i32_0 : i32, i32
  }
  func.func @transform_5(%arg0: i32) -> (i32, i32) {
    %c0_i32 = arith.constant 0 : i32
    %c0_i32_0 = arith.constant 0 : i32
    %c0_i32_1 = arith.constant 0 : i32
    return %c0_i32, %c0_i32_0 : i32, i32
  }
}

</mosaic_0001>

<bundles_post_ra>
// kernel: encoder_forward.5
= control target key start
LH: loop header
LB: loop body
LE: loop exit
PB: predicated region body
PF: predicated region fallthrough
CT: control target
= control target key end

     0   :  { %s5253_s12 = smov 0   ;;  %s5763_s0 = inlined_call_operand.vmem [shape: bf16[3584,128], index: 0, kind: input, shape index: {}]   ;;  %s5764_s1 = inlined_call_operand.vmem [shape: bf16[128,128], index: 1, kind: input, shape index: {}]   ;;  %s5765_s2 = inlined_call_operand.vmem [shape: f32[1,128], index: 2, kind: input, shape index: {}]   ;;  %s5766_s3 = inlined_call_operand.vmem [shape: bf16[3584,128], index: 3, kind: output, shape index: {}]  }
   0x1 LB: > { %s3471_s13 = sadd.s32 4294967295, %s5231_s12   ;;  %p3475_p0 = scmp.ge.s32.totalorder %s5231_s12, 1  ;;  %s5231_s12 = sphi %s5253_s12, %s13_s12  }
   0x2   : > { %p138_p1 = scmp.lt.s32.totalorder %s5231_s12, 3 }
   0x4   : > { %p139_p2 = pnand %p3475_p0, %p138_p1 }
   0x5   : > { %v5104_v0 = vld [vmem:[%s5764_s1] sm:$0xff] (!%p139_p2)   ;;  %s162_s16 = smul.u32 (!%p139_p2), 224, %s3471_s13  ;;  %v5105_v1 = vld [vmem:[%s5764_s1 + $0x8] sm:$0xff] (!%p139_p2)   ;;  %v5106_v2 = vld [vmem:[%s5764_s1 + $0x10] sm:$0xff] (!%p139_p2)  }
   0x6   : > { %142 = sbr.rel (%p139_p2) target bundleno = 476 (0x1dc), region = 32  ;;  %4840 = vmatprep.subr.bf16.mxu0 (!%p139_p2), %v5104_v0  ;;  %5080 = vmatprep.subr.bf16.mxu1 (!%p139_p2), %v5104_v0  ;;  %v5107_v3 = vld [vmem:[%s5764_s1 + $0x18] sm:$0xff] (!%p139_p2)   ;;  %v5108_v6 = vld [vmem:[%s5764_s1 + $0x20] sm:$0xff] (!%p139_p2)   ;;  %v5109_v7 = vld [vmem:[%s5764_s1 + $0x28] sm:$0xff] (!%p139_p2)  }
   0x7   : > { %p163_p3 = scmp.lt.s32.totalorder (!%p139_p2), %s162_s16, 447  ;;  %4841 = vmatpush3.bf16.msra.mxu0 (!%p139_p2), %v5104_v0  ;;  %5088 = vmatpush3.bf16.msra.mxu1 (!%p139_p2), %v5104_v0  ;;  %v5110_v8 = vld [vmem:[%s5764_s1 + $0x30] sm:$0xff] (!%p139_p2)   ;;  %v5111_v9 = vld [vmem:[%s5764_s1 + $0x38] sm:$0xff] (!%p139_p2)  }
   0x8   : > { %4842 = vmatprep.subr.bf16.mxu0 (!%p139_p2), %v5105_v1  ;;  %5081 = vmatprep.subr.bf16.mxu1 (!%p139_p2), %v5105_v1 }
   0xb   : > { %4843 = vmatpush3.bf16.msra.mxu0 (!%p139_p2), %v5105_v1  ;;  %5089 = vmatpush3.bf16.msra.mxu1 (!%p139_p2), %v5105_v1 }
   0xc   : > { %4844 = vmatprep.subr.bf16.mxu0 (!%p139_p2), %v5106_v2  ;;  %5082 = vmatprep.subr.bf16.mxu1 (!%p139_p2), %v5106_v2 }
   0xd   : > { %s5768_s16 = smov (!%p163_p3, %s162_s16), 447 }
   0xe   : > { %s3476_s21 = sshll.u32 %s5768_s16, 2 }
   0xf   : > { %s5281_s26 = scalar_lea.vmem %s5763_s0, %s3476_s21  ;;  %4845 = vmatpush3.bf16.msra.mxu0 %v5106_v2  ;;  %5090 = vmatpush3.bf16.msra.mxu1 %v5106_v2  ;;  %s5425_s13 = scalar_lea.vmem %s5766_s3, %s3476_s21 }
  0x10   : > { %v5112_v4 = vld [vmem:[%s5281_s26] sm:$0xff]   ;;  %4846 = vmatprep.subr.bf16.mxu0 %v5107_v3  ;;  %5083 = vmatprep.subr.bf16.mxu1 %v5107_v3  ;;  %v5114_v10 = vld [vmem:[%s5281_s26 + $0x8] sm:$0xff]   ;;  %v5116_v12 = vld [vmem:[%s5281_s26 + $0x10] sm:$0xff]  }
  0x11   : > { %v5113_v5 = vld [vmem:[%s5281_s26 + $0x1c0] sm:$0xff]   ;;  %4856 = vmatprep.mubr.bf16.mxu0 %v5112_v4  ;;  %v5115_v11 = vld [vmem:[%s5281_s26 + $0x1c8] sm:$0xff]   ;;  %v5117_v13 = vld [vmem:[%s5281_s26 + $0x1d0] sm:$0xff]  }
  0x12   : > { %4968 = vmatprep.mubr.bf16.mxu1 %v5113_v5  ;;  %v5118_v14 = vld [vmem:[%s5281_s26 + $0x18] sm:$0xff]   ;;  %v5120_v16 = vld [vmem:[%s5281_s26 + $0x20] sm:$0xff]   ;;  %v5122_v18 = vld [vmem:[%s5281_s26 + $0x28] sm:$0xff]  }
  0x13   : > { %4847 = vmatpush3.bf16.msra.mxu0 %v5107_v3  ;;  %5091 = vmatpush3.bf16.msra.mxu1 %v5107_v3  ;;  %v5119_v15 = vld [vmem:[%s5281_s26 + $0x1d8] sm:$0xff]   ;;  %v5121_v17 = vld [vmem:[%s5281_s26 + $0x1e0] sm:$0xff]   ;;  %v5123_v19 = vld [vmem:[%s5281_s26 + $0x1e8] sm:$0xff]  }
  0x14   : > { %4848 = vmatprep.subr.bf16.mxu0 %v5108_v6  ;;  %5084 = vmatprep.subr.bf16.mxu1 %v5108_v6  ;;  %v5124_v20 = vld [vmem:[%s5281_s26 + $0x30] sm:$0xff]   ;;  %v5126_v22 = vld [vmem:[%s5281_s26 + $0x38] sm:$0xff]   ;;  %v5128_v24 = vld [vmem:[%s5281_s26 + $0x40] sm:$0xff]  }
  0x15   : > { %v5125_v21 = vld [vmem:[%s5281_s26 + $0x1f0] sm:$0xff]   ;;  %v5127_v23 = vld [vmem:[%s5281_s26 + $0x1f8] sm:$0xff]   ;;  %v5129_v25 = vld [vmem:[%s5281_s26 + $0x200] sm:$0xff]  }
  0x16   : > { %v5130_v26 = vld [vmem:[%s5281_s26 + $0x48] sm:$0xff]   ;;  %v5132_v28 = vld [vmem:[%s5281_s26 + $0x50] sm:$0xff]   ;;  %v5134_v30 = vld [vmem:[%s5281_s26 + $0x58] sm:$0xff]  }
  0x17   : > { %4849 = vmatpush3.bf16.msra.mxu0 %v5108_v6  ;;  %5092 = vmatpush3.bf16.msra.mxu1 %v5108_v6  ;;  %v5131_v27 = vld [vmem:[%s5281_s26 + $0x208] sm:$0xff]   ;;  %v5133_v29 = vld [vmem:[%s5281_s26 + $0x210] sm:$0xff]   ;;  %v5135_v31 = vld [vmem:[%s5281_s26 + $0x218] sm:$0xff]  }
  0x18   : > { %4850 = vmatprep.subr.bf16.mxu0 %v5109_v7  ;;  %5085 = vmatprep.subr.bf16.mxu1 %v5109_v7  ;;  %v5136_v32 = vld [vmem:[%s5281_s26 + $0x60] sm:$0xff]   ;;  %v5138_v34 = vld [vmem:[%s5281_s26 + $0x68] sm:$0xff]   ;;  %v5140_v36 = vld [vmem:[%s5281_s26 + $0x70] sm:$0xff]  }
  0x19   : > { %v5137_v33 = vld [vmem:[%s5281_s26 + $0x220] sm:$0xff]   ;;  %v5139_v35 = vld [vmem:[%s5281_s26 + $0x228] sm:$0xff]   ;;  %v5141_v37 = vld [vmem:[%s5281_s26 + $0x230] sm:$0xff]  }
  0x1a   : > { %v5142_v38 = vld [vmem:[%s5281_s26 + $0x78] sm:$0xff]   ;;  %v5144_v40 = vld [vmem:[%s5281_s26 + $0x80] sm:$0xff]   ;;  %v5146_v42 = vld [vmem:[%s5281_s26 + $0x88] sm:$0xff]  }
  0x1b   : > { %4851 = vmatpush3.bf16.msra.mxu0 %v5109_v7  ;;  %5093 = vmatpush3.bf16.msra.mxu1 %v5109_v7  ;;  %v5143_v39 = vld [vmem:[%s5281_s26 + $0x238] sm:$0xff]   ;;  %v5145_v41 = vld [vmem:[%s5281_s26 + $0x240] sm:$0xff]   ;;  %v5147_v43 = vld [vmem:[%s5281_s26 + $0x248] sm:$0xff]  }
  0x1c   : > { %4852 = vmatprep.subr.bf16.mxu0 %v5110_v8  ;;  %5086 = vmatprep.subr.bf16.mxu1 %v5110_v8  ;;  %v5148_v44 = vld [vmem:[%s5281_s26 + $0x90] sm:$0xff]   ;;  %v5150_v46 = vld [vmem:[%s5281_s26 + $0x98] sm:$0xff]   ;;  %v5152_v48 = vld [vmem:[%s5281_s26 + $0xa0] sm:$0xff]  }
  0x1d   : > { %v5149_v45 = vld [vmem:[%s5281_s26 + $0x250] sm:$0xff]   ;;  %v5151_v47 = vld [vmem:[%s5281_s26 + $0x258] sm:$0xff]   ;;  %v5153_v49 = vld [vmem:[%s5281_s26 + $0x260] sm:$0xff]  }
  0x1e   : > { %v5154_v50 = vld [vmem:[%s5281_s26 + $0xa8] sm:$0xff]   ;;  %v5156_v52 = vld [vmem:[%s5281_s26 + $0xb0] sm:$0xff]   ;;  %v5158_v54 = vld [vmem:[%s5281_s26 + $0xb8] sm:$0xff]  }
  0x1f   : > { %4853 = vmatpush3.bf16.msra.mxu0 %v5110_v8  ;;  %5094 = vmatpush3.bf16.msra.mxu1 %v5110_v8  ;;  %v5155_v51 = vld [vmem:[%s5281_s26 + $0x268] sm:$0xff]   ;;  %v5157_v53 = vld [vmem:[%s5281_s26 + $0x270] sm:$0xff]   ;;  %v5159_v55 = vld [vmem:[%s5281_s26 + $0x278] sm:$0xff]  }
  0x20   : > { %4854 = vmatprep.subr.bf16.mxu0 %v5111_v9  ;;  %5087 = vmatprep.subr.bf16.mxu1 %v5111_v9  ;;  %v5160_v56 = vld [vmem:[%s5281_s26 + $0xc0] sm:$0xff]   ;;  %v5162_v58 = vld [vmem:[%s5281_s26 + $0xc8] sm:$0xff]   ;;  %v5164_v60 = vld [vmem:[%s5281_s26 + $0xd0] sm:$0xff]  }
  0x21   : > { %v5161_v57 = vld [vmem:[%s5281_s26 + $0x280] sm:$0xff]   ;;  %v5163_v59 = vld [vmem:[%s5281_s26 + $0x288] sm:$0xff]   ;;  %v5165_v61 = vld [vmem:[%s5281_s26 + $0x290] sm:$0xff]  }
  0x22   : > { %v5166_v62 = vld [vmem:[%s5281_s26 + $0xd8] sm:$0xff]   ;;  %v5168_v0 = vld [vmem:[%s5281_s26 + $0xe0] sm:$0xff]   ;;  %v5170_v2 = vld [vmem:[%s5281_s26 + $0xe8] sm:$0xff]  }
  0x23   : > { %4855 = vmatpush3.bf16.msra.mxu0 %v5111_v9  ;;  %5095 = vmatpush3.bf16.msra.mxu1 %v5111_v9  ;;  %v5167_v63 = vld [vmem:[%s5281_s26 + $0x298] sm:$0xff]   ;;  %v5169_v1 = vld [vmem:[%s5281_s26 + $0x2a0] sm:$0xff]   ;;  %v5171_v3 = vld [vmem:[%s5281_s26 + $0x2a8] sm:$0xff]  }
  0x24   : > { %v5172_v4 = vld [vmem:[%s5281_s26 + $0xf0] sm:$0xff]   ;;  %v5174_v6 = vld [vmem:[%s5281_s26 + $0xf8] sm:$0xff]   ;;  %v5176_v8 = vld [vmem:[%s5281_s26 + $0x100] sm:$0xff]  }
  0x25   : > { %v5173_v5 = vld [vmem:[%s5281_s26 + $0x2b0] sm:$0xff]   ;;  %v5175_v7 = vld [vmem:[%s5281_s26 + $0x2b8] sm:$0xff]   ;;  %v5177_v9 = vld [vmem:[%s5281_s26 + $0x2c0] sm:$0xff]  }
  0x26   : > { %4857 = vmatmul.mubr.bf16.vlgmr.msra.gmra.mrb[0].mxu0 %v5114_v10  ;;  %4969 = vmatmul.mubr.bf16.vlgmr.msra.gmra.mrb[0].mxu1 %v5115_v11  ;;  %v5178_v10 = vld [vmem:[%s5281_s26 + $0x108] sm:$0xff]  }
  0x27   : > { %4860 = vmatprep.mubr.bf16.mxu0 %v5116_v12  ;;  %4972 = vmatprep.mubr.bf16.mxu1 %v5117_v13  ;;  %v5179_v11 = vld [vmem:[%s5281_s26 + $0x2c8] sm:$0xff]   ;;  %v5180_v12 = vld [vmem:[%s5281_s26 + $0x110] sm:$0xff]  }
  0x28   : > { %v5181_v13 = vld [vmem:[%s5281_s26 + $0x2d0] sm:$0xff]  }
  0x2e   : > { %4861 = vmatmul.mubr.bf16.gmra.mrb[4].mxu0 %v5118_v14  ;;  %4973 = vmatmul.mubr.bf16.gmra.mrb[4].mxu1 %v5119_v15  ;;  %v5182_v14 = vld [vmem:[%s5281_s26 + $0x118] sm:$0xff]  }
  0x2f   : > { %4864 = vmatprep.mubr.bf16.mxu0 %v5120_v16  ;;  %4976 = vmatprep.mubr.bf16.mxu1 %v5121_v17  ;;  %v5183_v15 = vld [vmem:[%s5281_s26 + $0x2d8] sm:$0xff]   ;;  %v5184_v16 = vld [vmem:[%s5281_s26 + $0x120] sm:$0xff]  }
  0x30   : > { %v5185_v17 = vld [vmem:[%s5281_s26 + $0x2e0] sm:$0xff]  }
  0x36   : > { %4865 = vmatmul.mubr.bf16.gmra.mrb[8].mxu0 %v5122_v18  ;;  %4977 = vmatmul.mubr.bf16.gmra.mrb[8].mxu1 %v5123_v19  ;;  %v5186_v18 = vld [vmem:[%s5281_s26 + $0x128] sm:$0xff]  }
  0x37   : > { %4868 = vmatprep.mubr.bf16.mxu0 %v5124_v20  ;;  %4980 = vmatprep.mubr.bf16.mxu1 %v5125_v21  ;;  %v5187_v19 = vld [vmem:[%s5281_s26 + $0x2e8] sm:$0xff]   ;;  %v5188_v20 = vld [vmem:[%s5281_s26 + $0x130] sm:$0xff]  }
  0x38   : > { %v5189_v21 = vld [vmem:[%s5281_s26 + $0x2f0] sm:$0xff]  }
  0x3e   : > { %4869 = vmatmul.mubr.bf16.gmra.mrb[12].mxu0 %v5126_v22  ;;  %4981 = vmatmul.mubr.bf16.gmra.mrb[12].mxu1 %v5127_v23  ;;  %v5190_v22 = vld [vmem:[%s5281_s26 + $0x138] sm:$0xff]  }
  0x3f   : > { %4872 = vmatprep.mubr.bf16.mxu0 %v5128_v24  ;;  %4984 = vmatprep.mubr.bf16.mxu1 %v5129_v25  ;;  %v5191_v23 = vld [vmem:[%s5281_s26 + $0x2f8] sm:$0xff]   ;;  %v5192_v24 = vld [vmem:[%s5281_s26 + $0x140] sm:$0xff]  }
  0x40   : > { %v5193_v25 = vld [vmem:[%s5281_s26 + $0x300] sm:$0xff]  }
  0x46   : > { %4873 = vmatmul.mubr.bf16.gmra.mrb[16].mxu0 %v5130_v26  ;;  %4985 = vmatmul.mubr.bf16.gmra.mrb[16].mxu1 %v5131_v27  ;;  %v5194_v26 = vld [vmem:[%s5281_s26 + $0x148] sm:$0xff]  }
  0x47   : > { %4876 = vmatprep.mubr.bf16.mxu0 %v5132_v28  ;;  %4988 = vmatprep.mubr.bf16.mxu1 %v5133_v29  ;;  %v5195_v27 = vld [vmem:[%s5281_s26 + $0x308] sm:$0xff]   ;;  %v5196_v28 = vld [vmem:[%s5281_s26 + $0x150] sm:$0xff]  }
  0x48   : > { %v5197_v29 = vld [vmem:[%s5281_s26 + $0x310] sm:$0xff]  }
  0x4e   : > { %4877 = vmatmul.mubr.bf16.gmra.mrb[20].mxu0 %v5134_v30  ;;  %4989 = vmatmul.mubr.bf16.gmra.mrb[20].mxu1 %v5135_v31  ;;  %v5198_v30 = vld [vmem:[%s5281_s26 + $0x158] sm:$0xff]  }
  0x4f   : > { %4880 = vmatprep.mubr.bf16.mxu0 %v5136_v32  ;;  %4992 = vmatprep.mubr.bf16.mxu1 %v5137_v33  ;;  %v5199_v31 = vld [vmem:[%s5281_s26 + $0x318] sm:$0xff]   ;;  %v5200_v32 = vld [vmem:[%s5281_s26 + $0x160] sm:$0xff]  }
  0x50   : > { %v5201_v33 = vld [vmem:[%s5281_s26 + $0x320] sm:$0xff]  }
  0x56   : > { %4881 = vmatmul.mubr.bf16.gmra.mrb[24].mxu0 %v5138_v34  ;;  %4993 = vmatmul.mubr.bf16.gmra.mrb[24].mxu1 %v5139_v35  ;;  %v5202_v34 = vld [vmem:[%s5281_s26 + $0x168] sm:$0xff]  }
  0x57   : > { %4884 = vmatprep.mubr.bf16.mxu0 %v5140_v36  ;;  %4996 = vmatprep.mubr.bf16.mxu1 %v5141_v37  ;;  %v5203_v35 = vld [vmem:[%s5281_s26 + $0x328] sm:$0xff]   ;;  %v5204_v36 = vld [vmem:[%s5281_s26 + $0x170] sm:$0xff]  }
  0x58   : > { %v5205_v37 = vld [vmem:[%s5281_s26 + $0x330] sm:$0xff]  }
  0x5e   : > { %4885 = vmatmul.mubr.bf16.gmra.mrb[28].mxu0 %v5142_v38  ;;  %4997 = vmatmul.mubr.bf16.gmra.mrb[28].mxu1 %v5143_v39  ;;  %v5206_v38 = vld [vmem:[%s5281_s26 + $0x178] sm:$0xff]  }
  0x5f   : > { %4888 = vmatprep.mubr.bf16.mxu0 %v5144_v40  ;;  %5000 = vmatprep.mubr.bf16.mxu1 %v5145_v41  ;;  %v5207_v39 = vld [vmem:[%s5281_s26 + $0x338] sm:$0xff]   ;;  %v5208_v40 = vld [vmem:[%s5281_s26 + $0x180] sm:$0xff]  }
  0x60   : > { %v5209_v41 = vld [vmem:[%s5281_s26 + $0x340] sm:$0xff]  }
  0x66   : > { %4889 = vmatmul.mubr.bf16.gmra.mrb[32].mxu0 %v5146_v42  ;;  %5001 = vmatmul.mubr.bf16.gmra.mrb[32].mxu1 %v5147_v43  ;;  %v5210_v42 = vld [vmem:[%s5281_s26 + $0x188] sm:$0xff]  }
  0x67   : > { %4892 = vmatprep.mubr.bf16.mxu0 %v5148_v44  ;;  %5004 = vmatprep.mubr.bf16.mxu1 %v5149_v45  ;;  %v5211_v43 = vld [vmem:[%s5281_s26 + $0x348] sm:$0xff]   ;;  %v5212_v44 = vld [vmem:[%s5281_s26 + $0x190] sm:$0xff]  }
  0x68   : > { %v5213_v45 = vld [vmem:[%s5281_s26 + $0x350] sm:$0xff]  }
  0x6e   : > { %4893 = vmatmul.mubr.bf16.gmra.mrb[36].mxu0 %v5150_v46  ;;  %5005 = vmatmul.mubr.bf16.gmra.mrb[36].mxu1 %v5151_v47  ;;  %v5214_v46 = vld [vmem:[%s5281_s26 + $0x198] sm:$0xff]  }
  0x6f   : > { %4896 = vmatprep.mubr.bf16.mxu0 %v5152_v48  ;;  %5008 = vmatprep.mubr.bf16.mxu1 %v5153_v49  ;;  %v5215_v47 = vld [vmem:[%s5281_s26 + $0x358] sm:$0xff]   ;;  %v5216_v48 = vld [vmem:[%s5281_s26 + $0x1a0] sm:$0xff]  }
  0x70   : > { %v5217_v49 = vld [vmem:[%s5281_s26 + $0x360] sm:$0xff]  }
  0x76   : > { %4897 = vmatmul.mubr.bf16.gmra.mrb[40].mxu0 %v5154_v50  ;;  %5009 = vmatmul.mubr.bf16.gmra.mrb[40].mxu1 %v5155_v51  ;;  %v5218_v50 = vld [vmem:[%s5281_s26 + $0x1a8] sm:$0xff]  }
  0x77   : > { %4900 = vmatprep.mubr.bf16.mxu0 %v5156_v52  ;;  %5012 = vmatprep.mubr.bf16.mxu1 %v5157_v53  ;;  %v5219_v51 = vld [vmem:[%s5281_s26 + $0x368] sm:$0xff]   ;;  %v5220_v52 = vld [vmem:[%s5281_s26 + $0x1b0] sm:$0xff]  }
  0x78   : > { %v5221_v53 = vld [vmem:[%s5281_s26 + $0x370] sm:$0xff]  }
  0x7e   : > { %4901 = vmatmul.mubr.bf16.gmra.mrb[44].mxu0 %v5158_v54  ;;  %5013 = vmatmul.mubr.bf16.gmra.mrb[44].mxu1 %v5159_v55  ;;  %v5408_v54 = vld [vmem:[%s5765_s2] ss:$0 sm:$0xff] }
  0x7f   : > { %4904 = vmatprep.mubr.bf16.mxu0 %v5160_v56  ;;  %5016 = vmatprep.mubr.bf16.mxu1 %v5161_v57 }
  0x86   : > { %4905 = vmatmul.mubr.bf16.gmra.mrb[48].mxu0 %v5162_v58  ;;  %5017 = vmatmul.mubr.bf16.gmra.mrb[48].mxu1 %v5163_v59 }
  0x87   : > { %4908 = vmatprep.mubr.bf16.mxu0 %v5164_v60  ;;  %5020 = vmatprep.mubr.bf16.mxu1 %v5165_v61  ;;  %v5222_v61 = vld [vmem:[%s5281_s26 + $0x1b8] sm:$0xff]  }
  0x8e   : > { %4909 = vmatmul.mubr.bf16.gmra.mrb[52].mxu0 %v5166_v62  ;;  %5021 = vmatmul.mubr.bf16.gmra.mrb[52].mxu1 %v5167_v63  ;;  %v5223_v62 = vld [vmem:[%s5281_s26 + $0x378] sm:$0xff]  }
  0x8f   : > { %4912 = vmatprep.mubr.bf16.mxu0 %v5168_v0  ;;  %5024 = vmatprep.mubr.bf16.mxu1 %v5169_v1 }
  0x96   : > { %4913 = vmatmul.mubr.bf16.gmra.mrb[56].mxu0 %v5170_v2  ;;  %5025 = vmatmul.mubr.bf16.gmra.mrb[56].mxu1 %v5171_v3 }
  0x97   : > { %4916 = vmatprep.mubr.bf16.mxu0 %v5172_v4  ;;  %5028 = vmatprep.mubr.bf16.mxu1 %v5173_v5 }
  0x9e   : > { %4917 = vmatmul.mubr.bf16.gmra.mrb[60].mxu0 %v5174_v6  ;;  %5029 = vmatmul.mubr.bf16.gmra.mrb[60].mxu1 %v5175_v7 }
  0x9f   : > { %4920 = vmatprep.mubr.bf16.mxu0 %v5176_v8  ;;  %5032 = vmatprep.mubr.bf16.mxu1 %v5177_v9 }
  0xa6   : > { %4921 = vmatmul.mubr.bf16.gmra.mrb[64].mxu0 %v5178_v10  ;;  %5033 = vmatmul.mubr.bf16.gmra.mrb[64].mxu1 %v5179_v11 }
  0xa7   : > { %4924 = vmatprep.mubr.bf16.mxu0 %v5180_v12  ;;  %5036 = vmatprep.mubr.bf16.mxu1 %v5181_v13 }
  0xae   : > { %4925 = vmatmul.mubr.bf16.gmra.mrb[68].mxu0 %v5182_v14  ;;  %5037 = vmatmul.mubr.bf16.gmra.mrb[68].mxu1 %v5183_v15 }
  0xaf   : > { %4928 = vmatprep.mubr.bf16.mxu0 %v5184_v16  ;;  %5040 = vmatprep.mubr.bf16.mxu1 %v5185_v17 }
  0xb6   : > { %4929 = vmatmul.mubr.bf16.gmra.mrb[72].mxu0 %v5186_v18  ;;  %5041 = vmatmul.mubr.bf16.gmra.mrb[72].mxu1 %v5187_v19 }
  0xb7   : > { %4932 = vmatprep.mubr.bf16.mxu0 %v5188_v20  ;;  %5044 = vmatprep.mubr.bf16.mxu1 %v5189_v21 }
  0xbe   : > { %4933 = vmatmul.mubr.bf16.gmra.mrb[76].mxu0 %v5190_v22  ;;  %5045 = vmatmul.mubr.bf16.gmra.mrb[76].mxu1 %v5191_v23 }
  0xbf   : > { %4936 = vmatprep.mubr.bf16.mxu0 %v5192_v24  ;;  %5048 = vmatprep.mubr.bf16.mxu1 %v5193_v25 }
  0xc6   : > { %4937 = vmatmul.mubr.bf16.gmra.mrb[80].mxu0 %v5194_v26  ;;  %5049 = vmatmul.mubr.bf16.gmra.mrb[80].mxu1 %v5195_v27 }
  0xc7   : > { %4940 = vmatprep.mubr.bf16.mxu0 %v5196_v28  ;;  %5052 = vmatprep.mubr.bf16.mxu1 %v5197_v29 }
  0xce   : > { %4941 = vmatmul.mubr.bf16.gmra.mrb[84].mxu0 %v5198_v30  ;;  %5053 = vmatmul.mubr.bf16.gmra.mrb[84].mxu1 %v5199_v31 }
  0xcf   : > { %4944 = vmatprep.mubr.bf16.mxu0 %v5200_v32  ;;  %5056 = vmatprep.mubr.bf16.mxu1 %v5201_v33 }
  0xd6   : > { %4945 = vmatmul.mubr.bf16.gmra.mrb[88].mxu0 %v5202_v34  ;;  %5057 = vmatmul.mubr.bf16.gmra.mrb[88].mxu1 %v5203_v35 }
  0xd7   : > { %4948 = vmatprep.mubr.bf16.mxu0 %v5204_v36  ;;  %5060 = vmatprep.mubr.bf16.mxu1 %v5205_v37 }
  0xde   : > { %4949 = vmatmul.mubr.bf16.gmra.mrb[92].mxu0 %v5206_v38  ;;  %5061 = vmatmul.mubr.bf16.gmra.mrb[92].mxu1 %v5207_v39 }
  0xdf   : > { %4952 = vmatprep.mubr.bf16.mxu0 %v5208_v40  ;;  %5064 = vmatprep.mubr.bf16.mxu1 %v5209_v41 }
  0xe6   : > { %4953 = vmatmul.mubr.bf16.gmra.mrb[96].mxu0 %v5210_v42  ;;  %5065 = vmatmul.mubr.bf16.gmra.mrb[96].mxu1 %v5211_v43 }
  0xe7   : > { %4956 = vmatprep.mubr.bf16.mxu0 %v5212_v44  ;;  %5068 = vmatprep.mubr.bf16.mxu1 %v5213_v45 }
  0xee   : > { %4957 = vmatmul.mubr.bf16.gmra.mrb[100].mxu0 %v5214_v46  ;;  %5069 = vmatmul.mubr.bf16.gmra.mrb[100].mxu1 %v5215_v47 }
  0xef   : > { %4960 = vmatprep.mubr.bf16.mxu0 %v5216_v48  ;;  %5072 = vmatprep.mubr.bf16.mxu1 %v5217_v49 }
  0xf6   : > { %4961 = vmatmul.mubr.bf16.gmra.mrb[104].mxu0 %v5218_v50  ;;  %5073 = vmatmul.mubr.bf16.gmra.mrb[104].mxu1 %v5219_v51 }
  0xf7   : > { %4964 = vmatprep.mubr.bf16.mxu0 %v5220_v52  ;;  %5076 = vmatprep.mubr.bf16.mxu1 %v5221_v53 }
  0xf9   : > { %v4858_v55 = vpop.f32.mrb[0].mxu0  ;;  %v4970_v56 = vpop.f32.mrb[0].mxu1 }
  0xfa   : > { %v1185_v57 = vadd.f32 %v4858_v55, %v5408_v54  ;;  %v1633_v58 = vadd.f32 %v4970_v56, %v5408_v54  ;;  %v1176_v59 = vpop.f32.mrb[1].mxu0  ;;  %v1624_v60 = vpop.f32.mrb[1].mxu1 }
  0xfb   : > { %v1177_v63 = vadd.f32 %v5408_v54, %v1176_v59  ;;  %v1625_v0 = vadd.f32 %v5408_v54, %v1624_v60  ;;  %v4859_v1 = vpop.f32.mrb[2].mxu0  ;;  %v4971_v2 = vpop.f32.mrb[2].mxu1 }
  0xfc   : > { %v1188_v3 = vadd.f32 %v4859_v1, %v5408_v54  ;;  %v1636_v4 = vadd.f32 %v4971_v2, %v5408_v54  ;;  %v1179_v5 = vpop.f32.mrb[3].mxu0  ;;  %v1627_v6 = vpop.f32.mrb[3].mxu1  ;;  %v2073_v9 = vmax.f32 %v1185_v57, 0.0  ;;  %v2185_v10 = vmax.f32 %v1633_v58, 0.0 }
  0xfd   : > { %v1180_v7 = vadd.f32 %v5408_v54, %v1179_v5  ;;  %v1628_v8 = vadd.f32 %v5408_v54, %v1627_v6  ;;  %v2071_v13 = vmax.f32 %v1177_v63, 0.0  ;;  %v2183_v14 = vmax.f32 %v1625_v0, 0.0 }
  0xfe   : > { %v2074_v11 = vmax.f32 %v1188_v3, 0.0  ;;  %v2186_v12 = vmax.f32 %v1636_v4, 0.0  ;;  %4965 = vmatmul.mubr.bf16.gmra.mrb[108].mxu0 %v5222_v61  ;;  %5077 = vmatmul.mubr.bf16.gmra.mrb[108].mxu1 %v5223_v62 }
  0xff   : > { %v2072_v15 = vmax.f32 %v1180_v7, 0.0  ;;  %v2184_v16 = vmax.f32 %v1628_v8, 0.0 }
 0x100   : > { %v4057_v17 = vpack.c.bf16 %v2074_v11, %v2073_v9  ;;  %v4337_v18 = vpack.c.bf16 %v2186_v12, %v2185_v10 }
 0x101   : > { %v4052_v19 = vpack.c.bf16 %v2072_v15, %v2071_v13  ;;  %v4332_v20 = vpack.c.bf16 %v2184_v16, %v2183_v14  ;;  %v4862_v21 = vpop.f32.mrb[4].mxu0  ;;  %v4974_v22 = vpop.f32.mrb[4].mxu1 }
 0x102   : > { %4609 = vst [vmem:[%s5425_s13 + $0x8] sm:$0xff] %v4057_v17   ;;  %4665 = vst [vmem:[%s5425_s13 + $0x1c8] sm:$0xff] %v4337_v18   ;;  %v1201_v23 = vadd.f32 %v4862_v21, %v5408_v54  ;;  %v1649_v24 = vadd.f32 %v4974_v22, %v5408_v54  ;;  %v1192_v25 = vpop.f32.mrb[5].mxu0  ;;  %v1640_v26 = vpop.f32.mrb[5].mxu1 }
 0x103   : > { %4053 = vst [vmem:[%s5425_s13] sm:$0xff] %v4052_v19   ;;  %4664 = vst [vmem:[%s5425_s13 + $0x1c0] sm:$0xff] %v4332_v20   ;;  %v1193_v27 = vadd.f32 %v5408_v54, %v1192_v25  ;;  %v1641_v28 = vadd.f32 %v5408_v54, %v1640_v26  ;;  %v4863_v29 = vpop.f32.mrb[6].mxu0  ;;  %v4975_v30 = vpop.f32.mrb[6].mxu1 }
 0x104   : > { %v1204_v31 = vadd.f32 %v4863_v29, %v5408_v54  ;;  %v1652_v32 = vadd.f32 %v4975_v30, %v5408_v54  ;;  %v1195_v33 = vpop.f32.mrb[7].mxu0  ;;  %v1643_v34 = vpop.f32.mrb[7].mxu1  ;;  %v2077_v37 = vmax.f32 %v1201_v23, 0.0  ;;  %v2189_v38 = vmax.f32 %v1649_v24, 0.0 }
 0x105   : > { %v1196_v35 = vadd.f32 %v5408_v54, %v1195_v33  ;;  %v1644_v36 = vadd.f32 %v5408_v54, %v1643_v34  ;;  %v2075_v41 = vmax.f32 %v1193_v27, 0.0  ;;  %v2187_v42 = vmax.f32 %v1641_v28, 0.0 }
 0x106   : > { %v2078_v39 = vmax.f32 %v1204_v31, 0.0  ;;  %v2190_v40 = vmax.f32 %v1652_v32, 0.0 }
 0x107   : > { %v2076_v43 = vmax.f32 %v1196_v35, 0.0  ;;  %v2188_v44 = vmax.f32 %v1644_v36, 0.0 }
 0x108   : > { %v4067_v45 = vpack.c.bf16 %v2078_v39, %v2077_v37  ;;  %v4347_v46 = vpack.c.bf16 %v2190_v40, %v2189_v38 }
 0x109   : > { %v4062_v47 = vpack.c.bf16 %v2076_v43, %v2075_v41  ;;  %v4342_v48 = vpack.c.bf16 %v2188_v44, %v2187_v42  ;;  %v4866_v49 = vpop.f32.mrb[8].mxu0  ;;  %v4978_v50 = vpop.f32.mrb[8].mxu1 }
 0x10a   : > { %4611 = vst [vmem:[%s5425_s13 + $0x18] sm:$0xff] %v4067_v45   ;;  %4667 = vst [vmem:[%s5425_s13 + $0x1d8] sm:$0xff] %v4347_v46   ;;  %v1217_v51 = vadd.f32 %v4866_v49, %v5408_v54  ;;  %v1665_v52 = vadd.f32 %v4978_v50, %v5408_v54  ;;  %v1208_v53 = vpop.f32.mrb[9].mxu0  ;;  %v1656_v55 = vpop.f32.mrb[9].mxu1 }
 0x10b   : > { %4610 = vst [vmem:[%s5425_s13 + $0x10] sm:$0xff] %v4062_v47   ;;  %4666 = vst [vmem:[%s5425_s13 + $0x1d0] sm:$0xff] %v4342_v48   ;;  %v1209_v56 = vadd.f32 %v5408_v54, %v1208_v53  ;;  %v1657_v57 = vadd.f32 %v5408_v54, %v1656_v55  ;;  %v4867_v58 = vpop.f32.mrb[10].mxu0  ;;  %v4979_v59 = vpop.f32.mrb[10].mxu1 }
 0x10c   : > { %v1220_v60 = vadd.f32 %v4867_v58, %v5408_v54  ;;  %v1668_v61 = vadd.f32 %v4979_v59, %v5408_v54  ;;  %v1211_v62 = vpop.f32.mrb[11].mxu0  ;;  %v1659_v63 = vpop.f32.mrb[11].mxu1  ;;  %v2081_v2 = vmax.f32 %v1217_v51, 0.0  ;;  %v2193_v3 = vmax.f32 %v1665_v52, 0.0 }
 0x10d   : > { %v1212_v0 = vadd.f32 %v5408_v54, %v1211_v62  ;;  %v1660_v1 = vadd.f32 %v5408_v54, %v1659_v63  ;;  %v2079_v6 = vmax.f32 %v1209_v56, 0.0  ;;  %v2191_v7 = vmax.f32 %v1657_v57, 0.0 }
 0x10e   : > { %v2082_v4 = vmax.f32 %v1220_v60, 0.0  ;;  %v2194_v5 = vmax.f32 %v1668_v61, 0.0 }
 0x10f   : > { %v2080_v8 = vmax.f32 %v1212_v0, 0.0  ;;  %v2192_v9 = vmax.f32 %v1660_v1, 0.0 }
 0x110   : > { %v4077_v10 = vpack.c.bf16 %v2082_v4, %v2081_v2  ;;  %v4357_v11 = vpack.c.bf16 %v2194_v5, %v2193_v3 }
 0x111   : > { %v4072_v12 = vpack.c.bf16 %v2080_v8, %v2079_v6  ;;  %v4352_v13 = vpack.c.bf16 %v2192_v9, %v2191_v7  ;;  %v4870_v14 = vpop.f32.mrb[12].mxu0  ;;  %v4982_v15 = vpop.f32.mrb[12].mxu1 }
 0x112   : > { %4613 = vst [vmem:[%s5425_s13 + $0x28] sm:$0xff] %v4077_v10   ;;  %4669 = vst [vmem:[%s5425_s13 + $0x1e8] sm:$0xff] %v4357_v11   ;;  %v1233_v16 = vadd.f32 %v4870_v14, %v5408_v54  ;;  %v1681_v17 = vadd.f32 %v4982_v15, %v5408_v54  ;;  %v1224_v18 = vpop.f32.mrb[13].mxu0  ;;  %v1672_v19 = vpop.f32.mrb[13].mxu1 }
 0x113   : > { %4612 = vst [vmem:[%s5425_s13 + $0x20] sm:$0xff] %v4072_v12   ;;  %4668 = vst [vmem:[%s5425_s13 + $0x1e0] sm:$0xff] %v4352_v13   ;;  %v1225_v20 = vadd.f32 %v5408_v54, %v1224_v18  ;;  %v1673_v21 = vadd.f32 %v5408_v54, %v1672_v19  ;;  %v4871_v22 = vpop.f32.mrb[14].mxu0  ;;  %v4983_v23 = vpop.f32.mrb[14].mxu1 }
 0x114   : > { %v1236_v24 = vadd.f32 %v4871_v22, %v5408_v54  ;;  %v1684_v25 = vadd.f32 %v4983_v23, %v5408_v54  ;;  %v1227_v26 = vpop.f32.mrb[15].mxu0  ;;  %v1675_v27 = vpop.f32.mrb[15].mxu1  ;;  %v2085_v30 = vmax.f32 %v1233_v16, 0.0  ;;  %v2197_v31 = vmax.f32 %v1681_v17, 0.0 }
 0x115   : > { %v1228_v28 = vadd.f32 %v5408_v54, %v1227_v26  ;;  %v1676_v29 = vadd.f32 %v5408_v54, %v1675_v27  ;;  %v2083_v34 = vmax.f32 %v1225_v20, 0.0  ;;  %v2195_v35 = vmax.f32 %v1673_v21, 0.0 }
 0x116   : > { %v2086_v32 = vmax.f32 %v1236_v24, 0.0  ;;  %v2198_v33 = vmax.f32 %v1684_v25, 0.0 }
 0x117   : > { %v2084_v36 = vmax.f32 %v1228_v28, 0.0  ;;  %v2196_v37 = vmax.f32 %v1676_v29, 0.0 }
 0x118   : > { %v4087_v38 = vpack.c.bf16 %v2086_v32, %v2085_v30  ;;  %v4367_v39 = vpack.c.bf16 %v2198_v33, %v2197_v31 }
 0x119   : > { %v4082_v40 = vpack.c.bf16 %v2084_v36, %v2083_v34  ;;  %v4362_v41 = vpack.c.bf16 %v2196_v37, %v2195_v35  ;;  %v4874_v42 = vpop.f32.mrb[16].mxu0  ;;  %v4986_v43 = vpop.f32.mrb[16].mxu1 }
 0x11a   : > { %4615 = vst [vmem:[%s5425_s13 + $0x38] sm:$0xff] %v4087_v38   ;;  %4671 = vst [vmem:[%s5425_s13 + $0x1f8] sm:$0xff] %v4367_v39   ;;  %v1249_v44 = vadd.f32 %v4874_v42, %v5408_v54  ;;  %v1697_v45 = vadd.f32 %v4986_v43, %v5408_v54  ;;  %v1240_v46 = vpop.f32.mrb[17].mxu0  ;;  %v1688_v47 = vpop.f32.mrb[17].mxu1 }
 0x11b   : > { %4614 = vst [vmem:[%s5425_s13 + $0x30] sm:$0xff] %v4082_v40   ;;  %4670 = vst [vmem:[%s5425_s13 + $0x1f0] sm:$0xff] %v4362_v41   ;;  %v1241_v48 = vadd.f32 %v5408_v54, %v1240_v46  ;;  %v1689_v49 = vadd.f32 %v5408_v54, %v1688_v47  ;;  %v4875_v50 = vpop.f32.mrb[18].mxu0  ;;  %v4987_v51 = vpop.f32.mrb[18].mxu1 }
 0x11c   : > { %v1252_v52 = vadd.f32 %v4875_v50, %v5408_v54  ;;  %v1700_v53 = vadd.f32 %v4987_v51, %v5408_v54  ;;  %v1243_v55 = vpop.f32.mrb[19].mxu0  ;;  %v1691_v56 = vpop.f32.mrb[19].mxu1  ;;  %v2089_v59 = vmax.f32 %v1249_v44, 0.0  ;;  %v2201_v60 = vmax.f32 %v1697_v45, 0.0 }
 0x11d   : > { %v1244_v57 = vadd.f32 %v5408_v54, %v1243_v55  ;;  %v1692_v58 = vadd.f32 %v5408_v54, %v1691_v56  ;;  %v2087_v63 = vmax.f32 %v1241_v48, 0.0  ;;  %v2199_v0 = vmax.f32 %v1689_v49, 0.0 }
 0x11e   : > { %v2090_v61 = vmax.f32 %v1252_v52, 0.0  ;;  %v2202_v62 = vmax.f32 %v1700_v53, 0.0 }
 0x11f   : > { %v2088_v1 = vmax.f32 %v1244_v57, 0.0  ;;  %v2200_v2 = vmax.f32 %v1692_v58, 0.0 }
 0x120   : > { %v4097_v3 = vpack.c.bf16 %v2090_v61, %v2089_v59  ;;  %v4377_v4 = vpack.c.bf16 %v2202_v62, %v2201_v60 }
 0x121   : > { %v4092_v5 = vpack.c.bf16 %v2088_v1, %v2087_v63  ;;  %v4372_v6 = vpack.c.bf16 %v2200_v2, %v2199_v0  ;;  %v4878_v7 = vpop.f32.mrb[20].mxu0  ;;  %v4990_v8 = vpop.f32.mrb[20].mxu1 }
 0x122   : > { %4617 = vst [vmem:[%s5425_s13 + $0x48] sm:$0xff] %v4097_v3   ;;  %4673 = vst [vmem:[%s5425_s13 + $0x208] sm:$0xff] %v4377_v4   ;;  %v1265_v9 = vadd.f32 %v4878_v7, %v5408_v54  ;;  %v1713_v10 = vadd.f32 %v4990_v8, %v5408_v54  ;;  %v1256_v11 = vpop.f32.mrb[21].mxu0  ;;  %v1704_v12 = vpop.f32.mrb[21].mxu1 }
 0x123   : > { %4616 = vst [vmem:[%s5425_s13 + $0x40] sm:$0xff] %v4092_v5   ;;  %4672 = vst [vmem:[%s5425_s13 + $0x200] sm:$0xff] %v4372_v6   ;;  %v1257_v13 = vadd.f32 %v5408_v54, %v1256_v11  ;;  %v1705_v14 = vadd.f32 %v5408_v54, %v1704_v12  ;;  %v4879_v15 = vpop.f32.mrb[22].mxu0  ;;  %v4991_v16 = vpop.f32.mrb[22].mxu1 }
 0x124   : > { %v1268_v17 = vadd.f32 %v4879_v15, %v5408_v54  ;;  %v1716_v18 = vadd.f32 %v4991_v16, %v5408_v54  ;;  %v1259_v19 = vpop.f32.mrb[23].mxu0  ;;  %v1707_v20 = vpop.f32.mrb[23].mxu1  ;;  %v2093_v23 = vmax.f32 %v1265_v9, 0.0  ;;  %v2205_v24 = vmax.f32 %v1713_v10, 0.0 }
 0x125   : > { %v1260_v21 = vadd.f32 %v5408_v54, %v1259_v19  ;;  %v1708_v22 = vadd.f32 %v5408_v54, %v1707_v20  ;;  %v2091_v27 = vmax.f32 %v1257_v13, 0.0  ;;  %v2203_v28 = vmax.f32 %v1705_v14, 0.0 }
 0x126   : > { %v2094_v25 = vmax.f32 %v1268_v17, 0.0  ;;  %v2206_v26 = vmax.f32 %v1716_v18, 0.0 }
 0x127   : > { %v2092_v29 = vmax.f32 %v1260_v21, 0.0  ;;  %v2204_v30 = vmax.f32 %v1708_v22, 0.0 }
 0x128   : > { %v4107_v31 = vpack.c.bf16 %v2094_v25, %v2093_v23  ;;  %v4387_v32 = vpack.c.bf16 %v2206_v26, %v2205_v24 }
 0x129   : > { %v4102_v33 = vpack.c.bf16 %v2092_v29, %v2091_v27  ;;  %v4382_v34 = vpack.c.bf16 %v2204_v30, %v2203_v28  ;;  %v4882_v35 = vpop.f32.mrb[24].mxu0  ;;  %v4994_v36 = vpop.f32.mrb[24].mxu1 }
 0x12a   : > { %4619 = vst [vmem:[%s5425_s13 + $0x58] sm:$0xff] %v4107_v31   ;;  %4675 = vst [vmem:[%s5425_s13 + $0x218] sm:$0xff] %v4387_v32   ;;  %v1281_v37 = vadd.f32 %v4882_v35, %v5408_v54  ;;  %v1729_v38 = vadd.f32 %v4994_v36, %v5408_v54  ;;  %v1272_v39 = vpop.f32.mrb[25].mxu0  ;;  %v1720_v40 = vpop.f32.mrb[25].mxu1 }
 0x12b   : > { %4618 = vst [vmem:[%s5425_s13 + $0x50] sm:$0xff] %v4102_v33   ;;  %4674 = vst [vmem:[%s5425_s13 + $0x210] sm:$0xff] %v4382_v34   ;;  %v1273_v41 = vadd.f32 %v5408_v54, %v1272_v39  ;;  %v1721_v42 = vadd.f32 %v5408_v54, %v1720_v40  ;;  %v4883_v43 = vpop.f32.mrb[26].mxu0  ;;  %v4995_v44 = vpop.f32.mrb[26].mxu1 }
 0x12c   : > { %v1284_v45 = vadd.f32 %v4883_v43, %v5408_v54  ;;  %v1732_v46 = vadd.f32 %v4995_v44, %v5408_v54  ;;  %v1275_v47 = vpop.f32.mrb[27].mxu0  ;;  %v1723_v48 = vpop.f32.mrb[27].mxu1  ;;  %v2097_v51 = vmax.f32 %v1281_v37, 0.0  ;;  %v2209_v52 = vmax.f32 %v1729_v38, 0.0 }
 0x12d   : > { %v1276_v49 = vadd.f32 %v5408_v54, %v1275_v47  ;;  %v1724_v50 = vadd.f32 %v5408_v54, %v1723_v48  ;;  %v2095_v56 = vmax.f32 %v1273_v41, 0.0  ;;  %v2207_v57 = vmax.f32 %v1721_v42, 0.0 }
 0x12e   : > { %v2098_v53 = vmax.f32 %v1284_v45, 0.0  ;;  %v2210_v55 = vmax.f32 %v1732_v46, 0.0 }
 0x12f   : > { %v2096_v58 = vmax.f32 %v1276_v49, 0.0  ;;  %v2208_v59 = vmax.f32 %v1724_v50, 0.0 }
 0x130   : > { %v4117_v60 = vpack.c.bf16 %v2098_v53, %v2097_v51  ;;  %v4397_v61 = vpack.c.bf16 %v2210_v55, %v2209_v52 }
 0x131   : > { %v4112_v62 = vpack.c.bf16 %v2096_v58, %v2095_v56  ;;  %v4392_v63 = vpack.c.bf16 %v2208_v59, %v2207_v57  ;;  %v4886_v0 = vpop.f32.mrb[28].mxu0  ;;  %v4998_v1 = vpop.f32.mrb[28].mxu1 }
 0x132   : > { %4621 = vst [vmem:[%s5425_s13 + $0x68] sm:$0xff] %v4117_v60   ;;  %4677 = vst [vmem:[%s5425_s13 + $0x228] sm:$0xff] %v4397_v61   ;;  %v1297_v2 = vadd.f32 %v4886_v0, %v5408_v54  ;;  %v1745_v3 = vadd.f32 %v4998_v1, %v5408_v54  ;;  %v1288_v4 = vpop.f32.mrb[29].mxu0  ;;  %v1736_v5 = vpop.f32.mrb[29].mxu1 }
 0x133   : > { %4620 = vst [vmem:[%s5425_s13 + $0x60] sm:$0xff] %v4112_v62   ;;  %4676 = vst [vmem:[%s5425_s13 + $0x220] sm:$0xff] %v4392_v63   ;;  %v1289_v6 = vadd.f32 %v5408_v54, %v1288_v4  ;;  %v1737_v7 = vadd.f32 %v5408_v54, %v1736_v5  ;;  %v4887_v8 = vpop.f32.mrb[30].mxu0  ;;  %v4999_v9 = vpop.f32.mrb[30].mxu1 }
 0x134   : > { %v1300_v10 = vadd.f32 %v4887_v8, %v5408_v54  ;;  %v1748_v11 = vadd.f32 %v4999_v9, %v5408_v54  ;;  %v1291_v12 = vpop.f32.mrb[31].mxu0  ;;  %v1739_v13 = vpop.f32.mrb[31].mxu1  ;;  %v2101_v16 = vmax.f32 %v1297_v2, 0.0  ;;  %v2213_v17 = vmax.f32 %v1745_v3, 0.0 }
 0x135   : > { %v1292_v14 = vadd.f32 %v5408_v54, %v1291_v12  ;;  %v1740_v15 = vadd.f32 %v5408_v54, %v1739_v13  ;;  %v2099_v20 = vmax.f32 %v1289_v6, 0.0  ;;  %v2211_v21 = vmax.f32 %v1737_v7, 0.0 }
 0x136   : > { %v2102_v18 = vmax.f32 %v1300_v10, 0.0  ;;  %v2214_v19 = vmax.f32 %v1748_v11, 0.0 }
 0x137   : > { %v2100_v22 = vmax.f32 %v1292_v14, 0.0  ;;  %v2212_v23 = vmax.f32 %v1740_v15, 0.0 }
 0x138   : > { %v4127_v24 = vpack.c.bf16 %v2102_v18, %v2101_v16  ;;  %v4407_v25 = vpack.c.bf16 %v2214_v19, %v2213_v17 }
 0x139   : > { %v4122_v26 = vpack.c.bf16 %v2100_v22, %v2099_v20  ;;  %v4402_v27 = vpack.c.bf16 %v2212_v23, %v2211_v21  ;;  %v4890_v28 = vpop.f32.mrb[32].mxu0  ;;  %v5002_v29 = vpop.f32.mrb[32].mxu1 }
 0x13a   : > { %4623 = vst [vmem:[%s5425_s13 + $0x78] sm:$0xff] %v4127_v24   ;;  %4679 = vst [vmem:[%s5425_s13 + $0x238] sm:$0xff] %v4407_v25   ;;  %v1313_v30 = vadd.f32 %v4890_v28, %v5408_v54  ;;  %v1761_v31 = vadd.f32 %v5002_v29, %v5408_v54  ;;  %v1304_v32 = vpop.f32.mrb[33].mxu0  ;;  %v1752_v33 = vpop.f32.mrb[33].mxu1 }
 0x13b   : > { %4622 = vst [vmem:[%s5425_s13 + $0x70] sm:$0xff] %v4122_v26   ;;  %4678 = vst [vmem:[%s5425_s13 + $0x230] sm:$0xff] %v4402_v27   ;;  %v1305_v34 = vadd.f32 %v5408_v54, %v1304_v32  ;;  %v1753_v35 = vadd.f32 %v5408_v54, %v1752_v33  ;;  %v4891_v36 = vpop.f32.mrb[34].mxu0  ;;  %v5003_v37 = vpop.f32.mrb[34].mxu1 }
 0x13c   : > { %v1316_v38 = vadd.f32 %v4891_v36, %v5408_v54  ;;  %v1764_v39 = vadd.f32 %v5003_v37, %v5408_v54  ;;  %v1307_v40 = vpop.f32.mrb[35].mxu0  ;;  %v1755_v41 = vpop.f32.mrb[35].mxu1  ;;  %v2105_v44 = vmax.f32 %v1313_v30, 0.0  ;;  %v2217_v45 = vmax.f32 %v1761_v31, 0.0 }
 0x13d   : > { %v1308_v42 = vadd.f32 %v5408_v54, %v1307_v40  ;;  %v1756_v43 = vadd.f32 %v5408_v54, %v1755_v41  ;;  %v2103_v48 = vmax.f32 %v1305_v34, 0.0  ;;  %v2215_v49 = vmax.f32 %v1753_v35, 0.0 }
 0x13e   : > { %v2106_v46 = vmax.f32 %v1316_v38, 0.0  ;;  %v2218_v47 = vmax.f32 %v1764_v39, 0.0 }
 0x13f   : > { %v2104_v50 = vmax.f32 %v1308_v42, 0.0  ;;  %v2216_v51 = vmax.f32 %v1756_v43, 0.0 }
 0x140   : > { %v4137_v52 = vpack.c.bf16 %v2106_v46, %v2105_v44  ;;  %v4417_v53 = vpack.c.bf16 %v2218_v47, %v2217_v45 }
 0x141   : > { %v4132_v55 = vpack.c.bf16 %v2104_v50, %v2103_v48  ;;  %v4412_v56 = vpack.c.bf16 %v2216_v51, %v2215_v49  ;;  %v4894_v57 = vpop.f32.mrb[36].mxu0  ;;  %v5006_v58 = vpop.f32.mrb[36].mxu1 }
 0x142   : > { %4625 = vst [vmem:[%s5425_s13 + $0x88] sm:$0xff] %v4137_v52   ;;  %4681 = vst [vmem:[%s5425_s13 + $0x248] sm:$0xff] %v4417_v53   ;;  %v1329_v59 = vadd.f32 %v4894_v57, %v5408_v54  ;;  %v1777_v60 = vadd.f32 %v5006_v58, %v5408_v54  ;;  %v1320_v61 = vpop.f32.mrb[37].mxu0  ;;  %v1768_v62 = vpop.f32.mrb[37].mxu1 }
 0x143   : > { %4624 = vst [vmem:[%s5425_s13 + $0x80] sm:$0xff] %v4132_v55   ;;  %4680 = vst [vmem:[%s5425_s13 + $0x240] sm:$0xff] %v4412_v56   ;;  %v1321_v63 = vadd.f32 %v5408_v54, %v1320_v61  ;;  %v1769_v0 = vadd.f32 %v5408_v54, %v1768_v62  ;;  %v4895_v1 = vpop.f32.mrb[38].mxu0  ;;  %v5007_v2 = vpop.f32.mrb[38].mxu1 }
 0x144   : > { %v1332_v3 = vadd.f32 %v4895_v1, %v5408_v54  ;;  %v1780_v4 = vadd.f32 %v5007_v2, %v5408_v54  ;;  %v1323_v5 = vpop.f32.mrb[39].mxu0  ;;  %v1771_v6 = vpop.f32.mrb[39].mxu1  ;;  %v2109_v9 = vmax.f32 %v1329_v59, 0.0  ;;  %v2221_v10 = vmax.f32 %v1777_v60, 0.0 }
 0x145   : > { %v1324_v7 = vadd.f32 %v5408_v54, %v1323_v5  ;;  %v1772_v8 = vadd.f32 %v5408_v54, %v1771_v6  ;;  %v2107_v13 = vmax.f32 %v1321_v63, 0.0  ;;  %v2219_v14 = vmax.f32 %v1769_v0, 0.0 }
 0x146   : > { %v2110_v11 = vmax.f32 %v1332_v3, 0.0  ;;  %v2222_v12 = vmax.f32 %v1780_v4, 0.0 }
 0x147   : > { %v2108_v15 = vmax.f32 %v1324_v7, 0.0  ;;  %v2220_v16 = vmax.f32 %v1772_v8, 0.0 }
 0x148   : > { %v4147_v17 = vpack.c.bf16 %v2110_v11, %v2109_v9  ;;  %v4427_v18 = vpack.c.bf16 %v2222_v12, %v2221_v10 }
 0x149   : > { %v4142_v19 = vpack.c.bf16 %v2108_v15, %v2107_v13  ;;  %v4422_v20 = vpack.c.bf16 %v2220_v16, %v2219_v14  ;;  %v4898_v21 = vpop.f32.mrb[40].mxu0  ;;  %v5010_v22 = vpop.f32.mrb[40].mxu1 }
 0x14a   : > { %4627 = vst [vmem:[%s5425_s13 + $0x98] sm:$0xff] %v4147_v17   ;;  %4683 = vst [vmem:[%s5425_s13 + $0x258] sm:$0xff] %v4427_v18   ;;  %v1345_v23 = vadd.f32 %v4898_v21, %v5408_v54  ;;  %v1793_v24 = vadd.f32 %v5010_v22, %v5408_v54  ;;  %v1336_v25 = vpop.f32.mrb[41].mxu0  ;;  %v1784_v26 = vpop.f32.mrb[41].mxu1 }
 0x14b   : > { %4626 = vst [vmem:[%s5425_s13 + $0x90] sm:$0xff] %v4142_v19   ;;  %4682 = vst [vmem:[%s5425_s13 + $0x250] sm:$0xff] %v4422_v20   ;;  %v1337_v27 = vadd.f32 %v5408_v54, %v1336_v25  ;;  %v1785_v28 = vadd.f32 %v5408_v54, %v1784_v26  ;;  %v4899_v29 = vpop.f32.mrb[42].mxu0  ;;  %v5011_v30 = vpop.f32.mrb[42].mxu1 }
 0x14c   : > { %v1348_v31 = vadd.f32 %v4899_v29, %v5408_v54  ;;  %v1796_v32 = vadd.f32 %v5011_v30, %v5408_v54  ;;  %v1339_v33 = vpop.f32.mrb[43].mxu0  ;;  %v1787_v34 = vpop.f32.mrb[43].mxu1  ;;  %v2113_v37 = vmax.f32 %v1345_v23, 0.0  ;;  %v2225_v38 = vmax.f32 %v1793_v24, 0.0 }
 0x14d   : > { %v1340_v35 = vadd.f32 %v5408_v54, %v1339_v33  ;;  %v1788_v36 = vadd.f32 %v5408_v54, %v1787_v34  ;;  %v2111_v41 = vmax.f32 %v1337_v27, 0.0  ;;  %v2223_v42 = vmax.f32 %v1785_v28, 0.0 }
 0x14e   : > { %v2114_v39 = vmax.f32 %v1348_v31, 0.0  ;;  %v2226_v40 = vmax.f32 %v1796_v32, 0.0 }
 0x14f   : > { %v2112_v43 = vmax.f32 %v1340_v35, 0.0  ;;  %v2224_v44 = vmax.f32 %v1788_v36, 0.0 }
 0x150   : > { %v4157_v45 = vpack.c.bf16 %v2114_v39, %v2113_v37  ;;  %v4437_v46 = vpack.c.bf16 %v2226_v40, %v2225_v38 }
 0x151   : > { %v4152_v47 = vpack.c.bf16 %v2112_v43, %v2111_v41  ;;  %v4432_v48 = vpack.c.bf16 %v2224_v44, %v2223_v42  ;;  %v4902_v49 = vpop.f32.mrb[44].mxu0  ;;  %v5014_v50 = vpop.f32.mrb[44].mxu1 }
 0x152   : > { %4629 = vst [vmem:[%s5425_s13 + $0xa8] sm:$0xff] %v4157_v45   ;;  %4685 = vst [vmem:[%s5425_s13 + $0x268] sm:$0xff] %v4437_v46   ;;  %v1361_v51 = vadd.f32 %v4902_v49, %v5408_v54  ;;  %v1809_v52 = vadd.f32 %v5014_v50, %v5408_v54  ;;  %v1352_v53 = vpop.f32.mrb[45].mxu0  ;;  %v1800_v55 = vpop.f32.mrb[45].mxu1 }
 0x153   : > { %4628 = vst [vmem:[%s5425_s13 + $0xa0] sm:$0xff] %v4152_v47   ;;  %4684 = vst [vmem:[%s5425_s13 + $0x260] sm:$0xff] %v4432_v48   ;;  %v1353_v56 = vadd.f32 %v5408_v54, %v1352_v53  ;;  %v1801_v57 = vadd.f32 %v5408_v54, %v1800_v55  ;;  %v4903_v58 = vpop.f32.mrb[46].mxu0  ;;  %v5015_v59 = vpop.f32.mrb[46].mxu1 }
 0x154   : > { %v1364_v60 = vadd.f32 %v4903_v58, %v5408_v54  ;;  %v1812_v61 = vadd.f32 %v5015_v59, %v5408_v54  ;;  %v1355_v62 = vpop.f32.mrb[47].mxu0  ;;  %v1803_v63 = vpop.f32.mrb[47].mxu1  ;;  %v2117_v2 = vmax.f32 %v1361_v51, 0.0  ;;  %v2229_v3 = vmax.f32 %v1809_v52, 0.0 }
 0x155   : > { %v1356_v0 = vadd.f32 %v5408_v54, %v1355_v62  ;;  %v1804_v1 = vadd.f32 %v5408_v54, %v1803_v63  ;;  %v2115_v6 = vmax.f32 %v1353_v56, 0.0  ;;  %v2227_v7 = vmax.f32 %v1801_v57, 0.0 }
 0x156   : > { %v2118_v4 = vmax.f32 %v1364_v60, 0.0  ;;  %v2230_v5 = vmax.f32 %v1812_v61, 0.0 }
 0x157   : > { %v2116_v8 = vmax.f32 %v1356_v0, 0.0  ;;  %v2228_v9 = vmax.f32 %v1804_v1, 0.0 }
 0x158   : > { %v4167_v10 = vpack.c.bf16 %v2118_v4, %v2117_v2  ;;  %v4447_v11 = vpack.c.bf16 %v2230_v5, %v2229_v3 }
 0x159   : > { %v4162_v12 = vpack.c.bf16 %v2116_v8, %v2115_v6  ;;  %v4442_v13 = vpack.c.bf16 %v2228_v9, %v2227_v7  ;;  %v4906_v14 = vpop.f32.mrb[48].mxu0  ;;  %v5018_v15 = vpop.f32.mrb[48].mxu1 }
 0x15a   : > { %4631 = vst [vmem:[%s5425_s13 + $0xb8] sm:$0xff] %v4167_v10   ;;  %4687 = vst [vmem:[%s5425_s13 + $0x278] sm:$0xff] %v4447_v11   ;;  %v1377_v16 = vadd.f32 %v4906_v14, %v5408_v54  ;;  %v1825_v17 = vadd.f32 %v5018_v15, %v5408_v54  ;;  %v1368_v18 = vpop.f32.mrb[49].mxu0  ;;  %v1816_v19 = vpop.f32.mrb[49].mxu1 }
 0x15b   : > { %4630 = vst [vmem:[%s5425_s13 + $0xb0] sm:$0xff] %v4162_v12   ;;  %4686 = vst [vmem:[%s5425_s13 + $0x270] sm:$0xff] %v4442_v13   ;;  %v1369_v20 = vadd.f32 %v5408_v54, %v1368_v18  ;;  %v1817_v21 = vadd.f32 %v5408_v54, %v1816_v19  ;;  %v4907_v22 = vpop.f32.mrb[50].mxu0  ;;  %v5019_v23 = vpop.f32.mrb[50].mxu1 }
 0x15c   : > { %v1380_v24 = vadd.f32 %v4907_v22, %v5408_v54  ;;  %v1828_v25 = vadd.f32 %v5019_v23, %v5408_v54  ;;  %v1371_v26 = vpop.f32.mrb[51].mxu0  ;;  %v1819_v27 = vpop.f32.mrb[51].mxu1  ;;  %v2121_v30 = vmax.f32 %v1377_v16, 0.0  ;;  %v2233_v31 = vmax.f32 %v1825_v17, 0.0 }
 0x15d   : > { %v1372_v28 = vadd.f32 %v5408_v54, %v1371_v26  ;;  %v1820_v29 = vadd.f32 %v5408_v54, %v1819_v27  ;;  %v2119_v34 = vmax.f32 %v1369_v20, 0.0  ;;  %v2231_v35 = vmax.f32 %v1817_v21, 0.0 }
 0x15e   : > { %v2122_v32 = vmax.f32 %v1380_v24, 0.0  ;;  %v2234_v33 = vmax.f32 %v1828_v25, 0.0 }
 0x15f   : > { %v2120_v36 = vmax.f32 %v1372_v28, 0.0  ;;  %v2232_v37 = vmax.f32 %v1820_v29, 0.0 }
 0x160   : > { %v4177_v38 = vpack.c.bf16 %v2122_v32, %v2121_v30  ;;  %v4457_v39 = vpack.c.bf16 %v2234_v33, %v2233_v31 }
 0x161   : > { %v4172_v40 = vpack.c.bf16 %v2120_v36, %v2119_v34  ;;  %v4452_v41 = vpack.c.bf16 %v2232_v37, %v2231_v35  ;;  %v4910_v42 = vpop.f32.mrb[52].mxu0  ;;  %v5022_v43 = vpop.f32.mrb[52].mxu1 }
 0x162   : > { %4633 = vst [vmem:[%s5425_s13 + $0xc8] sm:$0xff] %v4177_v38   ;;  %4689 = vst [vmem:[%s5425_s13 + $0x288] sm:$0xff] %v4457_v39   ;;  %v1393_v44 = vadd.f32 %v4910_v42, %v5408_v54  ;;  %v1841_v45 = vadd.f32 %v5022_v43, %v5408_v54  ;;  %v1384_v46 = vpop.f32.mrb[53].mxu0  ;;  %v1832_v47 = vpop.f32.mrb[53].mxu1 }
 0x163   : > { %4632 = vst [vmem:[%s5425_s13 + $0xc0] sm:$0xff] %v4172_v40   ;;  %4688 = vst [vmem:[%s5425_s13 + $0x280] sm:$0xff] %v4452_v41   ;;  %v1385_v48 = vadd.f32 %v5408_v54, %v1384_v46  ;;  %v1833_v49 = vadd.f32 %v5408_v54, %v1832_v47  ;;  %v4911_v50 = vpop.f32.mrb[54].mxu0  ;;  %v5023_v51 = vpop.f32.mrb[54].mxu1 }
 0x164   : > { %v1396_v52 = vadd.f32 %v4911_v50, %v5408_v54  ;;  %v1844_v53 = vadd.f32 %v5023_v51, %v5408_v54  ;;  %v1387_v55 = vpop.f32.mrb[55].mxu0  ;;  %v1835_v56 = vpop.f32.mrb[55].mxu1  ;;  %v2125_v59 = vmax.f32 %v1393_v44, 0.0  ;;  %v2237_v60 = vmax.f32 %v1841_v45, 0.0 }
 0x165   : > { %v1388_v57 = vadd.f32 %v5408_v54, %v1387_v55  ;;  %v1836_v58 = vadd.f32 %v5408_v54, %v1835_v56  ;;  %v2123_v63 = vmax.f32 %v1385_v48, 0.0  ;;  %v2235_v0 = vmax.f32 %v1833_v49, 0.0 }
 0x166   : > { %v2126_v61 = vmax.f32 %v1396_v52, 0.0  ;;  %v2238_v62 = vmax.f32 %v1844_v53, 0.0 }
 0x167   : > { %v2124_v1 = vmax.f32 %v1388_v57, 0.0  ;;  %v2236_v2 = vmax.f32 %v1836_v58, 0.0 }
 0x168   : > { %v4187_v3 = vpack.c.bf16 %v2126_v61, %v2125_v59  ;;  %v4467_v4 = vpack.c.bf16 %v2238_v62, %v2237_v60 }
 0x169   : > { %v4182_v5 = vpack.c.bf16 %v2124_v1, %v2123_v63  ;;  %v4462_v6 = vpack.c.bf16 %v2236_v2, %v2235_v0  ;;  %v4914_v7 = vpop.f32.mrb[56].mxu0  ;;  %v5026_v8 = vpop.f32.mrb[56].mxu1 }
 0x16a   : > { %4635 = vst [vmem:[%s5425_s13 + $0xd8] sm:$0xff] %v4187_v3   ;;  %4691 = vst [vmem:[%s5425_s13 + $0x298] sm:$0xff] %v4467_v4   ;;  %v1409_v9 = vadd.f32 %v4914_v7, %v5408_v54  ;;  %v1857_v10 = vadd.f32 %v5026_v8, %v5408_v54  ;;  %v1400_v11 = vpop.f32.mrb[57].mxu0  ;;  %v1848_v12 = vpop.f32.mrb[57].mxu1 }
 0x16b   : > { %4634 = vst [vmem:[%s5425_s13 + $0xd0] sm:$0xff] %v4182_v5   ;;  %4690 = vst [vmem:[%s5425_s13 + $0x290] sm:$0xff] %v4462_v6   ;;  %v1401_v13 = vadd.f32 %v5408_v54, %v1400_v11  ;;  %v1849_v14 = vadd.f32 %v5408_v54, %v1848_v12  ;;  %v4915_v15 = vpop.f32.mrb[58].mxu0  ;;  %v5027_v16 = vpop.f32.mrb[58].mxu1 }
 0x16c   : > { %v1412_v17 = vadd.f32 %v4915_v15, %v5408_v54  ;;  %v1860_v18 = vadd.f32 %v5027_v16, %v5408_v54  ;;  %v1403_v19 = vpop.f32.mrb[59].mxu0  ;;  %v1851_v20 = vpop.f32.mrb[59].mxu1  ;;  %v2129_v23 = vmax.f32 %v1409_v9, 0.0  ;;  %v2241_v24 = vmax.f32 %v1857_v10, 0.0 }
 0x16d   : > { %v1404_v21 = vadd.f32 %v5408_v54, %v1403_v19  ;;  %v1852_v22 = vadd.f32 %v5408_v54, %v1851_v20  ;;  %v2127_v27 = vmax.f32 %v1401_v13, 0.0  ;;  %v2239_v28 = vmax.f32 %v1849_v14, 0.0 }
 0x16e   : > { %v2130_v25 = vmax.f32 %v1412_v17, 0.0  ;;  %v2242_v26 = vmax.f32 %v1860_v18, 0.0 }
 0x16f   : > { %v2128_v29 = vmax.f32 %v1404_v21, 0.0  ;;  %v2240_v30 = vmax.f32 %v1852_v22, 0.0 }
 0x170   : > { %v4197_v31 = vpack.c.bf16 %v2130_v25, %v2129_v23  ;;  %v4477_v32 = vpack.c.bf16 %v2242_v26, %v2241_v24 }
 0x171   : > { %v4192_v33 = vpack.c.bf16 %v2128_v29, %v2127_v27  ;;  %v4472_v34 = vpack.c.bf16 %v2240_v30, %v2239_v28  ;;  %v4918_v35 = vpop.f32.mrb[60].mxu0  ;;  %v5030_v36 = vpop.f32.mrb[60].mxu1 }
 0x172   : > { %4637 = vst [vmem:[%s5425_s13 + $0xe8] sm:$0xff] %v4197_v31   ;;  %4693 = vst [vmem:[%s5425_s13 + $0x2a8] sm:$0xff] %v4477_v32   ;;  %v1425_v37 = vadd.f32 %v4918_v35, %v5408_v54  ;;  %v1873_v38 = vadd.f32 %v5030_v36, %v5408_v54  ;;  %v1416_v39 = vpop.f32.mrb[61].mxu0  ;;  %v1864_v40 = vpop.f32.mrb[61].mxu1 }
 0x173   : > { %4636 = vst [vmem:[%s5425_s13 + $0xe0] sm:$0xff] %v4192_v33   ;;  %4692 = vst [vmem:[%s5425_s13 + $0x2a0] sm:$0xff] %v4472_v34   ;;  %v1417_v41 = vadd.f32 %v5408_v54, %v1416_v39  ;;  %v1865_v42 = vadd.f32 %v5408_v54, %v1864_v40  ;;  %v4919_v43 = vpop.f32.mrb[62].mxu0  ;;  %v5031_v44 = vpop.f32.mrb[62].mxu1 }
 0x174   : > { %v1428_v45 = vadd.f32 %v4919_v43, %v5408_v54  ;;  %v1876_v46 = vadd.f32 %v5031_v44, %v5408_v54  ;;  %v1419_v47 = vpop.f32.mrb[63].mxu0  ;;  %v1867_v48 = vpop.f32.mrb[63].mxu1  ;;  %v2133_v51 = vmax.f32 %v1425_v37, 0.0  ;;  %v2245_v52 = vmax.f32 %v1873_v38, 0.0 }
 0x175   : > { %v1420_v49 = vadd.f32 %v5408_v54, %v1419_v47  ;;  %v1868_v50 = vadd.f32 %v5408_v54, %v1867_v48  ;;  %v2131_v56 = vmax.f32 %v1417_v41, 0.0  ;;  %v2243_v57 = vmax.f32 %v1865_v42, 0.0  ;;  %v5612_v54 = vld [vmem:[%s5765_s2] ss:$0 sm:$0xff] }
 0x176   : > { %v2134_v53 = vmax.f32 %v1428_v45, 0.0  ;;  %v2246_v55 = vmax.f32 %v1876_v46, 0.0 }
 0x177   : > { %v2132_v58 = vmax.f32 %v1420_v49, 0.0  ;;  %v2244_v59 = vmax.f32 %v1868_v50, 0.0 }
 0x178   : > { %v4207_v60 = vpack.c.bf16 %v2134_v53, %v2133_v51  ;;  %v4487_v61 = vpack.c.bf16 %v2246_v55, %v2245_v52 }
 0x179   : > { %v4202_v62 = vpack.c.bf16 %v2132_v58, %v2131_v56  ;;  %v4482_v63 = vpack.c.bf16 %v2244_v59, %v2243_v57  ;;  %v4922_v0 = vpop.f32.mrb[64].mxu0  ;;  %v5034_v1 = vpop.f32.mrb[64].mxu1 }
 0x17a   : > { %4639 = vst [vmem:[%s5425_s13 + $0xf8] sm:$0xff] %v4207_v60   ;;  %4695 = vst [vmem:[%s5425_s13 + $0x2b8] sm:$0xff] %v4487_v61   ;;  %v1441_v2 = vadd.f32 %v5612_v54, %v4922_v0  ;;  %v1889_v3 = vadd.f32 %v5612_v54, %v5034_v1  ;;  %v1432_v4 = vpop.f32.mrb[65].mxu0  ;;  %v1880_v5 = vpop.f32.mrb[65].mxu1 }
 0x17b   : > { %4638 = vst [vmem:[%s5425_s13 + $0xf0] sm:$0xff] %v4202_v62   ;;  %4694 = vst [vmem:[%s5425_s13 + $0x2b0] sm:$0xff] %v4482_v63   ;;  %v1433_v6 = vadd.f32 %v5612_v54, %v1432_v4  ;;  %v1881_v7 = vadd.f32 %v5612_v54, %v1880_v5  ;;  %v4923_v8 = vpop.f32.mrb[66].mxu0  ;;  %v5035_v9 = vpop.f32.mrb[66].mxu1 }
 0x17c   : > { %v1444_v10 = vadd.f32 %v5612_v54, %v4923_v8  ;;  %v1892_v11 = vadd.f32 %v5612_v54, %v5035_v9  ;;  %v1435_v12 = vpop.f32.mrb[67].mxu0  ;;  %v1883_v13 = vpop.f32.mrb[67].mxu1  ;;  %v2137_v16 = vmax.f32 %v1441_v2, 0.0  ;;  %v2249_v17 = vmax.f32 %v1889_v3, 0.0 }
 0x17d   : > { %v1436_v14 = vadd.f32 %v5612_v54, %v1435_v12  ;;  %v1884_v15 = vadd.f32 %v5612_v54, %v1883_v13  ;;  %v2135_v20 = vmax.f32 %v1433_v6, 0.0  ;;  %v2247_v21 = vmax.f32 %v1881_v7, 0.0 }
 0x17e   : > { %v2138_v18 = vmax.f32 %v1444_v10, 0.0  ;;  %v2250_v19 = vmax.f32 %v1892_v11, 0.0 }
 0x17f   : > { %v2136_v22 = vmax.f32 %v1436_v14, 0.0  ;;  %v2248_v23 = vmax.f32 %v1884_v15, 0.0 }
 0x180   : > { %v4217_v24 = vpack.c.bf16 %v2138_v18, %v2137_v16  ;;  %v4497_v25 = vpack.c.bf16 %v2250_v19, %v2249_v17 }
 0x181   : > { %v4212_v26 = vpack.c.bf16 %v2136_v22, %v2135_v20  ;;  %v4492_v27 = vpack.c.bf16 %v2248_v23, %v2247_v21  ;;  %v4926_v28 = vpop.f32.mrb[68].mxu0  ;;  %v5038_v29 = vpop.f32.mrb[68].mxu1 }
 0x182   : > { %4641 = vst [vmem:[%s5425_s13 + $0x108] sm:$0xff] %v4217_v24   ;;  %4697 = vst [vmem:[%s5425_s13 + $0x2c8] sm:$0xff] %v4497_v25   ;;  %v1457_v30 = vadd.f32 %v5612_v54, %v4926_v28  ;;  %v1905_v31 = vadd.f32 %v5612_v54, %v5038_v29  ;;  %v1448_v32 = vpop.f32.mrb[69].mxu0  ;;  %v1896_v33 = vpop.f32.mrb[69].mxu1 }
 0x183   : > { %4640 = vst [vmem:[%s5425_s13 + $0x100] sm:$0xff] %v4212_v26   ;;  %4696 = vst [vmem:[%s5425_s13 + $0x2c0] sm:$0xff] %v4492_v27   ;;  %v1449_v34 = vadd.f32 %v5612_v54, %v1448_v32  ;;  %v1897_v35 = vadd.f32 %v5612_v54, %v1896_v33  ;;  %v4927_v36 = vpop.f32.mrb[70].mxu0  ;;  %v5039_v37 = vpop.f32.mrb[70].mxu1 }
 0x184   : > { %v1460_v38 = vadd.f32 %v5612_v54, %v4927_v36  ;;  %v1908_v39 = vadd.f32 %v5612_v54, %v5039_v37  ;;  %v1451_v40 = vpop.f32.mrb[71].mxu0  ;;  %v1899_v41 = vpop.f32.mrb[71].mxu1  ;;  %v2141_v44 = vmax.f32 %v1457_v30, 0.0  ;;  %v2253_v45 = vmax.f32 %v1905_v31, 0.0 }
 0x185   : > { %v1452_v42 = vadd.f32 %v5612_v54, %v1451_v40  ;;  %v1900_v43 = vadd.f32 %v5612_v54, %v1899_v41  ;;  %v2139_v48 = vmax.f32 %v1449_v34, 0.0  ;;  %v2251_v49 = vmax.f32 %v1897_v35, 0.0 }
 0x186   : > { %v2142_v46 = vmax.f32 %v1460_v38, 0.0  ;;  %v2254_v47 = vmax.f32 %v1908_v39, 0.0 }
 0x187   : > { %v2140_v50 = vmax.f32 %v1452_v42, 0.0  ;;  %v2252_v51 = vmax.f32 %v1900_v43, 0.0 }
 0x188   : > { %v4227_v52 = vpack.c.bf16 %v2142_v46, %v2141_v44  ;;  %v4507_v53 = vpack.c.bf16 %v2254_v47, %v2253_v45 }
 0x189   : > { %v4222_v55 = vpack.c.bf16 %v2140_v50, %v2139_v48  ;;  %v4502_v56 = vpack.c.bf16 %v2252_v51, %v2251_v49  ;;  %v4930_v57 = vpop.f32.mrb[72].mxu0  ;;  %v5042_v58 = vpop.f32.mrb[72].mxu1 }
 0x18a   : > { %4643 = vst [vmem:[%s5425_s13 + $0x118] sm:$0xff] %v4227_v52   ;;  %4699 = vst [vmem:[%s5425_s13 + $0x2d8] sm:$0xff] %v4507_v53   ;;  %v1473_v59 = vadd.f32 %v5612_v54, %v4930_v57  ;;  %v1921_v60 = vadd.f32 %v5612_v54, %v5042_v58  ;;  %v1464_v61 = vpop.f32.mrb[73].mxu0  ;;  %v1912_v62 = vpop.f32.mrb[73].mxu1 }
 0x18b   : > { %4642 = vst [vmem:[%s5425_s13 + $0x110] sm:$0xff] %v4222_v55   ;;  %4698 = vst [vmem:[%s5425_s13 + $0x2d0] sm:$0xff] %v4502_v56   ;;  %v1465_v63 = vadd.f32 %v5612_v54, %v1464_v61  ;;  %v1913_v0 = vadd.f32 %v5612_v54, %v1912_v62  ;;  %v4931_v1 = vpop.f32.mrb[74].mxu0  ;;  %v5043_v2 = vpop.f32.mrb[74].mxu1 }
 0x18c   : > { %v1476_v3 = vadd.f32 %v5612_v54, %v4931_v1  ;;  %v1924_v4 = vadd.f32 %v5612_v54, %v5043_v2  ;;  %v1467_v5 = vpop.f32.mrb[75].mxu0  ;;  %v1915_v6 = vpop.f32.mrb[75].mxu1  ;;  %v2145_v9 = vmax.f32 %v1473_v59, 0.0  ;;  %v2257_v10 = vmax.f32 %v1921_v60, 0.0 }
 0x18d   : > { %v1468_v7 = vadd.f32 %v5612_v54, %v1467_v5  ;;  %v1916_v8 = vadd.f32 %v5612_v54, %v1915_v6  ;;  %v2143_v13 = vmax.f32 %v1465_v63, 0.0  ;;  %v2255_v14 = vmax.f32 %v1913_v0, 0.0 }
 0x18e   : > { %v2146_v11 = vmax.f32 %v1476_v3, 0.0  ;;  %v2258_v12 = vmax.f32 %v1924_v4, 0.0 }
 0x18f   : > { %v2144_v15 = vmax.f32 %v1468_v7, 0.0  ;;  %v2256_v16 = vmax.f32 %v1916_v8, 0.0 }
 0x190   : > { %v4237_v17 = vpack.c.bf16 %v2146_v11, %v2145_v9  ;;  %v4517_v18 = vpack.c.bf16 %v2258_v12, %v2257_v10 }
 0x191   : > { %v4232_v19 = vpack.c.bf16 %v2144_v15, %v2143_v13  ;;  %v4512_v20 = vpack.c.bf16 %v2256_v16, %v2255_v14  ;;  %v4934_v21 = vpop.f32.mrb[76].mxu0  ;;  %v5046_v22 = vpop.f32.mrb[76].mxu1 }
 0x192   : > { %4645 = vst [vmem:[%s5425_s13 + $0x128] sm:$0xff] %v4237_v17   ;;  %4701 = vst [vmem:[%s5425_s13 + $0x2e8] sm:$0xff] %v4517_v18   ;;  %v1489_v23 = vadd.f32 %v5612_v54, %v4934_v21  ;;  %v1937_v24 = vadd.f32 %v5612_v54, %v5046_v22  ;;  %v1480_v25 = vpop.f32.mrb[77].mxu0  ;;  %v1928_v26 = vpop.f32.mrb[77].mxu1 }
 0x193   : > { %4644 = vst [vmem:[%s5425_s13 + $0x120] sm:$0xff] %v4232_v19   ;;  %4700 = vst [vmem:[%s5425_s13 + $0x2e0] sm:$0xff] %v4512_v20   ;;  %v1481_v27 = vadd.f32 %v5612_v54, %v1480_v25  ;;  %v1929_v28 = vadd.f32 %v5612_v54, %v1928_v26  ;;  %v4935_v29 = vpop.f32.mrb[78].mxu0  ;;  %v5047_v30 = vpop.f32.mrb[78].mxu1 }
 0x194   : > { %v1492_v31 = vadd.f32 %v5612_v54, %v4935_v29  ;;  %v1940_v32 = vadd.f32 %v5612_v54, %v5047_v30  ;;  %v1483_v33 = vpop.f32.mrb[79].mxu0  ;;  %v1931_v34 = vpop.f32.mrb[79].mxu1  ;;  %v2149_v37 = vmax.f32 %v1489_v23, 0.0  ;;  %v2261_v38 = vmax.f32 %v1937_v24, 0.0 }
 0x195   : > { %v1484_v35 = vadd.f32 %v5612_v54, %v1483_v33  ;;  %v1932_v36 = vadd.f32 %v5612_v54, %v1931_v34  ;;  %v2147_v41 = vmax.f32 %v1481_v27, 0.0  ;;  %v2259_v42 = vmax.f32 %v1929_v28, 0.0 }
 0x196   : > { %v2150_v39 = vmax.f32 %v1492_v31, 0.0  ;;  %v2262_v40 = vmax.f32 %v1940_v32, 0.0 }
 0x197   : > { %v2148_v43 = vmax.f32 %v1484_v35, 0.0  ;;  %v2260_v44 = vmax.f32 %v1932_v36, 0.0 }
 0x198   : > { %v4247_v45 = vpack.c.bf16 %v2150_v39, %v2149_v37  ;;  %v4527_v46 = vpack.c.bf16 %v2262_v40, %v2261_v38 }
 0x199   : > { %v4242_v47 = vpack.c.bf16 %v2148_v43, %v2147_v41  ;;  %v4522_v48 = vpack.c.bf16 %v2260_v44, %v2259_v42  ;;  %v4938_v49 = vpop.f32.mrb[80].mxu0  ;;  %v5050_v50 = vpop.f32.mrb[80].mxu1 }
 0x19a   : > { %4647 = vst [vmem:[%s5425_s13 + $0x138] sm:$0xff] %v4247_v45   ;;  %4703 = vst [vmem:[%s5425_s13 + $0x2f8] sm:$0xff] %v4527_v46   ;;  %v1505_v51 = vadd.f32 %v5612_v54, %v4938_v49  ;;  %v1953_v52 = vadd.f32 %v5612_v54, %v5050_v50  ;;  %v1496_v53 = vpop.f32.mrb[81].mxu0  ;;  %v1944_v55 = vpop.f32.mrb[81].mxu1 }
 0x19b   : > { %4646 = vst [vmem:[%s5425_s13 + $0x130] sm:$0xff] %v4242_v47   ;;  %4702 = vst [vmem:[%s5425_s13 + $0x2f0] sm:$0xff] %v4522_v48   ;;  %v1497_v56 = vadd.f32 %v5612_v54, %v1496_v53  ;;  %v1945_v57 = vadd.f32 %v5612_v54, %v1944_v55  ;;  %v4939_v58 = vpop.f32.mrb[82].mxu0  ;;  %v5051_v59 = vpop.f32.mrb[82].mxu1 }
 0x19c   : > { %v1508_v60 = vadd.f32 %v5612_v54, %v4939_v58  ;;  %v1956_v61 = vadd.f32 %v5612_v54, %v5051_v59  ;;  %v1499_v62 = vpop.f32.mrb[83].mxu0  ;;  %v1947_v63 = vpop.f32.mrb[83].mxu1  ;;  %v2153_v2 = vmax.f32 %v1505_v51, 0.0  ;;  %v2265_v3 = vmax.f32 %v1953_v52, 0.0 }
 0x19d   : > { %v1500_v0 = vadd.f32 %v5612_v54, %v1499_v62  ;;  %v1948_v1 = vadd.f32 %v5612_v54, %v1947_v63  ;;  %v2151_v6 = vmax.f32 %v1497_v56, 0.0  ;;  %v2263_v7 = vmax.f32 %v1945_v57, 0.0 }
 0x19e   : > { %v2154_v4 = vmax.f32 %v1508_v60, 0.0  ;;  %v2266_v5 = vmax.f32 %v1956_v61, 0.0 }
 0x19f   : > { %v2152_v8 = vmax.f32 %v1500_v0, 0.0  ;;  %v2264_v9 = vmax.f32 %v1948_v1, 0.0 }
 0x1a0   : > { %v4257_v10 = vpack.c.bf16 %v2154_v4, %v2153_v2  ;;  %v4537_v11 = vpack.c.bf16 %v2266_v5, %v2265_v3 }
 0x1a1   : > { %v4252_v12 = vpack.c.bf16 %v2152_v8, %v2151_v6  ;;  %v4532_v13 = vpack.c.bf16 %v2264_v9, %v2263_v7  ;;  %v4942_v14 = vpop.f32.mrb[84].mxu0  ;;  %v5054_v15 = vpop.f32.mrb[84].mxu1 }
 0x1a2   : > { %4649 = vst [vmem:[%s5425_s13 + $0x148] sm:$0xff] %v4257_v10   ;;  %4705 = vst [vmem:[%s5425_s13 + $0x308] sm:$0xff] %v4537_v11   ;;  %v1521_v16 = vadd.f32 %v5612_v54, %v4942_v14  ;;  %v1969_v17 = vadd.f32 %v5612_v54, %v5054_v15  ;;  %v1512_v18 = vpop.f32.mrb[85].mxu0  ;;  %v1960_v19 = vpop.f32.mrb[85].mxu1 }
 0x1a3   : > { %4648 = vst [vmem:[%s5425_s13 + $0x140] sm:$0xff] %v4252_v12   ;;  %4704 = vst [vmem:[%s5425_s13 + $0x300] sm:$0xff] %v4532_v13   ;;  %v1513_v20 = vadd.f32 %v5612_v54, %v1512_v18  ;;  %v1961_v21 = vadd.f32 %v5612_v54, %v1960_v19  ;;  %v4943_v22 = vpop.f32.mrb[86].mxu0  ;;  %v5055_v23 = vpop.f32.mrb[86].mxu1 }
 0x1a4   : > { %v1524_v24 = vadd.f32 %v5612_v54, %v4943_v22  ;;  %v1972_v25 = vadd.f32 %v5612_v54, %v5055_v23  ;;  %v1515_v26 = vpop.f32.mrb[87].mxu0  ;;  %v1963_v27 = vpop.f32.mrb[87].mxu1  ;;  %v2157_v30 = vmax.f32 %v1521_v16, 0.0  ;;  %v2269_v31 = vmax.f32 %v1969_v17, 0.0 }
 0x1a5   : > { %v1516_v28 = vadd.f32 %v5612_v54, %v1515_v26  ;;  %v1964_v29 = vadd.f32 %v5612_v54, %v1963_v27  ;;  %v2155_v34 = vmax.f32 %v1513_v20, 0.0  ;;  %v2267_v35 = vmax.f32 %v1961_v21, 0.0 }
 0x1a6   : > { %v2158_v32 = vmax.f32 %v1524_v24, 0.0  ;;  %v2270_v33 = vmax.f32 %v1972_v25, 0.0 }
 0x1a7   : > { %v2156_v36 = vmax.f32 %v1516_v28, 0.0  ;;  %v2268_v37 = vmax.f32 %v1964_v29, 0.0 }
 0x1a8   : > { %v4267_v38 = vpack.c.bf16 %v2158_v32, %v2157_v30  ;;  %v4547_v39 = vpack.c.bf16 %v2270_v33, %v2269_v31 }
 0x1a9   : > { %v4262_v40 = vpack.c.bf16 %v2156_v36, %v2155_v34  ;;  %v4542_v41 = vpack.c.bf16 %v2268_v37, %v2267_v35  ;;  %v4946_v42 = vpop.f32.mrb[88].mxu0  ;;  %v5058_v43 = vpop.f32.mrb[88].mxu1 }
 0x1aa   : > { %4651 = vst [vmem:[%s5425_s13 + $0x158] sm:$0xff] %v4267_v38   ;;  %4707 = vst [vmem:[%s5425_s13 + $0x318] sm:$0xff] %v4547_v39   ;;  %v1537_v44 = vadd.f32 %v5612_v54, %v4946_v42  ;;  %v1985_v45 = vadd.f32 %v5612_v54, %v5058_v43  ;;  %v1528_v46 = vpop.f32.mrb[89].mxu0  ;;  %v1976_v47 = vpop.f32.mrb[89].mxu1 }
 0x1ab   : > { %4650 = vst [vmem:[%s5425_s13 + $0x150] sm:$0xff] %v4262_v40   ;;  %4706 = vst [vmem:[%s5425_s13 + $0x310] sm:$0xff] %v4542_v41   ;;  %v1529_v48 = vadd.f32 %v5612_v54, %v1528_v46  ;;  %v1977_v49 = vadd.f32 %v5612_v54, %v1976_v47  ;;  %v4947_v50 = vpop.f32.mrb[90].mxu0  ;;  %v5059_v51 = vpop.f32.mrb[90].mxu1 }
 0x1ac   : > { %v1540_v52 = vadd.f32 %v5612_v54, %v4947_v50  ;;  %v1988_v53 = vadd.f32 %v5612_v54, %v5059_v51  ;;  %v1531_v55 = vpop.f32.mrb[91].mxu0  ;;  %v1979_v56 = vpop.f32.mrb[91].mxu1  ;;  %v2161_v59 = vmax.f32 %v1537_v44, 0.0  ;;  %v2273_v60 = vmax.f32 %v1985_v45, 0.0 }
 0x1ad   : > { %v1532_v57 = vadd.f32 %v5612_v54, %v1531_v55  ;;  %v1980_v58 = vadd.f32 %v5612_v54, %v1979_v56  ;;  %v2159_v63 = vmax.f32 %v1529_v48, 0.0  ;;  %v2271_v0 = vmax.f32 %v1977_v49, 0.0 }
 0x1ae   : > { %v2162_v61 = vmax.f32 %v1540_v52, 0.0  ;;  %v2274_v62 = vmax.f32 %v1988_v53, 0.0 }
 0x1af   : > { %v2160_v1 = vmax.f32 %v1532_v57, 0.0  ;;  %v2272_v2 = vmax.f32 %v1980_v58, 0.0 }
 0x1b0   : > { %v4277_v3 = vpack.c.bf16 %v2162_v61, %v2161_v59  ;;  %v4557_v4 = vpack.c.bf16 %v2274_v62, %v2273_v60 }
 0x1b1   : > { %v4272_v5 = vpack.c.bf16 %v2160_v1, %v2159_v63  ;;  %v4552_v6 = vpack.c.bf16 %v2272_v2, %v2271_v0  ;;  %v4950_v7 = vpop.f32.mrb[92].mxu0  ;;  %v5062_v8 = vpop.f32.mrb[92].mxu1 }
 0x1b2   : > { %4653 = vst [vmem:[%s5425_s13 + $0x168] sm:$0xff] %v4277_v3   ;;  %4709 = vst [vmem:[%s5425_s13 + $0x328] sm:$0xff] %v4557_v4   ;;  %v1553_v9 = vadd.f32 %v5612_v54, %v4950_v7  ;;  %v2001_v10 = vadd.f32 %v5612_v54, %v5062_v8  ;;  %v1544_v11 = vpop.f32.mrb[93].mxu0  ;;  %v1992_v12 = vpop.f32.mrb[93].mxu1 }
 0x1b3   : > { %4652 = vst [vmem:[%s5425_s13 + $0x160] sm:$0xff] %v4272_v5   ;;  %4708 = vst [vmem:[%s5425_s13 + $0x320] sm:$0xff] %v4552_v6   ;;  %v1545_v13 = vadd.f32 %v5612_v54, %v1544_v11  ;;  %v1993_v14 = vadd.f32 %v5612_v54, %v1992_v12  ;;  %v4951_v15 = vpop.f32.mrb[94].mxu0  ;;  %v5063_v16 = vpop.f32.mrb[94].mxu1 }
 0x1b4   : > { %v1556_v17 = vadd.f32 %v5612_v54, %v4951_v15  ;;  %v2004_v18 = vadd.f32 %v5612_v54, %v5063_v16  ;;  %v1547_v19 = vpop.f32.mrb[95].mxu0  ;;  %v1995_v20 = vpop.f32.mrb[95].mxu1  ;;  %v2165_v23 = vmax.f32 %v1553_v9, 0.0  ;;  %v2277_v24 = vmax.f32 %v2001_v10, 0.0 }
 0x1b5   : > { %v1548_v21 = vadd.f32 %v5612_v54, %v1547_v19  ;;  %v1996_v22 = vadd.f32 %v5612_v54, %v1995_v20  ;;  %v2163_v27 = vmax.f32 %v1545_v13, 0.0  ;;  %v2275_v28 = vmax.f32 %v1993_v14, 0.0 }
 0x1b6   : > { %v2166_v25 = vmax.f32 %v1556_v17, 0.0  ;;  %v2278_v26 = vmax.f32 %v2004_v18, 0.0 }
 0x1b7   : > { %v2164_v29 = vmax.f32 %v1548_v21, 0.0  ;;  %v2276_v30 = vmax.f32 %v1996_v22, 0.0 }
 0x1b8   : > { %v4287_v31 = vpack.c.bf16 %v2166_v25, %v2165_v23  ;;  %v4567_v32 = vpack.c.bf16 %v2278_v26, %v2277_v24 }
 0x1b9   : > { %v4282_v33 = vpack.c.bf16 %v2164_v29, %v2163_v27  ;;  %v4562_v34 = vpack.c.bf16 %v2276_v30, %v2275_v28  ;;  %v4954_v35 = vpop.f32.mrb[96].mxu0  ;;  %v5066_v36 = vpop.f32.mrb[96].mxu1 }
 0x1ba   : > { %4655 = vst [vmem:[%s5425_s13 + $0x178] sm:$0xff] %v4287_v31   ;;  %4711 = vst [vmem:[%s5425_s13 + $0x338] sm:$0xff] %v4567_v32   ;;  %v1569_v37 = vadd.f32 %v5612_v54, %v4954_v35  ;;  %v2017_v38 = vadd.f32 %v5612_v54, %v5066_v36  ;;  %v1560_v39 = vpop.f32.mrb[97].mxu0  ;;  %v2008_v40 = vpop.f32.mrb[97].mxu1 }
 0x1bb   : > { %4654 = vst [vmem:[%s5425_s13 + $0x170] sm:$0xff] %v4282_v33   ;;  %4710 = vst [vmem:[%s5425_s13 + $0x330] sm:$0xff] %v4562_v34   ;;  %v1561_v41 = vadd.f32 %v5612_v54, %v1560_v39  ;;  %v2009_v42 = vadd.f32 %v5612_v54, %v2008_v40  ;;  %v4955_v43 = vpop.f32.mrb[98].mxu0  ;;  %v5067_v44 = vpop.f32.mrb[98].mxu1 }
 0x1bc   : > { %v1572_v45 = vadd.f32 %v5612_v54, %v4955_v43  ;;  %v2020_v46 = vadd.f32 %v5612_v54, %v5067_v44  ;;  %v1563_v47 = vpop.f32.mrb[99].mxu0  ;;  %v2011_v48 = vpop.f32.mrb[99].mxu1  ;;  %v2169_v51 = vmax.f32 %v1569_v37, 0.0  ;;  %v2281_v52 = vmax.f32 %v2017_v38, 0.0 }
 0x1bd   : > { %v1564_v49 = vadd.f32 %v5612_v54, %v1563_v47  ;;  %v2012_v50 = vadd.f32 %v5612_v54, %v2011_v48  ;;  %v2167_v56 = vmax.f32 %v1561_v41, 0.0  ;;  %v2279_v57 = vmax.f32 %v2009_v42, 0.0 }
 0x1be   : > { %v2170_v53 = vmax.f32 %v1572_v45, 0.0  ;;  %v2282_v55 = vmax.f32 %v2020_v46, 0.0 }
 0x1bf   : > { %v2168_v58 = vmax.f32 %v1564_v49, 0.0  ;;  %v2280_v59 = vmax.f32 %v2012_v50, 0.0 }
 0x1c0   : > { %v4297_v60 = vpack.c.bf16 %v2170_v53, %v2169_v51  ;;  %v4577_v61 = vpack.c.bf16 %v2282_v55, %v2281_v52 }
 0x1c1   : > { %v4292_v62 = vpack.c.bf16 %v2168_v58, %v2167_v56  ;;  %v4572_v63 = vpack.c.bf16 %v2280_v59, %v2279_v57  ;;  %v4958_v0 = vpop.f32.mrb[100].mxu0  ;;  %v5070_v1 = vpop.f32.mrb[100].mxu1 }
 0x1c2   : > { %4657 = vst [vmem:[%s5425_s13 + $0x188] sm:$0xff] %v4297_v60   ;;  %4713 = vst [vmem:[%s5425_s13 + $0x348] sm:$0xff] %v4577_v61   ;;  %v1585_v2 = vadd.f32 %v5612_v54, %v4958_v0  ;;  %v2033_v3 = vadd.f32 %v5612_v54, %v5070_v1  ;;  %v1576_v4 = vpop.f32.mrb[101].mxu0  ;;  %v2024_v5 = vpop.f32.mrb[101].mxu1 }
 0x1c3   : > { %4656 = vst [vmem:[%s5425_s13 + $0x180] sm:$0xff] %v4292_v62   ;;  %4712 = vst [vmem:[%s5425_s13 + $0x340] sm:$0xff] %v4572_v63   ;;  %v1577_v6 = vadd.f32 %v5612_v54, %v1576_v4  ;;  %v2025_v7 = vadd.f32 %v5612_v54, %v2024_v5  ;;  %v4959_v8 = vpop.f32.mrb[102].mxu0  ;;  %v5071_v9 = vpop.f32.mrb[102].mxu1 }
 0x1c4   : > { %v1588_v10 = vadd.f32 %v5612_v54, %v4959_v8  ;;  %v2036_v11 = vadd.f32 %v5612_v54, %v5071_v9  ;;  %v1579_v12 = vpop.f32.mrb[103].mxu0  ;;  %v2027_v13 = vpop.f32.mrb[103].mxu1  ;;  %v2173_v16 = vmax.f32 %v1585_v2, 0.0  ;;  %v2285_v17 = vmax.f32 %v2033_v3, 0.0 }
 0x1c5   : > { %v1580_v14 = vadd.f32 %v5612_v54, %v1579_v12  ;;  %v2028_v15 = vadd.f32 %v5612_v54, %v2027_v13  ;;  %v2171_v20 = vmax.f32 %v1577_v6, 0.0  ;;  %v2283_v21 = vmax.f32 %v2025_v7, 0.0 }
 0x1c6   : > { %v2174_v18 = vmax.f32 %v1588_v10, 0.0  ;;  %v2286_v19 = vmax.f32 %v2036_v11, 0.0 }
 0x1c7   : > { %v2172_v22 = vmax.f32 %v1580_v14, 0.0  ;;  %v2284_v23 = vmax.f32 %v2028_v15, 0.0 }
 0x1c8   : > { %v4307_v24 = vpack.c.bf16 %v2174_v18, %v2173_v16  ;;  %v4587_v25 = vpack.c.bf16 %v2286_v19, %v2285_v17 }
 0x1c9   : > { %v4302_v26 = vpack.c.bf16 %v2172_v22, %v2171_v20  ;;  %v4582_v27 = vpack.c.bf16 %v2284_v23, %v2283_v21  ;;  %v4962_v28 = vpop.f32.mrb[104].mxu0  ;;  %v5074_v29 = vpop.f32.mrb[104].mxu1 }
 0x1ca   : > { %4659 = vst [vmem:[%s5425_s13 + $0x198] sm:$0xff] %v4307_v24   ;;  %4715 = vst [vmem:[%s5425_s13 + $0x358] sm:$0xff] %v4587_v25   ;;  %v1601_v30 = vadd.f32 %v5612_v54, %v4962_v28  ;;  %v2049_v31 = vadd.f32 %v5612_v54, %v5074_v29  ;;  %v1592_v32 = vpop.f32.mrb[105].mxu0  ;;  %v2040_v33 = vpop.f32.mrb[105].mxu1 }
 0x1cb   : > { %4658 = vst [vmem:[%s5425_s13 + $0x190] sm:$0xff] %v4302_v26   ;;  %4714 = vst [vmem:[%s5425_s13 + $0x350] sm:$0xff] %v4582_v27   ;;  %v1593_v34 = vadd.f32 %v5612_v54, %v1592_v32  ;;  %v2041_v35 = vadd.f32 %v5612_v54, %v2040_v33  ;;  %v4963_v36 = vpop.f32.mrb[106].mxu0  ;;  %v5075_v37 = vpop.f32.mrb[106].mxu1 }
 0x1cc   : > { %v1604_v38 = vadd.f32 %v5612_v54, %v4963_v36  ;;  %v2052_v39 = vadd.f32 %v5612_v54, %v5075_v37  ;;  %v1595_v40 = vpop.f32.mrb[107].mxu0  ;;  %v2043_v41 = vpop.f32.mrb[107].mxu1  ;;  %v2177_v44 = vmax.f32 %v1601_v30, 0.0  ;;  %v2289_v45 = vmax.f32 %v2049_v31, 0.0 }
 0x1cd   : > { %v1596_v42 = vadd.f32 %v5612_v54, %v1595_v40  ;;  %v2044_v43 = vadd.f32 %v5612_v54, %v2043_v41  ;;  %v2175_v48 = vmax.f32 %v1593_v34, 0.0  ;;  %v2287_v49 = vmax.f32 %v2041_v35, 0.0 }
 0x1ce   : > { %v2178_v46 = vmax.f32 %v1604_v38, 0.0  ;;  %v2290_v47 = vmax.f32 %v2052_v39, 0.0 }
 0x1cf   : > { %v2176_v50 = vmax.f32 %v1596_v42, 0.0  ;;  %v2288_v51 = vmax.f32 %v2044_v43, 0.0 }
 0x1d0   : > { %v4317_v52 = vpack.c.bf16 %v2178_v46, %v2177_v44  ;;  %v4597_v53 = vpack.c.bf16 %v2290_v47, %v2289_v45 }
 0x1d1   : > { %v4312_v55 = vpack.c.bf16 %v2176_v50, %v2175_v48  ;;  %v4592_v56 = vpack.c.bf16 %v2288_v51, %v2287_v49  ;;  %v4966_v57 = vpop.f32.mrb[108].mxu0  ;;  %v5078_v58 = vpop.f32.mrb[108].mxu1 }
 0x1d2   : > { %4661 = vst [vmem:[%s5425_s13 + $0x1a8] sm:$0xff] %v4317_v52   ;;  %4717 = vst [vmem:[%s5425_s13 + $0x368] sm:$0xff] %v4597_v53   ;;  %v1617_v59 = vadd.f32 %v5612_v54, %v4966_v57  ;;  %v2065_v60 = vadd.f32 %v5612_v54, %v5078_v58  ;;  %v1608_v61 = vpop.f32.mrb[109].mxu0  ;;  %v2056_v62 = vpop.f32.mrb[109].mxu1 }
 0x1d3   : > { %4660 = vst [vmem:[%s5425_s13 + $0x1a0] sm:$0xff] %v4312_v55   ;;  %4716 = vst [vmem:[%s5425_s13 + $0x360] sm:$0xff] %v4592_v56   ;;  %v1609_v63 = vadd.f32 %v5612_v54, %v1608_v61  ;;  %v2057_v0 = vadd.f32 %v5612_v54, %v2056_v62  ;;  %v4967_v1 = vpop.f32.mrb[110].mxu0  ;;  %v5079_v2 = vpop.f32.mrb[110].mxu1 }
 0x1d4   : > { %v1620_v3 = vadd.f32 %v5612_v54, %v4967_v1  ;;  %v2068_v4 = vadd.f32 %v5612_v54, %v5079_v2  ;;  %v1611_v5 = vpop.f32.mrb[111].mxu0  ;;  %v2059_v6 = vpop.f32.mrb[111].mxu1  ;;  %v2181_v9 = vmax.f32 %v1617_v59, 0.0  ;;  %v2293_v10 = vmax.f32 %v2065_v60, 0.0 }
 0x1d5   : > { %v1612_v7 = vadd.f32 %v5612_v54, %v1611_v5  ;;  %v2060_v8 = vadd.f32 %v5612_v54, %v2059_v6  ;;  %v2179_v13 = vmax.f32 %v1609_v63, 0.0  ;;  %v2291_v14 = vmax.f32 %v2057_v0, 0.0 }
 0x1d6   : > { %v2182_v11 = vmax.f32 %v1620_v3, 0.0  ;;  %v2294_v12 = vmax.f32 %v2068_v4, 0.0 }
 0x1d7   : > { %v2180_v15 = vmax.f32 %v1612_v7, 0.0  ;;  %v2292_v16 = vmax.f32 %v2060_v8, 0.0 }
 0x1d8   : > { %v4327_v17 = vpack.c.bf16 %v2182_v11, %v2181_v9  ;;  %v4607_v18 = vpack.c.bf16 %v2294_v12, %v2293_v10 }
 0x1d9   : > { %v4322_v19 = vpack.c.bf16 %v2180_v15, %v2179_v13  ;;  %v4602_v20 = vpack.c.bf16 %v2292_v16, %v2291_v14 }
 0x1da   : > { %4663 = vst [vmem:[%s5425_s13 + $0x1b8] sm:$0xff] %v4327_v17   ;;  %4719 = vst [vmem:[%s5425_s13 + $0x378] sm:$0xff] %v4607_v18  }
 0x1db   : > { %4662 = vst [vmem:[%s5425_s13 + $0x1b0] sm:$0xff] %v4322_v19   ;;  %4718 = vst [vmem:[%s5425_s13 + $0x370] sm:$0xff] %v4602_v20  }
 0x1dc PF: > { %s13_s12 = sadd.s32 1, %s5231_s12  }
 0x1dd   : > { %p10_p4 = scmp.ge.s32.totalorder %s13_s12, 4  }
 0x1df   :  { %12 = sbr.rel (!%p10_p4) target bundleno = 1 (0x1), region = 62 }

// kernel: encoder_forward.6
= control target key start
LH: loop header
LB: loop body
LE: loop exit
PB: predicated region body
PF: predicated region fallthrough
CT: control target
= control target key end

     0   :  { %v5024_v0 = vmov 0   ;;  %s6218_s1 = inlined_call_operand.vmem [shape: bf16[512,128], index: 1, kind: input, shape index: {}]   ;;  %s6219_s0 = inlined_call_operand.vmem [shape: bf16[968,512], index: 0, kind: input, shape index: {}]   ;;  %s6220_s2 = inlined_call_operand.vmem [shape: f32[1,128], index: 2, kind: input, shape index: {}]   ;;  %s6221_s3 = inlined_call_operand.vmem [shape: bf16[968,128], index: 3, kind: output, shape index: {}]  }
   0x1   :  { %1734 = vmatprep.subr.bf16.mxu1 %v5024_v0  ;;  %2254 = vmatprep.subr.bf16.mxu0 %v5024_v0  ;;  %v4626_v1 = vld [vmem:[%s6218_s1] sm:$0xff]   ;;  %v4628_v3 = vld [vmem:[%s6218_s1 + $0x8] sm:$0xff]   ;;  %v4630_v5 = vld [vmem:[%s6218_s1 + $0x10] sm:$0xff]  }
   0x2   :  { %v4627_v2 = vld [vmem:[%s6218_s1 + $0x80] sm:$0xff]   ;;  %1735 = vmatpush1.bf16.msra.mxu1 %v4626_v1  ;;  %v4629_v4 = vld [vmem:[%s6218_s1 + $0x88] sm:$0xff]   ;;  %v4631_v6 = vld [vmem:[%s6218_s1 + $0x90] sm:$0xff]  }
   0x3   :  { %2255 = vmatpush1.bf16.msra.mxu0 %v4627_v2  ;;  %1736 = vmatprep.subr.bf16.mxu1 %v5024_v0  ;;  %v4632_v7 = vld [vmem:[%s6218_s1 + $0x18] sm:$0xff]   ;;  %v4634_v9 = vld [vmem:[%s6218_s1 + $0x20] sm:$0xff]   ;;  %v4636_v11 = vld [vmem:[%s6218_s1 + $0x28] sm:$0xff]  }
   0x4   :  { %2256 = vmatprep.subr.bf16.mxu0 %v5024_v0  ;;  %v4633_v8 = vld [vmem:[%s6218_s1 + $0x98] sm:$0xff]   ;;  %v4635_v10 = vld [vmem:[%s6218_s1 + $0xa0] sm:$0xff]   ;;  %v4637_v12 = vld [vmem:[%s6218_s1 + $0xa8] sm:$0xff]  }
   0x5   :  { %v4638_v13 = vld [vmem:[%s6218_s1 + $0x30] sm:$0xff]   ;;  %v4640_v15 = vld [vmem:[%s6218_s1 + $0x38] sm:$0xff]   ;;  %v4642_v17 = vld [vmem:[%s6218_s1 + $0x40] sm:$0xff]  }
   0x6   :  { %1737 = vmatpush1.bf16.msra.mxu1 %v4628_v3  ;;  %v4639_v14 = vld [vmem:[%s6218_s1 + $0xb0] sm:$0xff]   ;;  %v4641_v16 = vld [vmem:[%s6218_s1 + $0xb8] sm:$0xff]   ;;  %v4643_v18 = vld [vmem:[%s6218_s1 + $0xc0] sm:$0xff]  }
   0x7   :  { %2257 = vmatpush1.bf16.msra.mxu0 %v4629_v4  ;;  %1738 = vmatprep.subr.bf16.mxu1 %v5024_v0  ;;  %v4660_v19 = vld [vmem:[%s6219_s0 + $0x4] ss:$16 sps:$4 sm:$0xff]   ;;  %v4644_v20 = vld [vmem:[%s6218_s1 + $0x48] sm:$0xff]   ;;  %v4648_v25 = vld [vmem:[%s6218_s1 + $0x58] sm:$0xff]  }
   0x8   :  { %2258 = vmatprep.subr.bf16.mxu0 %v5024_v0  ;;  %v4663_v21 = vld [vmem:[%s6219_s0 + $0xc] ss:$16 sps:$4 sm:$0xff]   ;;  %1766 = vmatprep.mubr.bf16.mxu1 %v4660_v19  ;;  %v4646_v23 = vld [vmem:[%s6218_s1 + $0x50] sm:$0xff]   ;;  %v4650_v27 = vld [vmem:[%s6218_s1 + $0x60] sm:$0xff]  }
   0x9   :  { %v4645_v22 = vld [vmem:[%s6218_s1 + $0xc8] sm:$0xff]   ;;  %2286 = vmatprep.mubr.bf16.mxu0 %v4663_v21  ;;  %v4647_v24 = vld [vmem:[%s6218_s1 + $0xd0] sm:$0xff]   ;;  %v4649_v26 = vld [vmem:[%s6218_s1 + $0xd8] sm:$0xff]  }
   0xa   :  { %1739 = vmatpush1.bf16.msra.mxu1 %v4630_v5  ;;  %v4651_v28 = vld [vmem:[%s6218_s1 + $0xe0] sm:$0xff]   ;;  %v4652_v29 = vld [vmem:[%s6218_s1 + $0x68] sm:$0xff]   ;;  %v4654_v31 = vld [vmem:[%s6218_s1 + $0x70] sm:$0xff]  }
   0xb   :  { %2259 = vmatpush1.bf16.msra.mxu0 %v4631_v6  ;;  %1740 = vmatprep.subr.bf16.mxu1 %v5024_v0  ;;  %v4653_v30 = vld [vmem:[%s6218_s1 + $0xe8] sm:$0xff]   ;;  %v4655_v32 = vld [vmem:[%s6218_s1 + $0xf0] sm:$0xff]   ;;  %v4656_v33 = vld [vmem:[%s6218_s1 + $0x78] sm:$0xff]  }
   0xc   :  { %2260 = vmatprep.subr.bf16.mxu0 %v5024_v0  ;;  %v4657_v34 = vld [vmem:[%s6218_s1 + $0xf8] sm:$0xff]   ;;  %v4658_v35 = vld [vmem:[%s6219_s0] ss:$16 sps:$4 sm:$0xff]   ;;  %v4664_v37 = vld [vmem:[%s6219_s0 + $0x24] ss:$16 sps:$4 sm:$0xff]  }
   0xd   :  { %v4661_v36 = vld [vmem:[%s6219_s0 + $0x8] ss:$16 sps:$4 sm:$0xff]   ;;  %v4666_v38 = vld [vmem:[%s6219_s0 + $0x2c] ss:$16 sps:$4 sm:$0xff]   ;;  %v4668_v39 = vld [vmem:[%s6219_s0 + $0x20] ss:$16 sps:$4 sm:$0xff]  }
   0xe   :  { %1741 = vmatpush1.bf16.msra.mxu1 %v4632_v7  ;;  %v4669_v40 = vld [vmem:[%s6219_s0 + $0x28] ss:$16 sps:$4 sm:$0xff]   ;;  %v4670_v41 = vld [vmem:[%s6219_s0 + $0x44] ss:$16 sps:$4 sm:$0xff]   ;;  %v4672_v42 = vld [vmem:[%s6219_s0 + $0x4c] ss:$16 sps:$4 sm:$0xff]  }
   0xf   :  { %2261 = vmatpush1.bf16.msra.mxu0 %v4633_v8  ;;  %1742 = vmatprep.subr.bf16.mxu1 %v5024_v0  ;;  %v4674_v43 = vld [vmem:[%s6219_s0 + $0x40] ss:$16 sps:$4 sm:$0xff]   ;;  %v4675_v44 = vld [vmem:[%s6219_s0 + $0x48] ss:$16 sps:$4 sm:$0xff]   ;;  %v4676_v45 = vld [vmem:[%s6219_s0 + $0x64] ss:$16 sps:$4 sm:$0xff]  }
  0x10   :  { %2262 = vmatprep.subr.bf16.mxu0 %v5024_v0  ;;  %v4678_v46 = vld [vmem:[%s6219_s0 + $0x6c] ss:$16 sps:$4 sm:$0xff]   ;;  %v4680_v47 = vld [vmem:[%s6219_s0 + $0x60] ss:$16 sps:$4 sm:$0xff]   ;;  %v4681_v48 = vld [vmem:[%s6219_s0 + $0x68] ss:$16 sps:$4 sm:$0xff]  }
  0x11   :  { %v4682_v49 = vld [vmem:[%s6219_s0 + $0x84] ss:$16 sps:$4 sm:$0xff]   ;;  %v4684_v50 = vld [vmem:[%s6219_s0 + $0x8c] ss:$16 sps:$4 sm:$0xff]   ;;  %v4686_v51 = vld [vmem:[%s6219_s0 + $0x80] ss:$16 sps:$4 sm:$0xff]  }
  0x12   :  { %1743 = vmatpush1.bf16.msra.mxu1 %v4634_v9  ;;  %v4687_v52 = vld [vmem:[%s6219_s0 + $0x88] ss:$16 sps:$4 sm:$0xff]   ;;  %v4688_v53 = vld [vmem:[%s6219_s0 + $0xa4] ss:$16 sps:$4 sm:$0xff]   ;;  %v4690_v54 = vld [vmem:[%s6219_s0 + $0xac] ss:$16 sps:$4 sm:$0xff]  }
  0x13   :  { %2263 = vmatpush1.bf16.msra.mxu0 %v4635_v10  ;;  %1744 = vmatprep.subr.bf16.mxu1 %v5024_v0  ;;  %v4692_v55 = vld [vmem:[%s6219_s0 + $0xa0] ss:$16 sps:$4 sm:$0xff]   ;;  %v4693_v56 = vld [vmem:[%s6219_s0 + $0xa8] ss:$16 sps:$4 sm:$0xff]   ;;  %v4694_v57 = vld [vmem:[%s6219_s0 + $0xc4] ss:$16 sps:$4 sm:$0xff]  }
  0x14   :  { %2264 = vmatprep.subr.bf16.mxu0 %v5024_v0  ;;  %v4696_v58 = vld [vmem:[%s6219_s0 + $0xcc] ss:$16 sps:$4 sm:$0xff]   ;;  %v4698_v59 = vld [vmem:[%s6219_s0 + $0xc0] ss:$16 sps:$4 sm:$0xff]   ;;  %v4699_v60 = vld [vmem:[%s6219_s0 + $0xc8] ss:$16 sps:$4 sm:$0xff]  }
  0x15   :  { %v4700_v61 = vld [vmem:[%s6219_s0 + $0xe4] ss:$16 sps:$4 sm:$0xff]   ;;  %v4702_v62 = vld [vmem:[%s6219_s0 + $0xec] ss:$16 sps:$4 sm:$0xff]   ;;  %v4704_v63 = vld [vmem:[%s6219_s0 + $0xe0] ss:$16 sps:$4 sm:$0xff]  }
  0x16   :  { %1745 = vmatpush1.bf16.msra.mxu1 %v4636_v11  ;;  %v4706_v1 = vld [vmem:[%s6219_s0 + $0x104] ss:$16 sps:$4 sm:$0xff]   ;;  %v4708_v2 = vld [vmem:[%s6219_s0 + $0x10c] ss:$16 sps:$4 sm:$0xff]   ;;  %v4710_v3 = vld [vmem:[%s6219_s0 + $0x100] ss:$16 sps:$4 sm:$0xff]  }
  0x17   :  { %2265 = vmatpush1.bf16.msra.mxu0 %v4637_v12  ;;  %1746 = vmatprep.subr.bf16.mxu1 %v5024_v0  ;;  %v4711_v4 = vld [vmem:[%s6219_s0 + $0x108] ss:$16 sps:$4 sm:$0xff]   ;;  %v4712_v5 = vld [vmem:[%s6219_s0 + $0x124] ss:$16 sps:$4 sm:$0xff]   ;;  %v4714_v6 = vld [vmem:[%s6219_s0 + $0x12c] ss:$16 sps:$4 sm:$0xff]  }
  0x18   :  { %2266 = vmatprep.subr.bf16.mxu0 %v5024_v0  ;;  %v4716_v7 = vld [vmem:[%s6219_s0 + $0x120] ss:$16 sps:$4 sm:$0xff]   ;;  %v4717_v8 = vld [vmem:[%s6219_s0 + $0x128] ss:$16 sps:$4 sm:$0xff]   ;;  %v4718_v9 = vld [vmem:[%s6219_s0 + $0x144] ss:$16 sps:$4 sm:$0xff]  }
  0x19   :  { %v4720_v10 = vld [vmem:[%s6219_s0 + $0x14c] ss:$16 sps:$4 sm:$0xff]   ;;  %v4722_v11 = vld [vmem:[%s6219_s0 + $0x140] ss:$16 sps:$4 sm:$0xff]   ;;  %v4723_v12 = vld [vmem:[%s6219_s0 + $0x148] ss:$16 sps:$4 sm:$0xff]  }
  0x1a   :  { %1747 = vmatpush1.bf16.msra.mxu1 %v4638_v13  ;;  %v4724_v13 = vld [vmem:[%s6219_s0 + $0x164] ss:$16 sps:$4 sm:$0xff]   ;;  %v4734_v19 = vld [vmem:[%s6219_s0 + $0x180] ss:$16 sps:$4 sm:$0xff]  }
  0x1b   :  { %2267 = vmatpush1.bf16.msra.mxu0 %v4639_v14  ;;  %1748 = vmatprep.subr.bf16.mxu1 %v5024_v0  ;;  %v4726_v14 = vld [vmem:[%s6219_s0 + $0x16c] ss:$16 sps:$4 sm:$0xff]   ;;  %v4736_v21 = vld [vmem:[%s6219_s0 + $0x1a4] ss:$16 sps:$4 sm:$0xff]  }
  0x1c   :  { %2268 = vmatprep.subr.bf16.mxu0 %v5024_v0 }
  0x1e   :  { %1749 = vmatpush1.bf16.msra.mxu1 %v4640_v15  ;;  %v4728_v15 = vld [vmem:[%s6219_s0 + $0x160] ss:$16 sps:$4 sm:$0xff]  }
  0x1f   :  { %2269 = vmatpush1.bf16.msra.mxu0 %v4641_v16  ;;  %1750 = vmatprep.subr.bf16.mxu1 %v5024_v0  ;;  %v4729_v16 = vld [vmem:[%s6219_s0 + $0x168] ss:$16 sps:$4 sm:$0xff]  }
  0x20   :  { %2270 = vmatprep.subr.bf16.mxu0 %v5024_v0 }
  0x22   :  { %1751 = vmatpush1.bf16.msra.mxu1 %v4642_v17  ;;  %v4730_v17 = vld [vmem:[%s6219_s0 + $0x184] ss:$16 sps:$4 sm:$0xff]  }
  0x23   :  { %2271 = vmatpush1.bf16.msra.mxu0 %v4643_v18  ;;  %1752 = vmatprep.subr.bf16.mxu1 %v5024_v0  ;;  %v4732_v18 = vld [vmem:[%s6219_s0 + $0x18c] ss:$16 sps:$4 sm:$0xff]  }
  0x24   :  { %2272 = vmatprep.subr.bf16.mxu0 %v5024_v0 }
  0x26   :  { %1753 = vmatpush1.bf16.msra.mxu1 %v4644_v20  ;;  %v4735_v20 = vld [vmem:[%s6219_s0 + $0x188] ss:$16 sps:$4 sm:$0xff]  }
  0x27   :  { %2273 = vmatpush1.bf16.msra.mxu0 %v4645_v22  ;;  %1754 = vmatprep.subr.bf16.mxu1 %v5024_v0  ;;  %v4738_v22 = vld [vmem:[%s6219_s0 + $0x1ac] ss:$16 sps:$4 sm:$0xff]  }
  0x28   :  { %2274 = vmatprep.subr.bf16.mxu0 %v5024_v0 }
  0x2a   :  { %1755 = vmatpush1.bf16.msra.mxu1 %v4646_v23  ;;  %v4740_v23 = vld [vmem:[%s6219_s0 + $0x1a0] ss:$16 sps:$4 sm:$0xff]  }
  0x2b   :  { %2275 = vmatpush1.bf16.msra.mxu0 %v4647_v24  ;;  %1756 = vmatprep.subr.bf16.mxu1 %v5024_v0  ;;  %v4741_v24 = vld [vmem:[%s6219_s0 + $0x1a8] ss:$16 sps:$4 sm:$0xff]  }
  0x2c   :  { %2276 = vmatprep.subr.bf16.mxu0 %v5024_v0 }
  0x2e   :  { %1757 = vmatpush1.bf16.msra.mxu1 %v4648_v25  ;;  %v4742_v25 = vld [vmem:[%s6219_s0 + $0x1c4] ss:$16 sps:$4 sm:$0xff]  }
  0x2f   :  { %2277 = vmatpush1.bf16.msra.mxu0 %v4649_v26  ;;  %1758 = vmatprep.subr.bf16.mxu1 %v5024_v0  ;;  %v4744_v26 = vld [vmem:[%s6219_s0 + $0x1cc] ss:$16 sps:$4 sm:$0xff]  }
  0x30   :  { %2278 = vmatprep.subr.bf16.mxu0 %v5024_v0 }
  0x32   :  { %1759 = vmatpush1.bf16.msra.mxu1 %v4650_v27  ;;  %v4746_v27 = vld [vmem:[%s6219_s0 + $0x1c0] ss:$16 sps:$4 sm:$0xff]  }
  0x33   :  { %2279 = vmatpush1.bf16.msra.mxu0 %v4651_v28  ;;  %1760 = vmatprep.subr.bf16.mxu1 %v5024_v0  ;;  %v4747_v28 = vld [vmem:[%s6219_s0 + $0x1c8] ss:$16 sps:$4 sm:$0xff]  }
  0x34   :  { %2280 = vmatprep.subr.bf16.mxu0 %v5024_v0 }
  0x36   :  { %1761 = vmatpush1.bf16.msra.mxu1 %v4652_v29  ;;  %v4748_v29 = vld [vmem:[%s6219_s0 + $0x1e4] ss:$16 sps:$4 sm:$0xff]  }
  0x37   :  { %2281 = vmatpush1.bf16.msra.mxu0 %v4653_v30  ;;  %1762 = vmatprep.subr.bf16.mxu1 %v5024_v0  ;;  %v4750_v30 = vld [vmem:[%s6219_s0 + $0x1ec] ss:$16 sps:$4 sm:$0xff]  }
  0x38   :  { %2282 = vmatprep.subr.bf16.mxu0 %v5024_v0 }
  0x3a   :  { %1763 = vmatpush1.bf16.msra.mxu1 %v4654_v31  ;;  %v4752_v31 = vld [vmem:[%s6219_s0 + $0x1e0] ss:$16 sps:$4 sm:$0xff]  }
  0x3b   :  { %2283 = vmatpush1.bf16.msra.mxu0 %v4655_v32  ;;  %1764 = vmatprep.subr.bf16.mxu1 %v5024_v0  ;;  %v4753_v32 = vld [vmem:[%s6219_s0 + $0x1e8] ss:$16 sps:$4 sm:$0xff]  }
  0x3c   :  { %2284 = vmatprep.subr.bf16.mxu0 %v5024_v0  ;;  %v4705_v0 = vld [vmem:[%s6219_s0 + $0xe8] ss:$16 sps:$4 sm:$0xff]  }
  0x3e   :  { %1765 = vmatpush1.bf16.msra.mxu1 %v4656_v33  ;;  %v4754_v33 = vld [vmem:[%s6219_s0 + $0x204] ss:$16 sps:$4 sm:$0xff]  }
  0x3f   :  { %2285 = vmatpush1.bf16.msra.mxu0 %v4657_v34  ;;  %v4756_v34 = vld [vmem:[%s6219_s0 + $0x20c] ss:$16 sps:$4 sm:$0xff]  }
  0x41   :  { %1767 = vmatmul.mubr.bf16.vlgmr.msra.gmra.mrb[0].mxu1 %v4658_v35  ;;  %v4758_v35 = vld [vmem:[%s6219_s0 + $0x200] ss:$16 sps:$4 sm:$0xff]  }
  0x42   :  { %2287 = vmatmul.mubr.bf16.vlgmr.msra.gmra.mrb[0].mxu0 %v4661_v36  ;;  %1774 = vmatprep.mubr.bf16.mxu1 %v4664_v37  ;;  %v4759_v36 = vld [vmem:[%s6219_s0 + $0x208] ss:$16 sps:$4 sm:$0xff]   ;;  %v4760_v37 = vld [vmem:[%s6219_s0 + $0x224] ss:$16 sps:$4 sm:$0xff]  }
  0x43   :  { %2294 = vmatprep.mubr.bf16.mxu0 %v4666_v38  ;;  %v4762_v38 = vld [vmem:[%s6219_s0 + $0x22c] ss:$16 sps:$4 sm:$0xff]  }
  0x49   :  { %1775 = vmatmul.mubr.bf16.gmra.mrb[4].mxu1 %v4668_v39  ;;  %v4764_v39 = vld [vmem:[%s6219_s0 + $0x220] ss:$16 sps:$4 sm:$0xff]  }
  0x4a   :  { %2295 = vmatmul.mubr.bf16.gmra.mrb[4].mxu0 %v4669_v40  ;;  %1782 = vmatprep.mubr.bf16.mxu1 %v4670_v41  ;;  %v4765_v40 = vld [vmem:[%s6219_s0 + $0x228] ss:$16 sps:$4 sm:$0xff]   ;;  %v4766_v41 = vld [vmem:[%s6219_s0 + $0x244] ss:$16 sps:$4 sm:$0xff]  }
  0x4b   :  { %2302 = vmatprep.mubr.bf16.mxu0 %v4672_v42  ;;  %v4768_v42 = vld [vmem:[%s6219_s0 + $0x24c] ss:$16 sps:$4 sm:$0xff]  }
  0x51   :  { %1783 = vmatmul.mubr.bf16.gmra.mrb[8].mxu1 %v4674_v43  ;;  %v4770_v43 = vld [vmem:[%s6219_s0 + $0x240] ss:$16 sps:$4 sm:$0xff]  }
  0x52   :  { %2303 = vmatmul.mubr.bf16.gmra.mrb[8].mxu0 %v4675_v44  ;;  %1790 = vmatprep.mubr.bf16.mxu1 %v4676_v45  ;;  %v4771_v44 = vld [vmem:[%s6219_s0 + $0x248] ss:$16 sps:$4 sm:$0xff]   ;;  %v4772_v45 = vld [vmem:[%s6219_s0 + $0x264] ss:$16 sps:$4 sm:$0xff]  }
  0x53   :  { %2310 = vmatprep.mubr.bf16.mxu0 %v4678_v46  ;;  %v4774_v46 = vld [vmem:[%s6219_s0 + $0x26c] ss:$16 sps:$4 sm:$0xff]  }
  0x59   :  { %1791 = vmatmul.mubr.bf16.gmra.mrb[12].mxu1 %v4680_v47  ;;  %v4776_v47 = vld [vmem:[%s6219_s0 + $0x260] ss:$16 sps:$4 sm:$0xff]  }
  0x5a   :  { %2311 = vmatmul.mubr.bf16.gmra.mrb[12].mxu0 %v4681_v48  ;;  %1798 = vmatprep.mubr.bf16.mxu1 %v4682_v49  ;;  %v4777_v48 = vld [vmem:[%s6219_s0 + $0x268] ss:$16 sps:$4 sm:$0xff]   ;;  %v4778_v49 = vld [vmem:[%s6219_s0 + $0x284] ss:$16 sps:$4 sm:$0xff]  }
  0x5b   :  { %2318 = vmatprep.mubr.bf16.mxu0 %v4684_v50  ;;  %v4780_v50 = vld [vmem:[%s6219_s0 + $0x28c] ss:$16 sps:$4 sm:$0xff]  }
  0x61   :  { %1799 = vmatmul.mubr.bf16.gmra.mrb[16].mxu1 %v4686_v51  ;;  %v4782_v51 = vld [vmem:[%s6219_s0 + $0x280] ss:$16 sps:$4 sm:$0xff]  }
  0x62   :  { %2319 = vmatmul.mubr.bf16.gmra.mrb[16].mxu0 %v4687_v52  ;;  %1806 = vmatprep.mubr.bf16.mxu1 %v4688_v53  ;;  %v4783_v52 = vld [vmem:[%s6219_s0 + $0x288] ss:$16 sps:$4 sm:$0xff]   ;;  %v4784_v53 = vld [vmem:[%s6219_s0 + $0x2a4] ss:$16 sps:$4 sm:$0xff]  }
  0x63   :  { %2326 = vmatprep.mubr.bf16.mxu0 %v4690_v54  ;;  %v4786_v54 = vld [vmem:[%s6219_s0 + $0x2ac] ss:$16 sps:$4 sm:$0xff]  }
  0x69   :  { %1807 = vmatmul.mubr.bf16.gmra.mrb[20].mxu1 %v4692_v55  ;;  %v4788_v55 = vld [vmem:[%s6219_s0 + $0x2a0] ss:$16 sps:$4 sm:$0xff]  }
  0x6a   :  { %2327 = vmatmul.mubr.bf16.gmra.mrb[20].mxu0 %v4693_v56  ;;  %1814 = vmatprep.mubr.bf16.mxu1 %v4694_v57  ;;  %v4789_v56 = vld [vmem:[%s6219_s0 + $0x2a8] ss:$16 sps:$4 sm:$0xff]   ;;  %v4790_v57 = vld [vmem:[%s6219_s0 + $0x2c4] ss:$16 sps:$4 sm:$0xff]  }
  0x6b   :  { %2334 = vmatprep.mubr.bf16.mxu0 %v4696_v58  ;;  %v4792_v58 = vld [vmem:[%s6219_s0 + $0x2cc] ss:$16 sps:$4 sm:$0xff]  }
  0x71   :  { %1815 = vmatmul.mubr.bf16.gmra.mrb[24].mxu1 %v4698_v59  ;;  %v4794_v59 = vld [vmem:[%s6219_s0 + $0x2c0] ss:$16 sps:$4 sm:$0xff]  }
  0x72   :  { %2335 = vmatmul.mubr.bf16.gmra.mrb[24].mxu0 %v4699_v60  ;;  %1822 = vmatprep.mubr.bf16.mxu1 %v4700_v61  ;;  %v4795_v60 = vld [vmem:[%s6219_s0 + $0x2c8] ss:$16 sps:$4 sm:$0xff]   ;;  %v4796_v61 = vld [vmem:[%s6219_s0 + $0x2e4] ss:$16 sps:$4 sm:$0xff]  }
  0x73   :  { %2342 = vmatprep.mubr.bf16.mxu0 %v4702_v62  ;;  %v4798_v62 = vld [vmem:[%s6219_s0 + $0x2ec] ss:$16 sps:$4 sm:$0xff]  }
  0x79   :  { %1823 = vmatmul.mubr.bf16.gmra.mrb[28].mxu1 %v4704_v63  ;;  %v4800_v63 = vld [vmem:[%s6219_s0 + $0x2e0] ss:$16 sps:$4 sm:$0xff]  }
  0x7a   :  { %2343 = vmatmul.mubr.bf16.gmra.mrb[28].mxu0 %v4705_v0  ;;  %1830 = vmatprep.mubr.bf16.mxu1 %v4706_v1  ;;  %v4801_v0 = vld [vmem:[%s6219_s0 + $0x2e8] ss:$16 sps:$4 sm:$0xff]   ;;  %v4802_v1 = vld [vmem:[%s6219_s0 + $0x304] ss:$16 sps:$4 sm:$0xff]  }
  0x7b   :  { %2350 = vmatprep.mubr.bf16.mxu0 %v4708_v2  ;;  %v4804_v2 = vld [vmem:[%s6219_s0 + $0x30c] ss:$16 sps:$4 sm:$0xff]  }
  0x81   :  { %1831 = vmatmul.mubr.bf16.gmra.mrb[32].mxu1 %v4710_v3  ;;  %v4806_v3 = vld [vmem:[%s6219_s0 + $0x300] ss:$16 sps:$4 sm:$0xff]  }
  0x82   :  { %2351 = vmatmul.mubr.bf16.gmra.mrb[32].mxu0 %v4711_v4  ;;  %1838 = vmatprep.mubr.bf16.mxu1 %v4712_v5  ;;  %v4807_v4 = vld [vmem:[%s6219_s0 + $0x308] ss:$16 sps:$4 sm:$0xff]   ;;  %v4808_v5 = vld [vmem:[%s6219_s0 + $0x324] ss:$16 sps:$4 sm:$0xff]  }
  0x83   :  { %2358 = vmatprep.mubr.bf16.mxu0 %v4714_v6  ;;  %v4810_v6 = vld [vmem:[%s6219_s0 + $0x32c] ss:$16 sps:$4 sm:$0xff]  }
  0x89   :  { %1839 = vmatmul.mubr.bf16.gmra.mrb[36].mxu1 %v4716_v7  ;;  %v4812_v7 = vld [vmem:[%s6219_s0 + $0x320] ss:$16 sps:$4 sm:$0xff]  }
  0x8a   :  { %2359 = vmatmul.mubr.bf16.gmra.mrb[36].mxu0 %v4717_v8  ;;  %1846 = vmatprep.mubr.bf16.mxu1 %v4718_v9  ;;  %v4813_v8 = vld [vmem:[%s6219_s0 + $0x328] ss:$16 sps:$4 sm:$0xff]   ;;  %v4814_v9 = vld [vmem:[%s6219_s0 + $0x344] ss:$16 sps:$4 sm:$0xff]  }
  0x8b   :  { %2366 = vmatprep.mubr.bf16.mxu0 %v4720_v10  ;;  %v4816_v10 = vld [vmem:[%s6219_s0 + $0x34c] ss:$16 sps:$4 sm:$0xff]  }
  0x91   :  { %1847 = vmatmul.mubr.bf16.gmra.mrb[40].mxu1 %v4722_v11  ;;  %v4818_v11 = vld [vmem:[%s6219_s0 + $0x340] ss:$16 sps:$4 sm:$0xff]  }
  0x92   :  { %2367 = vmatmul.mubr.bf16.gmra.mrb[40].mxu0 %v4723_v12  ;;  %1854 = vmatprep.mubr.bf16.mxu1 %v4724_v13  ;;  %v4819_v12 = vld [vmem:[%s6219_s0 + $0x348] ss:$16 sps:$4 sm:$0xff]   ;;  %v4820_v13 = vld [vmem:[%s6219_s0 + $0x364] ss:$16 sps:$4 sm:$0xff]  }
  0x93   :  { %2374 = vmatprep.mubr.bf16.mxu0 %v4726_v14  ;;  %v4822_v14 = vld [vmem:[%s6219_s0 + $0x36c] ss:$16 sps:$4 sm:$0xff]  }
  0x99   :  { %1855 = vmatmul.mubr.bf16.gmra.mrb[44].mxu1 %v4728_v15  ;;  %v5506_v15 = vld [vmem:[%s6220_s2] ss:$0 sm:$0xff] }
  0x9a   :  { %2375 = vmatmul.mubr.bf16.gmra.mrb[44].mxu0 %v4729_v16  ;;  %1862 = vmatprep.mubr.bf16.mxu1 %v4730_v17 }
  0x9b   :  { %2382 = vmatprep.mubr.bf16.mxu0 %v4732_v18 }
  0xa1   :  { %1863 = vmatmul.mubr.bf16.gmra.mrb[48].mxu1 %v4734_v19 }
  0xa2   :  { %2383 = vmatmul.mubr.bf16.gmra.mrb[48].mxu0 %v4735_v20  ;;  %1870 = vmatprep.mubr.bf16.mxu1 %v4736_v21  ;;  %v4824_v20 = vld [vmem:[%s6219_s0 + $0x360] ss:$16 sps:$4 sm:$0xff]  }
  0xa3   :  { %2390 = vmatprep.mubr.bf16.mxu0 %v4738_v22 }
  0xa9   :  { %1871 = vmatmul.mubr.bf16.gmra.mrb[52].mxu1 %v4740_v23  ;;  %v4825_v23 = vld [vmem:[%s6219_s0 + $0x368] ss:$16 sps:$4 sm:$0xff]  }
  0xaa   :  { %2391 = vmatmul.mubr.bf16.gmra.mrb[52].mxu0 %v4741_v24  ;;  %1878 = vmatprep.mubr.bf16.mxu1 %v4742_v25  ;;  %v4826_v24 = vld [vmem:[%s6219_s0 + $0x384] ss:$16 sps:$4 sm:$0xff]  }
  0xab   :  { %2398 = vmatprep.mubr.bf16.mxu0 %v4744_v26 }
  0xb1   :  { %1879 = vmatmul.mubr.bf16.gmra.mrb[56].mxu1 %v4746_v27 }
  0xb2   :  { %2399 = vmatmul.mubr.bf16.gmra.mrb[56].mxu0 %v4747_v28  ;;  %1886 = vmatprep.mubr.bf16.mxu1 %v4748_v29  ;;  %v4828_v29 = vld [vmem:[%s6219_s0 + $0x38c] ss:$16 sps:$4 sm:$0xff]  }
  0xb3   :  { %2406 = vmatprep.mubr.bf16.mxu0 %v4750_v30 }
  0xb9   :  { %1887 = vmatmul.mubr.bf16.gmra.mrb[60].mxu1 %v4752_v31 }
  0xba   :  { %2407 = vmatmul.mubr.bf16.gmra.mrb[60].mxu0 %v4753_v32  ;;  %1894 = vmatprep.mubr.bf16.mxu1 %v4754_v33 }
  0xbb   :  { %2414 = vmatprep.mubr.bf16.mxu0 %v4756_v34 }
  0xc1   :  { %1895 = vmatmul.mubr.bf16.gmra.mrb[64].mxu1 %v4758_v35 }
  0xc2   :  { %2415 = vmatmul.mubr.bf16.gmra.mrb[64].mxu0 %v4759_v36  ;;  %1902 = vmatprep.mubr.bf16.mxu1 %v4760_v37 }
  0xc3   :  { %2422 = vmatprep.mubr.bf16.mxu0 %v4762_v38 }
  0xc9   :  { %1903 = vmatmul.mubr.bf16.gmra.mrb[68].mxu1 %v4764_v39  ;;  %v4830_v39 = vld [vmem:[%s6219_s0 + $0x380] ss:$16 sps:$4 sm:$0xff]  }
  0xca   :  { %2423 = vmatmul.mubr.bf16.gmra.mrb[68].mxu0 %v4765_v40  ;;  %1910 = vmatprep.mubr.bf16.mxu1 %v4766_v41 }
  0xcb   :  { %2430 = vmatprep.mubr.bf16.mxu0 %v4768_v42  ;;  %v4831_v42 = vld [vmem:[%s6219_s0 + $0x388] ss:$16 sps:$4 sm:$0xff]  }
  0xd1   :  { %1911 = vmatmul.mubr.bf16.gmra.mrb[72].mxu1 %v4770_v43  ;;  %v4832_v43 = vld [vmem:[%s6219_s0 + $0x3a4] ss:$16 sps:$4 sm:$0xff]  }
  0xd2   :  { %2431 = vmatmul.mubr.bf16.gmra.mrb[72].mxu0 %v4771_v44  ;;  %1918 = vmatprep.mubr.bf16.mxu1 %v4772_v45 }
  0xd3   :  { %2438 = vmatprep.mubr.bf16.mxu0 %v4774_v46 }
  0xd9   :  { %1919 = vmatmul.mubr.bf16.gmra.mrb[76].mxu1 %v4776_v47 }
  0xda   :  { %2439 = vmatmul.mubr.bf16.gmra.mrb[76].mxu0 %v4777_v48  ;;  %1926 = vmatprep.mubr.bf16.mxu1 %v4778_v49  ;;  %v4834_v48 = vld [vmem:[%s6219_s0 + $0x3ac] ss:$16 sps:$4 sm:$0xff]  }
  0xdb   :  { %2446 = vmatprep.mubr.bf16.mxu0 %v4780_v50 }
  0xe1   :  { %1927 = vmatmul.mubr.bf16.gmra.mrb[80].mxu1 %v4782_v51 }
  0xe2   :  { %2447 = vmatmul.mubr.bf16.gmra.mrb[80].mxu0 %v4783_v52  ;;  %1934 = vmatprep.mubr.bf16.mxu1 %v4784_v53 }
  0xe3   :  { %2454 = vmatprep.mubr.bf16.mxu0 %v4786_v54 }
  0xe9   :  { %1935 = vmatmul.mubr.bf16.gmra.mrb[84].mxu1 %v4788_v55 }
  0xea   :  { %2455 = vmatmul.mubr.bf16.gmra.mrb[84].mxu0 %v4789_v56  ;;  %1942 = vmatprep.mubr.bf16.mxu1 %v4790_v57 }
  0xeb   :  { %2462 = vmatprep.mubr.bf16.mxu0 %v4792_v58  ;;  %v4836_v58 = vld [vmem:[%s6219_s0 + $0x3a0] ss:$16 sps:$4 sm:$0xff]  }
  0xf1   :  { %1943 = vmatmul.mubr.bf16.gmra.mrb[88].mxu1 %v4794_v59 }
  0xf2   :  { %2463 = vmatmul.mubr.bf16.gmra.mrb[88].mxu0 %v4795_v60  ;;  %1950 = vmatprep.mubr.bf16.mxu1 %v4796_v61  ;;  %v4837_v61 = vld [vmem:[%s6219_s0 + $0x3a8] ss:$16 sps:$4 sm:$0xff]  }
  0xf3   :  { %2470 = vmatprep.mubr.bf16.mxu0 %v4798_v62  ;;  %v4838_v62 = vld [vmem:[%s6219_s0 + $0x3c4] ss:$16 sps:$4 sm:$0xff]  }
  0xf9   :  { %1951 = vmatmul.mubr.bf16.gmra.mrb[92].mxu1 %v4800_v63 }
  0xfa   :  { %2471 = vmatmul.mubr.bf16.gmra.mrb[92].mxu0 %v4801_v0  ;;  %1958 = vmatprep.mubr.bf16.mxu1 %v4802_v1 }
  0xfb   :  { %2478 = vmatprep.mubr.bf16.mxu0 %v4804_v2 }
 0x101   :  { %1959 = vmatmul.mubr.bf16.gmra.mrb[96].mxu1 %v4806_v3  ;;  %v4840_v3 = vld [vmem:[%s6219_s0 + $0x3cc] ss:$16 sps:$4 sm:$0xff]  }
 0x102   :  { %2479 = vmatmul.mubr.bf16.gmra.mrb[96].mxu0 %v4807_v4  ;;  %1966 = vmatprep.mubr.bf16.mxu1 %v4808_v5 }
 0x103   :  { %2486 = vmatprep.mubr.bf16.mxu0 %v4810_v6 }
 0x109   :  { %1967 = vmatmul.mubr.bf16.gmra.mrb[100].mxu1 %v4812_v7 }
 0x10a   :  { %2487 = vmatmul.mubr.bf16.gmra.mrb[100].mxu0 %v4813_v8  ;;  %1974 = vmatprep.mubr.bf16.mxu1 %v4814_v9 }
 0x10b   :  { %2494 = vmatprep.mubr.bf16.mxu0 %v4816_v10 }
 0x111   :  { %1975 = vmatmul.mubr.bf16.gmra.mrb[104].mxu1 %v4818_v11 }
 0x112   :  { %2495 = vmatmul.mubr.bf16.gmra.mrb[104].mxu0 %v4819_v12  ;;  %1982 = vmatprep.mubr.bf16.mxu1 %v4820_v13  ;;  %v4842_v13 = vld [vmem:[%s6219_s0 + $0x3c0] ss:$16 sps:$4 sm:$0xff]  }
 0x113   :  { %2502 = vmatprep.mubr.bf16.mxu0 %v4822_v14 }
 0x114   :  { %v1768_v16 = vpop.f32.mrb[0].mxu1 }
 0x115   :  { %v1769_v17 = vadd.f32 %v5506_v15, %v1768_v16  ;;  %v2288_v18 = vpop.f32.mrb[0].mxu0  ;;  %v1770_v19 = vpop.f32.mrb[1].mxu1 }
 0x116   :  { %v2290_v21 = vpop.f32.mrb[1].mxu0  ;;  %v1771_v22 = vpop.f32.mrb[2].mxu1 }
 0x117   :  { %v2289_v25 = vadd.f32 %v2288_v18, %v1769_v17  ;;  %v1772_v26 = vadd.f32 %v5506_v15, %v1771_v22  ;;  %v2291_v27 = vpop.f32.mrb[2].mxu0  ;;  %v1773_v28 = vpop.f32.mrb[3].mxu1  ;;  %v4843_v17 = vld [vmem:[%s6219_s0 + $0x3c8] ss:$16 sps:$4 sm:$0xff]   ;;  %v4844_v18 = vld [vmem:[%s6219_s0 + $0x3e4] ss:$16 sps:$4 sm:$0xff]  }
 0x118   :  { %v2293_v30 = vpop.f32.mrb[3].mxu0 }
 0x119   :  { %v2292_v31 = vadd.f32 %v2291_v27, %v1772_v26  ;;  %1983 = vmatmul.mubr.bf16.gmra.mrb[108].mxu1 %v4824_v20  ;;  %v2774_v32 = vmax.f32 %v2289_v25, 0.0 }
 0x11a   :  { %2503 = vmatmul.mubr.bf16.gmra.mrb[108].mxu0 %v4825_v23  ;;  %1990 = vmatprep.mubr.bf16.mxu1 %v4826_v24  ;;  %v4846_v23 = vld [vmem:[%s6219_s0 + $0x3ec] ss:$16 sps:$4 sm:$0xff]  }
 0x11b   :  { %v2775_v33 = vmax.f32 %v2292_v31, 0.0  ;;  %2510 = vmatprep.mubr.bf16.mxu0 %v4828_v29 }
 0x11c   :  { %v1776_v34 = vpop.f32.mrb[4].mxu1 }
 0x11d   :  { %v4027_v35 = vpack.c.bf16 %v2775_v33, %v2774_v32  ;;  %v1777_v36 = vadd.f32 %v5506_v15, %v1776_v34  ;;  %v2296_v37 = vpop.f32.mrb[4].mxu0  ;;  %v1778_v38 = vpop.f32.mrb[5].mxu1  ;;  %v4848_v33 = vld [vmem:[%s6219_s0 + $0x3e0] ss:$16 sps:$4 sm:$0xff]  }
 0x11e   :  { %v2298_v40 = vpop.f32.mrb[5].mxu0  ;;  %v1779_v41 = vpop.f32.mrb[6].mxu1 }
 0x11f   :  { %4028 = vst [vmem:[%s6221_s3] sm:$0xff] %v4027_v35   ;;  %v2297_v44 = vadd.f32 %v2296_v37, %v1777_v36  ;;  %v1780_v45 = vadd.f32 %v5506_v15, %v1779_v41  ;;  %v2299_v46 = vpop.f32.mrb[6].mxu0  ;;  %v1781_v47 = vpop.f32.mrb[7].mxu1  ;;  %v4849_v36 = vld [vmem:[%s6219_s0 + $0x3e8] ss:$16 sps:$4 sm:$0xff]   ;;  %v4850_v37 = vld [vmem:[%s6219_s0 + $0x404] ss:$16 sps:$4 sm:$0xff]  }
 0x120   :  { %v2301_v49 = vpop.f32.mrb[7].mxu0 }
 0x121   :  { %v2300_v50 = vadd.f32 %v2299_v46, %v1780_v45  ;;  %1991 = vmatmul.mubr.bf16.gmra.mrb[112].mxu1 %v4830_v39  ;;  %v2776_v51 = vmax.f32 %v2297_v44, 0.0 }
 0x122   :  { %2511 = vmatmul.mubr.bf16.gmra.mrb[112].mxu0 %v4831_v42  ;;  %1998 = vmatprep.mubr.bf16.mxu1 %v4832_v43  ;;  %v4852_v42 = vld [vmem:[%s6219_s0 + $0x40c] ss:$16 sps:$4 sm:$0xff]  }
 0x123   :  { %v2777_v52 = vmax.f32 %v2300_v50, 0.0  ;;  %2518 = vmatprep.mubr.bf16.mxu0 %v4834_v48 }
 0x124   :  { %v1784_v53 = vpop.f32.mrb[8].mxu1 }
 0x125   :  { %v4032_v54 = vpack.c.bf16 %v2777_v52, %v2776_v51  ;;  %v1785_v55 = vadd.f32 %v5506_v15, %v1784_v53  ;;  %v2304_v56 = vpop.f32.mrb[8].mxu0  ;;  %v1786_v57 = vpop.f32.mrb[9].mxu1  ;;  %v4854_v52 = vld [vmem:[%s6219_s0 + $0x400] ss:$16 sps:$4 sm:$0xff]  }
 0x126   :  { %v2306_v59 = vpop.f32.mrb[9].mxu0  ;;  %v1787_v60 = vpop.f32.mrb[10].mxu1 }
 0x127   :  { %4324 = vst [vmem:[%s6221_s3 + $0x8] sm:$0xff] %v4032_v54   ;;  %v2305_v63 = vadd.f32 %v2304_v56, %v1785_v55  ;;  %v1788_v0 = vadd.f32 %v5506_v15, %v1787_v60  ;;  %v2307_v1 = vpop.f32.mrb[10].mxu0  ;;  %v1789_v2 = vpop.f32.mrb[11].mxu1  ;;  %v4855_v55 = vld [vmem:[%s6219_s0 + $0x408] ss:$16 sps:$4 sm:$0xff]  }
 0x128   :  { %v2309_v4 = vpop.f32.mrb[11].mxu0  ;;  %v4856_v56 = vld [vmem:[%s6219_s0 + $0x424] ss:$16 sps:$4 sm:$0xff]  }
 0x129   :  { %v2308_v5 = vadd.f32 %v2307_v1, %v1788_v0  ;;  %1999 = vmatmul.mubr.bf16.gmra.mrb[116].mxu1 %v4836_v58  ;;  %v2778_v6 = vmax.f32 %v2305_v63, 0.0 }
 0x12a   :  { %2519 = vmatmul.mubr.bf16.gmra.mrb[116].mxu0 %v4837_v61  ;;  %2006 = vmatprep.mubr.bf16.mxu1 %v4838_v62  ;;  %v4858_v61 = vld [vmem:[%s6219_s0 + $0x42c] ss:$16 sps:$4 sm:$0xff]  }
 0x12b   :  { %v2779_v7 = vmax.f32 %v2308_v5, 0.0  ;;  %2526 = vmatprep.mubr.bf16.mxu0 %v4840_v3 }
 0x12c   :  { %v1792_v8 = vpop.f32.mrb[12].mxu1 }
 0x12d   :  { %v4037_v9 = vpack.c.bf16 %v2779_v7, %v2778_v6  ;;  %v1793_v10 = vadd.f32 %v5506_v15, %v1792_v8  ;;  %v2312_v11 = vpop.f32.mrb[12].mxu0  ;;  %v1794_v12 = vpop.f32.mrb[13].mxu1  ;;  %v4860_v7 = vld [vmem:[%s6219_s0 + $0x420] ss:$16 sps:$4 sm:$0xff]  }
 0x12e   :  { %v2314_v14 = vpop.f32.mrb[13].mxu0  ;;  %v1795_v16 = vpop.f32.mrb[14].mxu1 }
 0x12f   :  { %4325 = vst [vmem:[%s6221_s3 + $0x10] sm:$0xff] %v4037_v9   ;;  %v2313_v19 = vadd.f32 %v2312_v11, %v1793_v10  ;;  %v1796_v20 = vadd.f32 %v5506_v15, %v1795_v16  ;;  %v2315_v21 = vpop.f32.mrb[14].mxu0  ;;  %v1797_v22 = vpop.f32.mrb[15].mxu1  ;;  %v4861_v10 = vld [vmem:[%s6219_s0 + $0x428] ss:$16 sps:$4 sm:$0xff]  }
 0x130   :  { %v2317_v24 = vpop.f32.mrb[15].mxu0  ;;  %v4862_v11 = vld [vmem:[%s6219_s0 + $0x444] ss:$16 sps:$4 sm:$0xff]  }
 0x131   :  { %v2316_v25 = vadd.f32 %v2315_v21, %v1796_v20  ;;  %2007 = vmatmul.mubr.bf16.gmra.mrb[120].mxu1 %v4842_v13  ;;  %v2780_v26 = vmax.f32 %v2313_v19, 0.0 }
 0x132   :  { %2527 = vmatmul.mubr.bf16.gmra.mrb[120].mxu0 %v4843_v17  ;;  %2014 = vmatprep.mubr.bf16.mxu1 %v4844_v18  ;;  %v4864_v17 = vld [vmem:[%s6219_s0 + $0x44c] ss:$16 sps:$4 sm:$0xff]  }
 0x133   :  { %v2781_v27 = vmax.f32 %v2316_v25, 0.0  ;;  %2534 = vmatprep.mubr.bf16.mxu0 %v4846_v23 }
 0x134   :  { %v1800_v28 = vpop.f32.mrb[16].mxu1 }
 0x135   :  { %v4042_v29 = vpack.c.bf16 %v2781_v27, %v2780_v26  ;;  %v1801_v30 = vadd.f32 %v5506_v15, %v1800_v28  ;;  %v2320_v31 = vpop.f32.mrb[16].mxu0  ;;  %v1802_v32 = vpop.f32.mrb[17].mxu1  ;;  %v4866_v27 = vld [vmem:[%s6219_s0 + $0x440] ss:$16 sps:$4 sm:$0xff]  }
 0x136   :  { %v2322_v34 = vpop.f32.mrb[17].mxu0  ;;  %v1803_v35 = vpop.f32.mrb[18].mxu1 }
 0x137   :  { %4326 = vst [vmem:[%s6221_s3 + $0x18] sm:$0xff] %v4042_v29   ;;  %v2321_v38 = vadd.f32 %v2320_v31, %v1801_v30  ;;  %v1804_v39 = vadd.f32 %v5506_v15, %v1803_v35  ;;  %v2323_v40 = vpop.f32.mrb[18].mxu0  ;;  %v1805_v41 = vpop.f32.mrb[19].mxu1  ;;  %v4867_v30 = vld [vmem:[%s6219_s0 + $0x448] ss:$16 sps:$4 sm:$0xff]  }
 0x138   :  { %v2325_v43 = vpop.f32.mrb[19].mxu0  ;;  %v4868_v31 = vld [vmem:[%s6219_s0 + $0x464] ss:$16 sps:$4 sm:$0xff]  }
 0x139   :  { %v2324_v44 = vadd.f32 %v2323_v40, %v1804_v39  ;;  %2015 = vmatmul.mubr.bf16.gmra.mrb[124].mxu1 %v4848_v33  ;;  %v2782_v45 = vmax.f32 %v2321_v38, 0.0 }
 0x13a   :  { %2535 = vmatmul.mubr.bf16.gmra.mrb[124].mxu0 %v4849_v36  ;;  %2022 = vmatprep.mubr.bf16.mxu1 %v4850_v37  ;;  %v4870_v36 = vld [vmem:[%s6219_s0 + $0x46c] ss:$16 sps:$4 sm:$0xff]  }
 0x13b   :  { %v2783_v46 = vmax.f32 %v2324_v44, 0.0  ;;  %2542 = vmatprep.mubr.bf16.mxu0 %v4852_v42 }
 0x13c   :  { %v1808_v47 = vpop.f32.mrb[20].mxu1 }
 0x13d   :  { %v4047_v48 = vpack.c.bf16 %v2783_v46, %v2782_v45  ;;  %v1809_v49 = vadd.f32 %v5506_v15, %v1808_v47  ;;  %v2328_v50 = vpop.f32.mrb[20].mxu0  ;;  %v1810_v51 = vpop.f32.mrb[21].mxu1  ;;  %v4872_v46 = vld [vmem:[%s6219_s0 + $0x460] ss:$16 sps:$4 sm:$0xff]  }
 0x13e   :  { %v2330_v53 = vpop.f32.mrb[21].mxu0  ;;  %v1811_v54 = vpop.f32.mrb[22].mxu1 }
 0x13f   :  { %4327 = vst [vmem:[%s6221_s3 + $0x20] sm:$0xff] %v4047_v48   ;;  %v2329_v57 = vadd.f32 %v2328_v50, %v1809_v49  ;;  %v1812_v58 = vadd.f32 %v5506_v15, %v1811_v54  ;;  %v2331_v59 = vpop.f32.mrb[22].mxu0  ;;  %v1813_v60 = vpop.f32.mrb[23].mxu1  ;;  %v4873_v49 = vld [vmem:[%s6219_s0 + $0x468] ss:$16 sps:$4 sm:$0xff]  }
 0x140   :  { %v2333_v62 = vpop.f32.mrb[23].mxu0  ;;  %v4874_v50 = vld [vmem:[%s6219_s0 + $0x484] ss:$16 sps:$4 sm:$0xff]  }
 0x141   :  { %v2332_v63 = vadd.f32 %v2331_v59, %v1812_v58  ;;  %2023 = vmatmul.mubr.bf16.gmra.mrb[128].mxu1 %v4854_v52  ;;  %v2784_v0 = vmax.f32 %v2329_v57, 0.0 }
 0x142   :  { %2543 = vmatmul.mubr.bf16.gmra.mrb[128].mxu0 %v4855_v55  ;;  %2030 = vmatprep.mubr.bf16.mxu1 %v4856_v56  ;;  %v4876_v55 = vld [vmem:[%s6219_s0 + $0x48c] ss:$16 sps:$4 sm:$0xff]  }
 0x143   :  { %v2785_v1 = vmax.f32 %v2332_v63, 0.0  ;;  %2550 = vmatprep.mubr.bf16.mxu0 %v4858_v61 }
 0x144   :  { %v1816_v2 = vpop.f32.mrb[24].mxu1 }
 0x145   :  { %v4052_v3 = vpack.c.bf16 %v2785_v1, %v2784_v0  ;;  %v1817_v4 = vadd.f32 %v5506_v15, %v1816_v2  ;;  %v2336_v5 = vpop.f32.mrb[24].mxu0  ;;  %v1818_v6 = vpop.f32.mrb[25].mxu1  ;;  %v4878_v1 = vld [vmem:[%s6219_s0 + $0x480] ss:$16 sps:$4 sm:$0xff]  }
 0x146   :  { %v2338_v8 = vpop.f32.mrb[25].mxu0  ;;  %v1819_v9 = vpop.f32.mrb[26].mxu1 }
 0x147   :  { %4328 = vst [vmem:[%s6221_s3 + $0x28] sm:$0xff] %v4052_v3   ;;  %v2337_v12 = vadd.f32 %v2336_v5, %v1817_v4  ;;  %v1820_v13 = vadd.f32 %v5506_v15, %v1819_v9  ;;  %v2339_v14 = vpop.f32.mrb[26].mxu0  ;;  %v1821_v16 = vpop.f32.mrb[27].mxu1  ;;  %v4879_v4 = vld [vmem:[%s6219_s0 + $0x488] ss:$16 sps:$4 sm:$0xff]  }
 0x148   :  { %v2341_v18 = vpop.f32.mrb[27].mxu0  ;;  %v4880_v5 = vld [vmem:[%s6219_s0 + $0x4a4] ss:$16 sps:$4 sm:$0xff]  }
 0x149   :  { %v2340_v19 = vadd.f32 %v2339_v14, %v1820_v13  ;;  %2031 = vmatmul.mubr.bf16.gmra.mrb[132].mxu1 %v4860_v7  ;;  %v2786_v20 = vmax.f32 %v2337_v12, 0.0 }
 0x14a   :  { %2551 = vmatmul.mubr.bf16.gmra.mrb[132].mxu0 %v4861_v10  ;;  %2038 = vmatprep.mubr.bf16.mxu1 %v4862_v11  ;;  %v4882_v10 = vld [vmem:[%s6219_s0 + $0x4ac] ss:$16 sps:$4 sm:$0xff]  }
 0x14b   :  { %v2787_v21 = vmax.f32 %v2340_v19, 0.0  ;;  %2558 = vmatprep.mubr.bf16.mxu0 %v4864_v17 }
 0x14c   :  { %v1824_v22 = vpop.f32.mrb[28].mxu1 }
 0x14d   :  { %v4057_v23 = vpack.c.bf16 %v2787_v21, %v2786_v20  ;;  %v1825_v24 = vadd.f32 %v5506_v15, %v1824_v22  ;;  %v2344_v25 = vpop.f32.mrb[28].mxu0  ;;  %v1826_v26 = vpop.f32.mrb[29].mxu1  ;;  %v4884_v21 = vld [vmem:[%s6219_s0 + $0x4a0] ss:$16 sps:$4 sm:$0xff]  }
 0x14e   :  { %v2346_v28 = vpop.f32.mrb[29].mxu0  ;;  %v1827_v29 = vpop.f32.mrb[30].mxu1 }
 0x14f   :  { %4329 = vst [vmem:[%s6221_s3 + $0x30] sm:$0xff] %v4057_v23   ;;  %v2345_v32 = vadd.f32 %v2344_v25, %v1825_v24  ;;  %v1828_v33 = vadd.f32 %v5506_v15, %v1827_v29  ;;  %v2347_v34 = vpop.f32.mrb[30].mxu0  ;;  %v1829_v35 = vpop.f32.mrb[31].mxu1  ;;  %v4885_v24 = vld [vmem:[%s6219_s0 + $0x4a8] ss:$16 sps:$4 sm:$0xff]  }
 0x150   :  { %v2349_v37 = vpop.f32.mrb[31].mxu0  ;;  %v4886_v25 = vld [vmem:[%s6219_s0 + $0x4c4] ss:$16 sps:$4 sm:$0xff]  }
 0x151   :  { %v2348_v38 = vadd.f32 %v2347_v34, %v1828_v33  ;;  %2039 = vmatmul.mubr.bf16.gmra.mrb[136].mxu1 %v4866_v27  ;;  %v2788_v39 = vmax.f32 %v2345_v32, 0.0 }
 0x152   :  { %2559 = vmatmul.mubr.bf16.gmra.mrb[136].mxu0 %v4867_v30  ;;  %2046 = vmatprep.mubr.bf16.mxu1 %v4868_v31  ;;  %v4888_v30 = vld [vmem:[%s6219_s0 + $0x4cc] ss:$16 sps:$4 sm:$0xff]  }
 0x153   :  { %v2789_v40 = vmax.f32 %v2348_v38, 0.0  ;;  %2566 = vmatprep.mubr.bf16.mxu0 %v4870_v36 }
 0x154   :  { %v1832_v41 = vpop.f32.mrb[32].mxu1 }
 0x155   :  { %v4062_v42 = vpack.c.bf16 %v2789_v40, %v2788_v39  ;;  %v1833_v43 = vadd.f32 %v5506_v15, %v1832_v41  ;;  %v2352_v44 = vpop.f32.mrb[32].mxu0  ;;  %v1834_v45 = vpop.f32.mrb[33].mxu1  ;;  %v4890_v40 = vld [vmem:[%s6219_s0 + $0x4c0] ss:$16 sps:$4 sm:$0xff]  }
 0x156   :  { %v2354_v47 = vpop.f32.mrb[33].mxu0  ;;  %v1835_v48 = vpop.f32.mrb[34].mxu1 }
 0x157   :  { %4330 = vst [vmem:[%s6221_s3 + $0x38] sm:$0xff] %v4062_v42   ;;  %v2353_v51 = vadd.f32 %v2352_v44, %v1833_v43  ;;  %v1836_v52 = vadd.f32 %v5506_v15, %v1835_v48  ;;  %v2355_v53 = vpop.f32.mrb[34].mxu0  ;;  %v1837_v54 = vpop.f32.mrb[35].mxu1  ;;  %v4891_v43 = vld [vmem:[%s6219_s0 + $0x4c8] ss:$16 sps:$4 sm:$0xff]  }
 0x158   :  { %v2357_v56 = vpop.f32.mrb[35].mxu0  ;;  %v4892_v44 = vld [vmem:[%s6219_s0 + $0x4e4] ss:$16 sps:$4 sm:$0xff]  }
 0x159   :  { %v2356_v57 = vadd.f32 %v2355_v53, %v1836_v52  ;;  %2047 = vmatmul.mubr.bf16.gmra.mrb[140].mxu1 %v4872_v46  ;;  %v2790_v58 = vmax.f32 %v2353_v51, 0.0 }
 0x15a   :  { %2567 = vmatmul.mubr.bf16.gmra.mrb[140].mxu0 %v4873_v49  ;;  %2054 = vmatprep.mubr.bf16.mxu1 %v4874_v50  ;;  %v4894_v49 = vld [vmem:[%s6219_s0 + $0x4ec] ss:$16 sps:$4 sm:$0xff]  }
 0x15b   :  { %v2791_v59 = vmax.f32 %v2356_v57, 0.0  ;;  %2574 = vmatprep.mubr.bf16.mxu0 %v4876_v55 }
 0x15c   :  { %v1840_v60 = vpop.f32.mrb[36].mxu1 }
 0x15d   :  { %v4067_v61 = vpack.c.bf16 %v2791_v59, %v2790_v58  ;;  %v1841_v62 = vadd.f32 %v5506_v15, %v1840_v60  ;;  %v2360_v63 = vpop.f32.mrb[36].mxu0  ;;  %v1842_v0 = vpop.f32.mrb[37].mxu1  ;;  %v4896_v59 = vld [vmem:[%s6219_s0 + $0x4e0] ss:$16 sps:$4 sm:$0xff]  }
 0x15e   :  { %v2362_v2 = vpop.f32.mrb[37].mxu0  ;;  %v1843_v3 = vpop.f32.mrb[38].mxu1 }
 0x15f   :  { %4331 = vst [vmem:[%s6221_s3 + $0x40] sm:$0xff] %v4067_v61   ;;  %v2361_v6 = vadd.f32 %v2360_v63, %v1841_v62  ;;  %v1844_v7 = vadd.f32 %v5506_v15, %v1843_v3  ;;  %v2363_v8 = vpop.f32.mrb[38].mxu0  ;;  %v1845_v9 = vpop.f32.mrb[39].mxu1  ;;  %v4897_v62 = vld [vmem:[%s6219_s0 + $0x4e8] ss:$16 sps:$4 sm:$0xff]  }
 0x160   :  { %v2365_v11 = vpop.f32.mrb[39].mxu0  ;;  %v4898_v63 = vld [vmem:[%s6219_s0 + $0x504] ss:$16 sps:$4 sm:$0xff]  }
 0x161   :  { %v2364_v12 = vadd.f32 %v2363_v8, %v1844_v7  ;;  %2055 = vmatmul.mubr.bf16.gmra.mrb[144].mxu1 %v4878_v1  ;;  %v2792_v13 = vmax.f32 %v2361_v6, 0.0 }
 0x162   :  { %2575 = vmatmul.mubr.bf16.gmra.mrb[144].mxu0 %v4879_v4  ;;  %2062 = vmatprep.mubr.bf16.mxu1 %v4880_v5  ;;  %v4900_v4 = vld [vmem:[%s6219_s0 + $0x50c] ss:$16 sps:$4 sm:$0xff]  }
 0x163   :  { %v2793_v14 = vmax.f32 %v2364_v12, 0.0  ;;  %2582 = vmatprep.mubr.bf16.mxu0 %v4882_v10 }
 0x164   :  { %v1848_v16 = vpop.f32.mrb[40].mxu1 }
 0x165   :  { %v4072_v17 = vpack.c.bf16 %v2793_v14, %v2792_v13  ;;  %v1849_v18 = vadd.f32 %v5506_v15, %v1848_v16  ;;  %v2368_v19 = vpop.f32.mrb[40].mxu0  ;;  %v1850_v20 = vpop.f32.mrb[41].mxu1  ;;  %v4902_v14 = vld [vmem:[%s6219_s0 + $0x500] ss:$16 sps:$4 sm:$0xff]  }
 0x166   :  { %v2370_v22 = vpop.f32.mrb[41].mxu0  ;;  %v1851_v23 = vpop.f32.mrb[42].mxu1 }
 0x167   :  { %4332 = vst [vmem:[%s6221_s3 + $0x48] sm:$0xff] %v4072_v17   ;;  %v2369_v26 = vadd.f32 %v2368_v19, %v1849_v18  ;;  %v1852_v27 = vadd.f32 %v5506_v15, %v1851_v23  ;;  %v2371_v28 = vpop.f32.mrb[42].mxu0  ;;  %v1853_v29 = vpop.f32.mrb[43].mxu1  ;;  %v4903_v18 = vld [vmem:[%s6219_s0 + $0x508] ss:$16 sps:$4 sm:$0xff]  }
 0x168   :  { %v2373_v31 = vpop.f32.mrb[43].mxu0  ;;  %v4904_v19 = vld [vmem:[%s6219_s0 + $0x524] ss:$16 sps:$4 sm:$0xff]  }
 0x169   :  { %v2372_v32 = vadd.f32 %v2371_v28, %v1852_v27  ;;  %2063 = vmatmul.mubr.bf16.gmra.mrb[148].mxu1 %v4884_v21  ;;  %v2794_v33 = vmax.f32 %v2369_v26, 0.0 }
 0x16a   :  { %2583 = vmatmul.mubr.bf16.gmra.mrb[148].mxu0 %v4885_v24  ;;  %2070 = vmatprep.mubr.bf16.mxu1 %v4886_v25  ;;  %v4906_v24 = vld [vmem:[%s6219_s0 + $0x52c] ss:$16 sps:$4 sm:$0xff]  }
 0x16b   :  { %v2795_v34 = vmax.f32 %v2372_v32, 0.0  ;;  %2590 = vmatprep.mubr.bf16.mxu0 %v4888_v30 }
 0x16c   :  { %v1856_v35 = vpop.f32.mrb[44].mxu1 }
 0x16d   :  { %v4077_v36 = vpack.c.bf16 %v2795_v34, %v2794_v33  ;;  %v1857_v37 = vadd.f32 %v5506_v15, %v1856_v35  ;;  %v2376_v38 = vpop.f32.mrb[44].mxu0  ;;  %v1858_v39 = vpop.f32.mrb[45].mxu1  ;;  %v4908_v34 = vld [vmem:[%s6219_s0 + $0x520] ss:$16 sps:$4 sm:$0xff]  }
 0x16e   :  { %v2378_v41 = vpop.f32.mrb[45].mxu0  ;;  %v1859_v42 = vpop.f32.mrb[46].mxu1 }
 0x16f   :  { %4333 = vst [vmem:[%s6221_s3 + $0x50] sm:$0xff] %v4077_v36   ;;  %v2377_v45 = vadd.f32 %v2376_v38, %v1857_v37  ;;  %v1860_v46 = vadd.f32 %v5506_v15, %v1859_v42  ;;  %v2379_v47 = vpop.f32.mrb[46].mxu0  ;;  %v1861_v48 = vpop.f32.mrb[47].mxu1  ;;  %v4909_v37 = vld [vmem:[%s6219_s0 + $0x528] ss:$16 sps:$4 sm:$0xff]  }
 0x170   :  { %v2381_v50 = vpop.f32.mrb[47].mxu0  ;;  %v4910_v38 = vld [vmem:[%s6219_s0 + $0x544] ss:$16 sps:$4 sm:$0xff]  }
 0x171   :  { %v2380_v51 = vadd.f32 %v2379_v47, %v1860_v46  ;;  %2071 = vmatmul.mubr.bf16.gmra.mrb[152].mxu1 %v4890_v40  ;;  %v2796_v52 = vmax.f32 %v2377_v45, 0.0 }
 0x172   :  { %2591 = vmatmul.mubr.bf16.gmra.mrb[152].mxu0 %v4891_v43  ;;  %2078 = vmatprep.mubr.bf16.mxu1 %v4892_v44  ;;  %v4912_v43 = vld [vmem:[%s6219_s0 + $0x54c] ss:$16 sps:$4 sm:$0xff]  }
 0x173   :  { %v2797_v53 = vmax.f32 %v2380_v51, 0.0  ;;  %2598 = vmatprep.mubr.bf16.mxu0 %v4894_v49 }
 0x174   :  { %v1864_v54 = vpop.f32.mrb[48].mxu1 }
 0x175   :  { %v4082_v55 = vpack.c.bf16 %v2797_v53, %v2796_v52  ;;  %v1865_v56 = vadd.f32 %v5506_v15, %v1864_v54  ;;  %v2384_v57 = vpop.f32.mrb[48].mxu0  ;;  %v1866_v58 = vpop.f32.mrb[49].mxu1  ;;  %v4914_v53 = vld [vmem:[%s6219_s0 + $0x540] ss:$16 sps:$4 sm:$0xff]  }
 0x176   :  { %v2386_v60 = vpop.f32.mrb[49].mxu0  ;;  %v1867_v61 = vpop.f32.mrb[50].mxu1 }
 0x177   :  { %4334 = vst [vmem:[%s6221_s3 + $0x58] sm:$0xff] %v4082_v55   ;;  %v2385_v0 = vadd.f32 %v2384_v57, %v1865_v56  ;;  %v1868_v1 = vadd.f32 %v5506_v15, %v1867_v61  ;;  %v2387_v2 = vpop.f32.mrb[50].mxu0  ;;  %v1869_v3 = vpop.f32.mrb[51].mxu1  ;;  %v4915_v56 = vld [vmem:[%s6219_s0 + $0x548] ss:$16 sps:$4 sm:$0xff]  }
 0x178   :  { %v2389_v5 = vpop.f32.mrb[51].mxu0  ;;  %v4916_v57 = vld [vmem:[%s6219_s0 + $0x564] ss:$16 sps:$4 sm:$0xff]  }
 0x179   :  { %v2388_v6 = vadd.f32 %v2387_v2, %v1868_v1  ;;  %2079 = vmatmul.mubr.bf16.gmra.mrb[156].mxu1 %v4896_v59  ;;  %v2798_v7 = vmax.f32 %v2385_v0, 0.0 }
 0x17a   :  { %2599 = vmatmul.mubr.bf16.gmra.mrb[156].mxu0 %v4897_v62  ;;  %2086 = vmatprep.mubr.bf16.mxu1 %v4898_v63  ;;  %v4918_v62 = vld [vmem:[%s6219_s0 + $0x56c] ss:$16 sps:$4 sm:$0xff]  }
 0x17b   :  { %v2799_v8 = vmax.f32 %v2388_v6, 0.0  ;;  %2606 = vmatprep.mubr.bf16.mxu0 %v4900_v4 }
 0x17c   :  { %v1872_v9 = vpop.f32.mrb[52].mxu1 }
 0x17d   :  { %v4087_v10 = vpack.c.bf16 %v2799_v8, %v2798_v7  ;;  %v1873_v11 = vadd.f32 %v5506_v15, %v1872_v9  ;;  %v2392_v12 = vpop.f32.mrb[52].mxu0  ;;  %v1874_v13 = vpop.f32.mrb[53].mxu1  ;;  %v4920_v8 = vld [vmem:[%s6219_s0 + $0x560] ss:$16 sps:$4 sm:$0xff]  }
 0x17e   :  { %v2394_v16 = vpop.f32.mrb[53].mxu0  ;;  %v1875_v17 = vpop.f32.mrb[54].mxu1 }
 0x17f   :  { %4335 = vst [vmem:[%s6221_s3 + $0x60] sm:$0xff] %v4087_v10   ;;  %v2393_v20 = vadd.f32 %v2392_v12, %v1873_v11  ;;  %v1876_v21 = vadd.f32 %v5506_v15, %v1875_v17  ;;  %v2395_v22 = vpop.f32.mrb[54].mxu0  ;;  %v1877_v23 = vpop.f32.mrb[55].mxu1  ;;  %v4921_v11 = vld [vmem:[%s6219_s0 + $0x568] ss:$16 sps:$4 sm:$0xff]  }
 0x180   :  { %v2397_v25 = vpop.f32.mrb[55].mxu0  ;;  %v4922_v12 = vld [vmem:[%s6219_s0 + $0x584] ss:$16 sps:$4 sm:$0xff]  }
 0x181   :  { %v2396_v26 = vadd.f32 %v2395_v22, %v1876_v21  ;;  %2087 = vmatmul.mubr.bf16.gmra.mrb[160].mxu1 %v4902_v14  ;;  %v2800_v27 = vmax.f32 %v2393_v20, 0.0 }
 0x182   :  { %2607 = vmatmul.mubr.bf16.gmra.mrb[160].mxu0 %v4903_v18  ;;  %2094 = vmatprep.mubr.bf16.mxu1 %v4904_v19  ;;  %v4924_v18 = vld [vmem:[%s6219_s0 + $0x58c] ss:$16 sps:$4 sm:$0xff]  }
 0x183   :  { %v2801_v28 = vmax.f32 %v2396_v26, 0.0  ;;  %2614 = vmatprep.mubr.bf16.mxu0 %v4906_v24 }
 0x184   :  { %v1880_v29 = vpop.f32.mrb[56].mxu1 }
 0x185   :  { %v4092_v30 = vpack.c.bf16 %v2801_v28, %v2800_v27  ;;  %v1881_v31 = vadd.f32 %v5506_v15, %v1880_v29  ;;  %v2400_v32 = vpop.f32.mrb[56].mxu0  ;;  %v1882_v33 = vpop.f32.mrb[57].mxu1  ;;  %v4926_v28 = vld [vmem:[%s6219_s0 + $0x580] ss:$16 sps:$4 sm:$0xff]  }
 0x186   :  { %v2402_v35 = vpop.f32.mrb[57].mxu0  ;;  %v1883_v36 = vpop.f32.mrb[58].mxu1 }
 0x187   :  { %4336 = vst [vmem:[%s6221_s3 + $0x68] sm:$0xff] %v4092_v30   ;;  %v2401_v39 = vadd.f32 %v2400_v32, %v1881_v31  ;;  %v1884_v40 = vadd.f32 %v5506_v15, %v1883_v36  ;;  %v2403_v41 = vpop.f32.mrb[58].mxu0  ;;  %v1885_v42 = vpop.f32.mrb[59].mxu1  ;;  %v4927_v31 = vld [vmem:[%s6219_s0 + $0x588] ss:$16 sps:$4 sm:$0xff]  }
 0x188   :  { %v2405_v44 = vpop.f32.mrb[59].mxu0  ;;  %v4928_v32 = vld [vmem:[%s6219_s0 + $0x5a4] ss:$16 sps:$4 sm:$0xff]  }
 0x189   :  { %v2404_v45 = vadd.f32 %v2403_v41, %v1884_v40  ;;  %2095 = vmatmul.mubr.bf16.gmra.mrb[164].mxu1 %v4908_v34  ;;  %v2802_v46 = vmax.f32 %v2401_v39, 0.0 }
 0x18a   :  { %2615 = vmatmul.mubr.bf16.gmra.mrb[164].mxu0 %v4909_v37  ;;  %2102 = vmatprep.mubr.bf16.mxu1 %v4910_v38  ;;  %v4930_v37 = vld [vmem:[%s6219_s0 + $0x5ac] ss:$16 sps:$4 sm:$0xff]  }
 0x18b   :  { %v2803_v47 = vmax.f32 %v2404_v45, 0.0  ;;  %2622 = vmatprep.mubr.bf16.mxu0 %v4912_v43 }
 0x18c   :  { %v1888_v48 = vpop.f32.mrb[60].mxu1 }
 0x18d   :  { %v4097_v49 = vpack.c.bf16 %v2803_v47, %v2802_v46  ;;  %v1889_v50 = vadd.f32 %v5506_v15, %v1888_v48  ;;  %v2408_v51 = vpop.f32.mrb[60].mxu0  ;;  %v1890_v52 = vpop.f32.mrb[61].mxu1  ;;  %v4932_v47 = vld [vmem:[%s6219_s0 + $0x5a0] ss:$16 sps:$4 sm:$0xff]  }
 0x18e   :  { %v2410_v54 = vpop.f32.mrb[61].mxu0  ;;  %v1891_v55 = vpop.f32.mrb[62].mxu1 }
 0x18f   :  { %4337 = vst [vmem:[%s6221_s3 + $0x70] sm:$0xff] %v4097_v49   ;;  %v2409_v58 = vadd.f32 %v2408_v51, %v1889_v50  ;;  %v1892_v59 = vadd.f32 %v5506_v15, %v1891_v55  ;;  %v2411_v60 = vpop.f32.mrb[62].mxu0  ;;  %v1893_v61 = vpop.f32.mrb[63].mxu1  ;;  %v4933_v50 = vld [vmem:[%s6219_s0 + $0x5a8] ss:$16 sps:$4 sm:$0xff]  }
 0x190   :  { %v2413_v63 = vpop.f32.mrb[63].mxu0  ;;  %v4934_v51 = vld [vmem:[%s6219_s0 + $0x5c4] ss:$16 sps:$4 sm:$0xff]  }
 0x191   :  { %v2412_v0 = vadd.f32 %v2411_v60, %v1892_v59  ;;  %2103 = vmatmul.mubr.bf16.gmra.mrb[168].mxu1 %v4914_v53  ;;  %v2804_v1 = vmax.f32 %v2409_v58, 0.0 }
 0x192   :  { %2623 = vmatmul.mubr.bf16.gmra.mrb[168].mxu0 %v4915_v56  ;;  %2110 = vmatprep.mubr.bf16.mxu1 %v4916_v57  ;;  %v4936_v56 = vld [vmem:[%s6219_s0 + $0x5cc] ss:$16 sps:$4 sm:$0xff]  }
 0x193   :  { %v2805_v2 = vmax.f32 %v2412_v0, 0.0  ;;  %2630 = vmatprep.mubr.bf16.mxu0 %v4918_v62 }
 0x194   :  { %v1896_v3 = vpop.f32.mrb[64].mxu1 }
 0x195   :  { %v4102_v4 = vpack.c.bf16 %v2805_v2, %v2804_v1  ;;  %v1897_v5 = vadd.f32 %v5506_v15, %v1896_v3  ;;  %v2416_v6 = vpop.f32.mrb[64].mxu0  ;;  %v1898_v7 = vpop.f32.mrb[65].mxu1  ;;  %v4938_v2 = vld [vmem:[%s6219_s0 + $0x5c0] ss:$16 sps:$4 sm:$0xff]  }
 0x196   :  { %v2418_v9 = vpop.f32.mrb[65].mxu0  ;;  %v1899_v10 = vpop.f32.mrb[66].mxu1 }
 0x197   :  { %4338 = vst [vmem:[%s6221_s3 + $0x78] sm:$0xff] %v4102_v4   ;;  %v2417_v13 = vadd.f32 %v2416_v6, %v1897_v5  ;;  %v1900_v14 = vadd.f32 %v5506_v15, %v1899_v10  ;;  %v2419_v16 = vpop.f32.mrb[66].mxu0  ;;  %v1901_v17 = vpop.f32.mrb[67].mxu1  ;;  %v4939_v5 = vld [vmem:[%s6219_s0 + $0x5c8] ss:$16 sps:$4 sm:$0xff]  }
 0x198   :  { %v2421_v19 = vpop.f32.mrb[67].mxu0  ;;  %v4940_v6 = vld [vmem:[%s6219_s0 + $0x5e4] ss:$16 sps:$4 sm:$0xff]  }
 0x199   :  { %v2420_v20 = vadd.f32 %v2419_v16, %v1900_v14  ;;  %2111 = vmatmul.mubr.bf16.gmra.mrb[172].mxu1 %v4920_v8  ;;  %v2806_v21 = vmax.f32 %v2417_v13, 0.0 }
 0x19a   :  { %2631 = vmatmul.mubr.bf16.gmra.mrb[172].mxu0 %v4921_v11  ;;  %2118 = vmatprep.mubr.bf16.mxu1 %v4922_v12  ;;  %v4942_v11 = vld [vmem:[%s6219_s0 + $0x5ec] ss:$16 sps:$4 sm:$0xff]  }
 0x19b   :  { %v2807_v22 = vmax.f32 %v2420_v20, 0.0  ;;  %2638 = vmatprep.mubr.bf16.mxu0 %v4924_v18 }
 0x19c   :  { %v1904_v23 = vpop.f32.mrb[68].mxu1 }
 0x19d   :  { %v4107_v24 = vpack.c.bf16 %v2807_v22, %v2806_v21  ;;  %v1905_v25 = vadd.f32 %v5506_v15, %v1904_v23  ;;  %v2424_v26 = vpop.f32.mrb[68].mxu0  ;;  %v1906_v27 = vpop.f32.mrb[69].mxu1  ;;  %v4944_v22 = vld [vmem:[%s6219_s0 + $0x5e0] ss:$16 sps:$4 sm:$0xff]  }
 0x19e   :  { %v2426_v29 = vpop.f32.mrb[69].mxu0  ;;  %v1907_v30 = vpop.f32.mrb[70].mxu1 }
 0x19f   :  { %4339 = vst [vmem:[%s6221_s3 + $0x80] sm:$0xff] %v4107_v24   ;;  %v2425_v33 = vadd.f32 %v2424_v26, %v1905_v25  ;;  %v1908_v34 = vadd.f32 %v5506_v15, %v1907_v30  ;;  %v2427_v35 = vpop.f32.mrb[70].mxu0  ;;  %v1909_v36 = vpop.f32.mrb[71].mxu1  ;;  %v4945_v25 = vld [vmem:[%s6219_s0 + $0x5e8] ss:$16 sps:$4 sm:$0xff]  }
 0x1a0   :  { %v2429_v38 = vpop.f32.mrb[71].mxu0  ;;  %v4946_v26 = vld [vmem:[%s6219_s0 + $0x604] ss:$16 sps:$4 sm:$0xff]  }
 0x1a1   :  { %v2428_v39 = vadd.f32 %v2427_v35, %v1908_v34  ;;  %2119 = vmatmul.mubr.bf16.gmra.mrb[176].mxu1 %v4926_v28  ;;  %v2808_v40 = vmax.f32 %v2425_v33, 0.0 }
 0x1a2   :  { %2639 = vmatmul.mubr.bf16.gmra.mrb[176].mxu0 %v4927_v31  ;;  %2126 = vmatprep.mubr.bf16.mxu1 %v4928_v32  ;;  %v4948_v31 = vld [vmem:[%s6219_s0 + $0x60c] ss:$16 sps:$4 sm:$0xff]  }
 0x1a3   :  { %v2809_v41 = vmax.f32 %v2428_v39, 0.0  ;;  %2646 = vmatprep.mubr.bf16.mxu0 %v4930_v37 }
 0x1a4   :  { %v1912_v42 = vpop.f32.mrb[72].mxu1 }
 0x1a5   :  { %v4112_v43 = vpack.c.bf16 %v2809_v41, %v2808_v40  ;;  %v1913_v44 = vadd.f32 %v5506_v15, %v1912_v42  ;;  %v2432_v45 = vpop.f32.mrb[72].mxu0  ;;  %v1914_v46 = vpop.f32.mrb[73].mxu1  ;;  %v4950_v41 = vld [vmem:[%s6219_s0 + $0x600] ss:$16 sps:$4 sm:$0xff]  }
 0x1a6   :  { %v2434_v48 = vpop.f32.mrb[73].mxu0  ;;  %v1915_v49 = vpop.f32.mrb[74].mxu1  ;;  %v5878_v46 = vld [vmem:[%s6220_s2] ss:$0 sm:$0xff] }
 0x1a7   :  { %4340 = vst [vmem:[%s6221_s3 + $0x88] sm:$0xff] %v4112_v43   ;;  %v2433_v52 = vadd.f32 %v2432_v45, %v1913_v44  ;;  %v1916_v53 = vadd.f32 %v5506_v15, %v1915_v49  ;;  %v2435_v54 = vpop.f32.mrb[74].mxu0  ;;  %v1917_v55 = vpop.f32.mrb[75].mxu1  ;;  %v4951_v44 = vld [vmem:[%s6219_s0 + $0x608] ss:$16 sps:$4 sm:$0xff]  }
 0x1a8   :  { %v2437_v57 = vpop.f32.mrb[75].mxu0  ;;  %v4952_v45 = vld [vmem:[%s6219_s0 + $0x624] ss:$16 sps:$4 sm:$0xff]  }
 0x1a9   :  { %v2436_v58 = vadd.f32 %v2435_v54, %v1916_v53  ;;  %2127 = vmatmul.mubr.bf16.gmra.mrb[180].mxu1 %v4932_v47  ;;  %v2810_v59 = vmax.f32 %v2433_v52, 0.0 }
 0x1aa   :  { %2647 = vmatmul.mubr.bf16.gmra.mrb[180].mxu0 %v4933_v50  ;;  %2134 = vmatprep.mubr.bf16.mxu1 %v4934_v51  ;;  %v4954_v50 = vld [vmem:[%s6219_s0 + $0x62c] ss:$16 sps:$4 sm:$0xff]  }
 0x1ab   :  { %v2811_v60 = vmax.f32 %v2436_v58, 0.0  ;;  %2654 = vmatprep.mubr.bf16.mxu0 %v4936_v56 }
 0x1ac   :  { %v1920_v61 = vpop.f32.mrb[76].mxu1 }
 0x1ad   :  { %v4117_v62 = vpack.c.bf16 %v2811_v60, %v2810_v59  ;;  %v1921_v63 = vadd.f32 %v5506_v15, %v1920_v61  ;;  %v2440_v0 = vpop.f32.mrb[76].mxu0  ;;  %v1922_v1 = vpop.f32.mrb[77].mxu1  ;;  %v4956_v60 = vld [vmem:[%s6219_s0 + $0x620] ss:$16 sps:$4 sm:$0xff]  }
 0x1ae   :  { %v2442_v3 = vpop.f32.mrb[77].mxu0  ;;  %v1923_v4 = vpop.f32.mrb[78].mxu1 }
 0x1af   :  { %4341 = vst [vmem:[%s6221_s3 + $0x90] sm:$0xff] %v4117_v62   ;;  %v2441_v7 = vadd.f32 %v2440_v0, %v1921_v63  ;;  %v1924_v8 = vadd.f32 %v5506_v15, %v1923_v4  ;;  %v2443_v9 = vpop.f32.mrb[78].mxu0  ;;  %v1925_v10 = vpop.f32.mrb[79].mxu1  ;;  %v4957_v63 = vld [vmem:[%s6219_s0 + $0x628] ss:$16 sps:$4 sm:$0xff]  }
 0x1b0   :  { %v2445_v12 = vpop.f32.mrb[79].mxu0  ;;  %v4958_v0 = vld [vmem:[%s6219_s0 + $0x644] ss:$16 sps:$4 sm:$0xff]  }
 0x1b1   :  { %v2444_v13 = vadd.f32 %v2443_v9, %v1924_v8  ;;  %2135 = vmatmul.mubr.bf16.gmra.mrb[184].mxu1 %v4938_v2  ;;  %v2812_v14 = vmax.f32 %v2441_v7, 0.0 }
 0x1b2   :  { %2655 = vmatmul.mubr.bf16.gmra.mrb[184].mxu0 %v4939_v5  ;;  %2142 = vmatprep.mubr.bf16.mxu1 %v4940_v6  ;;  %v4960_v5 = vld [vmem:[%s6219_s0 + $0x64c] ss:$16 sps:$4 sm:$0xff]  }
 0x1b3   :  { %v2813_v16 = vmax.f32 %v2444_v13, 0.0  ;;  %2662 = vmatprep.mubr.bf16.mxu0 %v4942_v11 }
 0x1b4   :  { %v1928_v17 = vpop.f32.mrb[80].mxu1 }
 0x1b5   :  { %v4122_v18 = vpack.c.bf16 %v2813_v16, %v2812_v14  ;;  %v1929_v19 = vadd.f32 %v5506_v15, %v1928_v17  ;;  %v2448_v20 = vpop.f32.mrb[80].mxu0  ;;  %v1930_v21 = vpop.f32.mrb[81].mxu1  ;;  %v4962_v16 = vld [vmem:[%s6219_s0 + $0x640] ss:$16 sps:$4 sm:$0xff]  }
 0x1b6   :  { %v2450_v23 = vpop.f32.mrb[81].mxu0  ;;  %v1931_v24 = vpop.f32.mrb[82].mxu1 }
 0x1b7   :  { %4342 = vst [vmem:[%s6221_s3 + $0x98] sm:$0xff] %v4122_v18   ;;  %v2449_v27 = vadd.f32 %v2448_v20, %v1929_v19  ;;  %v1932_v28 = vadd.f32 %v5506_v15, %v1931_v24  ;;  %v2451_v29 = vpop.f32.mrb[82].mxu0  ;;  %v1933_v30 = vpop.f32.mrb[83].mxu1  ;;  %v4963_v19 = vld [vmem:[%s6219_s0 + $0x648] ss:$16 sps:$4 sm:$0xff]  }
 0x1b8   :  { %v2453_v32 = vpop.f32.mrb[83].mxu0  ;;  %v4964_v20 = vld [vmem:[%s6219_s0 + $0x664] ss:$16 sps:$4 sm:$0xff]  }
 0x1b9   :  { %v2452_v33 = vadd.f32 %v2451_v29, %v1932_v28  ;;  %2143 = vmatmul.mubr.bf16.gmra.mrb[188].mxu1 %v4944_v22  ;;  %v2814_v34 = vmax.f32 %v2449_v27, 0.0 }
 0x1ba   :  { %2663 = vmatmul.mubr.bf16.gmra.mrb[188].mxu0 %v4945_v25  ;;  %2150 = vmatprep.mubr.bf16.mxu1 %v4946_v26  ;;  %v4966_v25 = vld [vmem:[%s6219_s0 + $0x66c] ss:$16 sps:$4 sm:$0xff]  }
 0x1bb   :  { %v2815_v35 = vmax.f32 %v2452_v33, 0.0  ;;  %2670 = vmatprep.mubr.bf16.mxu0 %v4948_v31 }
 0x1bc   :  { %v1936_v36 = vpop.f32.mrb[84].mxu1 }
 0x1bd   :  { %v4127_v37 = vpack.c.bf16 %v2815_v35, %v2814_v34  ;;  %v1937_v38 = vadd.f32 %v5506_v15, %v1936_v36  ;;  %v2456_v39 = vpop.f32.mrb[84].mxu0  ;;  %v1938_v40 = vpop.f32.mrb[85].mxu1  ;;  %v4968_v35 = vld [vmem:[%s6219_s0 + $0x660] ss:$16 sps:$4 sm:$0xff]  }
 0x1be   :  { %v2458_v42 = vpop.f32.mrb[85].mxu0  ;;  %v1939_v43 = vpop.f32.mrb[86].mxu1 }
 0x1bf   :  { %4343 = vst [vmem:[%s6221_s3 + $0xa0] sm:$0xff] %v4127_v37   ;;  %v2457_v15 = vadd.f32 %v2456_v39, %v1937_v38  ;;  %v1940_v47 = vadd.f32 %v5878_v46, %v1939_v43  ;;  %v2459_v48 = vpop.f32.mrb[86].mxu0  ;;  %v1941_v49 = vpop.f32.mrb[87].mxu1  ;;  %v4969_v38 = vld [vmem:[%s6219_s0 + $0x668] ss:$16 sps:$4 sm:$0xff]  }
 0x1c0   :  { %v2461_v51 = vpop.f32.mrb[87].mxu0  ;;  %v4970_v39 = vld [vmem:[%s6219_s0 + $0x684] ss:$16 sps:$4 sm:$0xff]  }
 0x1c1   :  { %v2460_v52 = vadd.f32 %v2459_v48, %v1940_v47  ;;  %2151 = vmatmul.mubr.bf16.gmra.mrb[192].mxu1 %v4950_v41  ;;  %v2816_v53 = vmax.f32 %v2457_v15, 0.0 }
 0x1c2   :  { %2671 = vmatmul.mubr.bf16.gmra.mrb[192].mxu0 %v4951_v44  ;;  %2158 = vmatprep.mubr.bf16.mxu1 %v4952_v45  ;;  %v4972_v44 = vld [vmem:[%s6219_s0 + $0x68c] ss:$16 sps:$4 sm:$0xff]  }
 0x1c3   :  { %v2817_v54 = vmax.f32 %v2460_v52, 0.0  ;;  %2678 = vmatprep.mubr.bf16.mxu0 %v4954_v50 }
 0x1c4   :  { %v1944_v55 = vpop.f32.mrb[88].mxu1 }
 0x1c5   :  { %v4132_v56 = vpack.c.bf16 %v2817_v54, %v2816_v53  ;;  %v1945_v57 = vadd.f32 %v5878_v46, %v1944_v55  ;;  %v2464_v58 = vpop.f32.mrb[88].mxu0  ;;  %v1946_v59 = vpop.f32.mrb[89].mxu1  ;;  %v4974_v54 = vld [vmem:[%s6219_s0 + $0x680] ss:$16 sps:$4 sm:$0xff]  }
 0x1c6   :  { %v2466_v61 = vpop.f32.mrb[89].mxu0  ;;  %v1947_v62 = vpop.f32.mrb[90].mxu1 }
 0x1c7   :  { %4344 = vst [vmem:[%s6221_s3 + $0xa8] sm:$0xff] %v4132_v56   ;;  %v2465_v1 = vadd.f32 %v2464_v58, %v1945_v57  ;;  %v1948_v2 = vadd.f32 %v5878_v46, %v1947_v62  ;;  %v2467_v3 = vpop.f32.mrb[90].mxu0  ;;  %v1949_v4 = vpop.f32.mrb[91].mxu1  ;;  %v4975_v57 = vld [vmem:[%s6219_s0 + $0x688] ss:$16 sps:$4 sm:$0xff]  }
 0x1c8   :  { %v2469_v6 = vpop.f32.mrb[91].mxu0  ;;  %v4976_v58 = vld [vmem:[%s6219_s0 + $0x6a4] ss:$16 sps:$4 sm:$0xff]  }
 0x1c9   :  { %v2468_v7 = vadd.f32 %v2467_v3, %v1948_v2  ;;  %2159 = vmatmul.mubr.bf16.gmra.mrb[196].mxu1 %v4956_v60  ;;  %v2818_v8 = vmax.f32 %v2465_v1, 0.0 }
 0x1ca   :  { %2679 = vmatmul.mubr.bf16.gmra.mrb[196].mxu0 %v4957_v63  ;;  %2166 = vmatprep.mubr.bf16.mxu1 %v4958_v0  ;;  %v4978_v63 = vld [vmem:[%s6219_s0 + $0x6ac] ss:$16 sps:$4 sm:$0xff]  }
 0x1cb   :  { %v2819_v9 = vmax.f32 %v2468_v7, 0.0  ;;  %2686 = vmatprep.mubr.bf16.mxu0 %v4960_v5 }
 0x1cc   :  { %v1952_v10 = vpop.f32.mrb[92].mxu1 }
 0x1cd   :  { %v4137_v11 = vpack.c.bf16 %v2819_v9, %v2818_v8  ;;  %v1953_v12 = vadd.f32 %v5878_v46, %v1952_v10  ;;  %v2472_v13 = vpop.f32.mrb[92].mxu0  ;;  %v1954_v14 = vpop.f32.mrb[93].mxu1  ;;  %v4980_v9 = vld [vmem:[%s6219_s0 + $0x6a0] ss:$16 sps:$4 sm:$0xff]  }
 0x1ce   :  { %v2474_v17 = vpop.f32.mrb[93].mxu0  ;;  %v1955_v18 = vpop.f32.mrb[94].mxu1 }
 0x1cf   :  { %4345 = vst [vmem:[%s6221_s3 + $0xb0] sm:$0xff] %v4137_v11   ;;  %v2473_v21 = vadd.f32 %v2472_v13, %v1953_v12  ;;  %v1956_v22 = vadd.f32 %v5878_v46, %v1955_v18  ;;  %v2475_v23 = vpop.f32.mrb[94].mxu0  ;;  %v1957_v24 = vpop.f32.mrb[95].mxu1  ;;  %v4981_v12 = vld [vmem:[%s6219_s0 + $0x6a8] ss:$16 sps:$4 sm:$0xff]  }
 0x1d0   :  { %v2477_v26 = vpop.f32.mrb[95].mxu0  ;;  %v4982_v13 = vld [vmem:[%s6219_s0 + $0x6c4] ss:$16 sps:$4 sm:$0xff]  }
 0x1d1   :  { %v2476_v27 = vadd.f32 %v2475_v23, %v1956_v22  ;;  %2167 = vmatmul.mubr.bf16.gmra.mrb[200].mxu1 %v4962_v16  ;;  %v2820_v28 = vmax.f32 %v2473_v21, 0.0 }
 0x1d2   :  { %2687 = vmatmul.mubr.bf16.gmra.mrb[200].mxu0 %v4963_v19  ;;  %2174 = vmatprep.mubr.bf16.mxu1 %v4964_v20  ;;  %v4984_v19 = vld [vmem:[%s6219_s0 + $0x6cc] ss:$16 sps:$4 sm:$0xff]  }
 0x1d3   :  { %v2821_v29 = vmax.f32 %v2476_v27, 0.0  ;;  %2694 = vmatprep.mubr.bf16.mxu0 %v4966_v25 }
 0x1d4   :  { %v1960_v30 = vpop.f32.mrb[96].mxu1 }
 0x1d5   :  { %v4142_v31 = vpack.c.bf16 %v2821_v29, %v2820_v28  ;;  %v1961_v32 = vadd.f32 %v5878_v46, %v1960_v30  ;;  %v2480_v33 = vpop.f32.mrb[96].mxu0  ;;  %v1962_v34 = vpop.f32.mrb[97].mxu1  ;;  %v4986_v29 = vld [vmem:[%s6219_s0 + $0x6c0] ss:$16 sps:$4 sm:$0xff]  }
 0x1d6   :  { %v2482_v36 = vpop.f32.mrb[97].mxu0  ;;  %v1963_v37 = vpop.f32.mrb[98].mxu1 }
 0x1d7   :  { %4346 = vst [vmem:[%s6221_s3 + $0xb8] sm:$0xff] %v4142_v31   ;;  %v2481_v40 = vadd.f32 %v2480_v33, %v1961_v32  ;;  %v1964_v41 = vadd.f32 %v5878_v46, %v1963_v37  ;;  %v2483_v42 = vpop.f32.mrb[98].mxu0  ;;  %v1965_v43 = vpop.f32.mrb[99].mxu1  ;;  %v4987_v32 = vld [vmem:[%s6219_s0 + $0x6c8] ss:$16 sps:$4 sm:$0xff]  }
 0x1d8   :  { %v2485_v45 = vpop.f32.mrb[99].mxu0  ;;  %v4988_v33 = vld [vmem:[%s6219_s0 + $0x6e4] ss:$16 sps:$4 sm:$0xff]  }
 0x1d9   :  { %v2484_v15 = vadd.f32 %v2483_v42, %v1964_v41  ;;  %2175 = vmatmul.mubr.bf16.gmra.mrb[204].mxu1 %v4968_v35  ;;  %v2822_v47 = vmax.f32 %v2481_v40, 0.0 }
 0x1da   :  { %2695 = vmatmul.mubr.bf16.gmra.mrb[204].mxu0 %v4969_v38  ;;  %2182 = vmatprep.mubr.bf16.mxu1 %v4970_v39  ;;  %v4990_v38 = vld [vmem:[%s6219_s0 + $0x6ec] ss:$16 sps:$4 sm:$0xff]  }
 0x1db   :  { %v2823_v48 = vmax.f32 %v2484_v15, 0.0  ;;  %2702 = vmatprep.mubr.bf16.mxu0 %v4972_v44 }
 0x1dc   :  { %v1968_v49 = vpop.f32.mrb[100].mxu1 }
 0x1dd   :  { %v4147_v50 = vpack.c.bf16 %v2823_v48, %v2822_v47  ;;  %v1969_v51 = vadd.f32 %v5878_v46, %v1968_v49  ;;  %v2488_v52 = vpop.f32.mrb[100].mxu0  ;;  %v1970_v53 = vpop.f32.mrb[101].mxu1  ;;  %v4992_v48 = vld [vmem:[%s6219_s0 + $0x6e0] ss:$16 sps:$4 sm:$0xff]  }
 0x1de   :  { %v2490_v55 = vpop.f32.mrb[101].mxu0  ;;  %v1971_v56 = vpop.f32.mrb[102].mxu1 }
 0x1df   :  { %4347 = vst [vmem:[%s6221_s3 + $0xc0] sm:$0xff] %v4147_v50   ;;  %v2489_v59 = vadd.f32 %v2488_v52, %v1969_v51  ;;  %v1972_v60 = vadd.f32 %v5878_v46, %v1971_v56  ;;  %v2491_v61 = vpop.f32.mrb[102].mxu0  ;;  %v1973_v62 = vpop.f32.mrb[103].mxu1  ;;  %v4993_v51 = vld [vmem:[%s6219_s0 + $0x6e8] ss:$16 sps:$4 sm:$0xff]  }
 0x1e0   :  { %v2493_v0 = vpop.f32.mrb[103].mxu0  ;;  %v4994_v52 = vld [vmem:[%s6219_s0 + $0x704] ss:$16 sps:$4 sm:$0xff]  }
 0x1e1   :  { %v2492_v1 = vadd.f32 %v2491_v61, %v1972_v60  ;;  %2183 = vmatmul.mubr.bf16.gmra.mrb[208].mxu1 %v4974_v54  ;;  %v2824_v2 = vmax.f32 %v2489_v59, 0.0 }
 0x1e2   :  { %2703 = vmatmul.mubr.bf16.gmra.mrb[208].mxu0 %v4975_v57  ;;  %2190 = vmatprep.mubr.bf16.mxu1 %v4976_v58  ;;  %v4996_v57 = vld [vmem:[%s6219_s0 + $0x70c] ss:$16 sps:$4 sm:$0xff]  }
 0x1e3   :  { %v2825_v3 = vmax.f32 %v2492_v1, 0.0  ;;  %2710 = vmatprep.mubr.bf16.mxu0 %v4978_v63 }
 0x1e4   :  { %v1976_v4 = vpop.f32.mrb[104].mxu1 }
 0x1e5   :  { %v4152_v5 = vpack.c.bf16 %v2825_v3, %v2824_v2  ;;  %v1977_v6 = vadd.f32 %v5878_v46, %v1976_v4  ;;  %v2496_v7 = vpop.f32.mrb[104].mxu0  ;;  %v1978_v8 = vpop.f32.mrb[105].mxu1  ;;  %v4998_v3 = vld [vmem:[%s6219_s0 + $0x700] ss:$16 sps:$4 sm:$0xff]  }
 0x1e6   :  { %v2498_v10 = vpop.f32.mrb[105].mxu0  ;;  %v1979_v11 = vpop.f32.mrb[106].mxu1 }
 0x1e7   :  { %4348 = vst [vmem:[%s6221_s3 + $0xc8] sm:$0xff] %v4152_v5   ;;  %v2497_v14 = vadd.f32 %v2496_v7, %v1977_v6  ;;  %v1980_v16 = vadd.f32 %v5878_v46, %v1979_v11  ;;  %v2499_v17 = vpop.f32.mrb[106].mxu0  ;;  %v1981_v18 = vpop.f32.mrb[107].mxu1  ;;  %v4999_v6 = vld [vmem:[%s6219_s0 + $0x708] ss:$16 sps:$4 sm:$0xff]  }
 0x1e8   :  { %v2501_v20 = vpop.f32.mrb[107].mxu0  ;;  %v5000_v7 = vld [vmem:[%s6219_s0 + $0x724] ss:$16 sps:$4 sm:$0xff]  }
 0x1e9   :  { %v2500_v21 = vadd.f32 %v2499_v17, %v1980_v16  ;;  %2191 = vmatmul.mubr.bf16.gmra.mrb[212].mxu1 %v4980_v9  ;;  %v2826_v22 = vmax.f32 %v2497_v14, 0.0 }
 0x1ea   :  { %2711 = vmatmul.mubr.bf16.gmra.mrb[212].mxu0 %v4981_v12  ;;  %2198 = vmatprep.mubr.bf16.mxu1 %v4982_v13  ;;  %v5002_v12 = vld [vmem:[%s6219_s0 + $0x72c] ss:$16 sps:$4 sm:$0xff]  }
 0x1eb   :  { %v2827_v23 = vmax.f32 %v2500_v21, 0.0  ;;  %2718 = vmatprep.mubr.bf16.mxu0 %v4984_v19 }
 0x1ec   :  { %v1984_v24 = vpop.f32.mrb[108].mxu1 }
 0x1ed   :  { %v4157_v25 = vpack.c.bf16 %v2827_v23, %v2826_v22  ;;  %v1985_v26 = vadd.f32 %v5878_v46, %v1984_v24  ;;  %v2504_v27 = vpop.f32.mrb[108].mxu0  ;;  %v1986_v28 = vpop.f32.mrb[109].mxu1  ;;  %v5004_v23 = vld [vmem:[%s6219_s0 + $0x720] ss:$16 sps:$4 sm:$0xff]  }
 0x1ee   :  { %v2506_v30 = vpop.f32.mrb[109].mxu0  ;;  %v1987_v31 = vpop.f32.mrb[110].mxu1 }
 0x1ef   :  { %4349 = vst [vmem:[%s6221_s3 + $0xd0] sm:$0xff] %v4157_v25   ;;  %v2505_v34 = vadd.f32 %v2504_v27, %v1985_v26  ;;  %v1988_v35 = vadd.f32 %v5878_v46, %v1987_v31  ;;  %v2507_v36 = vpop.f32.mrb[110].mxu0  ;;  %v1989_v37 = vpop.f32.mrb[111].mxu1  ;;  %v5005_v26 = vld [vmem:[%s6219_s0 + $0x728] ss:$16 sps:$4 sm:$0xff]  }
 0x1f0   :  { %v2509_v39 = vpop.f32.mrb[111].mxu0  ;;  %v5006_v27 = vld [vmem:[%s6219_s0 + $0x744] ss:$16 sps:$4 sm:$0xff]  }
 0x1f1   :  { %v2508_v40 = vadd.f32 %v2507_v36, %v1988_v35  ;;  %2199 = vmatmul.mubr.bf16.gmra.mrb[216].mxu1 %v4986_v29  ;;  %v2828_v41 = vmax.f32 %v2505_v34, 0.0 }
 0x1f2   :  { %2719 = vmatmul.mubr.bf16.gmra.mrb[216].mxu0 %v4987_v32  ;;  %2206 = vmatprep.mubr.bf16.mxu1 %v4988_v33  ;;  %v5008_v32 = vld [vmem:[%s6219_s0 + $0x74c] ss:$16 sps:$4 sm:$0xff]  }
 0x1f3   :  { %v2829_v42 = vmax.f32 %v2508_v40, 0.0  ;;  %2726 = vmatprep.mubr.bf16.mxu0 %v4990_v38 }
 0x1f4   :  { %v1992_v43 = vpop.f32.mrb[112].mxu1 }
 0x1f5   :  { %v4162_v44 = vpack.c.bf16 %v2829_v42, %v2828_v41  ;;  %v1993_v45 = vadd.f32 %v5878_v46, %v1992_v43  ;;  %v2512_v15 = vpop.f32.mrb[112].mxu0  ;;  %v1994_v47 = vpop.f32.mrb[113].mxu1  ;;  %v5010_v42 = vld [vmem:[%s6219_s0 + $0x740] ss:$16 sps:$4 sm:$0xff]  }
 0x1f6   :  { %v2514_v49 = vpop.f32.mrb[113].mxu0  ;;  %v1995_v50 = vpop.f32.mrb[114].mxu1 }
 0x1f7   :  { %4350 = vst [vmem:[%s6221_s3 + $0xd8] sm:$0xff] %v4162_v44   ;;  %v2513_v53 = vadd.f32 %v2512_v15, %v1993_v45  ;;  %v1996_v54 = vadd.f32 %v5878_v46, %v1995_v50  ;;  %v2515_v55 = vpop.f32.mrb[114].mxu0  ;;  %v1997_v56 = vpop.f32.mrb[115].mxu1  ;;  %v5011_v45 = vld [vmem:[%s6219_s0 + $0x748] ss:$16 sps:$4 sm:$0xff]  }
 0x1f8   :  { %v2517_v58 = vpop.f32.mrb[115].mxu0  ;;  %v5012_v15 = vld [vmem:[%s6219_s0 + $0x764] ss:$16 sps:$4 sm:$0xff]  }
 0x1f9   :  { %v2516_v59 = vadd.f32 %v2515_v55, %v1996_v54  ;;  %2207 = vmatmul.mubr.bf16.gmra.mrb[220].mxu1 %v4992_v48  ;;  %v2830_v60 = vmax.f32 %v2513_v53, 0.0  ;;  %v255_v56 = vld [vmem:[%s6219_s0 + $0x780] sm:$0xff]  ;;  %v256_v58 = vld [vmem:[%s6219_s0 + $0x788] sm:$0xff] }
 0x1fa   :  { %2727 = vmatmul.mubr.bf16.gmra.mrb[220].mxu0 %v4993_v51  ;;  %2214 = vmatprep.mubr.bf16.mxu1 %v4994_v52  ;;  %v5014_v51 = vld [vmem:[%s6219_s0 + $0x76c] ss:$16 sps:$4 sm:$0xff]  }
 0x1fb   :  { %v2831_v61 = vmax.f32 %v2516_v59, 0.0  ;;  %2734 = vmatprep.mubr.bf16.mxu0 %v4996_v57 }
 0x1fc   :  { %v2000_v62 = vpop.f32.mrb[116].mxu1 }
 0x1fd   :  { %v4167_v63 = vpack.c.bf16 %v2831_v61, %v2830_v60  ;;  %v2001_v0 = vadd.f32 %v5878_v46, %v2000_v62  ;;  %v2520_v1 = vpop.f32.mrb[116].mxu0  ;;  %v2002_v2 = vpop.f32.mrb[117].mxu1 }
 0x1fe   :  { %v2522_v4 = vpop.f32.mrb[117].mxu0  ;;  %v2003_v5 = vpop.f32.mrb[118].mxu1  ;;  %v5017_v2 = vld [vmem:[%s6219_s0 + $0x768] ss:$16 sps:$4 sm:$0xff]  }
 0x1ff   :  { %4351 = vst [vmem:[%s6221_s3 + $0xe0] sm:$0xff] %v4167_v63   ;;  %v2521_v8 = vadd.f32 %v2520_v1, %v2001_v0  ;;  %v2004_v9 = vadd.f32 %v5878_v46, %v2003_v5  ;;  %v2523_v10 = vpop.f32.mrb[118].mxu0  ;;  %v2005_v11 = vpop.f32.mrb[119].mxu1  ;;  %v5016_v63 = vld [vmem:[%s6219_s0 + $0x760] ss:$16 sps:$4 sm:$0xff]  }
 0x200   :  { %v2525_v13 = vpop.f32.mrb[119].mxu0 }
 0x201   :  { %v2524_v14 = vadd.f32 %v2523_v10, %v2004_v9  ;;  %2215 = vmatmul.mubr.bf16.gmra.mrb[224].mxu1 %v4998_v3  ;;  %v2832_v16 = vmax.f32 %v2521_v8, 0.0  ;;  %v3747_v3 = vcombine.high %v255_v56, %v255_v56  ;;  %v3749_v8 = vcombine.high %v256_v58, %v256_v58 }
 0x202   :  { %2735 = vmatmul.mubr.bf16.gmra.mrb[224].mxu0 %v4999_v6  ;;  %2222 = vmatprep.mubr.bf16.mxu1 %v5000_v7 }
 0x203   :  { %v2833_v17 = vmax.f32 %v2524_v14, 0.0  ;;  %2742 = vmatprep.mubr.bf16.mxu0 %v5002_v12 }
 0x204   :  { %v2008_v18 = vpop.f32.mrb[120].mxu1 }
 0x205   :  { %v4172_v19 = vpack.c.bf16 %v2833_v17, %v2832_v16  ;;  %v2009_v20 = vadd.f32 %v5878_v46, %v2008_v18  ;;  %v2528_v21 = vpop.f32.mrb[120].mxu0  ;;  %v2010_v22 = vpop.f32.mrb[121].mxu1 }
 0x206   :  { %v2530_v24 = vpop.f32.mrb[121].mxu0  ;;  %v2011_v25 = vpop.f32.mrb[122].mxu1  ;;  %v3748_v22 = vcombine.low %v256_v58, %v256_v58 }
 0x207   :  { %4352 = vst [vmem:[%s6221_s3 + $0xe8] sm:$0xff] %v4172_v19   ;;  %v2529_v28 = vadd.f32 %v2528_v21, %v2009_v20  ;;  %v2012_v29 = vadd.f32 %v5878_v46, %v2011_v25  ;;  %v2531_v30 = vpop.f32.mrb[122].mxu0  ;;  %v2013_v31 = vpop.f32.mrb[123].mxu1  ;;  %v3746_v19 = vcombine.low %v255_v56, %v255_v56 }
 0x208   :  { %v2533_v33 = vpop.f32.mrb[123].mxu0 }
 0x209   :  { %v2532_v34 = vadd.f32 %v2531_v30, %v2012_v29  ;;  %2223 = vmatmul.mubr.bf16.gmra.mrb[228].mxu1 %v5004_v23  ;;  %v2834_v35 = vmax.f32 %v2529_v28, 0.0 }
 0x20a   :  { %2743 = vmatmul.mubr.bf16.gmra.mrb[228].mxu0 %v5005_v26  ;;  %2230 = vmatprep.mubr.bf16.mxu1 %v5006_v27 }
 0x20b   :  { %v2835_v36 = vmax.f32 %v2532_v34, 0.0  ;;  %2750 = vmatprep.mubr.bf16.mxu0 %v5008_v32 }
 0x20c   :  { %v2016_v37 = vpop.f32.mrb[124].mxu1 }
 0x20d   :  { %v4177_v38 = vpack.c.bf16 %v2835_v36, %v2834_v35  ;;  %v2017_v39 = vadd.f32 %v5878_v46, %v2016_v37  ;;  %v2536_v40 = vpop.f32.mrb[124].mxu0  ;;  %v2018_v41 = vpop.f32.mrb[125].mxu1 }
 0x20e   :  { %v2538_v43 = vpop.f32.mrb[125].mxu0  ;;  %v2019_v44 = vpop.f32.mrb[126].mxu1 }
 0x20f   :  { %4353 = vst [vmem:[%s6221_s3 + $0xf0] sm:$0xff] %v4177_v38   ;;  %v2537_v47 = vadd.f32 %v2536_v40, %v2017_v39  ;;  %v2020_v48 = vadd.f32 %v5878_v46, %v2019_v44  ;;  %v2539_v49 = vpop.f32.mrb[126].mxu0  ;;  %v2021_v50 = vpop.f32.mrb[127].mxu1 }
 0x210   :  { %v2541_v52 = vpop.f32.mrb[127].mxu0 }
 0x211   :  { %v2540_v53 = vadd.f32 %v2539_v49, %v2020_v48  ;;  %2231 = vmatmul.mubr.bf16.gmra.mrb[232].mxu1 %v5010_v42  ;;  %v2836_v54 = vmax.f32 %v2537_v47, 0.0 }
 0x212   :  { %2751 = vmatmul.mubr.bf16.gmra.mrb[232].mxu0 %v5011_v45  ;;  %2238 = vmatprep.mubr.bf16.mxu1 %v5012_v15 }
 0x213   :  { %v2837_v55 = vmax.f32 %v2540_v53, 0.0  ;;  %2758 = vmatprep.mubr.bf16.mxu0 %v5014_v51 }
 0x214   :  { %v2024_v57 = vpop.f32.mrb[128].mxu1 }
 0x215   :  { %v4182_v59 = vpack.c.bf16 %v2837_v55, %v2836_v54  ;;  %v2025_v60 = vadd.f32 %v5878_v46, %v2024_v57  ;;  %v2544_v61 = vpop.f32.mrb[128].mxu0  ;;  %v2026_v62 = vpop.f32.mrb[129].mxu1 }
 0x216   :  { %v2546_v0 = vpop.f32.mrb[129].mxu0  ;;  %v2027_v1 = vpop.f32.mrb[130].mxu1 }
 0x217   :  { %4354 = vst [vmem:[%s6221_s3 + $0xf8] sm:$0xff] %v4182_v59   ;;  %v2545_v4 = vadd.f32 %v2544_v61, %v2025_v60  ;;  %v2028_v5 = vadd.f32 %v5878_v46, %v2027_v1  ;;  %v2547_v6 = vpop.f32.mrb[130].mxu0  ;;  %v2029_v7 = vpop.f32.mrb[131].mxu1 }
 0x218   :  { %v2549_v9 = vpop.f32.mrb[131].mxu0 }
 0x219   :  { %v2548_v10 = vadd.f32 %v2547_v6, %v2028_v5  ;;  %2239 = vmatmul.mubr.bf16.gmra.mrb[236].mxu1 %v5016_v63  ;;  %v2838_v11 = vmax.f32 %v2545_v4, 0.0 }
 0x21a   :  { %2759 = vmatmul.mubr.bf16.gmra.mrb[236].mxu0 %v5017_v2  ;;  %2246 = vmatprep.mubr.bf16.mxu1 %v3747_v3 }
 0x21b   :  { %v2839_v12 = vmax.f32 %v2548_v10, 0.0  ;;  %2766 = vmatprep.mubr.bf16.mxu0 %v3749_v8 }
 0x21c   :  { %v2032_v13 = vpop.f32.mrb[132].mxu1 }
 0x21d   :  { %v4187_v14 = vpack.c.bf16 %v2839_v12, %v2838_v11  ;;  %v2033_v16 = vadd.f32 %v5878_v46, %v2032_v13  ;;  %v2552_v17 = vpop.f32.mrb[132].mxu0  ;;  %v2034_v18 = vpop.f32.mrb[133].mxu1 }
 0x21e   :  { %v2554_v20 = vpop.f32.mrb[133].mxu0  ;;  %v2035_v21 = vpop.f32.mrb[134].mxu1 }
 0x21f   :  { %4355 = vst [vmem:[%s6221_s3 + $0x100] sm:$0xff] %v4187_v14   ;;  %v2553_v23 = vadd.f32 %v2552_v17, %v2033_v16  ;;  %v2036_v24 = vadd.f32 %v5878_v46, %v2035_v21  ;;  %v2555_v25 = vpop.f32.mrb[134].mxu0  ;;  %v2037_v26 = vpop.f32.mrb[135].mxu1 }
 0x220   :  { %v2557_v27 = vpop.f32.mrb[135].mxu0 }
 0x221   :  { %v2556_v28 = vadd.f32 %v2555_v25, %v2036_v24  ;;  %2247 = vmatmul.mubr.bf16.gmra.mrb[240].mxu1 %v3746_v19  ;;  %v2840_v29 = vmax.f32 %v2553_v23, 0.0 }
 0x222   :  { %2767 = vmatmul.mubr.bf16.gmra.mrb[240].mxu0 %v3748_v22 }
 0x223   :  { %v2841_v30 = vmax.f32 %v2556_v28, 0.0 }
 0x224   :  { %v2040_v31 = vpop.f32.mrb[136].mxu1 }
 0x225   :  { %v4192_v32 = vpack.c.bf16 %v2841_v30, %v2840_v29  ;;  %v2041_v33 = vadd.f32 %v5878_v46, %v2040_v31  ;;  %v2560_v34 = vpop.f32.mrb[136].mxu0  ;;  %v2042_v35 = vpop.f32.mrb[137].mxu1 }
 0x226   :  { %v2562_v36 = vpop.f32.mrb[137].mxu0  ;;  %v2043_v37 = vpop.f32.mrb[138].mxu1 }
 0x227   :  { %4356 = vst [vmem:[%s6221_s3 + $0x108] sm:$0xff] %v4192_v32   ;;  %v2561_v38 = vadd.f32 %v2560_v34, %v2041_v33  ;;  %v2044_v39 = vadd.f32 %v5878_v46, %v2043_v37  ;;  %v2563_v40 = vpop.f32.mrb[138].mxu0  ;;  %v2045_v41 = vpop.f32.mrb[139].mxu1 }
 0x228   :  { %v2565_v42 = vpop.f32.mrb[139].mxu0 }
 0x229   :  { %v2564_v43 = vadd.f32 %v2563_v40, %v2044_v39  ;;  %v2842_v44 = vmax.f32 %v2561_v38, 0.0 }
 0x22b   :  { %v2843_v45 = vmax.f32 %v2564_v43, 0.0 }
 0x22c   :  { %v2048_v15 = vpop.f32.mrb[140].mxu1 }
 0x22d   :  { %v4197_v47 = vpack.c.bf16 %v2843_v45, %v2842_v44  ;;  %v2049_v48 = vadd.f32 %v5878_v46, %v2048_v15  ;;  %v2568_v49 = vpop.f32.mrb[140].mxu0  ;;  %v2050_v50 = vpop.f32.mrb[141].mxu1 }
 0x22e   :  { %v2570_v51 = vpop.f32.mrb[141].mxu0  ;;  %v2051_v52 = vpop.f32.mrb[142].mxu1 }
 0x22f   :  { %4357 = vst [vmem:[%s6221_s3 + $0x110] sm:$0xff] %v4197_v47   ;;  %v2569_v53 = vadd.f32 %v2568_v49, %v2049_v48  ;;  %v2052_v54 = vadd.f32 %v5878_v46, %v2051_v52  ;;  %v2571_v55 = vpop.f32.mrb[142].mxu0  ;;  %v2053_v56 = vpop.f32.mrb[143].mxu1 }
 0x230   :  { %v2573_v57 = vpop.f32.mrb[143].mxu0 }
 0x231   :  { %v2572_v58 = vadd.f32 %v2571_v55, %v2052_v54  ;;  %v2844_v59 = vmax.f32 %v2569_v53, 0.0 }
 0x233   :  { %v2845_v60 = vmax.f32 %v2572_v58, 0.0 }
 0x234   :  { %v2056_v61 = vpop.f32.mrb[144].mxu1 }
 0x235   :  { %v4202_v62 = vpack.c.bf16 %v2845_v60, %v2844_v59  ;;  %v2057_v63 = vadd.f32 %v5878_v46, %v2056_v61  ;;  %v2576_v0 = vpop.f32.mrb[144].mxu0  ;;  %v2058_v1 = vpop.f32.mrb[145].mxu1 }
 0x236   :  { %v2578_v2 = vpop.f32.mrb[145].mxu0  ;;  %v2059_v3 = vpop.f32.mrb[146].mxu1 }
 0x237   :  { %4358 = vst [vmem:[%s6221_s3 + $0x118] sm:$0xff] %v4202_v62   ;;  %v2577_v4 = vadd.f32 %v2576_v0, %v2057_v63  ;;  %v2060_v5 = vadd.f32 %v5878_v46, %v2059_v3  ;;  %v2579_v6 = vpop.f32.mrb[146].mxu0  ;;  %v2061_v7 = vpop.f32.mrb[147].mxu1 }
 0x238   :  { %v2581_v8 = vpop.f32.mrb[147].mxu0 }
 0x239   :  { %v2580_v9 = vadd.f32 %v2579_v6, %v2060_v5  ;;  %v2846_v10 = vmax.f32 %v2577_v4, 0.0 }
 0x23b   :  { %v2847_v11 = vmax.f32 %v2580_v9, 0.0 }
 0x23c   :  { %v2064_v12 = vpop.f32.mrb[148].mxu1 }
 0x23d   :  { %v4207_v13 = vpack.c.bf16 %v2847_v11, %v2846_v10  ;;  %v2065_v14 = vadd.f32 %v5878_v46, %v2064_v12  ;;  %v2584_v16 = vpop.f32.mrb[148].mxu0  ;;  %v2066_v17 = vpop.f32.mrb[149].mxu1 }
 0x23e   :  { %v2586_v18 = vpop.f32.mrb[149].mxu0  ;;  %v2067_v19 = vpop.f32.mrb[150].mxu1 }
 0x23f   :  { %4359 = vst [vmem:[%s6221_s3 + $0x120] sm:$0xff] %v4207_v13   ;;  %v2585_v20 = vadd.f32 %v2584_v16, %v2065_v14  ;;  %v2068_v21 = vadd.f32 %v5878_v46, %v2067_v19  ;;  %v2587_v22 = vpop.f32.mrb[150].mxu0  ;;  %v2069_v23 = vpop.f32.mrb[151].mxu1 }
 0x240   :  { %v2589_v24 = vpop.f32.mrb[151].mxu0 }
 0x241   :  { %v2588_v25 = vadd.f32 %v2587_v22, %v2068_v21  ;;  %v2848_v26 = vmax.f32 %v2585_v20, 0.0 }
 0x243   :  { %v2849_v27 = vmax.f32 %v2588_v25, 0.0 }
 0x244   :  { %v2072_v28 = vpop.f32.mrb[152].mxu1 }
 0x245   :  { %v4212_v29 = vpack.c.bf16 %v2849_v27, %v2848_v26  ;;  %v2073_v30 = vadd.f32 %v5878_v46, %v2072_v28  ;;  %v2592_v31 = vpop.f32.mrb[152].mxu0  ;;  %v2074_v32 = vpop.f32.mrb[153].mxu1 }
 0x246   :  { %v2594_v33 = vpop.f32.mrb[153].mxu0  ;;  %v2075_v34 = vpop.f32.mrb[154].mxu1 }
 0x247   :  { %4360 = vst [vmem:[%s6221_s3 + $0x128] sm:$0xff] %v4212_v29   ;;  %v2593_v35 = vadd.f32 %v2592_v31, %v2073_v30  ;;  %v2076_v36 = vadd.f32 %v5878_v46, %v2075_v34  ;;  %v2595_v37 = vpop.f32.mrb[154].mxu0  ;;  %v2077_v38 = vpop.f32.mrb[155].mxu1 }
 0x248   :  { %v2597_v39 = vpop.f32.mrb[155].mxu0 }
 0x249   :  { %v2596_v40 = vadd.f32 %v2595_v37, %v2076_v36  ;;  %v2850_v41 = vmax.f32 %v2593_v35, 0.0 }
 0x24b   :  { %v2851_v42 = vmax.f32 %v2596_v40, 0.0 }
 0x24c   :  { %v2080_v43 = vpop.f32.mrb[156].mxu1 }
 0x24d   :  { %v4217_v44 = vpack.c.bf16 %v2851_v42, %v2850_v41  ;;  %v2081_v45 = vadd.f32 %v5878_v46, %v2080_v43  ;;  %v2600_v15 = vpop.f32.mrb[156].mxu0  ;;  %v2082_v47 = vpop.f32.mrb[157].mxu1 }
 0x24e   :  { %v2602_v48 = vpop.f32.mrb[157].mxu0  ;;  %v2083_v49 = vpop.f32.mrb[158].mxu1 }
 0x24f   :  { %4361 = vst [vmem:[%s6221_s3 + $0x130] sm:$0xff] %v4217_v44   ;;  %v2601_v50 = vadd.f32 %v2600_v15, %v2081_v45  ;;  %v2084_v51 = vadd.f32 %v5878_v46, %v2083_v49  ;;  %v2603_v52 = vpop.f32.mrb[158].mxu0  ;;  %v2085_v53 = vpop.f32.mrb[159].mxu1 }
 0x250   :  { %v2605_v54 = vpop.f32.mrb[159].mxu0 }
 0x251   :  { %v2604_v55 = vadd.f32 %v2603_v52, %v2084_v51  ;;  %v2852_v56 = vmax.f32 %v2601_v50, 0.0 }
 0x253   :  { %v2853_v57 = vmax.f32 %v2604_v55, 0.0 }
 0x254   :  { %v2088_v58 = vpop.f32.mrb[160].mxu1 }
 0x255   :  { %v4222_v59 = vpack.c.bf16 %v2853_v57, %v2852_v56  ;;  %v2089_v60 = vadd.f32 %v5878_v46, %v2088_v58  ;;  %v2608_v61 = vpop.f32.mrb[160].mxu0  ;;  %v2090_v62 = vpop.f32.mrb[161].mxu1 }
 0x256   :  { %v2610_v63 = vpop.f32.mrb[161].mxu0  ;;  %v2091_v0 = vpop.f32.mrb[162].mxu1 }
 0x257   :  { %4362 = vst [vmem:[%s6221_s3 + $0x138] sm:$0xff] %v4222_v59   ;;  %v2609_v1 = vadd.f32 %v2608_v61, %v2089_v60  ;;  %v2092_v2 = vadd.f32 %v5878_v46, %v2091_v0  ;;  %v2611_v3 = vpop.f32.mrb[162].mxu0  ;;  %v2093_v4 = vpop.f32.mrb[163].mxu1 }
 0x258   :  { %v2613_v5 = vpop.f32.mrb[163].mxu0 }
 0x259   :  { %v2612_v6 = vadd.f32 %v2611_v3, %v2092_v2  ;;  %v2854_v7 = vmax.f32 %v2609_v1, 0.0 }
 0x25b   :  { %v2855_v8 = vmax.f32 %v2612_v6, 0.0 }
 0x25c   :  { %v2096_v9 = vpop.f32.mrb[164].mxu1 }
 0x25d   :  { %v4227_v10 = vpack.c.bf16 %v2855_v8, %v2854_v7  ;;  %v2097_v11 = vadd.f32 %v5878_v46, %v2096_v9  ;;  %v2616_v12 = vpop.f32.mrb[164].mxu0  ;;  %v2098_v13 = vpop.f32.mrb[165].mxu1 }
 0x25e   :  { %v2618_v14 = vpop.f32.mrb[165].mxu0  ;;  %v2099_v16 = vpop.f32.mrb[166].mxu1 }
 0x25f   :  { %4363 = vst [vmem:[%s6221_s3 + $0x140] sm:$0xff] %v4227_v10   ;;  %v2617_v17 = vadd.f32 %v2616_v12, %v2097_v11  ;;  %v2100_v18 = vadd.f32 %v5878_v46, %v2099_v16  ;;  %v2619_v19 = vpop.f32.mrb[166].mxu0  ;;  %v2101_v20 = vpop.f32.mrb[167].mxu1 }
 0x260   :  { %v2621_v21 = vpop.f32.mrb[167].mxu0 }
 0x261   :  { %v2620_v22 = vadd.f32 %v2619_v19, %v2100_v18  ;;  %v2856_v23 = vmax.f32 %v2617_v17, 0.0 }
 0x263   :  { %v2857_v24 = vmax.f32 %v2620_v22, 0.0 }
 0x264   :  { %v2104_v25 = vpop.f32.mrb[168].mxu1 }
 0x265   :  { %v4232_v26 = vpack.c.bf16 %v2857_v24, %v2856_v23  ;;  %v2105_v27 = vadd.f32 %v5878_v46, %v2104_v25  ;;  %v2624_v28 = vpop.f32.mrb[168].mxu0  ;;  %v2106_v29 = vpop.f32.mrb[169].mxu1 }
 0x266   :  { %v2626_v30 = vpop.f32.mrb[169].mxu0  ;;  %v2107_v31 = vpop.f32.mrb[170].mxu1 }
 0x267   :  { %4364 = vst [vmem:[%s6221_s3 + $0x148] sm:$0xff] %v4232_v26   ;;  %v2625_v32 = vadd.f32 %v2624_v28, %v2105_v27  ;;  %v2108_v33 = vadd.f32 %v5878_v46, %v2107_v31  ;;  %v2627_v34 = vpop.f32.mrb[170].mxu0  ;;  %v2109_v35 = vpop.f32.mrb[171].mxu1 }
 0x268   :  { %v2629_v36 = vpop.f32.mrb[171].mxu0 }
 0x269   :  { %v2628_v37 = vadd.f32 %v2627_v34, %v2108_v33  ;;  %v2858_v38 = vmax.f32 %v2625_v32, 0.0 }
 0x26b   :  { %v2859_v39 = vmax.f32 %v2628_v37, 0.0 }
 0x26c   :  { %v2112_v40 = vpop.f32.mrb[172].mxu1 }
 0x26d   :  { %v4237_v41 = vpack.c.bf16 %v2859_v39, %v2858_v38  ;;  %v2113_v42 = vadd.f32 %v5878_v46, %v2112_v40  ;;  %v2632_v43 = vpop.f32.mrb[172].mxu0  ;;  %v2114_v44 = vpop.f32.mrb[173].mxu1 }
 0x26e   :  { %v2634_v45 = vpop.f32.mrb[173].mxu0  ;;  %v2115_v15 = vpop.f32.mrb[174].mxu1 }
 0x26f   :  { %4365 = vst [vmem:[%s6221_s3 + $0x150] sm:$0xff] %v4237_v41   ;;  %v2633_v47 = vadd.f32 %v2632_v43, %v2113_v42  ;;  %v2116_v48 = vadd.f32 %v5878_v46, %v2115_v15  ;;  %v2635_v49 = vpop.f32.mrb[174].mxu0  ;;  %v2117_v50 = vpop.f32.mrb[175].mxu1  ;;  %v6148_v45 = vld [vmem:[%s6220_s2] ss:$0 sm:$0xff] }
 0x270   :  { %v2637_v51 = vpop.f32.mrb[175].mxu0 }
 0x271   :  { %v2636_v52 = vadd.f32 %v2635_v49, %v2116_v48  ;;  %v2860_v53 = vmax.f32 %v2633_v47, 0.0 }
 0x273   :  { %v2861_v54 = vmax.f32 %v2636_v52, 0.0 }
 0x274   :  { %v2120_v55 = vpop.f32.mrb[176].mxu1 }
 0x275   :  { %v4242_v56 = vpack.c.bf16 %v2861_v54, %v2860_v53  ;;  %v2121_v57 = vadd.f32 %v5878_v46, %v2120_v55  ;;  %v2640_v58 = vpop.f32.mrb[176].mxu0  ;;  %v2122_v59 = vpop.f32.mrb[177].mxu1 }
 0x276   :  { %v2642_v60 = vpop.f32.mrb[177].mxu0  ;;  %v2123_v61 = vpop.f32.mrb[178].mxu1 }
 0x277   :  { %4366 = vst [vmem:[%s6221_s3 + $0x158] sm:$0xff] %v4242_v56   ;;  %v2641_v62 = vadd.f32 %v2640_v58, %v2121_v57  ;;  %v2124_v63 = vadd.f32 %v5878_v46, %v2123_v61  ;;  %v2643_v0 = vpop.f32.mrb[178].mxu0  ;;  %v2125_v1 = vpop.f32.mrb[179].mxu1 }
 0x278   :  { %v2645_v2 = vpop.f32.mrb[179].mxu0 }
 0x279   :  { %v2644_v3 = vadd.f32 %v2643_v0, %v2124_v63  ;;  %v2862_v4 = vmax.f32 %v2641_v62, 0.0 }
 0x27b   :  { %v2863_v5 = vmax.f32 %v2644_v3, 0.0 }
 0x27c   :  { %v2128_v6 = vpop.f32.mrb[180].mxu1 }
 0x27d   :  { %v4247_v7 = vpack.c.bf16 %v2863_v5, %v2862_v4  ;;  %v2129_v8 = vadd.f32 %v5878_v46, %v2128_v6  ;;  %v2648_v9 = vpop.f32.mrb[180].mxu0  ;;  %v2130_v10 = vpop.f32.mrb[181].mxu1 }
 0x27e   :  { %v2650_v11 = vpop.f32.mrb[181].mxu0  ;;  %v2131_v12 = vpop.f32.mrb[182].mxu1 }
 0x27f   :  { %4367 = vst [vmem:[%s6221_s3 + $0x160] sm:$0xff] %v4247_v7   ;;  %v2649_v13 = vadd.f32 %v2648_v9, %v2129_v8  ;;  %v2132_v14 = vadd.f32 %v5878_v46, %v2131_v12  ;;  %v2651_v16 = vpop.f32.mrb[182].mxu0  ;;  %v2133_v17 = vpop.f32.mrb[183].mxu1 }
 0x280   :  { %v2653_v18 = vpop.f32.mrb[183].mxu0 }
 0x281   :  { %v2652_v19 = vadd.f32 %v2651_v16, %v2132_v14  ;;  %v2864_v20 = vmax.f32 %v2649_v13, 0.0 }
 0x283   :  { %v2865_v21 = vmax.f32 %v2652_v19, 0.0 }
 0x284   :  { %v2136_v22 = vpop.f32.mrb[184].mxu1 }
 0x285   :  { %v4252_v23 = vpack.c.bf16 %v2865_v21, %v2864_v20  ;;  %v2137_v24 = vadd.f32 %v5878_v46, %v2136_v22  ;;  %v2656_v25 = vpop.f32.mrb[184].mxu0  ;;  %v2138_v26 = vpop.f32.mrb[185].mxu1 }
 0x286   :  { %v2658_v27 = vpop.f32.mrb[185].mxu0  ;;  %v2139_v28 = vpop.f32.mrb[186].mxu1 }
 0x287   :  { %4368 = vst [vmem:[%s6221_s3 + $0x168] sm:$0xff] %v4252_v23   ;;  %v2657_v29 = vadd.f32 %v2656_v25, %v2137_v24  ;;  %v2140_v30 = vadd.f32 %v5878_v46, %v2139_v28  ;;  %v2659_v31 = vpop.f32.mrb[186].mxu0  ;;  %v2141_v32 = vpop.f32.mrb[187].mxu1 }
 0x288   :  { %v2661_v33 = vpop.f32.mrb[187].mxu0 }
 0x289   :  { %v2660_v34 = vadd.f32 %v2659_v31, %v2140_v30  ;;  %v2866_v35 = vmax.f32 %v2657_v29, 0.0 }
 0x28b   :  { %v2867_v36 = vmax.f32 %v2660_v34, 0.0 }
 0x28c   :  { %v2144_v37 = vpop.f32.mrb[188].mxu1 }
 0x28d   :  { %v4257_v38 = vpack.c.bf16 %v2867_v36, %v2866_v35  ;;  %v2145_v39 = vadd.f32 %v5878_v46, %v2144_v37  ;;  %v2664_v40 = vpop.f32.mrb[188].mxu0  ;;  %v2146_v41 = vpop.f32.mrb[189].mxu1 }
 0x28e   :  { %v2666_v42 = vpop.f32.mrb[189].mxu0  ;;  %v2147_v43 = vpop.f32.mrb[190].mxu1 }
 0x28f   :  { %4369 = vst [vmem:[%s6221_s3 + $0x170] sm:$0xff] %v4257_v38   ;;  %v2665_v44 = vadd.f32 %v2664_v40, %v2145_v39  ;;  %v2148_v15 = vadd.f32 %v6148_v45, %v2147_v43  ;;  %v2667_v47 = vpop.f32.mrb[190].mxu0  ;;  %v2149_v48 = vpop.f32.mrb[191].mxu1 }
 0x290   :  { %v2669_v49 = vpop.f32.mrb[191].mxu0 }
 0x291   :  { %v2668_v46 = vadd.f32 %v2667_v47, %v2148_v15  ;;  %v2868_v50 = vmax.f32 %v2665_v44, 0.0 }
 0x293   :  { %v2869_v51 = vmax.f32 %v2668_v46, 0.0 }
 0x294   :  { %v2152_v52 = vpop.f32.mrb[192].mxu1 }
 0x295   :  { %v4262_v53 = vpack.c.bf16 %v2869_v51, %v2868_v50  ;;  %v2153_v54 = vadd.f32 %v6148_v45, %v2152_v52  ;;  %v2672_v55 = vpop.f32.mrb[192].mxu0  ;;  %v2154_v56 = vpop.f32.mrb[193].mxu1 }
 0x296   :  { %v2674_v57 = vpop.f32.mrb[193].mxu0  ;;  %v2155_v58 = vpop.f32.mrb[194].mxu1 }
 0x297   :  { %4370 = vst [vmem:[%s6221_s3 + $0x178] sm:$0xff] %v4262_v53   ;;  %v2673_v59 = vadd.f32 %v2672_v55, %v2153_v54  ;;  %v2156_v60 = vadd.f32 %v6148_v45, %v2155_v58  ;;  %v2675_v61 = vpop.f32.mrb[194].mxu0  ;;  %v2157_v62 = vpop.f32.mrb[195].mxu1 }
 0x298   :  { %v2677_v63 = vpop.f32.mrb[195].mxu0 }
 0x299   :  { %v2676_v0 = vadd.f32 %v2675_v61, %v2156_v60  ;;  %v2870_v1 = vmax.f32 %v2673_v59, 0.0 }
 0x29b   :  { %v2871_v2 = vmax.f32 %v2676_v0, 0.0 }
 0x29c   :  { %v2160_v3 = vpop.f32.mrb[196].mxu1 }
 0x29d   :  { %v4267_v4 = vpack.c.bf16 %v2871_v2, %v2870_v1  ;;  %v2161_v5 = vadd.f32 %v6148_v45, %v2160_v3  ;;  %v2680_v6 = vpop.f32.mrb[196].mxu0  ;;  %v2162_v7 = vpop.f32.mrb[197].mxu1 }
 0x29e   :  { %v2682_v8 = vpop.f32.mrb[197].mxu0  ;;  %v2163_v9 = vpop.f32.mrb[198].mxu1 }
 0x29f   :  { %4371 = vst [vmem:[%s6221_s3 + $0x180] sm:$0xff] %v4267_v4   ;;  %v2681_v10 = vadd.f32 %v2680_v6, %v2161_v5  ;;  %v2164_v11 = vadd.f32 %v6148_v45, %v2163_v9  ;;  %v2683_v12 = vpop.f32.mrb[198].mxu0  ;;  %v2165_v13 = vpop.f32.mrb[199].mxu1 }
 0x2a0   :  { %v2685_v14 = vpop.f32.mrb[199].mxu0 }
 0x2a1   :  { %v2684_v16 = vadd.f32 %v2683_v12, %v2164_v11  ;;  %v2872_v17 = vmax.f32 %v2681_v10, 0.0 }
 0x2a3   :  { %v2873_v18 = vmax.f32 %v2684_v16, 0.0 }
 0x2a4   :  { %v2168_v19 = vpop.f32.mrb[200].mxu1 }
 0x2a5   :  { %v4272_v20 = vpack.c.bf16 %v2873_v18, %v2872_v17  ;;  %v2169_v21 = vadd.f32 %v6148_v45, %v2168_v19  ;;  %v2688_v22 = vpop.f32.mrb[200].mxu0  ;;  %v2170_v23 = vpop.f32.mrb[201].mxu1 }
 0x2a6   :  { %v2690_v24 = vpop.f32.mrb[201].mxu0  ;;  %v2171_v25 = vpop.f32.mrb[202].mxu1 }
 0x2a7   :  { %4372 = vst [vmem:[%s6221_s3 + $0x188] sm:$0xff] %v4272_v20   ;;  %v2689_v26 = vadd.f32 %v2688_v22, %v2169_v21  ;;  %v2172_v27 = vadd.f32 %v6148_v45, %v2171_v25  ;;  %v2691_v28 = vpop.f32.mrb[202].mxu0  ;;  %v2173_v29 = vpop.f32.mrb[203].mxu1 }
 0x2a8   :  { %v2693_v30 = vpop.f32.mrb[203].mxu0 }
 0x2a9   :  { %v2692_v31 = vadd.f32 %v2691_v28, %v2172_v27  ;;  %v2874_v32 = vmax.f32 %v2689_v26, 0.0 }
 0x2ab   :  { %v2875_v33 = vmax.f32 %v2692_v31, 0.0 }
 0x2ac   :  { %v2176_v34 = vpop.f32.mrb[204].mxu1 }
 0x2ad   :  { %v4277_v35 = vpack.c.bf16 %v2875_v33, %v2874_v32  ;;  %v2177_v36 = vadd.f32 %v6148_v45, %v2176_v34  ;;  %v2696_v37 = vpop.f32.mrb[204].mxu0  ;;  %v2178_v38 = vpop.f32.mrb[205].mxu1 }
 0x2ae   :  { %v2698_v39 = vpop.f32.mrb[205].mxu0  ;;  %v2179_v40 = vpop.f32.mrb[206].mxu1 }
 0x2af   :  { %4373 = vst [vmem:[%s6221_s3 + $0x190] sm:$0xff] %v4277_v35   ;;  %v2697_v41 = vadd.f32 %v2696_v37, %v2177_v36  ;;  %v2180_v42 = vadd.f32 %v6148_v45, %v2179_v40  ;;  %v2699_v43 = vpop.f32.mrb[206].mxu0  ;;  %v2181_v44 = vpop.f32.mrb[207].mxu1 }
 0x2b0   :  { %v2701_v15 = vpop.f32.mrb[207].mxu0 }
 0x2b1   :  { %v2700_v47 = vadd.f32 %v2699_v43, %v2180_v42  ;;  %v2876_v48 = vmax.f32 %v2697_v41, 0.0 }
 0x2b3   :  { %v2877_v49 = vmax.f32 %v2700_v47, 0.0 }
 0x2b4   :  { %v2184_v46 = vpop.f32.mrb[208].mxu1 }
 0x2b5   :  { %v4282_v50 = vpack.c.bf16 %v2877_v49, %v2876_v48  ;;  %v2185_v51 = vadd.f32 %v6148_v45, %v2184_v46  ;;  %v2704_v52 = vpop.f32.mrb[208].mxu0  ;;  %v2186_v53 = vpop.f32.mrb[209].mxu1 }
 0x2b6   :  { %v2706_v54 = vpop.f32.mrb[209].mxu0  ;;  %v2187_v55 = vpop.f32.mrb[210].mxu1 }
 0x2b7   :  { %4374 = vst [vmem:[%s6221_s3 + $0x198] sm:$0xff] %v4282_v50   ;;  %v2705_v56 = vadd.f32 %v2704_v52, %v2185_v51  ;;  %v2188_v57 = vadd.f32 %v6148_v45, %v2187_v55  ;;  %v2707_v58 = vpop.f32.mrb[210].mxu0  ;;  %v2189_v59 = vpop.f32.mrb[211].mxu1 }
 0x2b8   :  { %v2709_v60 = vpop.f32.mrb[211].mxu0 }
 0x2b9   :  { %v2708_v61 = vadd.f32 %v2707_v58, %v2188_v57  ;;  %v2878_v62 = vmax.f32 %v2705_v56, 0.0 }
 0x2bb   :  { %v2879_v63 = vmax.f32 %v2708_v61, 0.0 }
 0x2bc   :  { %v2192_v0 = vpop.f32.mrb[212].mxu1 }
 0x2bd   :  { %v4287_v1 = vpack.c.bf16 %v2879_v63, %v2878_v62  ;;  %v2193_v2 = vadd.f32 %v6148_v45, %v2192_v0  ;;  %v2712_v3 = vpop.f32.mrb[212].mxu0  ;;  %v2194_v4 = vpop.f32.mrb[213].mxu1 }
 0x2be   :  { %v2714_v5 = vpop.f32.mrb[213].mxu0  ;;  %v2195_v6 = vpop.f32.mrb[214].mxu1 }
 0x2bf   :  { %4375 = vst [vmem:[%s6221_s3 + $0x1a0] sm:$0xff] %v4287_v1   ;;  %v2713_v7 = vadd.f32 %v2712_v3, %v2193_v2  ;;  %v2196_v8 = vadd.f32 %v6148_v45, %v2195_v6  ;;  %v2715_v9 = vpop.f32.mrb[214].mxu0  ;;  %v2197_v10 = vpop.f32.mrb[215].mxu1 }
 0x2c0   :  { %v2717_v11 = vpop.f32.mrb[215].mxu0 }
 0x2c1   :  { %v2716_v12 = vadd.f32 %v2715_v9, %v2196_v8  ;;  %v2880_v13 = vmax.f32 %v2713_v7, 0.0 }
 0x2c3   :  { %v2881_v14 = vmax.f32 %v2716_v12, 0.0 }
 0x2c4   :  { %v2200_v16 = vpop.f32.mrb[216].mxu1 }
 0x2c5   :  { %v4292_v17 = vpack.c.bf16 %v2881_v14, %v2880_v13  ;;  %v2201_v18 = vadd.f32 %v6148_v45, %v2200_v16  ;;  %v2720_v19 = vpop.f32.mrb[216].mxu0  ;;  %v2202_v20 = vpop.f32.mrb[217].mxu1 }
 0x2c6   :  { %v2722_v21 = vpop.f32.mrb[217].mxu0  ;;  %v2203_v22 = vpop.f32.mrb[218].mxu1 }
 0x2c7   :  { %4376 = vst [vmem:[%s6221_s3 + $0x1a8] sm:$0xff] %v4292_v17   ;;  %v2721_v23 = vadd.f32 %v2720_v19, %v2201_v18  ;;  %v2204_v24 = vadd.f32 %v6148_v45, %v2203_v22  ;;  %v2723_v25 = vpop.f32.mrb[218].mxu0  ;;  %v2205_v26 = vpop.f32.mrb[219].mxu1 }
 0x2c8   :  { %v2725_v27 = vpop.f32.mrb[219].mxu0 }
 0x2c9   :  { %v2724_v28 = vadd.f32 %v2723_v25, %v2204_v24  ;;  %v2882_v29 = vmax.f32 %v2721_v23, 0.0 }
 0x2cb   :  { %v2883_v30 = vmax.f32 %v2724_v28, 0.0 }
 0x2cc   :  { %v2208_v31 = vpop.f32.mrb[220].mxu1 }
 0x2cd   :  { %v4297_v32 = vpack.c.bf16 %v2883_v30, %v2882_v29  ;;  %v2209_v33 = vadd.f32 %v6148_v45, %v2208_v31  ;;  %v2728_v34 = vpop.f32.mrb[220].mxu0  ;;  %v2210_v35 = vpop.f32.mrb[221].mxu1 }
 0x2ce   :  { %v2730_v36 = vpop.f32.mrb[221].mxu0  ;;  %v2211_v37 = vpop.f32.mrb[222].mxu1 }
 0x2cf   :  { %4377 = vst [vmem:[%s6221_s3 + $0x1b0] sm:$0xff] %v4297_v32   ;;  %v2729_v38 = vadd.f32 %v2728_v34, %v2209_v33  ;;  %v2212_v39 = vadd.f32 %v6148_v45, %v2211_v37  ;;  %v2731_v40 = vpop.f32.mrb[222].mxu0  ;;  %v2213_v41 = vpop.f32.mrb[223].mxu1 }
 0x2d0   :  { %v2733_v42 = vpop.f32.mrb[223].mxu0 }
 0x2d1   :  { %v2732_v43 = vadd.f32 %v2731_v40, %v2212_v39  ;;  %v2884_v44 = vmax.f32 %v2729_v38, 0.0 }
 0x2d3   :  { %v2885_v15 = vmax.f32 %v2732_v43, 0.0 }
 0x2d4   :  { %v2216_v47 = vpop.f32.mrb[224].mxu1 }
 0x2d5   :  { %v4302_v48 = vpack.c.bf16 %v2885_v15, %v2884_v44  ;;  %v2217_v49 = vadd.f32 %v6148_v45, %v2216_v47  ;;  %v2736_v46 = vpop.f32.mrb[224].mxu0  ;;  %v2218_v50 = vpop.f32.mrb[225].mxu1 }
 0x2d6   :  { %v2738_v51 = vpop.f32.mrb[225].mxu0  ;;  %v2219_v52 = vpop.f32.mrb[226].mxu1 }
 0x2d7   :  { %4378 = vst [vmem:[%s6221_s3 + $0x1b8] sm:$0xff] %v4302_v48   ;;  %v2737_v53 = vadd.f32 %v2736_v46, %v2217_v49  ;;  %v2220_v54 = vadd.f32 %v6148_v45, %v2219_v52  ;;  %v2739_v55 = vpop.f32.mrb[226].mxu0  ;;  %v2221_v56 = vpop.f32.mrb[227].mxu1 }
 0x2d8   :  { %v2741_v57 = vpop.f32.mrb[227].mxu0 }
 0x2d9   :  { %v2740_v58 = vadd.f32 %v2739_v55, %v2220_v54  ;;  %v2886_v59 = vmax.f32 %v2737_v53, 0.0 }
 0x2db   :  { %v2887_v60 = vmax.f32 %v2740_v58, 0.0 }
 0x2dc   :  { %v2224_v61 = vpop.f32.mrb[228].mxu1 }
 0x2dd   :  { %v4307_v62 = vpack.c.bf16 %v2887_v60, %v2886_v59  ;;  %v2225_v63 = vadd.f32 %v6148_v45, %v2224_v61  ;;  %v2744_v0 = vpop.f32.mrb[228].mxu0  ;;  %v2226_v1 = vpop.f32.mrb[229].mxu1 }
 0x2de   :  { %v2746_v2 = vpop.f32.mrb[229].mxu0  ;;  %v2227_v3 = vpop.f32.mrb[230].mxu1 }
 0x2df   :  { %4379 = vst [vmem:[%s6221_s3 + $0x1c0] sm:$0xff] %v4307_v62   ;;  %v2745_v4 = vadd.f32 %v2744_v0, %v2225_v63  ;;  %v2228_v5 = vadd.f32 %v6148_v45, %v2227_v3  ;;  %v2747_v6 = vpop.f32.mrb[230].mxu0  ;;  %v2229_v7 = vpop.f32.mrb[231].mxu1 }
 0x2e0   :  { %v2749_v8 = vpop.f32.mrb[231].mxu0 }
 0x2e1   :  { %v2748_v9 = vadd.f32 %v2747_v6, %v2228_v5  ;;  %v2888_v10 = vmax.f32 %v2745_v4, 0.0 }
 0x2e3   :  { %v2889_v11 = vmax.f32 %v2748_v9, 0.0 }
 0x2e4   :  { %v2232_v12 = vpop.f32.mrb[232].mxu1 }
 0x2e5   :  { %v4312_v13 = vpack.c.bf16 %v2889_v11, %v2888_v10  ;;  %v2233_v14 = vadd.f32 %v6148_v45, %v2232_v12  ;;  %v2752_v16 = vpop.f32.mrb[232].mxu0  ;;  %v2234_v17 = vpop.f32.mrb[233].mxu1 }
 0x2e6   :  { %v2754_v18 = vpop.f32.mrb[233].mxu0  ;;  %v2235_v19 = vpop.f32.mrb[234].mxu1 }
 0x2e7   :  { %4380 = vst [vmem:[%s6221_s3 + $0x1c8] sm:$0xff] %v4312_v13   ;;  %v2753_v20 = vadd.f32 %v2752_v16, %v2233_v14  ;;  %v2236_v21 = vadd.f32 %v6148_v45, %v2235_v19  ;;  %v2755_v22 = vpop.f32.mrb[234].mxu0  ;;  %v2237_v23 = vpop.f32.mrb[235].mxu1 }
 0x2e8   :  { %v2757_v24 = vpop.f32.mrb[235].mxu0 }
 0x2e9   :  { %v2756_v25 = vadd.f32 %v2755_v22, %v2236_v21  ;;  %v2890_v26 = vmax.f32 %v2753_v20, 0.0 }
 0x2eb   :  { %v2891_v27 = vmax.f32 %v2756_v25, 0.0 }
 0x2ec   :  { %v2240_v28 = vpop.f32.mrb[236].mxu1 }
 0x2ed   :  { %v4317_v29 = vpack.c.bf16 %v2891_v27, %v2890_v26  ;;  %v2241_v30 = vadd.f32 %v6148_v45, %v2240_v28  ;;  %v2760_v31 = vpop.f32.mrb[236].mxu0  ;;  %v2242_v32 = vpop.f32.mrb[237].mxu1 }
 0x2ee   :  { %v2762_v33 = vpop.f32.mrb[237].mxu0  ;;  %v2243_v34 = vpop.f32.mrb[238].mxu1 }
 0x2ef   :  { %4381 = vst [vmem:[%s6221_s3 + $0x1d0] sm:$0xff] %v4317_v29   ;;  %v2761_v35 = vadd.f32 %v2760_v31, %v2241_v30  ;;  %v2244_v36 = vadd.f32 %v6148_v45, %v2243_v34  ;;  %v2763_v37 = vpop.f32.mrb[238].mxu0  ;;  %v2245_v38 = vpop.f32.mrb[239].mxu1 }
 0x2f0   :  { %v2765_v39 = vpop.f32.mrb[239].mxu0 }
 0x2f1   :  { %v2764_v40 = vadd.f32 %v2763_v37, %v2244_v36  ;;  %v2892_v41 = vmax.f32 %v2761_v35, 0.0 }
 0x2f3   :  { %v2893_v42 = vmax.f32 %v2764_v40, 0.0 }
 0x2f4   :  { %v2248_v43 = vpop.f32.mrb[240].mxu1 }
 0x2f5   :  { %v4322_v44 = vpack.c.bf16 %v2893_v42, %v2892_v41  ;;  %v2249_v15 = vadd.f32 %v6148_v45, %v2248_v43  ;;  %v2768_v47 = vpop.f32.mrb[240].mxu0  ;;  %v2250_v48 = vpop.f32.mrb[241].mxu1 }
 0x2f6   :  { %v2770_v49 = vpop.f32.mrb[241].mxu0  ;;  %v2251_v46 = vpop.f32.mrb[242].mxu1 }
 0x2f7   :  { %4382 = vst [vmem:[%s6221_s3 + $0x1d8] sm:$0xff] %v4322_v44   ;;  %v2769_v50 = vadd.f32 %v2768_v47, %v2249_v15  ;;  %v2771_v51 = vpop.f32.mrb[242].mxu0  ;;  %v2252_v52 = vpop.f32.mrb[243].mxu1 }
 0x2f8   :  { %v2772_v53 = vpop.f32.mrb[243].mxu0 }
 0x2f9   :  { %v2894_v54 = vmax.f32 %v2769_v50, 0.0 }
 0x2fb   :  { %v4023_v55 = vpack.c.bf16 %v2894_v54, %v2894_v54 }
 0x2fd   :  { %3500 = vst [vmem:[%s6221_s3 + $0x1e0] sm:$0xf] %v4023_v55 }

// kernel: encoder_forward.7
= control target key start
LH: loop header
LB: loop body
LE: loop exit
PB: predicated region body
PF: predicated region fallthrough
CT: control target
= control target key end

     0   :  { %v1781_v0 = vmov 0   ;;  %s2241_s1 = inlined_call_operand.vmem [shape: bf16[512,128], index: 1, kind: input, shape index: {}]   ;;  %s2242_s0 = inlined_call_operand.vmem [shape: bf16[288,512], index: 0, kind: input, shape index: {}]   ;;  %s2243_s2 = inlined_call_operand.vmem [shape: f32[1,128], index: 2, kind: input, shape index: {}]   ;;  %s2244_s3 = inlined_call_operand.vmem [shape: bf16[288,128], index: 3, kind: output, shape index: {}]  }
   0x1   :  { %710 = vmatprep.subr.bf16.mxu1 %v1781_v0  ;;  %887 = vmatprep.subr.bf16.mxu0 %v1781_v0  ;;  %v1641_v1 = vld [vmem:[%s2241_s1] sm:$0xff]   ;;  %v1643_v3 = vld [vmem:[%s2241_s1 + $0x8] sm:$0xff]   ;;  %v1645_v5 = vld [vmem:[%s2241_s1 + $0x10] sm:$0xff]  }
   0x2   :  { %v1642_v2 = vld [vmem:[%s2241_s1 + $0x80] sm:$0xff]   ;;  %711 = vmatpush1.bf16.msra.mxu1 %v1641_v1  ;;  %v1644_v4 = vld [vmem:[%s2241_s1 + $0x88] sm:$0xff]   ;;  %v1646_v6 = vld [vmem:[%s2241_s1 + $0x90] sm:$0xff]  }
   0x3   :  { %888 = vmatpush1.bf16.msra.mxu0 %v1642_v2  ;;  %712 = vmatprep.subr.bf16.mxu1 %v1781_v0  ;;  %v1647_v7 = vld [vmem:[%s2241_s1 + $0x18] sm:$0xff]   ;;  %v1649_v9 = vld [vmem:[%s2241_s1 + $0x20] sm:$0xff]   ;;  %v1651_v11 = vld [vmem:[%s2241_s1 + $0x28] sm:$0xff]  }
   0x4   :  { %889 = vmatprep.subr.bf16.mxu0 %v1781_v0  ;;  %v1648_v8 = vld [vmem:[%s2241_s1 + $0x98] sm:$0xff]   ;;  %v1650_v10 = vld [vmem:[%s2241_s1 + $0xa0] sm:$0xff]   ;;  %v1652_v12 = vld [vmem:[%s2241_s1 + $0xa8] sm:$0xff]  }
   0x5   :  { %v1653_v13 = vld [vmem:[%s2241_s1 + $0x30] sm:$0xff]   ;;  %v1655_v15 = vld [vmem:[%s2241_s1 + $0x38] sm:$0xff]   ;;  %v1657_v17 = vld [vmem:[%s2241_s1 + $0x40] sm:$0xff]  }
   0x6   :  { %713 = vmatpush1.bf16.msra.mxu1 %v1643_v3  ;;  %v1654_v14 = vld [vmem:[%s2241_s1 + $0xb0] sm:$0xff]   ;;  %v1656_v16 = vld [vmem:[%s2241_s1 + $0xb8] sm:$0xff]   ;;  %v1658_v18 = vld [vmem:[%s2241_s1 + $0xc0] sm:$0xff]  }
   0x7   :  { %890 = vmatpush1.bf16.msra.mxu0 %v1644_v4  ;;  %714 = vmatprep.subr.bf16.mxu1 %v1781_v0  ;;  %v1675_v19 = vld [vmem:[%s2242_s0 + $0x4] ss:$16 sps:$4 sm:$0xff]   ;;  %v1659_v20 = vld [vmem:[%s2241_s1 + $0x48] sm:$0xff]   ;;  %v1663_v25 = vld [vmem:[%s2241_s1 + $0x58] sm:$0xff]  }
   0x8   :  { %891 = vmatprep.subr.bf16.mxu0 %v1781_v0  ;;  %v1678_v21 = vld [vmem:[%s2242_s0 + $0xc] ss:$16 sps:$4 sm:$0xff]   ;;  %742 = vmatprep.mubr.bf16.mxu1 %v1675_v19  ;;  %v1661_v23 = vld [vmem:[%s2241_s1 + $0x50] sm:$0xff]   ;;  %v1665_v27 = vld [vmem:[%s2241_s1 + $0x60] sm:$0xff]  }
   0x9   :  { %v1660_v22 = vld [vmem:[%s2241_s1 + $0xc8] sm:$0xff]   ;;  %919 = vmatprep.mubr.bf16.mxu0 %v1678_v21  ;;  %v1662_v24 = vld [vmem:[%s2241_s1 + $0xd0] sm:$0xff]   ;;  %v1664_v26 = vld [vmem:[%s2241_s1 + $0xd8] sm:$0xff]  }
   0xa   :  { %715 = vmatpush1.bf16.msra.mxu1 %v1645_v5  ;;  %v1666_v28 = vld [vmem:[%s2241_s1 + $0xe0] sm:$0xff]   ;;  %v1667_v29 = vld [vmem:[%s2241_s1 + $0x68] sm:$0xff]   ;;  %v1669_v31 = vld [vmem:[%s2241_s1 + $0x70] sm:$0xff]  }
   0xb   :  { %892 = vmatpush1.bf16.msra.mxu0 %v1646_v6  ;;  %716 = vmatprep.subr.bf16.mxu1 %v1781_v0  ;;  %v1668_v30 = vld [vmem:[%s2241_s1 + $0xe8] sm:$0xff]   ;;  %v1670_v32 = vld [vmem:[%s2241_s1 + $0xf0] sm:$0xff]   ;;  %v1671_v33 = vld [vmem:[%s2241_s1 + $0x78] sm:$0xff]  }
   0xc   :  { %893 = vmatprep.subr.bf16.mxu0 %v1781_v0  ;;  %v1672_v34 = vld [vmem:[%s2241_s1 + $0xf8] sm:$0xff]   ;;  %v1673_v35 = vld [vmem:[%s2242_s0] ss:$16 sps:$4 sm:$0xff]   ;;  %v1679_v37 = vld [vmem:[%s2242_s0 + $0x24] ss:$16 sps:$4 sm:$0xff]  }
   0xd   :  { %v1676_v36 = vld [vmem:[%s2242_s0 + $0x8] ss:$16 sps:$4 sm:$0xff]   ;;  %v1681_v38 = vld [vmem:[%s2242_s0 + $0x2c] ss:$16 sps:$4 sm:$0xff]   ;;  %v1683_v39 = vld [vmem:[%s2242_s0 + $0x20] ss:$16 sps:$4 sm:$0xff]  }
   0xe   :  { %717 = vmatpush1.bf16.msra.mxu1 %v1647_v7  ;;  %v1684_v40 = vld [vmem:[%s2242_s0 + $0x28] ss:$16 sps:$4 sm:$0xff]   ;;  %v1685_v41 = vld [vmem:[%s2242_s0 + $0x44] ss:$16 sps:$4 sm:$0xff]   ;;  %v1687_v42 = vld [vmem:[%s2242_s0 + $0x4c] ss:$16 sps:$4 sm:$0xff]  }
   0xf   :  { %894 = vmatpush1.bf16.msra.mxu0 %v1648_v8  ;;  %718 = vmatprep.subr.bf16.mxu1 %v1781_v0  ;;  %v1689_v43 = vld [vmem:[%s2242_s0 + $0x40] ss:$16 sps:$4 sm:$0xff]   ;;  %v1690_v44 = vld [vmem:[%s2242_s0 + $0x48] ss:$16 sps:$4 sm:$0xff]   ;;  %v1691_v45 = vld [vmem:[%s2242_s0 + $0x64] ss:$16 sps:$4 sm:$0xff]  }
  0x10   :  { %895 = vmatprep.subr.bf16.mxu0 %v1781_v0  ;;  %v1693_v46 = vld [vmem:[%s2242_s0 + $0x6c] ss:$16 sps:$4 sm:$0xff]   ;;  %v1695_v47 = vld [vmem:[%s2242_s0 + $0x60] ss:$16 sps:$4 sm:$0xff]   ;;  %v1696_v48 = vld [vmem:[%s2242_s0 + $0x68] ss:$16 sps:$4 sm:$0xff]  }
  0x11   :  { %v1697_v49 = vld [vmem:[%s2242_s0 + $0x84] ss:$16 sps:$4 sm:$0xff]   ;;  %v1699_v50 = vld [vmem:[%s2242_s0 + $0x8c] ss:$16 sps:$4 sm:$0xff]   ;;  %v1701_v51 = vld [vmem:[%s2242_s0 + $0x80] ss:$16 sps:$4 sm:$0xff]  }
  0x12   :  { %719 = vmatpush1.bf16.msra.mxu1 %v1649_v9  ;;  %v1702_v52 = vld [vmem:[%s2242_s0 + $0x88] ss:$16 sps:$4 sm:$0xff]   ;;  %v1703_v53 = vld [vmem:[%s2242_s0 + $0xa4] ss:$16 sps:$4 sm:$0xff]   ;;  %v1705_v54 = vld [vmem:[%s2242_s0 + $0xac] ss:$16 sps:$4 sm:$0xff]  }
  0x13   :  { %896 = vmatpush1.bf16.msra.mxu0 %v1650_v10  ;;  %720 = vmatprep.subr.bf16.mxu1 %v1781_v0  ;;  %v1707_v55 = vld [vmem:[%s2242_s0 + $0xa0] ss:$16 sps:$4 sm:$0xff]   ;;  %v1708_v56 = vld [vmem:[%s2242_s0 + $0xa8] ss:$16 sps:$4 sm:$0xff]   ;;  %v1709_v57 = vld [vmem:[%s2242_s0 + $0xc4] ss:$16 sps:$4 sm:$0xff]  }
  0x14   :  { %897 = vmatprep.subr.bf16.mxu0 %v1781_v0  ;;  %v1711_v58 = vld [vmem:[%s2242_s0 + $0xcc] ss:$16 sps:$4 sm:$0xff]   ;;  %v1713_v59 = vld [vmem:[%s2242_s0 + $0xc0] ss:$16 sps:$4 sm:$0xff]   ;;  %v1714_v60 = vld [vmem:[%s2242_s0 + $0xc8] ss:$16 sps:$4 sm:$0xff]  }
  0x15   :  { %v1715_v61 = vld [vmem:[%s2242_s0 + $0xe4] ss:$16 sps:$4 sm:$0xff]   ;;  %v1717_v62 = vld [vmem:[%s2242_s0 + $0xec] ss:$16 sps:$4 sm:$0xff]   ;;  %v1719_v63 = vld [vmem:[%s2242_s0 + $0xe0] ss:$16 sps:$4 sm:$0xff]  }
  0x16   :  { %721 = vmatpush1.bf16.msra.mxu1 %v1651_v11  ;;  %v1721_v1 = vld [vmem:[%s2242_s0 + $0x104] ss:$16 sps:$4 sm:$0xff]   ;;  %v1723_v2 = vld [vmem:[%s2242_s0 + $0x10c] ss:$16 sps:$4 sm:$0xff]   ;;  %v1725_v3 = vld [vmem:[%s2242_s0 + $0x100] ss:$16 sps:$4 sm:$0xff]  }
  0x17   :  { %898 = vmatpush1.bf16.msra.mxu0 %v1652_v12  ;;  %722 = vmatprep.subr.bf16.mxu1 %v1781_v0  ;;  %v1726_v4 = vld [vmem:[%s2242_s0 + $0x108] ss:$16 sps:$4 sm:$0xff]   ;;  %v1727_v5 = vld [vmem:[%s2242_s0 + $0x124] ss:$16 sps:$4 sm:$0xff]   ;;  %v1729_v6 = vld [vmem:[%s2242_s0 + $0x12c] ss:$16 sps:$4 sm:$0xff]  }
  0x18   :  { %899 = vmatprep.subr.bf16.mxu0 %v1781_v0  ;;  %v1731_v7 = vld [vmem:[%s2242_s0 + $0x120] ss:$16 sps:$4 sm:$0xff]   ;;  %v1732_v8 = vld [vmem:[%s2242_s0 + $0x128] ss:$16 sps:$4 sm:$0xff]   ;;  %v1733_v9 = vld [vmem:[%s2242_s0 + $0x144] ss:$16 sps:$4 sm:$0xff]  }
  0x19   :  { %v1735_v10 = vld [vmem:[%s2242_s0 + $0x14c] ss:$16 sps:$4 sm:$0xff]   ;;  %v1737_v11 = vld [vmem:[%s2242_s0 + $0x140] ss:$16 sps:$4 sm:$0xff]   ;;  %v1738_v12 = vld [vmem:[%s2242_s0 + $0x148] ss:$16 sps:$4 sm:$0xff]  }
  0x1a   :  { %723 = vmatpush1.bf16.msra.mxu1 %v1653_v13  ;;  %v1739_v13 = vld [vmem:[%s2242_s0 + $0x164] ss:$16 sps:$4 sm:$0xff]   ;;  %v1749_v19 = vld [vmem:[%s2242_s0 + $0x180] ss:$16 sps:$4 sm:$0xff]  }
  0x1b   :  { %900 = vmatpush1.bf16.msra.mxu0 %v1654_v14  ;;  %724 = vmatprep.subr.bf16.mxu1 %v1781_v0  ;;  %v1741_v14 = vld [vmem:[%s2242_s0 + $0x16c] ss:$16 sps:$4 sm:$0xff]   ;;  %v1751_v21 = vld [vmem:[%s2242_s0 + $0x1a4] ss:$16 sps:$4 sm:$0xff]  }
  0x1c   :  { %901 = vmatprep.subr.bf16.mxu0 %v1781_v0 }
  0x1e   :  { %725 = vmatpush1.bf16.msra.mxu1 %v1655_v15  ;;  %v1743_v15 = vld [vmem:[%s2242_s0 + $0x160] ss:$16 sps:$4 sm:$0xff]  }
  0x1f   :  { %902 = vmatpush1.bf16.msra.mxu0 %v1656_v16  ;;  %726 = vmatprep.subr.bf16.mxu1 %v1781_v0  ;;  %v1744_v16 = vld [vmem:[%s2242_s0 + $0x168] ss:$16 sps:$4 sm:$0xff]  }
  0x20   :  { %903 = vmatprep.subr.bf16.mxu0 %v1781_v0 }
  0x22   :  { %727 = vmatpush1.bf16.msra.mxu1 %v1657_v17  ;;  %v1745_v17 = vld [vmem:[%s2242_s0 + $0x184] ss:$16 sps:$4 sm:$0xff]  }
  0x23   :  { %904 = vmatpush1.bf16.msra.mxu0 %v1658_v18  ;;  %728 = vmatprep.subr.bf16.mxu1 %v1781_v0  ;;  %v1747_v18 = vld [vmem:[%s2242_s0 + $0x18c] ss:$16 sps:$4 sm:$0xff]  }
  0x24   :  { %905 = vmatprep.subr.bf16.mxu0 %v1781_v0 }
  0x26   :  { %729 = vmatpush1.bf16.msra.mxu1 %v1659_v20  ;;  %v1750_v20 = vld [vmem:[%s2242_s0 + $0x188] ss:$16 sps:$4 sm:$0xff]  }
  0x27   :  { %906 = vmatpush1.bf16.msra.mxu0 %v1660_v22  ;;  %730 = vmatprep.subr.bf16.mxu1 %v1781_v0  ;;  %v1753_v22 = vld [vmem:[%s2242_s0 + $0x1ac] ss:$16 sps:$4 sm:$0xff]  }
  0x28   :  { %907 = vmatprep.subr.bf16.mxu0 %v1781_v0 }
  0x2a   :  { %731 = vmatpush1.bf16.msra.mxu1 %v1661_v23  ;;  %v1755_v23 = vld [vmem:[%s2242_s0 + $0x1a0] ss:$16 sps:$4 sm:$0xff]  }
  0x2b   :  { %908 = vmatpush1.bf16.msra.mxu0 %v1662_v24  ;;  %732 = vmatprep.subr.bf16.mxu1 %v1781_v0  ;;  %v1756_v24 = vld [vmem:[%s2242_s0 + $0x1a8] ss:$16 sps:$4 sm:$0xff]  }
  0x2c   :  { %909 = vmatprep.subr.bf16.mxu0 %v1781_v0 }
  0x2e   :  { %733 = vmatpush1.bf16.msra.mxu1 %v1663_v25  ;;  %v1757_v25 = vld [vmem:[%s2242_s0 + $0x1c4] ss:$16 sps:$4 sm:$0xff]  }
  0x2f   :  { %910 = vmatpush1.bf16.msra.mxu0 %v1664_v26  ;;  %734 = vmatprep.subr.bf16.mxu1 %v1781_v0  ;;  %v1759_v26 = vld [vmem:[%s2242_s0 + $0x1cc] ss:$16 sps:$4 sm:$0xff]  }
  0x30   :  { %911 = vmatprep.subr.bf16.mxu0 %v1781_v0 }
  0x32   :  { %735 = vmatpush1.bf16.msra.mxu1 %v1665_v27  ;;  %v1761_v27 = vld [vmem:[%s2242_s0 + $0x1c0] ss:$16 sps:$4 sm:$0xff]  }
  0x33   :  { %912 = vmatpush1.bf16.msra.mxu0 %v1666_v28  ;;  %736 = vmatprep.subr.bf16.mxu1 %v1781_v0  ;;  %v1762_v28 = vld [vmem:[%s2242_s0 + $0x1c8] ss:$16 sps:$4 sm:$0xff]  }
  0x34   :  { %913 = vmatprep.subr.bf16.mxu0 %v1781_v0 }
  0x36   :  { %737 = vmatpush1.bf16.msra.mxu1 %v1667_v29  ;;  %v1763_v29 = vld [vmem:[%s2242_s0 + $0x1e4] ss:$16 sps:$4 sm:$0xff]  }
  0x37   :  { %914 = vmatpush1.bf16.msra.mxu0 %v1668_v30  ;;  %738 = vmatprep.subr.bf16.mxu1 %v1781_v0  ;;  %v1765_v30 = vld [vmem:[%s2242_s0 + $0x1ec] ss:$16 sps:$4 sm:$0xff]  }
  0x38   :  { %915 = vmatprep.subr.bf16.mxu0 %v1781_v0 }
  0x3a   :  { %739 = vmatpush1.bf16.msra.mxu1 %v1669_v31  ;;  %v1767_v31 = vld [vmem:[%s2242_s0 + $0x1e0] ss:$16 sps:$4 sm:$0xff]  }
  0x3b   :  { %916 = vmatpush1.bf16.msra.mxu0 %v1670_v32  ;;  %740 = vmatprep.subr.bf16.mxu1 %v1781_v0  ;;  %v1768_v32 = vld [vmem:[%s2242_s0 + $0x1e8] ss:$16 sps:$4 sm:$0xff]  }
  0x3c   :  { %917 = vmatprep.subr.bf16.mxu0 %v1781_v0  ;;  %v1720_v0 = vld [vmem:[%s2242_s0 + $0xe8] ss:$16 sps:$4 sm:$0xff]  }
  0x3e   :  { %741 = vmatpush1.bf16.msra.mxu1 %v1671_v33  ;;  %v1769_v33 = vld [vmem:[%s2242_s0 + $0x204] ss:$16 sps:$4 sm:$0xff]  }
  0x3f   :  { %918 = vmatpush1.bf16.msra.mxu0 %v1672_v34  ;;  %v1771_v34 = vld [vmem:[%s2242_s0 + $0x20c] ss:$16 sps:$4 sm:$0xff]  }
  0x41   :  { %743 = vmatmul.mubr.bf16.vlgmr.msra.gmra.mrb[0].mxu1 %v1673_v35  ;;  %v1773_v35 = vld [vmem:[%s2242_s0 + $0x200] ss:$16 sps:$4 sm:$0xff]  }
  0x42   :  { %920 = vmatmul.mubr.bf16.vlgmr.msra.gmra.mrb[0].mxu0 %v1676_v36  ;;  %750 = vmatprep.mubr.bf16.mxu1 %v1679_v37  ;;  %v1774_v36 = vld [vmem:[%s2242_s0 + $0x208] ss:$16 sps:$4 sm:$0xff]   ;;  %v1775_v37 = vld [vmem:[%s2242_s0 + $0x224] ss:$16 sps:$4 sm:$0xff]  }
  0x43   :  { %927 = vmatprep.mubr.bf16.mxu0 %v1681_v38  ;;  %v1777_v38 = vld [vmem:[%s2242_s0 + $0x22c] ss:$16 sps:$4 sm:$0xff]  }
  0x49   :  { %751 = vmatmul.mubr.bf16.gmra.mrb[4].mxu1 %v1683_v39  ;;  %v1779_v39 = vld [vmem:[%s2242_s0 + $0x220] ss:$16 sps:$4 sm:$0xff]  }
  0x4a   :  { %928 = vmatmul.mubr.bf16.gmra.mrb[4].mxu0 %v1684_v40  ;;  %758 = vmatprep.mubr.bf16.mxu1 %v1685_v41  ;;  %v1780_v40 = vld [vmem:[%s2242_s0 + $0x228] ss:$16 sps:$4 sm:$0xff]   ;;  %v2149_v41 = vld [vmem:[%s2243_s2] ss:$0 sm:$0xff] }
  0x4b   :  { %935 = vmatprep.mubr.bf16.mxu0 %v1687_v42 }
  0x51   :  { %759 = vmatmul.mubr.bf16.gmra.mrb[8].mxu1 %v1689_v43 }
  0x52   :  { %936 = vmatmul.mubr.bf16.gmra.mrb[8].mxu0 %v1690_v44  ;;  %766 = vmatprep.mubr.bf16.mxu1 %v1691_v45 }
  0x53   :  { %943 = vmatprep.mubr.bf16.mxu0 %v1693_v46 }
  0x59   :  { %767 = vmatmul.mubr.bf16.gmra.mrb[12].mxu1 %v1695_v47 }
  0x5a   :  { %944 = vmatmul.mubr.bf16.gmra.mrb[12].mxu0 %v1696_v48  ;;  %774 = vmatprep.mubr.bf16.mxu1 %v1697_v49 }
  0x5b   :  { %951 = vmatprep.mubr.bf16.mxu0 %v1699_v50 }
  0x61   :  { %775 = vmatmul.mubr.bf16.gmra.mrb[16].mxu1 %v1701_v51 }
  0x62   :  { %952 = vmatmul.mubr.bf16.gmra.mrb[16].mxu0 %v1702_v52  ;;  %782 = vmatprep.mubr.bf16.mxu1 %v1703_v53 }
  0x63   :  { %959 = vmatprep.mubr.bf16.mxu0 %v1705_v54 }
  0x69   :  { %783 = vmatmul.mubr.bf16.gmra.mrb[20].mxu1 %v1707_v55 }
  0x6a   :  { %960 = vmatmul.mubr.bf16.gmra.mrb[20].mxu0 %v1708_v56  ;;  %790 = vmatprep.mubr.bf16.mxu1 %v1709_v57 }
  0x6b   :  { %967 = vmatprep.mubr.bf16.mxu0 %v1711_v58 }
  0x71   :  { %791 = vmatmul.mubr.bf16.gmra.mrb[24].mxu1 %v1713_v59 }
  0x72   :  { %968 = vmatmul.mubr.bf16.gmra.mrb[24].mxu0 %v1714_v60  ;;  %798 = vmatprep.mubr.bf16.mxu1 %v1715_v61 }
  0x73   :  { %975 = vmatprep.mubr.bf16.mxu0 %v1717_v62 }
  0x79   :  { %799 = vmatmul.mubr.bf16.gmra.mrb[28].mxu1 %v1719_v63 }
  0x7a   :  { %976 = vmatmul.mubr.bf16.gmra.mrb[28].mxu0 %v1720_v0  ;;  %806 = vmatprep.mubr.bf16.mxu1 %v1721_v1 }
  0x7b   :  { %983 = vmatprep.mubr.bf16.mxu0 %v1723_v2 }
  0x81   :  { %807 = vmatmul.mubr.bf16.gmra.mrb[32].mxu1 %v1725_v3 }
  0x82   :  { %984 = vmatmul.mubr.bf16.gmra.mrb[32].mxu0 %v1726_v4  ;;  %814 = vmatprep.mubr.bf16.mxu1 %v1727_v5 }
  0x83   :  { %991 = vmatprep.mubr.bf16.mxu0 %v1729_v6 }
  0x89   :  { %815 = vmatmul.mubr.bf16.gmra.mrb[36].mxu1 %v1731_v7 }
  0x8a   :  { %992 = vmatmul.mubr.bf16.gmra.mrb[36].mxu0 %v1732_v8  ;;  %822 = vmatprep.mubr.bf16.mxu1 %v1733_v9 }
  0x8b   :  { %999 = vmatprep.mubr.bf16.mxu0 %v1735_v10 }
  0x91   :  { %823 = vmatmul.mubr.bf16.gmra.mrb[40].mxu1 %v1737_v11 }
  0x92   :  { %1000 = vmatmul.mubr.bf16.gmra.mrb[40].mxu0 %v1738_v12  ;;  %830 = vmatprep.mubr.bf16.mxu1 %v1739_v13 }
  0x93   :  { %1007 = vmatprep.mubr.bf16.mxu0 %v1741_v14 }
  0x99   :  { %831 = vmatmul.mubr.bf16.gmra.mrb[44].mxu1 %v1743_v15 }
  0x9a   :  { %1008 = vmatmul.mubr.bf16.gmra.mrb[44].mxu0 %v1744_v16  ;;  %838 = vmatprep.mubr.bf16.mxu1 %v1745_v17 }
  0x9b   :  { %1015 = vmatprep.mubr.bf16.mxu0 %v1747_v18 }
  0xa1   :  { %839 = vmatmul.mubr.bf16.gmra.mrb[48].mxu1 %v1749_v19 }
  0xa2   :  { %1016 = vmatmul.mubr.bf16.gmra.mrb[48].mxu0 %v1750_v20  ;;  %846 = vmatprep.mubr.bf16.mxu1 %v1751_v21 }
  0xa3   :  { %1023 = vmatprep.mubr.bf16.mxu0 %v1753_v22 }
  0xa9   :  { %847 = vmatmul.mubr.bf16.gmra.mrb[52].mxu1 %v1755_v23 }
  0xaa   :  { %1024 = vmatmul.mubr.bf16.gmra.mrb[52].mxu0 %v1756_v24  ;;  %854 = vmatprep.mubr.bf16.mxu1 %v1757_v25 }
  0xab   :  { %1031 = vmatprep.mubr.bf16.mxu0 %v1759_v26 }
  0xb1   :  { %855 = vmatmul.mubr.bf16.gmra.mrb[56].mxu1 %v1761_v27 }
  0xb2   :  { %1032 = vmatmul.mubr.bf16.gmra.mrb[56].mxu0 %v1762_v28  ;;  %862 = vmatprep.mubr.bf16.mxu1 %v1763_v29 }
  0xb3   :  { %1039 = vmatprep.mubr.bf16.mxu0 %v1765_v30 }
  0xb9   :  { %863 = vmatmul.mubr.bf16.gmra.mrb[60].mxu1 %v1767_v31 }
  0xba   :  { %1040 = vmatmul.mubr.bf16.gmra.mrb[60].mxu0 %v1768_v32  ;;  %870 = vmatprep.mubr.bf16.mxu1 %v1769_v33 }
  0xbb   :  { %1047 = vmatprep.mubr.bf16.mxu0 %v1771_v34 }
  0xc1   :  { %871 = vmatmul.mubr.bf16.gmra.mrb[64].mxu1 %v1773_v35 }
  0xc2   :  { %1048 = vmatmul.mubr.bf16.gmra.mrb[64].mxu0 %v1774_v36  ;;  %878 = vmatprep.mubr.bf16.mxu1 %v1775_v37 }
  0xc3   :  { %1055 = vmatprep.mubr.bf16.mxu0 %v1777_v38 }
  0xc9   :  { %879 = vmatmul.mubr.bf16.gmra.mrb[68].mxu1 %v1779_v39 }
  0xca   :  { %1056 = vmatmul.mubr.bf16.gmra.mrb[68].mxu0 %v1780_v40 }
 0x114   :  { %v744_v42 = vpop.f32.mrb[0].mxu1 }
 0x115   :  { %v745_v43 = vadd.f32 %v2149_v41, %v744_v42  ;;  %v921_v44 = vpop.f32.mrb[0].mxu0  ;;  %v746_v45 = vpop.f32.mrb[1].mxu1 }
 0x116   :  { %v923_v46 = vpop.f32.mrb[1].mxu0  ;;  %v747_v47 = vpop.f32.mrb[2].mxu1 }
 0x117   :  { %v922_v48 = vadd.f32 %v921_v44, %v745_v43  ;;  %v748_v49 = vadd.f32 %v2149_v41, %v747_v47  ;;  %v924_v50 = vpop.f32.mrb[2].mxu0  ;;  %v749_v51 = vpop.f32.mrb[3].mxu1 }
 0x118   :  { %v926_v52 = vpop.f32.mrb[3].mxu0 }
 0x119   :  { %v925_v53 = vadd.f32 %v924_v50, %v748_v49  ;;  %v1064_v54 = vmax.f32 %v922_v48, 0.0 }
 0x11b   :  { %v1065_v55 = vmax.f32 %v925_v53, 0.0 }
 0x11c   :  { %v752_v56 = vpop.f32.mrb[4].mxu1 }
 0x11d   :  { %v1464_v57 = vpack.c.bf16 %v1065_v55, %v1064_v54  ;;  %v753_v58 = vadd.f32 %v2149_v41, %v752_v56  ;;  %v929_v59 = vpop.f32.mrb[4].mxu0  ;;  %v754_v60 = vpop.f32.mrb[5].mxu1 }
 0x11e   :  { %v931_v61 = vpop.f32.mrb[5].mxu0  ;;  %v755_v62 = vpop.f32.mrb[6].mxu1 }
 0x11f   :  { %1465 = vst [vmem:[%s2244_s3] sm:$0xff] %v1464_v57   ;;  %v930_v63 = vadd.f32 %v929_v59, %v753_v58  ;;  %v756_v0 = vadd.f32 %v2149_v41, %v755_v62  ;;  %v932_v1 = vpop.f32.mrb[6].mxu0  ;;  %v757_v2 = vpop.f32.mrb[7].mxu1 }
 0x120   :  { %v934_v3 = vpop.f32.mrb[7].mxu0 }
 0x121   :  { %v933_v4 = vadd.f32 %v932_v1, %v756_v0  ;;  %v1066_v5 = vmax.f32 %v930_v63, 0.0 }
 0x123   :  { %v1067_v6 = vmax.f32 %v933_v4, 0.0 }
 0x124   :  { %v760_v7 = vpop.f32.mrb[8].mxu1 }
 0x125   :  { %v1469_v8 = vpack.c.bf16 %v1067_v6, %v1066_v5  ;;  %v761_v9 = vadd.f32 %v2149_v41, %v760_v7  ;;  %v937_v10 = vpop.f32.mrb[8].mxu0  ;;  %v762_v11 = vpop.f32.mrb[9].mxu1 }
 0x126   :  { %v939_v12 = vpop.f32.mrb[9].mxu0  ;;  %v763_v13 = vpop.f32.mrb[10].mxu1 }
 0x127   :  { %1551 = vst [vmem:[%s2244_s3 + $0x8] sm:$0xff] %v1469_v8   ;;  %v938_v14 = vadd.f32 %v937_v10, %v761_v9  ;;  %v764_v15 = vadd.f32 %v2149_v41, %v763_v13  ;;  %v940_v16 = vpop.f32.mrb[10].mxu0  ;;  %v765_v17 = vpop.f32.mrb[11].mxu1 }
 0x128   :  { %v942_v18 = vpop.f32.mrb[11].mxu0 }
 0x129   :  { %v941_v19 = vadd.f32 %v940_v16, %v764_v15  ;;  %v1068_v20 = vmax.f32 %v938_v14, 0.0 }
 0x12b   :  { %v1069_v21 = vmax.f32 %v941_v19, 0.0 }
 0x12c   :  { %v768_v22 = vpop.f32.mrb[12].mxu1 }
 0x12d   :  { %v1474_v23 = vpack.c.bf16 %v1069_v21, %v1068_v20  ;;  %v769_v24 = vadd.f32 %v2149_v41, %v768_v22  ;;  %v945_v25 = vpop.f32.mrb[12].mxu0  ;;  %v770_v26 = vpop.f32.mrb[13].mxu1 }
 0x12e   :  { %v947_v27 = vpop.f32.mrb[13].mxu0  ;;  %v771_v28 = vpop.f32.mrb[14].mxu1 }
 0x12f   :  { %1552 = vst [vmem:[%s2244_s3 + $0x10] sm:$0xff] %v1474_v23   ;;  %v946_v29 = vadd.f32 %v945_v25, %v769_v24  ;;  %v772_v30 = vadd.f32 %v2149_v41, %v771_v28  ;;  %v948_v31 = vpop.f32.mrb[14].mxu0  ;;  %v773_v32 = vpop.f32.mrb[15].mxu1 }
 0x130   :  { %v950_v33 = vpop.f32.mrb[15].mxu0 }
 0x131   :  { %v949_v34 = vadd.f32 %v948_v31, %v772_v30  ;;  %v1070_v35 = vmax.f32 %v946_v29, 0.0 }
 0x133   :  { %v1071_v36 = vmax.f32 %v949_v34, 0.0 }
 0x134   :  { %v776_v37 = vpop.f32.mrb[16].mxu1 }
 0x135   :  { %v1479_v38 = vpack.c.bf16 %v1071_v36, %v1070_v35  ;;  %v777_v39 = vadd.f32 %v2149_v41, %v776_v37  ;;  %v953_v40 = vpop.f32.mrb[16].mxu0  ;;  %v778_v42 = vpop.f32.mrb[17].mxu1 }
 0x136   :  { %v955_v43 = vpop.f32.mrb[17].mxu0  ;;  %v779_v44 = vpop.f32.mrb[18].mxu1 }
 0x137   :  { %1553 = vst [vmem:[%s2244_s3 + $0x18] sm:$0xff] %v1479_v38   ;;  %v954_v45 = vadd.f32 %v953_v40, %v777_v39  ;;  %v780_v46 = vadd.f32 %v2149_v41, %v779_v44  ;;  %v956_v47 = vpop.f32.mrb[18].mxu0  ;;  %v781_v48 = vpop.f32.mrb[19].mxu1 }
 0x138   :  { %v958_v49 = vpop.f32.mrb[19].mxu0 }
 0x139   :  { %v957_v50 = vadd.f32 %v956_v47, %v780_v46  ;;  %v1072_v51 = vmax.f32 %v954_v45, 0.0 }
 0x13b   :  { %v1073_v52 = vmax.f32 %v957_v50, 0.0 }
 0x13c   :  { %v784_v53 = vpop.f32.mrb[20].mxu1 }
 0x13d   :  { %v1484_v54 = vpack.c.bf16 %v1073_v52, %v1072_v51  ;;  %v785_v55 = vadd.f32 %v2149_v41, %v784_v53  ;;  %v961_v56 = vpop.f32.mrb[20].mxu0  ;;  %v786_v57 = vpop.f32.mrb[21].mxu1 }
 0x13e   :  { %v963_v58 = vpop.f32.mrb[21].mxu0  ;;  %v787_v59 = vpop.f32.mrb[22].mxu1 }
 0x13f   :  { %1554 = vst [vmem:[%s2244_s3 + $0x20] sm:$0xff] %v1484_v54   ;;  %v962_v60 = vadd.f32 %v961_v56, %v785_v55  ;;  %v788_v61 = vadd.f32 %v2149_v41, %v787_v59  ;;  %v964_v62 = vpop.f32.mrb[22].mxu0  ;;  %v789_v63 = vpop.f32.mrb[23].mxu1 }
 0x140   :  { %v966_v0 = vpop.f32.mrb[23].mxu0 }
 0x141   :  { %v965_v1 = vadd.f32 %v964_v62, %v788_v61  ;;  %v1074_v2 = vmax.f32 %v962_v60, 0.0 }
 0x143   :  { %v1075_v3 = vmax.f32 %v965_v1, 0.0 }
 0x144   :  { %v792_v4 = vpop.f32.mrb[24].mxu1 }
 0x145   :  { %v1489_v5 = vpack.c.bf16 %v1075_v3, %v1074_v2  ;;  %v793_v6 = vadd.f32 %v2149_v41, %v792_v4  ;;  %v969_v7 = vpop.f32.mrb[24].mxu0  ;;  %v794_v8 = vpop.f32.mrb[25].mxu1 }
 0x146   :  { %v971_v9 = vpop.f32.mrb[25].mxu0  ;;  %v795_v10 = vpop.f32.mrb[26].mxu1 }
 0x147   :  { %1555 = vst [vmem:[%s2244_s3 + $0x28] sm:$0xff] %v1489_v5   ;;  %v970_v11 = vadd.f32 %v969_v7, %v793_v6  ;;  %v796_v12 = vadd.f32 %v2149_v41, %v795_v10  ;;  %v972_v13 = vpop.f32.mrb[26].mxu0  ;;  %v797_v14 = vpop.f32.mrb[27].mxu1 }
 0x148   :  { %v974_v15 = vpop.f32.mrb[27].mxu0 }
 0x149   :  { %v973_v16 = vadd.f32 %v972_v13, %v796_v12  ;;  %v1076_v17 = vmax.f32 %v970_v11, 0.0 }
 0x14b   :  { %v1077_v18 = vmax.f32 %v973_v16, 0.0 }
 0x14c   :  { %v800_v19 = vpop.f32.mrb[28].mxu1 }
 0x14d   :  { %v1494_v20 = vpack.c.bf16 %v1077_v18, %v1076_v17  ;;  %v801_v21 = vadd.f32 %v2149_v41, %v800_v19  ;;  %v977_v22 = vpop.f32.mrb[28].mxu0  ;;  %v802_v23 = vpop.f32.mrb[29].mxu1 }
 0x14e   :  { %v979_v24 = vpop.f32.mrb[29].mxu0  ;;  %v803_v25 = vpop.f32.mrb[30].mxu1 }
 0x14f   :  { %1556 = vst [vmem:[%s2244_s3 + $0x30] sm:$0xff] %v1494_v20   ;;  %v978_v26 = vadd.f32 %v977_v22, %v801_v21  ;;  %v804_v27 = vadd.f32 %v2149_v41, %v803_v25  ;;  %v980_v28 = vpop.f32.mrb[30].mxu0  ;;  %v805_v29 = vpop.f32.mrb[31].mxu1 }
 0x150   :  { %v982_v30 = vpop.f32.mrb[31].mxu0 }
 0x151   :  { %v981_v31 = vadd.f32 %v980_v28, %v804_v27  ;;  %v1078_v32 = vmax.f32 %v978_v26, 0.0 }
 0x153   :  { %v1079_v33 = vmax.f32 %v981_v31, 0.0 }
 0x154   :  { %v808_v34 = vpop.f32.mrb[32].mxu1 }
 0x155   :  { %v1499_v35 = vpack.c.bf16 %v1079_v33, %v1078_v32  ;;  %v809_v36 = vadd.f32 %v2149_v41, %v808_v34  ;;  %v985_v37 = vpop.f32.mrb[32].mxu0  ;;  %v810_v38 = vpop.f32.mrb[33].mxu1 }
 0x156   :  { %v987_v39 = vpop.f32.mrb[33].mxu0  ;;  %v811_v40 = vpop.f32.mrb[34].mxu1 }
 0x157   :  { %1557 = vst [vmem:[%s2244_s3 + $0x38] sm:$0xff] %v1499_v35   ;;  %v986_v42 = vadd.f32 %v985_v37, %v809_v36  ;;  %v812_v43 = vadd.f32 %v2149_v41, %v811_v40  ;;  %v988_v44 = vpop.f32.mrb[34].mxu0  ;;  %v813_v45 = vpop.f32.mrb[35].mxu1 }
 0x158   :  { %v990_v46 = vpop.f32.mrb[35].mxu0 }
 0x159   :  { %v989_v47 = vadd.f32 %v988_v44, %v812_v43  ;;  %v1080_v48 = vmax.f32 %v986_v42, 0.0 }
 0x15b   :  { %v1081_v49 = vmax.f32 %v989_v47, 0.0 }
 0x15c   :  { %v816_v50 = vpop.f32.mrb[36].mxu1 }
 0x15d   :  { %v1504_v51 = vpack.c.bf16 %v1081_v49, %v1080_v48  ;;  %v817_v52 = vadd.f32 %v2149_v41, %v816_v50  ;;  %v993_v53 = vpop.f32.mrb[36].mxu0  ;;  %v818_v54 = vpop.f32.mrb[37].mxu1 }
 0x15e   :  { %v995_v55 = vpop.f32.mrb[37].mxu0  ;;  %v819_v56 = vpop.f32.mrb[38].mxu1 }
 0x15f   :  { %1558 = vst [vmem:[%s2244_s3 + $0x40] sm:$0xff] %v1504_v51   ;;  %v994_v57 = vadd.f32 %v993_v53, %v817_v52  ;;  %v820_v58 = vadd.f32 %v2149_v41, %v819_v56  ;;  %v996_v59 = vpop.f32.mrb[38].mxu0  ;;  %v821_v60 = vpop.f32.mrb[39].mxu1 }
 0x160   :  { %v998_v61 = vpop.f32.mrb[39].mxu0 }
 0x161   :  { %v997_v62 = vadd.f32 %v996_v59, %v820_v58  ;;  %v1082_v63 = vmax.f32 %v994_v57, 0.0 }
 0x163   :  { %v1083_v0 = vmax.f32 %v997_v62, 0.0 }
 0x164   :  { %v824_v1 = vpop.f32.mrb[40].mxu1 }
 0x165   :  { %v1509_v2 = vpack.c.bf16 %v1083_v0, %v1082_v63  ;;  %v825_v3 = vadd.f32 %v2149_v41, %v824_v1  ;;  %v1001_v4 = vpop.f32.mrb[40].mxu0  ;;  %v826_v5 = vpop.f32.mrb[41].mxu1 }
 0x166   :  { %v1003_v6 = vpop.f32.mrb[41].mxu0  ;;  %v827_v7 = vpop.f32.mrb[42].mxu1 }
 0x167   :  { %1559 = vst [vmem:[%s2244_s3 + $0x48] sm:$0xff] %v1509_v2   ;;  %v1002_v8 = vadd.f32 %v1001_v4, %v825_v3  ;;  %v828_v9 = vadd.f32 %v2149_v41, %v827_v7  ;;  %v1004_v10 = vpop.f32.mrb[42].mxu0  ;;  %v829_v11 = vpop.f32.mrb[43].mxu1 }
 0x168   :  { %v1006_v12 = vpop.f32.mrb[43].mxu0 }
 0x169   :  { %v1005_v13 = vadd.f32 %v1004_v10, %v828_v9  ;;  %v1084_v14 = vmax.f32 %v1002_v8, 0.0 }
 0x16b   :  { %v1085_v15 = vmax.f32 %v1005_v13, 0.0 }
 0x16c   :  { %v832_v16 = vpop.f32.mrb[44].mxu1 }
 0x16d   :  { %v1514_v17 = vpack.c.bf16 %v1085_v15, %v1084_v14  ;;  %v833_v18 = vadd.f32 %v2149_v41, %v832_v16  ;;  %v1009_v19 = vpop.f32.mrb[44].mxu0  ;;  %v834_v20 = vpop.f32.mrb[45].mxu1 }
 0x16e   :  { %v1011_v21 = vpop.f32.mrb[45].mxu0  ;;  %v835_v22 = vpop.f32.mrb[46].mxu1 }
 0x16f   :  { %1560 = vst [vmem:[%s2244_s3 + $0x50] sm:$0xff] %v1514_v17   ;;  %v1010_v23 = vadd.f32 %v1009_v19, %v833_v18  ;;  %v836_v24 = vadd.f32 %v2149_v41, %v835_v22  ;;  %v1012_v25 = vpop.f32.mrb[46].mxu0  ;;  %v837_v26 = vpop.f32.mrb[47].mxu1 }
 0x170   :  { %v1014_v27 = vpop.f32.mrb[47].mxu0 }
 0x171   :  { %v1013_v28 = vadd.f32 %v1012_v25, %v836_v24  ;;  %v1086_v29 = vmax.f32 %v1010_v23, 0.0 }
 0x173   :  { %v1087_v30 = vmax.f32 %v1013_v28, 0.0 }
 0x174   :  { %v840_v31 = vpop.f32.mrb[48].mxu1 }
 0x175   :  { %v1519_v32 = vpack.c.bf16 %v1087_v30, %v1086_v29  ;;  %v841_v33 = vadd.f32 %v2149_v41, %v840_v31  ;;  %v1017_v34 = vpop.f32.mrb[48].mxu0  ;;  %v842_v35 = vpop.f32.mrb[49].mxu1 }
 0x176   :  { %v1019_v36 = vpop.f32.mrb[49].mxu0  ;;  %v843_v37 = vpop.f32.mrb[50].mxu1 }
 0x177   :  { %1561 = vst [vmem:[%s2244_s3 + $0x58] sm:$0xff] %v1519_v32   ;;  %v1018_v38 = vadd.f32 %v1017_v34, %v841_v33  ;;  %v844_v39 = vadd.f32 %v2149_v41, %v843_v37  ;;  %v1020_v40 = vpop.f32.mrb[50].mxu0  ;;  %v845_v42 = vpop.f32.mrb[51].mxu1 }
 0x178   :  { %v1022_v43 = vpop.f32.mrb[51].mxu0 }
 0x179   :  { %v1021_v44 = vadd.f32 %v1020_v40, %v844_v39  ;;  %v1088_v45 = vmax.f32 %v1018_v38, 0.0 }
 0x17b   :  { %v1089_v46 = vmax.f32 %v1021_v44, 0.0 }
 0x17c   :  { %v848_v47 = vpop.f32.mrb[52].mxu1 }
 0x17d   :  { %v1524_v48 = vpack.c.bf16 %v1089_v46, %v1088_v45  ;;  %v849_v49 = vadd.f32 %v2149_v41, %v848_v47  ;;  %v1025_v50 = vpop.f32.mrb[52].mxu0  ;;  %v850_v51 = vpop.f32.mrb[53].mxu1 }
 0x17e   :  { %v1027_v52 = vpop.f32.mrb[53].mxu0  ;;  %v851_v53 = vpop.f32.mrb[54].mxu1 }
 0x17f   :  { %1562 = vst [vmem:[%s2244_s3 + $0x60] sm:$0xff] %v1524_v48   ;;  %v1026_v54 = vadd.f32 %v1025_v50, %v849_v49  ;;  %v852_v55 = vadd.f32 %v2149_v41, %v851_v53  ;;  %v1028_v56 = vpop.f32.mrb[54].mxu0  ;;  %v853_v57 = vpop.f32.mrb[55].mxu1 }
 0x180   :  { %v1030_v58 = vpop.f32.mrb[55].mxu0 }
 0x181   :  { %v1029_v59 = vadd.f32 %v1028_v56, %v852_v55  ;;  %v1090_v60 = vmax.f32 %v1026_v54, 0.0 }
 0x183   :  { %v1091_v61 = vmax.f32 %v1029_v59, 0.0 }
 0x184   :  { %v856_v62 = vpop.f32.mrb[56].mxu1 }
 0x185   :  { %v1529_v63 = vpack.c.bf16 %v1091_v61, %v1090_v60  ;;  %v857_v0 = vadd.f32 %v2149_v41, %v856_v62  ;;  %v1033_v1 = vpop.f32.mrb[56].mxu0  ;;  %v858_v2 = vpop.f32.mrb[57].mxu1 }
 0x186   :  { %v1035_v3 = vpop.f32.mrb[57].mxu0  ;;  %v859_v4 = vpop.f32.mrb[58].mxu1 }
 0x187   :  { %1563 = vst [vmem:[%s2244_s3 + $0x68] sm:$0xff] %v1529_v63   ;;  %v1034_v5 = vadd.f32 %v1033_v1, %v857_v0  ;;  %v860_v6 = vadd.f32 %v2149_v41, %v859_v4  ;;  %v1036_v7 = vpop.f32.mrb[58].mxu0  ;;  %v861_v8 = vpop.f32.mrb[59].mxu1 }
 0x188   :  { %v1038_v9 = vpop.f32.mrb[59].mxu0 }
 0x189   :  { %v1037_v10 = vadd.f32 %v1036_v7, %v860_v6  ;;  %v1092_v11 = vmax.f32 %v1034_v5, 0.0 }
 0x18b   :  { %v1093_v12 = vmax.f32 %v1037_v10, 0.0 }
 0x18c   :  { %v864_v13 = vpop.f32.mrb[60].mxu1 }
 0x18d   :  { %v1534_v14 = vpack.c.bf16 %v1093_v12, %v1092_v11  ;;  %v865_v15 = vadd.f32 %v2149_v41, %v864_v13  ;;  %v1041_v16 = vpop.f32.mrb[60].mxu0  ;;  %v866_v17 = vpop.f32.mrb[61].mxu1 }
 0x18e   :  { %v1043_v18 = vpop.f32.mrb[61].mxu0  ;;  %v867_v19 = vpop.f32.mrb[62].mxu1 }
 0x18f   :  { %1564 = vst [vmem:[%s2244_s3 + $0x70] sm:$0xff] %v1534_v14   ;;  %v1042_v20 = vadd.f32 %v1041_v16, %v865_v15  ;;  %v868_v21 = vadd.f32 %v2149_v41, %v867_v19  ;;  %v1044_v22 = vpop.f32.mrb[62].mxu0  ;;  %v869_v23 = vpop.f32.mrb[63].mxu1 }
 0x190   :  { %v1046_v24 = vpop.f32.mrb[63].mxu0 }
 0x191   :  { %v1045_v25 = vadd.f32 %v1044_v22, %v868_v21  ;;  %v1094_v26 = vmax.f32 %v1042_v20, 0.0 }
 0x193   :  { %v1095_v27 = vmax.f32 %v1045_v25, 0.0 }
 0x194   :  { %v872_v28 = vpop.f32.mrb[64].mxu1 }
 0x195   :  { %v1539_v29 = vpack.c.bf16 %v1095_v27, %v1094_v26  ;;  %v873_v30 = vadd.f32 %v2149_v41, %v872_v28  ;;  %v1049_v31 = vpop.f32.mrb[64].mxu0  ;;  %v874_v32 = vpop.f32.mrb[65].mxu1 }
 0x196   :  { %v1051_v33 = vpop.f32.mrb[65].mxu0  ;;  %v875_v34 = vpop.f32.mrb[66].mxu1 }
 0x197   :  { %1565 = vst [vmem:[%s2244_s3 + $0x78] sm:$0xff] %v1539_v29   ;;  %v1050_v35 = vadd.f32 %v1049_v31, %v873_v30  ;;  %v876_v36 = vadd.f32 %v2149_v41, %v875_v34  ;;  %v1052_v37 = vpop.f32.mrb[66].mxu0  ;;  %v877_v38 = vpop.f32.mrb[67].mxu1 }
 0x198   :  { %v1054_v39 = vpop.f32.mrb[67].mxu0 }
 0x199   :  { %v1053_v40 = vadd.f32 %v1052_v37, %v876_v36  ;;  %v1096_v42 = vmax.f32 %v1050_v35, 0.0 }
 0x19b   :  { %v1097_v43 = vmax.f32 %v1053_v40, 0.0 }
 0x19c   :  { %v880_v44 = vpop.f32.mrb[68].mxu1 }
 0x19d   :  { %v1544_v45 = vpack.c.bf16 %v1097_v43, %v1096_v42  ;;  %v881_v46 = vadd.f32 %v2149_v41, %v880_v44  ;;  %v1057_v47 = vpop.f32.mrb[68].mxu0  ;;  %v882_v48 = vpop.f32.mrb[69].mxu1 }
 0x19e   :  { %v1059_v49 = vpop.f32.mrb[69].mxu0  ;;  %v883_v50 = vpop.f32.mrb[70].mxu1 }
 0x19f   :  { %1566 = vst [vmem:[%s2244_s3 + $0x80] sm:$0xff] %v1544_v45   ;;  %v1058_v51 = vadd.f32 %v1057_v47, %v881_v46  ;;  %v884_v52 = vadd.f32 %v2149_v41, %v883_v50  ;;  %v1060_v53 = vpop.f32.mrb[70].mxu0  ;;  %v885_v54 = vpop.f32.mrb[71].mxu1 }
 0x1a0   :  { %v1062_v55 = vpop.f32.mrb[71].mxu0 }
 0x1a1   :  { %v1061_v56 = vadd.f32 %v1060_v53, %v884_v52  ;;  %v1098_v57 = vmax.f32 %v1058_v51, 0.0 }
 0x1a3   :  { %v1099_v58 = vmax.f32 %v1061_v56, 0.0 }
 0x1a5   :  { %v1549_v59 = vpack.c.bf16 %v1099_v58, %v1098_v57 }
 0x1a7   :  { %1567 = vst [vmem:[%s2244_s3 + $0x88] sm:$0xff] %v1549_v59  }

// kernel: encoder_forward.8
= control target key start
LH: loop header
LB: loop body
LE: loop exit
PB: predicated region body
PF: predicated region fallthrough
CT: control target
= control target key end

     0   :  { %s1240_s1 = inlined_call_operand.vmem [shape: bf16[512,128], index: 1, kind: input, shape index: {}]   ;;  %s1241_s0 = inlined_call_operand.vmem [shape: bf16[98,512], index: 0, kind: input, shape index: {}]   ;;  %s1242_s2 = inlined_call_operand.vmem [shape: f32[1,128], index: 2, kind: input, shape index: {}]   ;;  %s1243_s3 = inlined_call_operand.vmem [shape: bf16[98,128], index: 3, kind: output, shape index: {}]  }
   0x1   :  { %v935_v0 = vld [vmem:[%s1240_s1 + $0x40] sm:$0xff]   ;;  %v939_v4 = vld [vmem:[%s1240_s1 + $0x48] sm:$0xff]   ;;  %v943_v8 = vld [vmem:[%s1240_s1 + $0x50] sm:$0xff]  }
   0x2   :  { %v936_v1 = vld [vmem:[%s1240_s1 + $0xc0] sm:$0xff]   ;;  %819 = vmatprep.subr.bf16.mxu0 %v935_v0  ;;  %v940_v5 = vld [vmem:[%s1240_s1 + $0xc8] sm:$0xff]   ;;  %v944_v9 = vld [vmem:[%s1240_s1 + $0xd0] sm:$0xff]  }
   0x3   :  { %v937_v2 = vld [vmem:[%s1240_s1] sm:$0xff]   ;;  %877 = vmatprep.subr.bf16.mxu1 %v936_v1  ;;  %v941_v6 = vld [vmem:[%s1240_s1 + $0x8] sm:$0xff]   ;;  %v945_v10 = vld [vmem:[%s1240_s1 + $0x10] sm:$0xff]  }
   0x4   :  { %v938_v3 = vld [vmem:[%s1240_s1 + $0x80] sm:$0xff]   ;;  %820 = vmatpush3.bf16.msra.mxu0 %v937_v2  ;;  %v942_v7 = vld [vmem:[%s1240_s1 + $0x88] sm:$0xff]   ;;  %v946_v11 = vld [vmem:[%s1240_s1 + $0x90] sm:$0xff]  }
   0x5   :  { %878 = vmatpush3.bf16.msra.mxu1 %v938_v3  ;;  %821 = vmatprep.subr.bf16.mxu0 %v939_v4  ;;  %v947_v12 = vld [vmem:[%s1240_s1 + $0x58] sm:$0xff]   ;;  %v951_v16 = vld [vmem:[%s1240_s1 + $0x60] sm:$0xff]   ;;  %v955_v20 = vld [vmem:[%s1240_s1 + $0x68] sm:$0xff]  }
   0x6   :  { %879 = vmatprep.subr.bf16.mxu1 %v940_v5  ;;  %v948_v13 = vld [vmem:[%s1240_s1 + $0xd8] sm:$0xff]   ;;  %v952_v17 = vld [vmem:[%s1240_s1 + $0xe0] sm:$0xff]   ;;  %v956_v21 = vld [vmem:[%s1240_s1 + $0xe8] sm:$0xff]  }
   0x7   :  { %v949_v14 = vld [vmem:[%s1240_s1 + $0x18] sm:$0xff]   ;;  %v953_v18 = vld [vmem:[%s1240_s1 + $0x20] sm:$0xff]   ;;  %v957_v22 = vld [vmem:[%s1240_s1 + $0x28] sm:$0xff]  }
   0x8   :  { %822 = vmatpush3.bf16.msra.mxu0 %v941_v6  ;;  %v950_v15 = vld [vmem:[%s1240_s1 + $0x98] sm:$0xff]   ;;  %v954_v19 = vld [vmem:[%s1240_s1 + $0xa0] sm:$0xff]   ;;  %v958_v23 = vld [vmem:[%s1240_s1 + $0xa8] sm:$0xff]  }
   0x9   :  { %880 = vmatpush3.bf16.msra.mxu1 %v942_v7  ;;  %823 = vmatprep.subr.bf16.mxu0 %v943_v8  ;;  %v959_v24 = vld [vmem:[%s1240_s1 + $0x70] sm:$0xff]   ;;  %v963_v28 = vld [vmem:[%s1240_s1 + $0x78] sm:$0xff]   ;;  %v39_v54 = vld [vmem:[%s1241_s0 + $0xc0] sm:$0x11] }
   0xa   :  { %881 = vmatprep.subr.bf16.mxu1 %v944_v9  ;;  %v960_v25 = vld [vmem:[%s1240_s1 + $0xf0] sm:$0xff]   ;;  %v964_v29 = vld [vmem:[%s1240_s1 + $0xf8] sm:$0xff]   ;;  %v40_v55 = vld [vmem:[%s1241_s0 + $0xc8] sm:$0x11]  ;;  %v723_v58 = vcombine.high %v39_v54, %v39_v54  ;;  %v722_v60 = vcombine.low %v39_v54, %v39_v54 }
   0xb   :  { %v961_v26 = vld [vmem:[%s1240_s1 + $0x30] sm:$0xff]   ;;  %v965_v30 = vld [vmem:[%s1240_s1 + $0x38] sm:$0xff]   ;;  %v725_v59 = vcombine.high %v40_v55, %v40_v55  ;;  %v724_v61 = vcombine.low %v40_v55, %v40_v55  ;;  %v1204_v0 = vld [vmem:[%s1242_s2] ss:$0 sm:$0xff] }
   0xc   :  { %824 = vmatpush3.bf16.msra.mxu0 %v945_v10  ;;  %v962_v27 = vld [vmem:[%s1240_s1 + $0xb0] sm:$0xff]   ;;  %v966_v31 = vld [vmem:[%s1240_s1 + $0xb8] sm:$0xff]  }
   0xd   :  { %882 = vmatpush3.bf16.msra.mxu1 %v946_v11  ;;  %825 = vmatprep.subr.bf16.mxu0 %v947_v12  ;;  %v967_v32 = vld [vmem:[%s1241_s0] ss:$16 sps:$4 sm:$0xff]   ;;  %v969_v33 = vld [vmem:[%s1241_s0 + $0x4] ss:$16 sps:$4 sm:$0xff]   ;;  %v970_v34 = vld [vmem:[%s1241_s0 + $0x8] ss:$16 sps:$4 sm:$0xff]  }
   0xe   :  { %883 = vmatprep.subr.bf16.mxu1 %v948_v13  ;;  %v972_v35 = vld [vmem:[%s1241_s0 + $0xc] ss:$16 sps:$4 sm:$0xff]   ;;  %470 = vmatprep.mubr.bf16.mxu0 %v969_v33  ;;  %v973_v36 = vld [vmem:[%s1241_s0 + $0x24] ss:$16 sps:$4 sm:$0xff]   ;;  %v977_v38 = vld [vmem:[%s1241_s0 + $0x20] ss:$16 sps:$4 sm:$0xff]  }
   0xf   :  { %558 = vmatprep.mubr.bf16.mxu1 %v972_v35  ;;  %v975_v37 = vld [vmem:[%s1241_s0 + $0x2c] ss:$16 sps:$4 sm:$0xff]   ;;  %v978_v39 = vld [vmem:[%s1241_s0 + $0x28] ss:$16 sps:$4 sm:$0xff]   ;;  %v979_v40 = vld [vmem:[%s1241_s0 + $0x44] ss:$16 sps:$4 sm:$0xff]  }
  0x10   :  { %826 = vmatpush3.bf16.msra.mxu0 %v949_v14  ;;  %v981_v41 = vld [vmem:[%s1241_s0 + $0x4c] ss:$16 sps:$4 sm:$0xff]   ;;  %v983_v42 = vld [vmem:[%s1241_s0 + $0x40] ss:$16 sps:$4 sm:$0xff]   ;;  %v984_v43 = vld [vmem:[%s1241_s0 + $0x48] ss:$16 sps:$4 sm:$0xff]  }
  0x11   :  { %884 = vmatpush3.bf16.msra.mxu1 %v950_v15  ;;  %827 = vmatprep.subr.bf16.mxu0 %v951_v16  ;;  %v985_v44 = vld [vmem:[%s1241_s0 + $0x64] ss:$16 sps:$4 sm:$0xff]   ;;  %v987_v45 = vld [vmem:[%s1241_s0 + $0x6c] ss:$16 sps:$4 sm:$0xff]   ;;  %v989_v46 = vld [vmem:[%s1241_s0 + $0x60] ss:$16 sps:$4 sm:$0xff]  }
  0x12   :  { %885 = vmatprep.subr.bf16.mxu1 %v952_v17  ;;  %v990_v47 = vld [vmem:[%s1241_s0 + $0x68] ss:$16 sps:$4 sm:$0xff]   ;;  %v991_v48 = vld [vmem:[%s1241_s0 + $0x84] ss:$16 sps:$4 sm:$0xff]   ;;  %v993_v49 = vld [vmem:[%s1241_s0 + $0x8c] ss:$16 sps:$4 sm:$0xff]  }
  0x13   :  { %v995_v50 = vld [vmem:[%s1241_s0 + $0x80] ss:$16 sps:$4 sm:$0xff]   ;;  %v996_v51 = vld [vmem:[%s1241_s0 + $0x88] ss:$16 sps:$4 sm:$0xff]   ;;  %v997_v52 = vld [vmem:[%s1241_s0 + $0xa4] ss:$16 sps:$4 sm:$0xff]  }
  0x14   :  { %828 = vmatpush3.bf16.msra.mxu0 %v953_v18  ;;  %v999_v53 = vld [vmem:[%s1241_s0 + $0xac] ss:$16 sps:$4 sm:$0xff]   ;;  %v1001_v56 = vld [vmem:[%s1241_s0 + $0xa0] ss:$16 sps:$4 sm:$0xff]   ;;  %v1002_v57 = vld [vmem:[%s1241_s0 + $0xa8] ss:$16 sps:$4 sm:$0xff]  }
  0x15   :  { %886 = vmatpush3.bf16.msra.mxu1 %v954_v19  ;;  %829 = vmatprep.subr.bf16.mxu0 %v955_v20 }
  0x16   :  { %887 = vmatprep.subr.bf16.mxu1 %v956_v21 }
  0x18   :  { %830 = vmatpush3.bf16.msra.mxu0 %v957_v22 }
  0x19   :  { %888 = vmatpush3.bf16.msra.mxu1 %v958_v23  ;;  %831 = vmatprep.subr.bf16.mxu0 %v959_v24 }
  0x1a   :  { %889 = vmatprep.subr.bf16.mxu1 %v960_v25 }
  0x1c   :  { %832 = vmatpush3.bf16.msra.mxu0 %v961_v26 }
  0x1d   :  { %890 = vmatpush3.bf16.msra.mxu1 %v962_v27  ;;  %833 = vmatprep.subr.bf16.mxu0 %v963_v28 }
  0x1e   :  { %891 = vmatprep.subr.bf16.mxu1 %v964_v29 }
  0x20   :  { %834 = vmatpush3.bf16.msra.mxu0 %v965_v30 }
  0x21   :  { %892 = vmatpush3.bf16.msra.mxu1 %v966_v31 }
  0x23   :  { %471 = vmatmul.mubr.bf16.vlgmr.msra.gmra.mrb[0].mxu0 %v967_v32 }
  0x24   :  { %559 = vmatmul.mubr.bf16.vlgmr.msra.gmra.mrb[0].mxu1 %v970_v34  ;;  %478 = vmatprep.mubr.bf16.mxu0 %v973_v36 }
  0x25   :  { %566 = vmatprep.mubr.bf16.mxu1 %v975_v37 }
  0x2b   :  { %479 = vmatmul.mubr.bf16.gmra.mrb[4].mxu0 %v977_v38 }
  0x2c   :  { %567 = vmatmul.mubr.bf16.gmra.mrb[4].mxu1 %v978_v39  ;;  %486 = vmatprep.mubr.bf16.mxu0 %v979_v40 }
  0x2d   :  { %574 = vmatprep.mubr.bf16.mxu1 %v981_v41 }
  0x33   :  { %487 = vmatmul.mubr.bf16.gmra.mrb[8].mxu0 %v983_v42 }
  0x34   :  { %575 = vmatmul.mubr.bf16.gmra.mrb[8].mxu1 %v984_v43  ;;  %494 = vmatprep.mubr.bf16.mxu0 %v985_v44 }
  0x35   :  { %582 = vmatprep.mubr.bf16.mxu1 %v987_v45 }
  0x3b   :  { %495 = vmatmul.mubr.bf16.gmra.mrb[12].mxu0 %v989_v46 }
  0x3c   :  { %583 = vmatmul.mubr.bf16.gmra.mrb[12].mxu1 %v990_v47  ;;  %502 = vmatprep.mubr.bf16.mxu0 %v991_v48 }
  0x3d   :  { %590 = vmatprep.mubr.bf16.mxu1 %v993_v49 }
  0x43   :  { %503 = vmatmul.mubr.bf16.gmra.mrb[16].mxu0 %v995_v50 }
  0x44   :  { %591 = vmatmul.mubr.bf16.gmra.mrb[16].mxu1 %v996_v51  ;;  %510 = vmatprep.mubr.bf16.mxu0 %v997_v52 }
  0x45   :  { %598 = vmatprep.mubr.bf16.mxu1 %v999_v53 }
  0x4b   :  { %511 = vmatmul.mubr.bf16.gmra.mrb[20].mxu0 %v1001_v56 }
  0x4c   :  { %599 = vmatmul.mubr.bf16.gmra.mrb[20].mxu1 %v1002_v57  ;;  %518 = vmatprep.mubr.bf16.mxu0 %v723_v58 }
  0x4d   :  { %606 = vmatprep.mubr.bf16.mxu1 %v725_v59 }
  0x53   :  { %519 = vmatmul.mubr.bf16.gmra.mrb[24].mxu0 %v722_v60 }
  0x54   :  { %607 = vmatmul.mubr.bf16.gmra.mrb[24].mxu1 %v724_v61 }
  0xf6   :  { %v835_v62 = vpop.f32.mrb[0].mxu0 }
  0xf7   :  { %v893_v63 = vpop.f32.mrb[0].mxu1  ;;  %v836_v1 = vpop.f32.mrb[1].mxu0 }
  0xf8   :  { %v837_v2 = vadd.f32 %v836_v1, %v835_v62  ;;  %v894_v3 = vpop.f32.mrb[1].mxu1  ;;  %v838_v4 = vpop.f32.mrb[2].mxu0 }
  0xf9   :  { %v895_v5 = vadd.f32 %v894_v3, %v893_v63  ;;  %v896_v6 = vpop.f32.mrb[2].mxu1  ;;  %v839_v7 = vpop.f32.mrb[3].mxu0 }
  0xfa   :  { %v473_v8 = vadd.f32 %v837_v2, %v1204_v0  ;;  %v840_v9 = vadd.f32 %v839_v7, %v838_v4  ;;  %v897_v10 = vpop.f32.mrb[3].mxu1 }
  0xfb   :  { %v898_v11 = vadd.f32 %v897_v10, %v896_v6 }
  0xfc   :  { %v561_v12 = vadd.f32 %v895_v5, %v473_v8  ;;  %v476_v13 = vadd.f32 %v840_v9, %v1204_v0 }
  0xfe   :  { %v564_v14 = vadd.f32 %v898_v11, %v476_v13  ;;  %v841_v15 = vpop.f32.mrb[4].mxu0  ;;  %v614_v18 = vmax.f32 %v561_v12, 0.0 }
  0xff   :  { %v899_v16 = vpop.f32.mrb[4].mxu1  ;;  %v842_v17 = vpop.f32.mrb[5].mxu0 }
 0x100   :  { %v615_v19 = vmax.f32 %v564_v14, 0.0  ;;  %v843_v20 = vadd.f32 %v842_v17, %v841_v15  ;;  %v900_v21 = vpop.f32.mrb[5].mxu1  ;;  %v844_v22 = vpop.f32.mrb[6].mxu0 }
 0x101   :  { %v901_v23 = vadd.f32 %v900_v21, %v899_v16  ;;  %v902_v24 = vpop.f32.mrb[6].mxu1  ;;  %v845_v25 = vpop.f32.mrb[7].mxu0 }
 0x102   :  { %v787_v26 = vpack.c.bf16 %v615_v19, %v614_v18  ;;  %v481_v27 = vadd.f32 %v843_v20, %v1204_v0  ;;  %v846_v28 = vadd.f32 %v845_v25, %v844_v22  ;;  %v903_v29 = vpop.f32.mrb[7].mxu1 }
 0x103   :  { %v904_v30 = vadd.f32 %v903_v29, %v902_v24 }
 0x104   :  { %788 = vst [vmem:[%s1243_s3] sm:$0xff] %v787_v26   ;;  %v569_v31 = vadd.f32 %v901_v23, %v481_v27  ;;  %v484_v32 = vadd.f32 %v846_v28, %v1204_v0 }
 0x106   :  { %v572_v33 = vadd.f32 %v904_v30, %v484_v32  ;;  %v847_v34 = vpop.f32.mrb[8].mxu0  ;;  %v616_v37 = vmax.f32 %v569_v31, 0.0 }
 0x107   :  { %v905_v35 = vpop.f32.mrb[8].mxu1  ;;  %v848_v36 = vpop.f32.mrb[9].mxu0 }
 0x108   :  { %v617_v38 = vmax.f32 %v572_v33, 0.0  ;;  %v849_v39 = vadd.f32 %v848_v36, %v847_v34  ;;  %v906_v40 = vpop.f32.mrb[9].mxu1  ;;  %v850_v41 = vpop.f32.mrb[10].mxu0 }
 0x109   :  { %v907_v42 = vadd.f32 %v906_v40, %v905_v35  ;;  %v908_v43 = vpop.f32.mrb[10].mxu1  ;;  %v851_v44 = vpop.f32.mrb[11].mxu0 }
 0x10a   :  { %v792_v45 = vpack.c.bf16 %v617_v38, %v616_v37  ;;  %v489_v46 = vadd.f32 %v849_v39, %v1204_v0  ;;  %v852_v47 = vadd.f32 %v851_v44, %v850_v41  ;;  %v909_v48 = vpop.f32.mrb[11].mxu1 }
 0x10b   :  { %v910_v49 = vadd.f32 %v909_v48, %v908_v43 }
 0x10c   :  { %814 = vst [vmem:[%s1243_s3 + $0x8] sm:$0xff] %v792_v45   ;;  %v577_v50 = vadd.f32 %v907_v42, %v489_v46  ;;  %v492_v51 = vadd.f32 %v852_v47, %v1204_v0 }
 0x10e   :  { %v580_v52 = vadd.f32 %v910_v49, %v492_v51  ;;  %v853_v53 = vpop.f32.mrb[12].mxu0  ;;  %v618_v56 = vmax.f32 %v577_v50, 0.0 }
 0x10f   :  { %v911_v54 = vpop.f32.mrb[12].mxu1  ;;  %v854_v55 = vpop.f32.mrb[13].mxu0 }
 0x110   :  { %v619_v57 = vmax.f32 %v580_v52, 0.0  ;;  %v855_v58 = vadd.f32 %v854_v55, %v853_v53  ;;  %v912_v59 = vpop.f32.mrb[13].mxu1  ;;  %v856_v60 = vpop.f32.mrb[14].mxu0 }
 0x111   :  { %v913_v61 = vadd.f32 %v912_v59, %v911_v54  ;;  %v914_v62 = vpop.f32.mrb[14].mxu1  ;;  %v857_v63 = vpop.f32.mrb[15].mxu0 }
 0x112   :  { %v797_v1 = vpack.c.bf16 %v619_v57, %v618_v56  ;;  %v497_v2 = vadd.f32 %v855_v58, %v1204_v0  ;;  %v858_v3 = vadd.f32 %v857_v63, %v856_v60  ;;  %v915_v4 = vpop.f32.mrb[15].mxu1 }
 0x113   :  { %v916_v5 = vadd.f32 %v915_v4, %v914_v62 }
 0x114   :  { %815 = vst [vmem:[%s1243_s3 + $0x10] sm:$0xff] %v797_v1   ;;  %v585_v6 = vadd.f32 %v913_v61, %v497_v2  ;;  %v500_v7 = vadd.f32 %v858_v3, %v1204_v0 }
 0x116   :  { %v588_v8 = vadd.f32 %v916_v5, %v500_v7  ;;  %v859_v9 = vpop.f32.mrb[16].mxu0  ;;  %v620_v12 = vmax.f32 %v585_v6, 0.0 }
 0x117   :  { %v917_v10 = vpop.f32.mrb[16].mxu1  ;;  %v860_v11 = vpop.f32.mrb[17].mxu0 }
 0x118   :  { %v621_v13 = vmax.f32 %v588_v8, 0.0  ;;  %v861_v14 = vadd.f32 %v860_v11, %v859_v9  ;;  %v918_v15 = vpop.f32.mrb[17].mxu1  ;;  %v862_v16 = vpop.f32.mrb[18].mxu0 }
 0x119   :  { %v919_v17 = vadd.f32 %v918_v15, %v917_v10  ;;  %v920_v18 = vpop.f32.mrb[18].mxu1  ;;  %v863_v19 = vpop.f32.mrb[19].mxu0 }
 0x11a   :  { %v802_v20 = vpack.c.bf16 %v621_v13, %v620_v12  ;;  %v505_v21 = vadd.f32 %v861_v14, %v1204_v0  ;;  %v864_v22 = vadd.f32 %v863_v19, %v862_v16  ;;  %v921_v23 = vpop.f32.mrb[19].mxu1 }
 0x11b   :  { %v922_v24 = vadd.f32 %v921_v23, %v920_v18 }
 0x11c   :  { %816 = vst [vmem:[%s1243_s3 + $0x18] sm:$0xff] %v802_v20   ;;  %v593_v25 = vadd.f32 %v919_v17, %v505_v21  ;;  %v508_v26 = vadd.f32 %v864_v22, %v1204_v0 }
 0x11e   :  { %v596_v27 = vadd.f32 %v922_v24, %v508_v26  ;;  %v865_v28 = vpop.f32.mrb[20].mxu0  ;;  %v622_v31 = vmax.f32 %v593_v25, 0.0 }
 0x11f   :  { %v923_v29 = vpop.f32.mrb[20].mxu1  ;;  %v866_v30 = vpop.f32.mrb[21].mxu0 }
 0x120   :  { %v623_v32 = vmax.f32 %v596_v27, 0.0  ;;  %v867_v33 = vadd.f32 %v866_v30, %v865_v28  ;;  %v924_v34 = vpop.f32.mrb[21].mxu1  ;;  %v868_v35 = vpop.f32.mrb[22].mxu0 }
 0x121   :  { %v925_v36 = vadd.f32 %v924_v34, %v923_v29  ;;  %v926_v37 = vpop.f32.mrb[22].mxu1  ;;  %v869_v38 = vpop.f32.mrb[23].mxu0 }
 0x122   :  { %v807_v39 = vpack.c.bf16 %v623_v32, %v622_v31  ;;  %v513_v40 = vadd.f32 %v867_v33, %v1204_v0  ;;  %v870_v41 = vadd.f32 %v869_v38, %v868_v35  ;;  %v927_v42 = vpop.f32.mrb[23].mxu1 }
 0x123   :  { %v928_v43 = vadd.f32 %v927_v42, %v926_v37 }
 0x124   :  { %817 = vst [vmem:[%s1243_s3 + $0x20] sm:$0xff] %v807_v39   ;;  %v601_v44 = vadd.f32 %v925_v36, %v513_v40  ;;  %v516_v45 = vadd.f32 %v870_v41, %v1204_v0 }
 0x126   :  { %v604_v46 = vadd.f32 %v928_v43, %v516_v45  ;;  %v871_v47 = vpop.f32.mrb[24].mxu0  ;;  %v624_v50 = vmax.f32 %v601_v44, 0.0 }
 0x127   :  { %v929_v48 = vpop.f32.mrb[24].mxu1  ;;  %v872_v49 = vpop.f32.mrb[25].mxu0 }
 0x128   :  { %v625_v51 = vmax.f32 %v604_v46, 0.0  ;;  %v873_v52 = vadd.f32 %v872_v49, %v871_v47  ;;  %v930_v53 = vpop.f32.mrb[25].mxu1  ;;  %v874_v54 = vpop.f32.mrb[26].mxu0 }
 0x129   :  { %v931_v55 = vadd.f32 %v930_v53, %v929_v48  ;;  %v932_v56 = vpop.f32.mrb[26].mxu1  ;;  %v875_v57 = vpop.f32.mrb[27].mxu0 }
 0x12a   :  { %v812_v58 = vpack.c.bf16 %v625_v51, %v624_v50  ;;  %v521_v59 = vadd.f32 %v873_v52, %v1204_v0  ;;  %v933_v60 = vpop.f32.mrb[27].mxu1 }
 0x12c   :  { %818 = vst [vmem:[%s1243_s3 + $0x28] sm:$0xff] %v812_v58   ;;  %v609_v61 = vadd.f32 %v931_v55, %v521_v59 }
 0x12e   :  { %v626_v62 = vmax.f32 %v609_v61, 0.0 }
 0x130   :  { %v783_v63 = vpack.c.bf16 %v626_v62, %v626_v62 }
 0x132   :  { %692 = vst [vmem:[%s1243_s3 + $0x30] sm:$0x1] %v783_v63 }

// kernel: encoder_forward.9
= control target key start
LH: loop header
LB: loop body
LE: loop exit
PB: predicated region body
PF: predicated region fallthrough
CT: control target
= control target key end

     0   :  { %v815_v36 = vlaneseq  ;;  %v8478_v37 = vmov 1966171168   ;;  %s11178_s0 = inlined_call_operand.vmem [shape: bf16[2,6272], index: 0, kind: input, shape index: {}]   ;;  %s11179_s1 = inlined_call_operand.vmem [shape: bf16[6272,256], index: 1, kind: input, shape index: {}]   ;;  %s11180_s2 = inlined_call_operand.vmem [shape: f32[1,256], index: 2, kind: input, shape index: {}]   ;;  %s11181_s3 = inlined_call_operand.vmem [shape: bf16[256,64], index: 3, kind: input, shape index: {}]   ;;  %s11182_s4 = inlined_call_operand.vmem [shape: f32[1,64], index: 4, kind: input, shape index: {}]   ;;  %s11183_s5 = inlined_call_operand.hbm [shape: f32[2,64], index: 5, kind: output, shape index: {}]  }
   0x1   :  { %v7252_v0 = vld [vmem:[%s11179_s1 + $0x4] ss:$8 sps:$4 sm:$0xff]   ;;  %v7256_v2 = vld [vmem:[%s11179_s1] ss:$8 sps:$4 sm:$0xff]   ;;  %v7258_v4 = vld [vmem:[%s11179_s1 + $0x14] ss:$8 sps:$4 sm:$0xff]   ;;  %v834_v38 = vunpack.c.l.s4 %v8478_v37 }
   0x2   :  { %v7254_v1 = vld [vmem:[%s11179_s1 + $0xc04] ss:$8 sps:$4 sm:$0xff]   ;;  %5109 = vmatprep.subr.bf16.mxu1 %v7252_v0  ;;  %v7257_v3 = vld [vmem:[%s11179_s1 + $0xc00] ss:$8 sps:$4 sm:$0xff]   ;;  %v7260_v5 = vld [vmem:[%s11179_s1 + $0xc14] ss:$8 sps:$4 sm:$0xff]  }
   0x3   :  { %5601 = vmatprep.subr.bf16.mxu0 %v7254_v1  ;;  %5110 = vmatpush1.bf16.msra.mxu1 %v7256_v2  ;;  %v7262_v6 = vld [vmem:[%s11179_s1 + $0x10] ss:$8 sps:$4 sm:$0xff]   ;;  %v7264_v8 = vld [vmem:[%s11179_s1 + $0x24] ss:$8 sps:$4 sm:$0xff]   ;;  %v7268_v10 = vld [vmem:[%s11179_s1 + $0x20] ss:$8 sps:$4 sm:$0xff]   ;;  %v835_v43 = vunpack.c.0.s8 %v834_v38 }
   0x4   :  { %5602 = vmatpush1.bf16.msra.mxu0 %v7257_v3  ;;  %5111 = vmatprep.subr.bf16.mxu1 %v7258_v4  ;;  %v7263_v7 = vld [vmem:[%s11179_s1 + $0xc10] ss:$8 sps:$4 sm:$0xff]   ;;  %v7266_v9 = vld [vmem:[%s11179_s1 + $0xc24] ss:$8 sps:$4 sm:$0xff]   ;;  %v7269_v11 = vld [vmem:[%s11179_s1 + $0xc20] ss:$8 sps:$4 sm:$0xff]  }
   0x5   :  { %5603 = vmatprep.subr.bf16.mxu0 %v7260_v5  ;;  %v7270_v12 = vld [vmem:[%s11179_s1 + $0x34] ss:$8 sps:$4 sm:$0xff]   ;;  %v7274_v14 = vld [vmem:[%s11179_s1 + $0x30] ss:$8 sps:$4 sm:$0xff]   ;;  %v7276_v16 = vld [vmem:[%s11179_s1 + $0x44] ss:$8 sps:$4 sm:$0xff]  }
   0x6   :  { %v7272_v13 = vld [vmem:[%s11179_s1 + $0xc34] ss:$8 sps:$4 sm:$0xff]   ;;  %v7275_v15 = vld [vmem:[%s11179_s1 + $0xc30] ss:$8 sps:$4 sm:$0xff]   ;;  %v7278_v17 = vld [vmem:[%s11179_s1 + $0xc44] ss:$8 sps:$4 sm:$0xff]  }
   0x7   :  { %5112 = vmatpush1.bf16.msra.mxu1 %v7262_v6  ;;  %v7280_v18 = vld [vmem:[%s11179_s1 + $0x40] ss:$8 sps:$4 sm:$0xff]   ;;  %v7282_v20 = vld [vmem:[%s11179_s1 + $0x54] ss:$8 sps:$4 sm:$0xff]   ;;  %v7286_v22 = vld [vmem:[%s11179_s1 + $0x50] ss:$8 sps:$4 sm:$0xff]  }
   0x8   :  { %5604 = vmatpush1.bf16.msra.mxu0 %v7263_v7  ;;  %5113 = vmatprep.subr.bf16.mxu1 %v7264_v8  ;;  %v7281_v19 = vld [vmem:[%s11179_s1 + $0xc40] ss:$8 sps:$4 sm:$0xff]   ;;  %v7284_v21 = vld [vmem:[%s11179_s1 + $0xc54] ss:$8 sps:$4 sm:$0xff]   ;;  %v7287_v23 = vld [vmem:[%s11179_s1 + $0xc50] ss:$8 sps:$4 sm:$0xff]  }
   0x9   :  { %5605 = vmatprep.subr.bf16.mxu0 %v7266_v9  ;;  %v7288_v24 = vld [vmem:[%s11179_s1 + $0x64] ss:$8 sps:$4 sm:$0xff]   ;;  %v7292_v26 = vld [vmem:[%s11179_s1 + $0x60] ss:$8 sps:$4 sm:$0xff]   ;;  %v7294_v28 = vld [vmem:[%s11179_s1 + $0x74] ss:$8 sps:$4 sm:$0xff]  }
   0xa   :  { %v7290_v25 = vld [vmem:[%s11179_s1 + $0xc64] ss:$8 sps:$4 sm:$0xff]   ;;  %v7293_v27 = vld [vmem:[%s11179_s1 + $0xc60] ss:$8 sps:$4 sm:$0xff]   ;;  %v7296_v29 = vld [vmem:[%s11179_s1 + $0xc74] ss:$8 sps:$4 sm:$0xff]  }
   0xb   :  { %5114 = vmatpush1.bf16.msra.mxu1 %v7268_v10  ;;  %v7298_v30 = vld [vmem:[%s11179_s1 + $0x70] ss:$8 sps:$4 sm:$0xff]   ;;  %v7300_v32 = vld [vmem:[%s11179_s1 + $0x84] ss:$8 sps:$4 sm:$0xff]   ;;  %v7304_v34 = vld [vmem:[%s11179_s1 + $0x80] ss:$8 sps:$4 sm:$0xff]  }
   0xc   :  { %5606 = vmatpush1.bf16.msra.mxu0 %v7269_v11  ;;  %5115 = vmatprep.subr.bf16.mxu1 %v7270_v12  ;;  %v7299_v31 = vld [vmem:[%s11179_s1 + $0xc70] ss:$8 sps:$4 sm:$0xff]   ;;  %v7302_v33 = vld [vmem:[%s11179_s1 + $0xc84] ss:$8 sps:$4 sm:$0xff]   ;;  %v7305_v35 = vld [vmem:[%s11179_s1 + $0xc80] ss:$8 sps:$4 sm:$0xff]  }
   0xd   :  { %5607 = vmatprep.subr.bf16.mxu0 %v7272_v13  ;;  %v7306_v39 = vld [vmem:[%s11179_s1 + $0x94] ss:$8 sps:$4 sm:$0xff]   ;;  %v7310_v41 = vld [vmem:[%s11179_s1 + $0x90] ss:$8 sps:$4 sm:$0xff]   ;;  %v8628_v42 = vshrl.u32 %v815_v36, 7  ;;  %v8657_v52 = vld [vmem:[%s11178_s0] sm:$0xff] }
   0xe   :  { %v7308_v40 = vld [vmem:[%s11179_s1 + $0xc94] ss:$8 sps:$4 sm:$0xff]   ;;  %v7311_v44 = vld [vmem:[%s11179_s1 + $0xc90] ss:$8 sps:$4 sm:$0xff]   ;;  %v7312_v45 = vld [vmem:[%s11179_s1 + $0xa4] ss:$8 sps:$4 sm:$0xff]  }
   0xf   :  { %5116 = vmatpush1.bf16.msra.mxu1 %v7274_v14  ;;  %v7314_v46 = vld [vmem:[%s11179_s1 + $0xca4] ss:$8 sps:$4 sm:$0xff]   ;;  %v7316_v47 = vld [vmem:[%s11179_s1 + $0xa0] ss:$8 sps:$4 sm:$0xff]   ;;  %v8646_v49 = vsub.s32 %v835_v43, %v8628_v42  ;;  %v7318_v50 = vld [vmem:[%s11179_s1 + $0xb4] ss:$8 sps:$4 sm:$0xff]  }
  0x10   :  { %5608 = vmatpush1.bf16.msra.mxu0 %v7275_v15  ;;  %5117 = vmatprep.subr.bf16.mxu1 %v7276_v16  ;;  %v7317_v48 = vld [vmem:[%s11179_s1 + $0xca0] ss:$8 sps:$4 sm:$0xff]   ;;  %v7320_v51 = vld [vmem:[%s11179_s1 + $0xcb4] ss:$8 sps:$4 sm:$0xff]   ;;  %v7322_v53 = vld [vmem:[%s11179_s1 + $0xb0] ss:$8 sps:$4 sm:$0xff]  }
  0x11   :  { %5609 = vmatprep.subr.bf16.mxu0 %v7278_v17  ;;  %v839_v54 = vrot.slane %v8657_v52, %v8646_v49  ;;  %v7323_v55 = vld [vmem:[%s11179_s1 + $0xcb0] ss:$8 sps:$4 sm:$0xff]   ;;  %v7324_v57 = vld [vmem:[%s11179_s1 + $0xc4] ss:$8 sps:$4 sm:$0xff]   ;;  %v7328_v63 = vld [vmem:[%s11179_s1 + $0xc0] ss:$8 sps:$4 sm:$0xff]  }
  0x12   :  { %v8670_v56 = vld [vmem:[%s11178_s0 + $0x18] sm:$0xff]  ;;  %v7326_v58 = vld [vmem:[%s11179_s1 + $0xcc4] ss:$8 sps:$4 sm:$0xff]   ;;  %v7329_v0 = vld [vmem:[%s11179_s1 + $0xcc0] ss:$8 sps:$4 sm:$0xff]  }
  0x13   :  { %5118 = vmatpush1.bf16.msra.mxu1 %v7280_v18  ;;  %v847_v59 = vcombine.high %v839_v54, %v839_v54  ;;  %v986_v60 = vrot.slane %v8670_v56, %v8646_v49  ;;  %v7330_v1 = vld [vmem:[%s11179_s1 + $0xd4] ss:$8 sps:$4 sm:$0xff]   ;;  %v7334_v4 = vld [vmem:[%s11179_s1 + $0xd0] ss:$8 sps:$4 sm:$0xff]   ;;  %v7336_v6 = vld [vmem:[%s11179_s1 + $0xe4] ss:$8 sps:$4 sm:$0xff]   ;;  %v8731_v16 = vrot.slane %v839_v54, %v8646_v49 }
  0x14   :  { %5610 = vmatpush1.bf16.msra.mxu0 %v7281_v19  ;;  %5119 = vmatprep.subr.bf16.mxu1 %v7282_v20  ;;  %v7332_v2 = vld [vmem:[%s11179_s1 + $0xcd4] ss:$8 sps:$4 sm:$0xff]   ;;  %v7335_v5 = vld [vmem:[%s11179_s1 + $0xcd0] ss:$8 sps:$4 sm:$0xff]   ;;  %v7338_v7 = vld [vmem:[%s11179_s1 + $0xce4] ss:$8 sps:$4 sm:$0xff]  }
  0x15   :  { %5611 = vmatprep.subr.bf16.mxu0 %v7284_v21  ;;  %v869_v61 = vrot.slane %v847_v59, %v8646_v49  ;;  %v994_v62 = vcombine.high %v986_v60, %v986_v60  ;;  %v7340_v8 = vld [vmem:[%s11179_s1 + $0xe0] ss:$8 sps:$4 sm:$0xff]   ;;  %v7342_v10 = vld [vmem:[%s11179_s1 + $0xf4] ss:$8 sps:$4 sm:$0xff]   ;;  %v7346_v12 = vld [vmem:[%s11179_s1 + $0xf0] ss:$8 sps:$4 sm:$0xff]   ;;  %v8734_v17 = vrot.slane %v986_v60, %v8646_v49 }
  0x16   :  { %v7341_v9 = vld [vmem:[%s11179_s1 + $0xce0] ss:$8 sps:$4 sm:$0xff]   ;;  %v7344_v11 = vld [vmem:[%s11179_s1 + $0xcf4] ss:$8 sps:$4 sm:$0xff]   ;;  %v7347_v13 = vld [vmem:[%s11179_s1 + $0xcf0] ss:$8 sps:$4 sm:$0xff]  }
  0x17   :  { %5120 = vmatpush1.bf16.msra.mxu1 %v7286_v22  ;;  %v1016_v3 = vrot.slane %v994_v62, %v8646_v49  ;;  %5141 = vmatprep.mubr.bf16.mxu1 %v869_v61  ;;  %v7351_v14 = vld [vmem:[%s11179_s1 + $0x104] ss:$8 sps:$4 sm:$0xff]   ;;  %v7349_v18 = vld [vmem:[%s11179_s1 + $0x100] ss:$8 sps:$4 sm:$0xff]   ;;  %v7358_v20 = vld [vmem:[%s11179_s1 + $0x114] ss:$8 sps:$4 sm:$0xff]   ;;  %v879_v22 = vcombine.high %v869_v61, %v869_v61 }
  0x18   :  { %5612 = vmatpush1.bf16.msra.mxu0 %v7287_v23  ;;  %5121 = vmatprep.subr.bf16.mxu1 %v7288_v24  ;;  %v7355_v15 = vld [vmem:[%s11179_s1 + $0xd04] ss:$8 sps:$4 sm:$0xff]   ;;  %v7353_v19 = vld [vmem:[%s11179_s1 + $0xd00] ss:$8 sps:$4 sm:$0xff]   ;;  %v7361_v21 = vld [vmem:[%s11179_s1 + $0xd14] ss:$8 sps:$4 sm:$0xff]  }
  0x19   :  { %5613 = vmatprep.subr.bf16.mxu0 %v7290_v25  ;;  %5633 = vmatprep.mubr.bf16.mxu0 %v1016_v3  ;;  %v1026_v23 = vcombine.high %v1016_v3, %v1016_v3  ;;  %v7356_v24 = vld [vmem:[%s11179_s1 + $0x110] ss:$8 sps:$4 sm:$0xff]   ;;  %v7374_v36 = vld [vmem:[%s11179_s1 + $0x140] ss:$8 sps:$4 sm:$0xff]   ;;  %v7382_v38 = vld [vmem:[%s11179_s1 + $0x154] ss:$8 sps:$4 sm:$0xff]  }
  0x1a   :  { %v7359_v25 = vld [vmem:[%s11179_s1 + $0xd10] ss:$8 sps:$4 sm:$0xff]   ;;  %v7377_v37 = vld [vmem:[%s11179_s1 + $0xd40] ss:$8 sps:$4 sm:$0xff]   ;;  %v7388_v43 = vld [vmem:[%s11179_s1 + $0x164] ss:$8 sps:$4 sm:$0xff]  }
  0x1b   :  { %5122 = vmatpush1.bf16.msra.mxu1 %v7292_v26  ;;  %v7364_v26 = vld [vmem:[%s11179_s1 + $0x124] ss:$8 sps:$4 sm:$0xff]   ;;  %v7409_v59 = vld [vmem:[%s11179_s1 + $0xd94] ss:$8 sps:$4 sm:$0xff]   ;;  %v7404_v60 = vld [vmem:[%s11179_s1 + $0x190] ss:$8 sps:$4 sm:$0xff]  }
  0x1c   :  { %5614 = vmatpush1.bf16.msra.mxu0 %v7293_v27  ;;  %5123 = vmatprep.subr.bf16.mxu1 %v7294_v28  ;;  %v7367_v27 = vld [vmem:[%s11179_s1 + $0xd24] ss:$8 sps:$4 sm:$0xff]   ;;  %v7362_v28 = vld [vmem:[%s11179_s1 + $0x120] ss:$8 sps:$4 sm:$0xff]   ;;  %v7407_v61 = vld [vmem:[%s11179_s1 + $0xd90] ss:$8 sps:$4 sm:$0xff]  }
  0x1d   :  { %5615 = vmatprep.subr.bf16.mxu0 %v7296_v29  ;;  %v7365_v29 = vld [vmem:[%s11179_s1 + $0xd20] ss:$8 sps:$4 sm:$0xff]   ;;  %v7403_v54 = vld [vmem:[%s11179_s1 + $0xd84] ss:$8 sps:$4 sm:$0xff]   ;;  %v7421_v3 = vld [vmem:[%s11179_s1 + $0xdb4] ss:$8 sps:$4 sm:$0xff]  }
  0x1e   :  { %v7412_v62 = vld [vmem:[%s11179_s1 + $0x1a4] ss:$8 sps:$4 sm:$0xff]  }
  0x1f   :  { %5124 = vmatpush1.bf16.msra.mxu1 %v7298_v30  ;;  %v7370_v30 = vld [vmem:[%s11179_s1 + $0x134] ss:$8 sps:$4 sm:$0xff]  }
  0x20   :  { %5616 = vmatpush1.bf16.msra.mxu0 %v7299_v31  ;;  %5125 = vmatprep.subr.bf16.mxu1 %v7300_v32  ;;  %v7373_v31 = vld [vmem:[%s11179_s1 + $0xd34] ss:$8 sps:$4 sm:$0xff]   ;;  %v7368_v32 = vld [vmem:[%s11179_s1 + $0x130] ss:$8 sps:$4 sm:$0xff]  }
  0x21   :  { %5617 = vmatprep.subr.bf16.mxu0 %v7302_v33  ;;  %v7371_v33 = vld [vmem:[%s11179_s1 + $0xd30] ss:$8 sps:$4 sm:$0xff]  }
  0x23   :  { %5126 = vmatpush1.bf16.msra.mxu1 %v7304_v34  ;;  %v7376_v34 = vld [vmem:[%s11179_s1 + $0x144] ss:$8 sps:$4 sm:$0xff]  }
  0x24   :  { %5618 = vmatpush1.bf16.msra.mxu0 %v7305_v35  ;;  %5127 = vmatprep.subr.bf16.mxu1 %v7306_v39  ;;  %v7379_v35 = vld [vmem:[%s11179_s1 + $0xd44] ss:$8 sps:$4 sm:$0xff]   ;;  %v7385_v39 = vld [vmem:[%s11179_s1 + $0xd54] ss:$8 sps:$4 sm:$0xff]  }
  0x25   :  { %5619 = vmatprep.subr.bf16.mxu0 %v7308_v40  ;;  %v7380_v40 = vld [vmem:[%s11179_s1 + $0x150] ss:$8 sps:$4 sm:$0xff]  }
  0x27   :  { %5128 = vmatpush1.bf16.msra.mxu1 %v7310_v41  ;;  %v7383_v41 = vld [vmem:[%s11179_s1 + $0xd50] ss:$8 sps:$4 sm:$0xff]  }
  0x28   :  { %5620 = vmatpush1.bf16.msra.mxu0 %v7311_v44  ;;  %5129 = vmatprep.subr.bf16.mxu1 %v7312_v45  ;;  %v7391_v44 = vld [vmem:[%s11179_s1 + $0xd64] ss:$8 sps:$4 sm:$0xff]   ;;  %v7386_v45 = vld [vmem:[%s11179_s1 + $0x160] ss:$8 sps:$4 sm:$0xff]  }
  0x29   :  { %5621 = vmatprep.subr.bf16.mxu0 %v7314_v46  ;;  %v7389_v46 = vld [vmem:[%s11179_s1 + $0xd60] ss:$8 sps:$4 sm:$0xff]  }
  0x2b   :  { %5130 = vmatpush1.bf16.msra.mxu1 %v7316_v47  ;;  %v7394_v47 = vld [vmem:[%s11179_s1 + $0x174] ss:$8 sps:$4 sm:$0xff]  }
  0x2c   :  { %5622 = vmatpush1.bf16.msra.mxu0 %v7317_v48  ;;  %5131 = vmatprep.subr.bf16.mxu1 %v7318_v50  ;;  %v7397_v48 = vld [vmem:[%s11179_s1 + $0xd74] ss:$8 sps:$4 sm:$0xff]   ;;  %v7392_v50 = vld [vmem:[%s11179_s1 + $0x170] ss:$8 sps:$4 sm:$0xff]  }
  0x2d   :  { %5623 = vmatprep.subr.bf16.mxu0 %v7320_v51  ;;  %v7395_v51 = vld [vmem:[%s11179_s1 + $0xd70] ss:$8 sps:$4 sm:$0xff]  }
  0x2f   :  { %5132 = vmatpush1.bf16.msra.mxu1 %v7322_v53  ;;  %v7400_v53 = vld [vmem:[%s11179_s1 + $0x184] ss:$8 sps:$4 sm:$0xff]  }
  0x30   :  { %5624 = vmatpush1.bf16.msra.mxu0 %v7323_v55  ;;  %5133 = vmatprep.subr.bf16.mxu1 %v7324_v57  ;;  %v7398_v55 = vld [vmem:[%s11179_s1 + $0x180] ss:$8 sps:$4 sm:$0xff]  }
  0x31   :  { %5625 = vmatprep.subr.bf16.mxu0 %v7326_v58  ;;  %v7401_v57 = vld [vmem:[%s11179_s1 + $0xd80] ss:$8 sps:$4 sm:$0xff]   ;;  %v7406_v58 = vld [vmem:[%s11179_s1 + $0x194] ss:$8 sps:$4 sm:$0xff]  }
  0x33   :  { %5134 = vmatpush1.bf16.msra.mxu1 %v7328_v63  ;;  %v7415_v63 = vld [vmem:[%s11179_s1 + $0xda4] ss:$8 sps:$4 sm:$0xff]  }
  0x34   :  { %5626 = vmatpush1.bf16.msra.mxu0 %v7329_v0  ;;  %5135 = vmatprep.subr.bf16.mxu1 %v7330_v1  ;;  %v7410_v0 = vld [vmem:[%s11179_s1 + $0x1a0] ss:$8 sps:$4 sm:$0xff]  }
  0x35   :  { %5627 = vmatprep.subr.bf16.mxu0 %v7332_v2  ;;  %v7413_v1 = vld [vmem:[%s11179_s1 + $0xda0] ss:$8 sps:$4 sm:$0xff]   ;;  %v7418_v2 = vld [vmem:[%s11179_s1 + $0x1b4] ss:$8 sps:$4 sm:$0xff]  }
  0x37   :  { %5136 = vmatpush1.bf16.msra.mxu1 %v7334_v4  ;;  %v7416_v4 = vld [vmem:[%s11179_s1 + $0x1b0] ss:$8 sps:$4 sm:$0xff]  }
  0x38   :  { %5628 = vmatpush1.bf16.msra.mxu0 %v7335_v5  ;;  %5137 = vmatprep.subr.bf16.mxu1 %v7336_v6  ;;  %v7419_v5 = vld [vmem:[%s11179_s1 + $0xdb0] ss:$8 sps:$4 sm:$0xff]   ;;  %v7424_v6 = vld [vmem:[%s11179_s1 + $0x1c4] ss:$8 sps:$4 sm:$0xff]  }
  0x39   :  { %5629 = vmatprep.subr.bf16.mxu0 %v7338_v7  ;;  %v7427_v7 = vld [vmem:[%s11179_s1 + $0xdc4] ss:$8 sps:$4 sm:$0xff]  }
  0x3b   :  { %5138 = vmatpush1.bf16.msra.mxu1 %v7340_v8  ;;  %v7422_v8 = vld [vmem:[%s11179_s1 + $0x1c0] ss:$8 sps:$4 sm:$0xff]  }
  0x3c   :  { %5630 = vmatpush1.bf16.msra.mxu0 %v7341_v9  ;;  %5139 = vmatprep.subr.bf16.mxu1 %v7342_v10  ;;  %v7425_v9 = vld [vmem:[%s11179_s1 + $0xdc0] ss:$8 sps:$4 sm:$0xff]   ;;  %v7430_v10 = vld [vmem:[%s11179_s1 + $0x1d4] ss:$8 sps:$4 sm:$0xff]  }
  0x3d   :  { %5631 = vmatprep.subr.bf16.mxu0 %v7344_v11  ;;  %v7433_v11 = vld [vmem:[%s11179_s1 + $0xdd4] ss:$8 sps:$4 sm:$0xff]  }
  0x3f   :  { %5140 = vmatpush1.bf16.msra.mxu1 %v7346_v12  ;;  %v7428_v12 = vld [vmem:[%s11179_s1 + $0x1d0] ss:$8 sps:$4 sm:$0xff]  }
  0x40   :  { %5632 = vmatpush1.bf16.msra.mxu0 %v7347_v13  ;;  %5150 = vmatprep.subr.bf16.mxu1 %v7351_v14  ;;  %v7431_v13 = vld [vmem:[%s11179_s1 + $0xdd0] ss:$8 sps:$4 sm:$0xff]   ;;  %v7436_v14 = vld [vmem:[%s11179_s1 + $0x1e4] ss:$8 sps:$4 sm:$0xff]  }
  0x41   :  { %5642 = vmatprep.subr.bf16.mxu0 %v7355_v15  ;;  %v7439_v15 = vld [vmem:[%s11179_s1 + $0xde4] ss:$8 sps:$4 sm:$0xff]  }
  0x42   :  { %5142 = vmatmul.mubr.bf16.vlgmr.msra.gmra.mrb[0].mxu1 %v8731_v16 }
  0x43   :  { %5634 = vmatmul.mubr.bf16.vlgmr.msra.gmra.mrb[0].mxu0 %v8734_v17  ;;  %5151 = vmatpush1.bf16.msra.mxu1 %v7349_v18  ;;  %v832_v18 = vcombine.high %v8657_v52, %v8657_v52  ;;  %v7445_v52 = vld [vmem:[%s11179_s1 + $0xdf4] ss:$8 sps:$4 sm:$0xff]  }
  0x44   :  { %5643 = vmatpush1.bf16.msra.mxu0 %v7353_v19  ;;  %5152 = vmatprep.subr.bf16.mxu1 %v7358_v20  ;;  %v979_v19 = vcombine.high %v8670_v56, %v8670_v56  ;;  %v7434_v20 = vld [vmem:[%s11179_s1 + $0x1e0] ss:$8 sps:$4 sm:$0xff]  }
  0x45   :  { %5644 = vmatprep.subr.bf16.mxu0 %v7361_v21  ;;  %5182 = vmatprep.mubr.bf16.mxu1 %v879_v22  ;;  %v7437_v21 = vld [vmem:[%s11179_s1 + $0xde0] ss:$8 sps:$4 sm:$0xff]   ;;  %v7442_v22 = vld [vmem:[%s11179_s1 + $0x1f4] ss:$8 sps:$4 sm:$0xff]   ;;  %v8923_v56 = vrot.slane %v832_v18, %v8646_v49  ;;  %v7512_v18 = vld [vmem:[%s11179_s1 + $0x2b0] ss:$8 sps:$4 sm:$0xff]  }
  0x46   :  { %5674 = vmatprep.mubr.bf16.mxu0 %v1026_v23  ;;  %v8926_v23 = vrot.slane %v979_v19, %v8646_v49  ;;  %v7515_v19 = vld [vmem:[%s11179_s1 + $0xeb0] ss:$8 sps:$4 sm:$0xff]  }
  0x47   :  { %5153 = vmatpush1.bf16.msra.mxu1 %v7356_v24  ;;  %v7440_v24 = vld [vmem:[%s11179_s1 + $0x1f0] ss:$8 sps:$4 sm:$0xff]  }
  0x48   :  { %5645 = vmatpush1.bf16.msra.mxu0 %v7359_v25  ;;  %5154 = vmatprep.subr.bf16.mxu1 %v7364_v26  ;;  %v7443_v25 = vld [vmem:[%s11179_s1 + $0xdf0] ss:$8 sps:$4 sm:$0xff]   ;;  %v7448_v26 = vld [vmem:[%s11179_s1 + $0x204] ss:$8 sps:$4 sm:$0xff]  }
  0x49   :  { %5646 = vmatprep.subr.bf16.mxu0 %v7367_v27  ;;  %v7451_v27 = vld [vmem:[%s11179_s1 + $0xe04] ss:$8 sps:$4 sm:$0xff]  }
  0x4b   :  { %5155 = vmatpush1.bf16.msra.mxu1 %v7362_v28  ;;  %v848_v28 = vcombine.high %v8923_v56, %v8923_v56 }
  0x4c   :  { %5647 = vmatpush1.bf16.msra.mxu0 %v7365_v29  ;;  %5156 = vmatprep.subr.bf16.mxu1 %v7370_v30  ;;  %v995_v29 = vcombine.high %v8926_v23, %v8926_v23  ;;  %v877_v30 = vcombine.high %v8731_v16, %v8731_v16  ;;  %v7457_v16 = vld [vmem:[%s11179_s1 + $0xe14] ss:$8 sps:$4 sm:$0xff]  }
  0x4d   :  { %5648 = vmatprep.subr.bf16.mxu0 %v7373_v31  ;;  %v1024_v31 = vcombine.high %v8734_v17, %v8734_v17  ;;  %v8961_v17 = vrot.slane %v848_v28, %v8646_v49  ;;  %v7532_v28 = vld [vmem:[%s11179_s1 + $0x2e4] ss:$8 sps:$4 sm:$0xff]  }
  0x4f   :  { %5157 = vmatpush1.bf16.msra.mxu1 %v7368_v32  ;;  %v7446_v32 = vld [vmem:[%s11179_s1 + $0x200] ss:$8 sps:$4 sm:$0xff]  }
  0x50   :  { %5649 = vmatpush1.bf16.msra.mxu0 %v7371_v33  ;;  %5158 = vmatprep.subr.bf16.mxu1 %v7376_v34  ;;  %v7449_v33 = vld [vmem:[%s11179_s1 + $0xe00] ss:$8 sps:$4 sm:$0xff]   ;;  %v7454_v34 = vld [vmem:[%s11179_s1 + $0x214] ss:$8 sps:$4 sm:$0xff]  }
  0x51   :  { %5650 = vmatprep.subr.bf16.mxu0 %v7379_v35  ;;  %v8964_v35 = vrot.slane %v995_v29, %v8646_v49  ;;  %v7535_v29 = vld [vmem:[%s11179_s1 + $0xee4] ss:$8 sps:$4 sm:$0xff]  }
  0x53   :  { %5159 = vmatpush1.bf16.msra.mxu1 %v7374_v36  ;;  %v7452_v36 = vld [vmem:[%s11179_s1 + $0x210] ss:$8 sps:$4 sm:$0xff]  }
  0x54   :  { %5651 = vmatpush1.bf16.msra.mxu0 %v7377_v37  ;;  %5160 = vmatprep.subr.bf16.mxu1 %v7382_v38  ;;  %v7455_v37 = vld [vmem:[%s11179_s1 + $0xe10] ss:$8 sps:$4 sm:$0xff]   ;;  %v7460_v38 = vld [vmem:[%s11179_s1 + $0x224] ss:$8 sps:$4 sm:$0xff]  }
  0x55   :  { %5652 = vmatprep.subr.bf16.mxu0 %v7385_v39  ;;  %v7463_v39 = vld [vmem:[%s11179_s1 + $0xe24] ss:$8 sps:$4 sm:$0xff]  }
  0x57   :  { %5161 = vmatpush1.bf16.msra.mxu1 %v7380_v40  ;;  %v7458_v40 = vld [vmem:[%s11179_s1 + $0x220] ss:$8 sps:$4 sm:$0xff]  }
  0x58   :  { %5653 = vmatpush1.bf16.msra.mxu0 %v7383_v41  ;;  %5162 = vmatprep.subr.bf16.mxu1 %v7388_v43  ;;  %v7461_v41 = vld [vmem:[%s11179_s1 + $0xe20] ss:$8 sps:$4 sm:$0xff]   ;;  %v7466_v43 = vld [vmem:[%s11179_s1 + $0x234] ss:$8 sps:$4 sm:$0xff]  }
  0x59   :  { %5654 = vmatprep.subr.bf16.mxu0 %v7391_v44  ;;  %v7469_v44 = vld [vmem:[%s11179_s1 + $0xe34] ss:$8 sps:$4 sm:$0xff]  }
  0x5b   :  { %5163 = vmatpush1.bf16.msra.mxu1 %v7386_v45  ;;  %v7464_v45 = vld [vmem:[%s11179_s1 + $0x230] ss:$8 sps:$4 sm:$0xff]  }
  0x5c   :  { %5655 = vmatpush1.bf16.msra.mxu0 %v7389_v46  ;;  %5164 = vmatprep.subr.bf16.mxu1 %v7394_v47  ;;  %v7467_v46 = vld [vmem:[%s11179_s1 + $0xe30] ss:$8 sps:$4 sm:$0xff]   ;;  %v7472_v47 = vld [vmem:[%s11179_s1 + $0x244] ss:$8 sps:$4 sm:$0xff]  }
  0x5d   :  { %5656 = vmatprep.subr.bf16.mxu0 %v7397_v48  ;;  %v7475_v48 = vld [vmem:[%s11179_s1 + $0xe44] ss:$8 sps:$4 sm:$0xff]  }
  0x5f   :  { %5165 = vmatpush1.bf16.msra.mxu1 %v7392_v50  ;;  %v7470_v50 = vld [vmem:[%s11179_s1 + $0x240] ss:$8 sps:$4 sm:$0xff]  }
  0x60   :  { %5657 = vmatpush1.bf16.msra.mxu0 %v7395_v51  ;;  %5166 = vmatprep.subr.bf16.mxu1 %v7400_v53  ;;  %v7473_v51 = vld [vmem:[%s11179_s1 + $0xe40] ss:$8 sps:$4 sm:$0xff]   ;;  %v7478_v53 = vld [vmem:[%s11179_s1 + $0x254] ss:$8 sps:$4 sm:$0xff]  }
  0x61   :  { %5658 = vmatprep.subr.bf16.mxu0 %v7403_v54  ;;  %v7481_v54 = vld [vmem:[%s11179_s1 + $0xe54] ss:$8 sps:$4 sm:$0xff]  }
  0x63   :  { %5167 = vmatpush1.bf16.msra.mxu1 %v7398_v55  ;;  %v7476_v55 = vld [vmem:[%s11179_s1 + $0x250] ss:$8 sps:$4 sm:$0xff]  }
  0x64   :  { %5659 = vmatpush1.bf16.msra.mxu0 %v7401_v57  ;;  %5168 = vmatprep.subr.bf16.mxu1 %v7406_v58  ;;  %v7479_v57 = vld [vmem:[%s11179_s1 + $0xe50] ss:$8 sps:$4 sm:$0xff]   ;;  %v7484_v58 = vld [vmem:[%s11179_s1 + $0x264] ss:$8 sps:$4 sm:$0xff]  }
  0x65   :  { %5660 = vmatprep.subr.bf16.mxu0 %v7409_v59  ;;  %v7487_v59 = vld [vmem:[%s11179_s1 + $0xe64] ss:$8 sps:$4 sm:$0xff]  }
  0x67   :  { %5169 = vmatpush1.bf16.msra.mxu1 %v7404_v60  ;;  %v7482_v60 = vld [vmem:[%s11179_s1 + $0x260] ss:$8 sps:$4 sm:$0xff]  }
  0x68   :  { %5661 = vmatpush1.bf16.msra.mxu0 %v7407_v61  ;;  %5170 = vmatprep.subr.bf16.mxu1 %v7412_v62  ;;  %v7485_v61 = vld [vmem:[%s11179_s1 + $0xe60] ss:$8 sps:$4 sm:$0xff]   ;;  %v7490_v62 = vld [vmem:[%s11179_s1 + $0x274] ss:$8 sps:$4 sm:$0xff]  }
  0x69   :  { %5662 = vmatprep.subr.bf16.mxu0 %v7415_v63  ;;  %v7493_v63 = vld [vmem:[%s11179_s1 + $0xe74] ss:$8 sps:$4 sm:$0xff]  }
  0x6b   :  { %5171 = vmatpush1.bf16.msra.mxu1 %v7410_v0  ;;  %v7488_v0 = vld [vmem:[%s11179_s1 + $0x270] ss:$8 sps:$4 sm:$0xff]  }
  0x6c   :  { %5663 = vmatpush1.bf16.msra.mxu0 %v7413_v1  ;;  %5172 = vmatprep.subr.bf16.mxu1 %v7418_v2  ;;  %v7491_v1 = vld [vmem:[%s11179_s1 + $0xe70] ss:$8 sps:$4 sm:$0xff]   ;;  %v7496_v2 = vld [vmem:[%s11179_s1 + $0x284] ss:$8 sps:$4 sm:$0xff]  }
  0x6d   :  { %5664 = vmatprep.subr.bf16.mxu0 %v7421_v3  ;;  %v7499_v3 = vld [vmem:[%s11179_s1 + $0xe84] ss:$8 sps:$4 sm:$0xff]  }
  0x6f   :  { %5173 = vmatpush1.bf16.msra.mxu1 %v7416_v4  ;;  %v7494_v4 = vld [vmem:[%s11179_s1 + $0x280] ss:$8 sps:$4 sm:$0xff]  }
  0x70   :  { %5665 = vmatpush1.bf16.msra.mxu0 %v7419_v5  ;;  %5174 = vmatprep.subr.bf16.mxu1 %v7424_v6  ;;  %v7497_v5 = vld [vmem:[%s11179_s1 + $0xe80] ss:$8 sps:$4 sm:$0xff]   ;;  %v7502_v6 = vld [vmem:[%s11179_s1 + $0x294] ss:$8 sps:$4 sm:$0xff]  }
  0x71   :  { %5666 = vmatprep.subr.bf16.mxu0 %v7427_v7  ;;  %v7505_v7 = vld [vmem:[%s11179_s1 + $0xe94] ss:$8 sps:$4 sm:$0xff]  }
  0x73   :  { %5175 = vmatpush1.bf16.msra.mxu1 %v7422_v8  ;;  %v7500_v8 = vld [vmem:[%s11179_s1 + $0x290] ss:$8 sps:$4 sm:$0xff]  }
  0x74   :  { %5667 = vmatpush1.bf16.msra.mxu0 %v7425_v9  ;;  %5176 = vmatprep.subr.bf16.mxu1 %v7430_v10  ;;  %v7503_v9 = vld [vmem:[%s11179_s1 + $0xe90] ss:$8 sps:$4 sm:$0xff]   ;;  %v7508_v10 = vld [vmem:[%s11179_s1 + $0x2a4] ss:$8 sps:$4 sm:$0xff]  }
  0x75   :  { %5668 = vmatprep.subr.bf16.mxu0 %v7433_v11  ;;  %v7511_v11 = vld [vmem:[%s11179_s1 + $0xea4] ss:$8 sps:$4 sm:$0xff]  }
  0x77   :  { %5177 = vmatpush1.bf16.msra.mxu1 %v7428_v12  ;;  %v7506_v12 = vld [vmem:[%s11179_s1 + $0x2a0] ss:$8 sps:$4 sm:$0xff]  }
  0x78   :  { %5669 = vmatpush1.bf16.msra.mxu0 %v7431_v13  ;;  %5178 = vmatprep.subr.bf16.mxu1 %v7436_v14  ;;  %v7509_v13 = vld [vmem:[%s11179_s1 + $0xea0] ss:$8 sps:$4 sm:$0xff]   ;;  %v7514_v14 = vld [vmem:[%s11179_s1 + $0x2b4] ss:$8 sps:$4 sm:$0xff]  }
  0x79   :  { %5670 = vmatprep.subr.bf16.mxu0 %v7439_v15  ;;  %v7517_v15 = vld [vmem:[%s11179_s1 + $0xeb4] ss:$8 sps:$4 sm:$0xff]  }
  0x7b   :  { %5179 = vmatpush1.bf16.msra.mxu1 %v7434_v20  ;;  %v7520_v20 = vld [vmem:[%s11179_s1 + $0x2c4] ss:$8 sps:$4 sm:$0xff]  }
  0x7c   :  { %5671 = vmatpush1.bf16.msra.mxu0 %v7437_v21  ;;  %5180 = vmatprep.subr.bf16.mxu1 %v7442_v22  ;;  %v7523_v21 = vld [vmem:[%s11179_s1 + $0xec4] ss:$8 sps:$4 sm:$0xff]   ;;  %v7518_v22 = vld [vmem:[%s11179_s1 + $0x2c0] ss:$8 sps:$4 sm:$0xff]  }
  0x7d   :  { %5672 = vmatprep.subr.bf16.mxu0 %v7445_v52  ;;  %v7521_v52 = vld [vmem:[%s11179_s1 + $0xec0] ss:$8 sps:$4 sm:$0xff]  }
  0x7f   :  { %5181 = vmatpush1.bf16.msra.mxu1 %v7440_v24  ;;  %v7526_v24 = vld [vmem:[%s11179_s1 + $0x2d4] ss:$8 sps:$4 sm:$0xff]  }
  0x80   :  { %5673 = vmatpush1.bf16.msra.mxu0 %v7443_v25  ;;  %5191 = vmatprep.subr.bf16.mxu1 %v7448_v26  ;;  %v7529_v25 = vld [vmem:[%s11179_s1 + $0xed4] ss:$8 sps:$4 sm:$0xff]   ;;  %v7524_v26 = vld [vmem:[%s11179_s1 + $0x2d0] ss:$8 sps:$4 sm:$0xff]  }
  0x81   :  { %5683 = vmatprep.subr.bf16.mxu0 %v7451_v27  ;;  %v7527_v27 = vld [vmem:[%s11179_s1 + $0xed0] ss:$8 sps:$4 sm:$0xff]  }
  0x82   :  { %5183 = vmatmul.mubr.bf16.vlgmr.msra.gmra.mrb[0].mxu1 %v877_v30  ;;  %v7530_v30 = vld [vmem:[%s11179_s1 + $0x2e0] ss:$8 sps:$4 sm:$0xff]  }
  0x83   :  { %5675 = vmatmul.mubr.bf16.vlgmr.msra.gmra.mrb[0].mxu0 %v1024_v31  ;;  %5192 = vmatpush1.bf16.msra.mxu1 %v7446_v32  ;;  %v7533_v31 = vld [vmem:[%s11179_s1 + $0xee0] ss:$8 sps:$4 sm:$0xff]   ;;  %v7538_v32 = vld [vmem:[%s11179_s1 + $0x2f4] ss:$8 sps:$4 sm:$0xff]  }
  0x84   :  { %5684 = vmatpush1.bf16.msra.mxu0 %v7449_v33  ;;  %5193 = vmatprep.subr.bf16.mxu1 %v7454_v34  ;;  %v7541_v33 = vld [vmem:[%s11179_s1 + $0xef4] ss:$8 sps:$4 sm:$0xff]   ;;  %v7536_v34 = vld [vmem:[%s11179_s1 + $0x2f0] ss:$8 sps:$4 sm:$0xff]  }
  0x85   :  { %5685 = vmatprep.subr.bf16.mxu0 %v7457_v16  ;;  %5223 = vmatprep.mubr.bf16.mxu1 %v8961_v17  ;;  %v7539_v16 = vld [vmem:[%s11179_s1 + $0xef0] ss:$8 sps:$4 sm:$0xff]  }
  0x86   :  { %5715 = vmatprep.mubr.bf16.mxu0 %v8964_v35 }
  0x87   :  { %5194 = vmatpush1.bf16.msra.mxu1 %v7452_v36  ;;  %v7544_v36 = vld [vmem:[%s11179_s1 + $0x304] ss:$8 sps:$4 sm:$0xff]  }
  0x88   :  { %5686 = vmatpush1.bf16.msra.mxu0 %v7455_v37  ;;  %5195 = vmatprep.subr.bf16.mxu1 %v7460_v38  ;;  %v7547_v37 = vld [vmem:[%s11179_s1 + $0xf04] ss:$8 sps:$4 sm:$0xff]   ;;  %v9150_v38 = vrot.slane %v8923_v56, %v8646_v49  ;;  %v7550_v56 = vld [vmem:[%s11179_s1 + $0x314] ss:$8 sps:$4 sm:$0xff]  }
  0x89   :  { %5687 = vmatprep.subr.bf16.mxu0 %v7463_v39  ;;  %v9154_v39 = vrot.slane %v8926_v23, %v8646_v49  ;;  %v7553_v23 = vld [vmem:[%s11179_s1 + $0xf14] ss:$8 sps:$4 sm:$0xff]  }
  0x8b   :  { %5196 = vmatpush1.bf16.msra.mxu1 %v7458_v40  ;;  %v7542_v40 = vld [vmem:[%s11179_s1 + $0x300] ss:$8 sps:$4 sm:$0xff]  }
  0x8c   :  { %5688 = vmatpush1.bf16.msra.mxu0 %v7461_v41  ;;  %5197 = vmatprep.subr.bf16.mxu1 %v7466_v43  ;;  %v7545_v41 = vld [vmem:[%s11179_s1 + $0xf00] ss:$8 sps:$4 sm:$0xff]   ;;  %v880_v43 = vcombine.high %v8961_v17, %v8961_v17  ;;  %v7556_v17 = vld [vmem:[%s11179_s1 + $0x324] ss:$8 sps:$4 sm:$0xff]  }
  0x8d   :  { %5689 = vmatprep.subr.bf16.mxu0 %v7469_v44  ;;  %v1027_v44 = vcombine.high %v8964_v35, %v8964_v35  ;;  %v7559_v35 = vld [vmem:[%s11179_s1 + $0xf24] ss:$8 sps:$4 sm:$0xff]  }
  0x8f   :  { %5198 = vmatpush1.bf16.msra.mxu1 %v7464_v45  ;;  %v7548_v45 = vld [vmem:[%s11179_s1 + $0x310] ss:$8 sps:$4 sm:$0xff]  }
  0x90   :  { %5690 = vmatpush1.bf16.msra.mxu0 %v7467_v46  ;;  %5199 = vmatprep.subr.bf16.mxu1 %v7472_v47  ;;  %v7551_v46 = vld [vmem:[%s11179_s1 + $0xf10] ss:$8 sps:$4 sm:$0xff]   ;;  %v7554_v47 = vld [vmem:[%s11179_s1 + $0x320] ss:$8 sps:$4 sm:$0xff]  }
  0x91   :  { %5691 = vmatprep.subr.bf16.mxu0 %v7475_v48  ;;  %v7557_v48 = vld [vmem:[%s11179_s1 + $0xf20] ss:$8 sps:$4 sm:$0xff]  }
  0x93   :  { %5200 = vmatpush1.bf16.msra.mxu1 %v7470_v50  ;;  %v7562_v50 = vld [vmem:[%s11179_s1 + $0x334] ss:$8 sps:$4 sm:$0xff]  }
  0x94   :  { %5692 = vmatpush1.bf16.msra.mxu0 %v7473_v51  ;;  %5201 = vmatprep.subr.bf16.mxu1 %v7478_v53  ;;  %v7565_v51 = vld [vmem:[%s11179_s1 + $0xf34] ss:$8 sps:$4 sm:$0xff]   ;;  %v7560_v53 = vld [vmem:[%s11179_s1 + $0x330] ss:$8 sps:$4 sm:$0xff]  }
  0x95   :  { %5693 = vmatprep.subr.bf16.mxu0 %v7481_v54  ;;  %v7563_v54 = vld [vmem:[%s11179_s1 + $0xf30] ss:$8 sps:$4 sm:$0xff]  }
  0x97   :  { %5202 = vmatpush1.bf16.msra.mxu1 %v7476_v55  ;;  %v7568_v55 = vld [vmem:[%s11179_s1 + $0x344] ss:$8 sps:$4 sm:$0xff]  }
  0x98   :  { %5694 = vmatpush1.bf16.msra.mxu0 %v7479_v57  ;;  %5203 = vmatprep.subr.bf16.mxu1 %v7484_v58  ;;  %v7571_v57 = vld [vmem:[%s11179_s1 + $0xf44] ss:$8 sps:$4 sm:$0xff]   ;;  %v7566_v58 = vld [vmem:[%s11179_s1 + $0x340] ss:$8 sps:$4 sm:$0xff]  }
  0x99   :  { %5695 = vmatprep.subr.bf16.mxu0 %v7487_v59  ;;  %v7569_v59 = vld [vmem:[%s11179_s1 + $0xf40] ss:$8 sps:$4 sm:$0xff]  }
  0x9b   :  { %5204 = vmatpush1.bf16.msra.mxu1 %v7482_v60  ;;  %v7574_v60 = vld [vmem:[%s11179_s1 + $0x354] ss:$8 sps:$4 sm:$0xff]  }
  0x9c   :  { %5696 = vmatpush1.bf16.msra.mxu0 %v7485_v61  ;;  %5205 = vmatprep.subr.bf16.mxu1 %v7490_v62  ;;  %v7577_v61 = vld [vmem:[%s11179_s1 + $0xf54] ss:$8 sps:$4 sm:$0xff]   ;;  %v7572_v62 = vld [vmem:[%s11179_s1 + $0x350] ss:$8 sps:$4 sm:$0xff]  }
  0x9d   :  { %5697 = vmatprep.subr.bf16.mxu0 %v7493_v63  ;;  %v7575_v63 = vld [vmem:[%s11179_s1 + $0xf50] ss:$8 sps:$4 sm:$0xff]  }
  0x9f   :  { %5206 = vmatpush1.bf16.msra.mxu1 %v7488_v0  ;;  %v7580_v0 = vld [vmem:[%s11179_s1 + $0x364] ss:$8 sps:$4 sm:$0xff]  }
  0xa0   :  { %5698 = vmatpush1.bf16.msra.mxu0 %v7491_v1  ;;  %5207 = vmatprep.subr.bf16.mxu1 %v7496_v2  ;;  %v7583_v1 = vld [vmem:[%s11179_s1 + $0xf64] ss:$8 sps:$4 sm:$0xff]   ;;  %v7578_v2 = vld [vmem:[%s11179_s1 + $0x360] ss:$8 sps:$4 sm:$0xff]  }
  0xa1   :  { %5699 = vmatprep.subr.bf16.mxu0 %v7499_v3  ;;  %v7581_v3 = vld [vmem:[%s11179_s1 + $0xf60] ss:$8 sps:$4 sm:$0xff]  }
  0xa3   :  { %5208 = vmatpush1.bf16.msra.mxu1 %v7494_v4  ;;  %v7586_v4 = vld [vmem:[%s11179_s1 + $0x374] ss:$8 sps:$4 sm:$0xff]  }
  0xa4   :  { %5700 = vmatpush1.bf16.msra.mxu0 %v7497_v5  ;;  %5209 = vmatprep.subr.bf16.mxu1 %v7502_v6  ;;  %v7589_v5 = vld [vmem:[%s11179_s1 + $0xf74] ss:$8 sps:$4 sm:$0xff]   ;;  %v7584_v6 = vld [vmem:[%s11179_s1 + $0x370] ss:$8 sps:$4 sm:$0xff]  }
  0xa5   :  { %5701 = vmatprep.subr.bf16.mxu0 %v7505_v7  ;;  %v7587_v7 = vld [vmem:[%s11179_s1 + $0xf70] ss:$8 sps:$4 sm:$0xff]  }
  0xa7   :  { %5210 = vmatpush1.bf16.msra.mxu1 %v7500_v8  ;;  %v7592_v8 = vld [vmem:[%s11179_s1 + $0x384] ss:$8 sps:$4 sm:$0xff]  }
  0xa8   :  { %5702 = vmatpush1.bf16.msra.mxu0 %v7503_v9  ;;  %5211 = vmatprep.subr.bf16.mxu1 %v7508_v10  ;;  %v7595_v9 = vld [vmem:[%s11179_s1 + $0xf84] ss:$8 sps:$4 sm:$0xff]   ;;  %v7590_v10 = vld [vmem:[%s11179_s1 + $0x380] ss:$8 sps:$4 sm:$0xff]  }
  0xa9   :  { %5703 = vmatprep.subr.bf16.mxu0 %v7511_v11  ;;  %v7593_v11 = vld [vmem:[%s11179_s1 + $0xf80] ss:$8 sps:$4 sm:$0xff]  }
  0xab   :  { %5212 = vmatpush1.bf16.msra.mxu1 %v7506_v12  ;;  %v7598_v12 = vld [vmem:[%s11179_s1 + $0x394] ss:$8 sps:$4 sm:$0xff]  }
  0xac   :  { %5704 = vmatpush1.bf16.msra.mxu0 %v7509_v13  ;;  %5213 = vmatprep.subr.bf16.mxu1 %v7514_v14  ;;  %v7601_v13 = vld [vmem:[%s11179_s1 + $0xf94] ss:$8 sps:$4 sm:$0xff]   ;;  %v7596_v14 = vld [vmem:[%s11179_s1 + $0x390] ss:$8 sps:$4 sm:$0xff]  }
  0xad   :  { %5705 = vmatprep.subr.bf16.mxu0 %v7517_v15  ;;  %v7599_v15 = vld [vmem:[%s11179_s1 + $0xf90] ss:$8 sps:$4 sm:$0xff]  }
  0xaf   :  { %5214 = vmatpush1.bf16.msra.mxu1 %v7512_v18  ;;  %v7604_v18 = vld [vmem:[%s11179_s1 + $0x3a4] ss:$8 sps:$4 sm:$0xff]  }
  0xb0   :  { %5706 = vmatpush1.bf16.msra.mxu0 %v7515_v19  ;;  %5215 = vmatprep.subr.bf16.mxu1 %v7520_v20  ;;  %v7607_v19 = vld [vmem:[%s11179_s1 + $0xfa4] ss:$8 sps:$4 sm:$0xff]   ;;  %v7602_v20 = vld [vmem:[%s11179_s1 + $0x3a0] ss:$8 sps:$4 sm:$0xff]  }
  0xb1   :  { %5707 = vmatprep.subr.bf16.mxu0 %v7523_v21  ;;  %v7605_v21 = vld [vmem:[%s11179_s1 + $0xfa0] ss:$8 sps:$4 sm:$0xff]  }
  0xb3   :  { %5216 = vmatpush1.bf16.msra.mxu1 %v7518_v22  ;;  %v7610_v22 = vld [vmem:[%s11179_s1 + $0x3b4] ss:$8 sps:$4 sm:$0xff]  }
  0xb4   :  { %5708 = vmatpush1.bf16.msra.mxu0 %v7521_v52  ;;  %5217 = vmatprep.subr.bf16.mxu1 %v7526_v24  ;;  %v7613_v52 = vld [vmem:[%s11179_s1 + $0xfb4] ss:$8 sps:$4 sm:$0xff]   ;;  %v7608_v24 = vld [vmem:[%s11179_s1 + $0x3b0] ss:$8 sps:$4 sm:$0xff]  }
  0xb5   :  { %5709 = vmatprep.subr.bf16.mxu0 %v7529_v25  ;;  %v7611_v25 = vld [vmem:[%s11179_s1 + $0xfb0] ss:$8 sps:$4 sm:$0xff]  }
  0xb7   :  { %5218 = vmatpush1.bf16.msra.mxu1 %v7524_v26  ;;  %v7616_v26 = vld [vmem:[%s11179_s1 + $0x3c4] ss:$8 sps:$4 sm:$0xff]  }
  0xb8   :  { %5710 = vmatpush1.bf16.msra.mxu0 %v7527_v27  ;;  %5219 = vmatprep.subr.bf16.mxu1 %v7532_v28  ;;  %v7619_v27 = vld [vmem:[%s11179_s1 + $0xfc4] ss:$8 sps:$4 sm:$0xff]   ;;  %v7614_v28 = vld [vmem:[%s11179_s1 + $0x3c0] ss:$8 sps:$4 sm:$0xff]  }
  0xb9   :  { %5711 = vmatprep.subr.bf16.mxu0 %v7535_v29  ;;  %v7617_v29 = vld [vmem:[%s11179_s1 + $0xfc0] ss:$8 sps:$4 sm:$0xff]  }
  0xbb   :  { %5220 = vmatpush1.bf16.msra.mxu1 %v7530_v30  ;;  %v7622_v30 = vld [vmem:[%s11179_s1 + $0x3d4] ss:$8 sps:$4 sm:$0xff]  }
  0xbc   :  { %5712 = vmatpush1.bf16.msra.mxu0 %v7533_v31  ;;  %5221 = vmatprep.subr.bf16.mxu1 %v7538_v32  ;;  %v7625_v31 = vld [vmem:[%s11179_s1 + $0xfd4] ss:$8 sps:$4 sm:$0xff]   ;;  %v7620_v32 = vld [vmem:[%s11179_s1 + $0x3d0] ss:$8 sps:$4 sm:$0xff]  }
  0xbd   :  { %5713 = vmatprep.subr.bf16.mxu0 %v7541_v33  ;;  %v7623_v33 = vld [vmem:[%s11179_s1 + $0xfd0] ss:$8 sps:$4 sm:$0xff]  }
  0xbf   :  { %5222 = vmatpush1.bf16.msra.mxu1 %v7536_v34  ;;  %v7628_v34 = vld [vmem:[%s11179_s1 + $0x3e4] ss:$8 sps:$4 sm:$0xff]  }
  0xc0   :  { %5714 = vmatpush1.bf16.msra.mxu0 %v7539_v16  ;;  %5232 = vmatprep.subr.bf16.mxu1 %v7544_v36  ;;  %v7631_v16 = vld [vmem:[%s11179_s1 + $0xfe4] ss:$8 sps:$4 sm:$0xff]   ;;  %v7626_v36 = vld [vmem:[%s11179_s1 + $0x3e0] ss:$8 sps:$4 sm:$0xff]  }
  0xc1   :  { %5724 = vmatprep.subr.bf16.mxu0 %v7547_v37  ;;  %v7629_v37 = vld [vmem:[%s11179_s1 + $0xfe0] ss:$8 sps:$4 sm:$0xff]  }
  0xc2   :  { %5224 = vmatmul.mubr.bf16.vlgmr.msra.gmra.mrb[0].mxu1 %v9150_v38 }
  0xc3   :  { %5716 = vmatmul.mubr.bf16.vlgmr.msra.gmra.mrb[0].mxu0 %v9154_v39  ;;  %5233 = vmatpush1.bf16.msra.mxu1 %v7542_v40  ;;  %v9339_v40 = vld.sshfl [vmem:[%s11178_s0 + $0x8] sm:$0xff pattern:$0x75316420] }
  0xc4   :  { %5725 = vmatpush1.bf16.msra.mxu0 %v7545_v41  ;;  %5234 = vmatprep.subr.bf16.mxu1 %v7550_v56  ;;  %v9344_v41 = vld.sshfl [vmem:[%s11178_s0 + $0x20] sm:$0xff pattern:$0x75316420]  ;;  %v7634_v56 = vld [vmem:[%s11179_s1 + $0x3f4] ss:$8 sps:$4 sm:$0xff]  }
  0xc5   :  { %5726 = vmatprep.subr.bf16.mxu0 %v7553_v23  ;;  %5264 = vmatprep.mubr.bf16.mxu1 %v880_v43  ;;  %v7637_v23 = vld [vmem:[%s11179_s1 + $0xff4] ss:$8 sps:$4 sm:$0xff]   ;;  %v7632_v43 = vld [vmem:[%s11179_s1 + $0x3f0] ss:$8 sps:$4 sm:$0xff]  }
  0xc6   :  { %5756 = vmatprep.mubr.bf16.mxu0 %v1027_v44  ;;  %v7635_v44 = vld [vmem:[%s11179_s1 + $0xff0] ss:$8 sps:$4 sm:$0xff]  }
  0xc7   :  { %5235 = vmatpush1.bf16.msra.mxu1 %v7548_v45  ;;  %v7640_v45 = vld [vmem:[%s11179_s1 + $0x404] ss:$8 sps:$4 sm:$0xff]  }
  0xc8   :  { %5727 = vmatpush1.bf16.msra.mxu0 %v7551_v46  ;;  %5236 = vmatprep.subr.bf16.mxu1 %v7556_v17  ;;  %v7643_v46 = vld [vmem:[%s11179_s1 + $0x1004] ss:$8 sps:$4 sm:$0xff]   ;;  %v896_v17 = vcombine.high %v9339_v40, %v9339_v40 }
  0xc9   :  { %5728 = vmatprep.subr.bf16.mxu0 %v7559_v35  ;;  %v1043_v35 = vcombine.high %v9344_v41, %v9344_v41 }
  0xcb   :  { %5237 = vmatpush1.bf16.msra.mxu1 %v7554_v47  ;;  %v7638_v47 = vld [vmem:[%s11179_s1 + $0x400] ss:$8 sps:$4 sm:$0xff]  }
  0xcc   :  { %5729 = vmatpush1.bf16.msra.mxu0 %v7557_v48  ;;  %5238 = vmatprep.subr.bf16.mxu1 %v7562_v50  ;;  %v7641_v48 = vld [vmem:[%s11179_s1 + $0x1000] ss:$8 sps:$4 sm:$0xff]   ;;  %v878_v50 = vcombine.high %v9150_v38, %v9150_v38  ;;  %v9388_v38 = vrot.slane %v1043_v35, %v8646_v49  ;;  %v7727_v35 = vld [vmem:[%s11179_s1 + $0x10e4] ss:$8 sps:$4 sm:$0xff]  }
  0xcd   :  { %5730 = vmatprep.subr.bf16.mxu0 %v7565_v51  ;;  %v1025_v51 = vcombine.high %v9154_v39, %v9154_v39  ;;  %v7644_v39 = vld [vmem:[%s11179_s1 + $0x410] ss:$8 sps:$4 sm:$0xff]  }
  0xcf   :  { %5239 = vmatpush1.bf16.msra.mxu1 %v7560_v53  ;;  %v7646_v53 = vld [vmem:[%s11179_s1 + $0x414] ss:$8 sps:$4 sm:$0xff]  }
  0xd0   :  { %5731 = vmatpush1.bf16.msra.mxu0 %v7563_v54  ;;  %5240 = vmatprep.subr.bf16.mxu1 %v7568_v55  ;;  %v7649_v54 = vld [vmem:[%s11179_s1 + $0x1014] ss:$8 sps:$4 sm:$0xff]   ;;  %v9385_v55 = vrot.slane %v896_v17, %v8646_v49  ;;  %v7724_v17 = vld [vmem:[%s11179_s1 + $0x4e4] ss:$8 sps:$4 sm:$0xff]  }
  0xd1   :  { %5732 = vmatprep.subr.bf16.mxu0 %v7571_v57  ;;  %v7647_v57 = vld [vmem:[%s11179_s1 + $0x1010] ss:$8 sps:$4 sm:$0xff]  }
  0xd3   :  { %5241 = vmatpush1.bf16.msra.mxu1 %v7566_v58  ;;  %v7652_v58 = vld [vmem:[%s11179_s1 + $0x424] ss:$8 sps:$4 sm:$0xff]  }
  0xd4   :  { %5733 = vmatpush1.bf16.msra.mxu0 %v7569_v59  ;;  %5242 = vmatprep.subr.bf16.mxu1 %v7574_v60  ;;  %v7655_v59 = vld [vmem:[%s11179_s1 + $0x1024] ss:$8 sps:$4 sm:$0xff]   ;;  %v7650_v60 = vld [vmem:[%s11179_s1 + $0x420] ss:$8 sps:$4 sm:$0xff]  }
  0xd5   :  { %5734 = vmatprep.subr.bf16.mxu0 %v7577_v61  ;;  %v7653_v61 = vld [vmem:[%s11179_s1 + $0x1020] ss:$8 sps:$4 sm:$0xff]  }
  0xd7   :  { %5243 = vmatpush1.bf16.msra.mxu1 %v7572_v62  ;;  %v7658_v62 = vld [vmem:[%s11179_s1 + $0x434] ss:$8 sps:$4 sm:$0xff]  }
  0xd8   :  { %5735 = vmatpush1.bf16.msra.mxu0 %v7575_v63  ;;  %5244 = vmatprep.subr.bf16.mxu1 %v7580_v0  ;;  %v7661_v63 = vld [vmem:[%s11179_s1 + $0x1034] ss:$8 sps:$4 sm:$0xff]   ;;  %v7656_v0 = vld [vmem:[%s11179_s1 + $0x430] ss:$8 sps:$4 sm:$0xff]  }
  0xd9   :  { %5736 = vmatprep.subr.bf16.mxu0 %v7583_v1  ;;  %v7659_v1 = vld [vmem:[%s11179_s1 + $0x1030] ss:$8 sps:$4 sm:$0xff]  }
  0xdb   :  { %5245 = vmatpush1.bf16.msra.mxu1 %v7578_v2  ;;  %v7664_v2 = vld [vmem:[%s11179_s1 + $0x444] ss:$8 sps:$4 sm:$0xff]  }
  0xdc   :  { %5737 = vmatpush1.bf16.msra.mxu0 %v7581_v3  ;;  %5246 = vmatprep.subr.bf16.mxu1 %v7586_v4  ;;  %v7667_v3 = vld [vmem:[%s11179_s1 + $0x1044] ss:$8 sps:$4 sm:$0xff]   ;;  %v7662_v4 = vld [vmem:[%s11179_s1 + $0x440] ss:$8 sps:$4 sm:$0xff]  }
  0xdd   :  { %5738 = vmatprep.subr.bf16.mxu0 %v7589_v5  ;;  %v7665_v5 = vld [vmem:[%s11179_s1 + $0x1040] ss:$8 sps:$4 sm:$0xff]  }
  0xdf   :  { %5247 = vmatpush1.bf16.msra.mxu1 %v7584_v6  ;;  %v7670_v6 = vld [vmem:[%s11179_s1 + $0x454] ss:$8 sps:$4 sm:$0xff]  }
  0xe0   :  { %5739 = vmatpush1.bf16.msra.mxu0 %v7587_v7  ;;  %5248 = vmatprep.subr.bf16.mxu1 %v7592_v8  ;;  %v7673_v7 = vld [vmem:[%s11179_s1 + $0x1054] ss:$8 sps:$4 sm:$0xff]   ;;  %v7668_v8 = vld [vmem:[%s11179_s1 + $0x450] ss:$8 sps:$4 sm:$0xff]  }
  0xe1   :  { %5740 = vmatprep.subr.bf16.mxu0 %v7595_v9  ;;  %v7671_v9 = vld [vmem:[%s11179_s1 + $0x1050] ss:$8 sps:$4 sm:$0xff]  }
  0xe3   :  { %5249 = vmatpush1.bf16.msra.mxu1 %v7590_v10  ;;  %v7676_v10 = vld [vmem:[%s11179_s1 + $0x464] ss:$8 sps:$4 sm:$0xff]  }
  0xe4   :  { %5741 = vmatpush1.bf16.msra.mxu0 %v7593_v11  ;;  %5250 = vmatprep.subr.bf16.mxu1 %v7598_v12  ;;  %v7679_v11 = vld [vmem:[%s11179_s1 + $0x1064] ss:$8 sps:$4 sm:$0xff]   ;;  %v7674_v12 = vld [vmem:[%s11179_s1 + $0x460] ss:$8 sps:$4 sm:$0xff]  }
  0xe5   :  { %5742 = vmatprep.subr.bf16.mxu0 %v7601_v13  ;;  %v7677_v13 = vld [vmem:[%s11179_s1 + $0x1060] ss:$8 sps:$4 sm:$0xff]  }
  0xe7   :  { %5251 = vmatpush1.bf16.msra.mxu1 %v7596_v14  ;;  %v7682_v14 = vld [vmem:[%s11179_s1 + $0x474] ss:$8 sps:$4 sm:$0xff]  }
  0xe8   :  { %5743 = vmatpush1.bf16.msra.mxu0 %v7599_v15  ;;  %5252 = vmatprep.subr.bf16.mxu1 %v7604_v18  ;;  %v7685_v15 = vld [vmem:[%s11179_s1 + $0x1074] ss:$8 sps:$4 sm:$0xff]   ;;  %v7680_v18 = vld [vmem:[%s11179_s1 + $0x470] ss:$8 sps:$4 sm:$0xff]  }
  0xe9   :  { %5744 = vmatprep.subr.bf16.mxu0 %v7607_v19  ;;  %v7683_v19 = vld [vmem:[%s11179_s1 + $0x1070] ss:$8 sps:$4 sm:$0xff]  }
  0xeb   :  { %5253 = vmatpush1.bf16.msra.mxu1 %v7602_v20  ;;  %v7688_v20 = vld [vmem:[%s11179_s1 + $0x484] ss:$8 sps:$4 sm:$0xff]  }
  0xec   :  { %5745 = vmatpush1.bf16.msra.mxu0 %v7605_v21  ;;  %5254 = vmatprep.subr.bf16.mxu1 %v7610_v22  ;;  %v7691_v21 = vld [vmem:[%s11179_s1 + $0x1084] ss:$8 sps:$4 sm:$0xff]   ;;  %v7686_v22 = vld [vmem:[%s11179_s1 + $0x480] ss:$8 sps:$4 sm:$0xff]  }
  0xed   :  { %5746 = vmatprep.subr.bf16.mxu0 %v7613_v52  ;;  %v7689_v52 = vld [vmem:[%s11179_s1 + $0x1080] ss:$8 sps:$4 sm:$0xff]  }
  0xef   :  { %5255 = vmatpush1.bf16.msra.mxu1 %v7608_v24  ;;  %v7694_v24 = vld [vmem:[%s11179_s1 + $0x494] ss:$8 sps:$4 sm:$0xff]  }
  0xf0   :  { %5747 = vmatpush1.bf16.msra.mxu0 %v7611_v25  ;;  %5256 = vmatprep.subr.bf16.mxu1 %v7616_v26  ;;  %v7697_v25 = vld [vmem:[%s11179_s1 + $0x1094] ss:$8 sps:$4 sm:$0xff]   ;;  %v7692_v26 = vld [vmem:[%s11179_s1 + $0x490] ss:$8 sps:$4 sm:$0xff]  }
  0xf1   :  { %5748 = vmatprep.subr.bf16.mxu0 %v7619_v27  ;;  %v7695_v27 = vld [vmem:[%s11179_s1 + $0x1090] ss:$8 sps:$4 sm:$0xff]  }
  0xf3   :  { %5257 = vmatpush1.bf16.msra.mxu1 %v7614_v28  ;;  %v7700_v28 = vld [vmem:[%s11179_s1 + $0x4a4] ss:$8 sps:$4 sm:$0xff]  }
  0xf4   :  { %5749 = vmatpush1.bf16.msra.mxu0 %v7617_v29  ;;  %5258 = vmatprep.subr.bf16.mxu1 %v7622_v30  ;;  %v7703_v29 = vld [vmem:[%s11179_s1 + $0x10a4] ss:$8 sps:$4 sm:$0xff]   ;;  %v7698_v30 = vld [vmem:[%s11179_s1 + $0x4a0] ss:$8 sps:$4 sm:$0xff]  }
  0xf5   :  { %5750 = vmatprep.subr.bf16.mxu0 %v7625_v31  ;;  %v7701_v31 = vld [vmem:[%s11179_s1 + $0x10a0] ss:$8 sps:$4 sm:$0xff]  }
  0xf7   :  { %5259 = vmatpush1.bf16.msra.mxu1 %v7620_v32  ;;  %v7706_v32 = vld [vmem:[%s11179_s1 + $0x4b4] ss:$8 sps:$4 sm:$0xff]  }
  0xf8   :  { %5751 = vmatpush1.bf16.msra.mxu0 %v7623_v33  ;;  %5260 = vmatprep.subr.bf16.mxu1 %v7628_v34  ;;  %v7709_v33 = vld [vmem:[%s11179_s1 + $0x10b4] ss:$8 sps:$4 sm:$0xff]   ;;  %v7704_v34 = vld [vmem:[%s11179_s1 + $0x4b0] ss:$8 sps:$4 sm:$0xff]  }
  0xf9   :  { %5752 = vmatprep.subr.bf16.mxu0 %v7631_v16  ;;  %v7707_v16 = vld [vmem:[%s11179_s1 + $0x10b0] ss:$8 sps:$4 sm:$0xff]  }
  0xfb   :  { %5261 = vmatpush1.bf16.msra.mxu1 %v7626_v36  ;;  %v7712_v36 = vld [vmem:[%s11179_s1 + $0x4c4] ss:$8 sps:$4 sm:$0xff]  }
  0xfc   :  { %5753 = vmatpush1.bf16.msra.mxu0 %v7629_v37  ;;  %5262 = vmatprep.subr.bf16.mxu1 %v7634_v56  ;;  %v7715_v37 = vld [vmem:[%s11179_s1 + $0x10c4] ss:$8 sps:$4 sm:$0xff]   ;;  %v7710_v56 = vld [vmem:[%s11179_s1 + $0x4c0] ss:$8 sps:$4 sm:$0xff]  }
  0xfd   :  { %5754 = vmatprep.subr.bf16.mxu0 %v7637_v23  ;;  %v7713_v23 = vld [vmem:[%s11179_s1 + $0x10c0] ss:$8 sps:$4 sm:$0xff]  }
  0xff   :  { %5263 = vmatpush1.bf16.msra.mxu1 %v7632_v43  ;;  %v7718_v43 = vld [vmem:[%s11179_s1 + $0x4d4] ss:$8 sps:$4 sm:$0xff]  }
 0x100   :  { %5755 = vmatpush1.bf16.msra.mxu0 %v7635_v44  ;;  %5273 = vmatprep.subr.bf16.mxu1 %v7640_v45  ;;  %v7721_v44 = vld [vmem:[%s11179_s1 + $0x10d4] ss:$8 sps:$4 sm:$0xff]   ;;  %v7716_v45 = vld [vmem:[%s11179_s1 + $0x4d0] ss:$8 sps:$4 sm:$0xff]  }
 0x101   :  { %5765 = vmatprep.subr.bf16.mxu0 %v7643_v46  ;;  %v7719_v46 = vld [vmem:[%s11179_s1 + $0x10d0] ss:$8 sps:$4 sm:$0xff]  }
 0x102   :  { %5265 = vmatmul.mubr.bf16.vlgmr.msra.gmra.mrb[0].mxu1 %v878_v50  ;;  %v7730_v50 = vld [vmem:[%s11179_s1 + $0x4f4] ss:$8 sps:$4 sm:$0xff]  }
 0x103   :  { %5757 = vmatmul.mubr.bf16.vlgmr.msra.gmra.mrb[0].mxu0 %v1025_v51  ;;  %5274 = vmatpush1.bf16.msra.mxu1 %v7638_v47  ;;  %v7722_v47 = vld [vmem:[%s11179_s1 + $0x4e0] ss:$8 sps:$4 sm:$0xff]   ;;  %v7733_v51 = vld [vmem:[%s11179_s1 + $0x10f4] ss:$8 sps:$4 sm:$0xff]  }
 0x104   :  { %5766 = vmatpush1.bf16.msra.mxu0 %v7641_v48  ;;  %5275 = vmatprep.subr.bf16.mxu1 %v7646_v53  ;;  %v7725_v48 = vld [vmem:[%s11179_s1 + $0x10e0] ss:$8 sps:$4 sm:$0xff]   ;;  %v7728_v53 = vld [vmem:[%s11179_s1 + $0x4f0] ss:$8 sps:$4 sm:$0xff]  }
 0x105   :  { %5767 = vmatprep.subr.bf16.mxu0 %v7649_v54  ;;  %5305 = vmatprep.mubr.bf16.mxu1 %v9385_v55  ;;  %v7731_v54 = vld [vmem:[%s11179_s1 + $0x10f0] ss:$8 sps:$4 sm:$0xff]  }
 0x106   :  { %5797 = vmatprep.mubr.bf16.mxu0 %v9388_v38 }
 0x107   :  { %5276 = vmatpush1.bf16.msra.mxu1 %v7644_v39  ;;  %v7736_v39 = vld [vmem:[%s11179_s1 + $0x504] ss:$8 sps:$4 sm:$0xff]  }
 0x108   :  { %5768 = vmatpush1.bf16.msra.mxu0 %v7647_v57  ;;  %5277 = vmatprep.subr.bf16.mxu1 %v7652_v58  ;;  %v7739_v57 = vld [vmem:[%s11179_s1 + $0x1104] ss:$8 sps:$4 sm:$0xff]   ;;  %v9574_v58 = vrot.slane %v9339_v40, %v8646_v49  ;;  %v7742_v40 = vld [vmem:[%s11179_s1 + $0x514] ss:$8 sps:$4 sm:$0xff]  }
 0x109   :  { %5769 = vmatprep.subr.bf16.mxu0 %v7655_v59  ;;  %v9578_v59 = vrot.slane %v9344_v41, %v8646_v49  ;;  %v7745_v41 = vld [vmem:[%s11179_s1 + $0x1114] ss:$8 sps:$4 sm:$0xff]  }
 0x10b   :  { %5278 = vmatpush1.bf16.msra.mxu1 %v7650_v60  ;;  %v7734_v60 = vld [vmem:[%s11179_s1 + $0x500] ss:$8 sps:$4 sm:$0xff]  }
 0x10c   :  { %5770 = vmatpush1.bf16.msra.mxu0 %v7653_v61  ;;  %5279 = vmatprep.subr.bf16.mxu1 %v7658_v62  ;;  %v7737_v61 = vld [vmem:[%s11179_s1 + $0x1100] ss:$8 sps:$4 sm:$0xff]   ;;  %v928_v62 = vcombine.high %v9385_v55, %v9385_v55  ;;  %v7748_v55 = vld [vmem:[%s11179_s1 + $0x524] ss:$8 sps:$4 sm:$0xff]  }
 0x10d   :  { %5771 = vmatprep.subr.bf16.mxu0 %v7661_v63  ;;  %v1075_v63 = vcombine.high %v9388_v38, %v9388_v38  ;;  %v7751_v38 = vld [vmem:[%s11179_s1 + $0x1124] ss:$8 sps:$4 sm:$0xff]  }
 0x10f   :  { %5280 = vmatpush1.bf16.msra.mxu1 %v7656_v0  ;;  %v7740_v0 = vld [vmem:[%s11179_s1 + $0x510] ss:$8 sps:$4 sm:$0xff]  }
 0x110   :  { %5772 = vmatpush1.bf16.msra.mxu0 %v7659_v1  ;;  %5281 = vmatprep.subr.bf16.mxu1 %v7664_v2  ;;  %v7743_v1 = vld [vmem:[%s11179_s1 + $0x1110] ss:$8 sps:$4 sm:$0xff]   ;;  %v7746_v2 = vld [vmem:[%s11179_s1 + $0x520] ss:$8 sps:$4 sm:$0xff]  }
 0x111   :  { %5773 = vmatprep.subr.bf16.mxu0 %v7667_v3  ;;  %v7749_v3 = vld [vmem:[%s11179_s1 + $0x1120] ss:$8 sps:$4 sm:$0xff]  }
 0x113   :  { %5282 = vmatpush1.bf16.msra.mxu1 %v7662_v4  ;;  %v7754_v4 = vld [vmem:[%s11179_s1 + $0x534] ss:$8 sps:$4 sm:$0xff]  }
 0x114   :  { %5774 = vmatpush1.bf16.msra.mxu0 %v7665_v5  ;;  %5283 = vmatprep.subr.bf16.mxu1 %v7670_v6  ;;  %v7757_v5 = vld [vmem:[%s11179_s1 + $0x1134] ss:$8 sps:$4 sm:$0xff]   ;;  %v7752_v6 = vld [vmem:[%s11179_s1 + $0x530] ss:$8 sps:$4 sm:$0xff]  }
 0x115   :  { %5775 = vmatprep.subr.bf16.mxu0 %v7673_v7  ;;  %v7755_v7 = vld [vmem:[%s11179_s1 + $0x1130] ss:$8 sps:$4 sm:$0xff]  }
 0x117   :  { %5284 = vmatpush1.bf16.msra.mxu1 %v7668_v8  ;;  %v7760_v8 = vld [vmem:[%s11179_s1 + $0x544] ss:$8 sps:$4 sm:$0xff]  }
 0x118   :  { %5776 = vmatpush1.bf16.msra.mxu0 %v7671_v9  ;;  %5285 = vmatprep.subr.bf16.mxu1 %v7676_v10  ;;  %v7763_v9 = vld [vmem:[%s11179_s1 + $0x1144] ss:$8 sps:$4 sm:$0xff]   ;;  %v7758_v10 = vld [vmem:[%s11179_s1 + $0x540] ss:$8 sps:$4 sm:$0xff]  }
 0x119   :  { %5777 = vmatprep.subr.bf16.mxu0 %v7679_v11  ;;  %v7761_v11 = vld [vmem:[%s11179_s1 + $0x1140] ss:$8 sps:$4 sm:$0xff]  }
 0x11b   :  { %5286 = vmatpush1.bf16.msra.mxu1 %v7674_v12  ;;  %v7766_v12 = vld [vmem:[%s11179_s1 + $0x554] ss:$8 sps:$4 sm:$0xff]  }
 0x11c   :  { %5778 = vmatpush1.bf16.msra.mxu0 %v7677_v13  ;;  %5287 = vmatprep.subr.bf16.mxu1 %v7682_v14  ;;  %v7769_v13 = vld [vmem:[%s11179_s1 + $0x1154] ss:$8 sps:$4 sm:$0xff]   ;;  %v7764_v14 = vld [vmem:[%s11179_s1 + $0x550] ss:$8 sps:$4 sm:$0xff]  }
 0x11d   :  { %5779 = vmatprep.subr.bf16.mxu0 %v7685_v15  ;;  %v7767_v15 = vld [vmem:[%s11179_s1 + $0x1150] ss:$8 sps:$4 sm:$0xff]  }
 0x11f   :  { %5288 = vmatpush1.bf16.msra.mxu1 %v7680_v18  ;;  %v7772_v18 = vld [vmem:[%s11179_s1 + $0x564] ss:$8 sps:$4 sm:$0xff]  }
 0x120   :  { %5780 = vmatpush1.bf16.msra.mxu0 %v7683_v19  ;;  %5289 = vmatprep.subr.bf16.mxu1 %v7688_v20  ;;  %v7775_v19 = vld [vmem:[%s11179_s1 + $0x1164] ss:$8 sps:$4 sm:$0xff]   ;;  %v7770_v20 = vld [vmem:[%s11179_s1 + $0x560] ss:$8 sps:$4 sm:$0xff]  }
 0x121   :  { %5781 = vmatprep.subr.bf16.mxu0 %v7691_v21  ;;  %v7773_v21 = vld [vmem:[%s11179_s1 + $0x1160] ss:$8 sps:$4 sm:$0xff]  }
 0x123   :  { %5290 = vmatpush1.bf16.msra.mxu1 %v7686_v22  ;;  %v7778_v22 = vld [vmem:[%s11179_s1 + $0x574] ss:$8 sps:$4 sm:$0xff]  }
 0x124   :  { %5782 = vmatpush1.bf16.msra.mxu0 %v7689_v52  ;;  %5291 = vmatprep.subr.bf16.mxu1 %v7694_v24  ;;  %v7781_v52 = vld [vmem:[%s11179_s1 + $0x1174] ss:$8 sps:$4 sm:$0xff]   ;;  %v7776_v24 = vld [vmem:[%s11179_s1 + $0x570] ss:$8 sps:$4 sm:$0xff]  }
 0x125   :  { %5783 = vmatprep.subr.bf16.mxu0 %v7697_v25  ;;  %v7779_v25 = vld [vmem:[%s11179_s1 + $0x1170] ss:$8 sps:$4 sm:$0xff]  }
 0x127   :  { %5292 = vmatpush1.bf16.msra.mxu1 %v7692_v26  ;;  %v7784_v26 = vld [vmem:[%s11179_s1 + $0x584] ss:$8 sps:$4 sm:$0xff]  }
 0x128   :  { %5784 = vmatpush1.bf16.msra.mxu0 %v7695_v27  ;;  %5293 = vmatprep.subr.bf16.mxu1 %v7700_v28  ;;  %v7787_v27 = vld [vmem:[%s11179_s1 + $0x1184] ss:$8 sps:$4 sm:$0xff]   ;;  %v7782_v28 = vld [vmem:[%s11179_s1 + $0x580] ss:$8 sps:$4 sm:$0xff]  }
 0x129   :  { %5785 = vmatprep.subr.bf16.mxu0 %v7703_v29  ;;  %v7785_v29 = vld [vmem:[%s11179_s1 + $0x1180] ss:$8 sps:$4 sm:$0xff]  }
 0x12b   :  { %5294 = vmatpush1.bf16.msra.mxu1 %v7698_v30  ;;  %v7790_v30 = vld [vmem:[%s11179_s1 + $0x594] ss:$8 sps:$4 sm:$0xff]  }
 0x12c   :  { %5786 = vmatpush1.bf16.msra.mxu0 %v7701_v31  ;;  %5295 = vmatprep.subr.bf16.mxu1 %v7706_v32  ;;  %v7793_v31 = vld [vmem:[%s11179_s1 + $0x1194] ss:$8 sps:$4 sm:$0xff]   ;;  %v7788_v32 = vld [vmem:[%s11179_s1 + $0x590] ss:$8 sps:$4 sm:$0xff]  }
 0x12d   :  { %5787 = vmatprep.subr.bf16.mxu0 %v7709_v33  ;;  %v7791_v33 = vld [vmem:[%s11179_s1 + $0x1190] ss:$8 sps:$4 sm:$0xff]  }
 0x12f   :  { %5296 = vmatpush1.bf16.msra.mxu1 %v7704_v34  ;;  %v7796_v34 = vld [vmem:[%s11179_s1 + $0x5a4] ss:$8 sps:$4 sm:$0xff]  }
 0x130   :  { %5788 = vmatpush1.bf16.msra.mxu0 %v7707_v16  ;;  %5297 = vmatprep.subr.bf16.mxu1 %v7712_v36  ;;  %v7799_v16 = vld [vmem:[%s11179_s1 + $0x11a4] ss:$8 sps:$4 sm:$0xff]   ;;  %v7794_v36 = vld [vmem:[%s11179_s1 + $0x5a0] ss:$8 sps:$4 sm:$0xff]  }
 0x131   :  { %5789 = vmatprep.subr.bf16.mxu0 %v7715_v37  ;;  %v7797_v37 = vld [vmem:[%s11179_s1 + $0x11a0] ss:$8 sps:$4 sm:$0xff]  }
 0x133   :  { %5298 = vmatpush1.bf16.msra.mxu1 %v7710_v56  ;;  %v7802_v56 = vld [vmem:[%s11179_s1 + $0x5b4] ss:$8 sps:$4 sm:$0xff]  }
 0x134   :  { %5790 = vmatpush1.bf16.msra.mxu0 %v7713_v23  ;;  %5299 = vmatprep.subr.bf16.mxu1 %v7718_v43  ;;  %v7805_v23 = vld [vmem:[%s11179_s1 + $0x11b4] ss:$8 sps:$4 sm:$0xff]   ;;  %v7800_v43 = vld [vmem:[%s11179_s1 + $0x5b0] ss:$8 sps:$4 sm:$0xff]  }
 0x135   :  { %5791 = vmatprep.subr.bf16.mxu0 %v7721_v44  ;;  %v7803_v44 = vld [vmem:[%s11179_s1 + $0x11b0] ss:$8 sps:$4 sm:$0xff]  }
 0x137   :  { %5300 = vmatpush1.bf16.msra.mxu1 %v7716_v45  ;;  %v7808_v45 = vld [vmem:[%s11179_s1 + $0x5c4] ss:$8 sps:$4 sm:$0xff]  }
 0x138   :  { %5792 = vmatpush1.bf16.msra.mxu0 %v7719_v46  ;;  %5301 = vmatprep.subr.bf16.mxu1 %v7724_v17  ;;  %v7811_v46 = vld [vmem:[%s11179_s1 + $0x11c4] ss:$8 sps:$4 sm:$0xff]   ;;  %v7806_v17 = vld [vmem:[%s11179_s1 + $0x5c0] ss:$8 sps:$4 sm:$0xff]  }
 0x139   :  { %5793 = vmatprep.subr.bf16.mxu0 %v7727_v35  ;;  %v7809_v35 = vld [vmem:[%s11179_s1 + $0x11c0] ss:$8 sps:$4 sm:$0xff]  }
 0x13b   :  { %5302 = vmatpush1.bf16.msra.mxu1 %v7722_v47  ;;  %v7814_v47 = vld [vmem:[%s11179_s1 + $0x5d4] ss:$8 sps:$4 sm:$0xff]  }
 0x13c   :  { %5794 = vmatpush1.bf16.msra.mxu0 %v7725_v48  ;;  %5303 = vmatprep.subr.bf16.mxu1 %v7730_v50  ;;  %v7817_v48 = vld [vmem:[%s11179_s1 + $0x11d4] ss:$8 sps:$4 sm:$0xff]   ;;  %v7812_v50 = vld [vmem:[%s11179_s1 + $0x5d0] ss:$8 sps:$4 sm:$0xff]  }
 0x13d   :  { %5795 = vmatprep.subr.bf16.mxu0 %v7733_v51  ;;  %v7815_v51 = vld [vmem:[%s11179_s1 + $0x11d0] ss:$8 sps:$4 sm:$0xff]  }
 0x13f   :  { %5304 = vmatpush1.bf16.msra.mxu1 %v7728_v53  ;;  %v7820_v53 = vld [vmem:[%s11179_s1 + $0x5e4] ss:$8 sps:$4 sm:$0xff]  }
 0x140   :  { %5796 = vmatpush1.bf16.msra.mxu0 %v7731_v54  ;;  %5314 = vmatprep.subr.bf16.mxu1 %v7736_v39  ;;  %v7823_v54 = vld [vmem:[%s11179_s1 + $0x11e4] ss:$8 sps:$4 sm:$0xff]  }
 0x141   :  { %5806 = vmatprep.subr.bf16.mxu0 %v7739_v57  ;;  %v8450_v39 = vld [vmem:[%s11178_s0 + $0x8] sm:$0xff] }
 0x142   :  { %5306 = vmatmul.mubr.bf16.vlgmr.msra.gmra.mrb[0].mxu1 %v9574_v58  ;;  %v881_v57 = vcombine.high %v8450_v39, %v8450_v39  ;;  %v7898_v39 = vld [vmem:[%s11179_s1 + $0x6b4] ss:$8 sps:$4 sm:$0xff]  }
 0x143   :  { %5798 = vmatmul.mubr.bf16.vlgmr.msra.gmra.mrb[0].mxu0 %v9578_v59  ;;  %5315 = vmatpush1.bf16.msra.mxu1 %v7734_v60  ;;  %v8451_v60 = vld [vmem:[%s11178_s0 + $0x20] sm:$0xff] }
 0x144   :  { %5807 = vmatpush1.bf16.msra.mxu0 %v7737_v61  ;;  %5316 = vmatprep.subr.bf16.mxu1 %v7742_v40  ;;  %v1028_v61 = vcombine.high %v8451_v60, %v8451_v60  ;;  %v7818_v40 = vld [vmem:[%s11179_s1 + $0x5e0] ss:$8 sps:$4 sm:$0xff]   ;;  %v7896_v60 = vld [vmem:[%s11179_s1 + $0x6b0] ss:$8 sps:$4 sm:$0xff]  }
 0x145   :  { %5808 = vmatprep.subr.bf16.mxu0 %v7745_v41  ;;  %5346 = vmatprep.mubr.bf16.mxu1 %v928_v62  ;;  %v7821_v41 = vld [vmem:[%s11179_s1 + $0x11e0] ss:$8 sps:$4 sm:$0xff]   ;;  %v7826_v62 = vld [vmem:[%s11179_s1 + $0x5f4] ss:$8 sps:$4 sm:$0xff]  }
 0x146   :  { %5838 = vmatprep.mubr.bf16.mxu0 %v1075_v63  ;;  %v7829_v63 = vld [vmem:[%s11179_s1 + $0x11f4] ss:$8 sps:$4 sm:$0xff]  }
 0x147   :  { %5317 = vmatpush1.bf16.msra.mxu1 %v7740_v0  ;;  %v9773_v0 = vrot.slane %v881_v57, %v8646_v49  ;;  %v7901_v57 = vld [vmem:[%s11179_s1 + $0x12b4] ss:$8 sps:$4 sm:$0xff]  }
 0x148   :  { %5809 = vmatpush1.bf16.msra.mxu0 %v7743_v1  ;;  %5318 = vmatprep.subr.bf16.mxu1 %v7748_v55  ;;  %v9776_v1 = vrot.slane %v1028_v61, %v8646_v49  ;;  %v7824_v55 = vld [vmem:[%s11179_s1 + $0x5f0] ss:$8 sps:$4 sm:$0xff]  }
 0x149   :  { %5810 = vmatprep.subr.bf16.mxu0 %v7751_v38  ;;  %v7827_v38 = vld [vmem:[%s11179_s1 + $0x11f0] ss:$8 sps:$4 sm:$0xff]  }
 0x14a   :  { %v7899_v61 = vld [vmem:[%s11179_s1 + $0x12b0] ss:$8 sps:$4 sm:$0xff]  }
 0x14b   :  { %5319 = vmatpush1.bf16.msra.mxu1 %v7746_v2  ;;  %v7832_v2 = vld [vmem:[%s11179_s1 + $0x604] ss:$8 sps:$4 sm:$0xff]  }
 0x14c   :  { %5811 = vmatpush1.bf16.msra.mxu0 %v7749_v3  ;;  %5320 = vmatprep.subr.bf16.mxu1 %v7754_v4  ;;  %v7835_v3 = vld [vmem:[%s11179_s1 + $0x1204] ss:$8 sps:$4 sm:$0xff]   ;;  %v897_v4 = vcombine.high %v9773_v0, %v9773_v0 }
 0x14d   :  { %5812 = vmatprep.subr.bf16.mxu0 %v7757_v5  ;;  %v1044_v5 = vcombine.high %v9776_v1, %v9776_v1 }
 0x14f   :  { %5321 = vmatpush1.bf16.msra.mxu1 %v7752_v6  ;;  %v926_v6 = vcombine.high %v9574_v58, %v9574_v58  ;;  %v7841_v58 = vld [vmem:[%s11179_s1 + $0x1214] ss:$8 sps:$4 sm:$0xff]  }
 0x150   :  { %5813 = vmatpush1.bf16.msra.mxu0 %v7755_v7  ;;  %5322 = vmatprep.subr.bf16.mxu1 %v7760_v8  ;;  %v1073_v7 = vcombine.high %v9578_v59, %v9578_v59  ;;  %v7830_v8 = vld [vmem:[%s11179_s1 + $0x600] ss:$8 sps:$4 sm:$0xff]   ;;  %v9811_v59 = vrot.slane %v897_v4, %v8646_v49  ;;  %v7916_v4 = vld [vmem:[%s11179_s1 + $0x6e4] ss:$8 sps:$4 sm:$0xff]  }
 0x151   :  { %5814 = vmatprep.subr.bf16.mxu0 %v7763_v9  ;;  %v7833_v9 = vld [vmem:[%s11179_s1 + $0x1200] ss:$8 sps:$4 sm:$0xff]  }
 0x153   :  { %5323 = vmatpush1.bf16.msra.mxu1 %v7758_v10  ;;  %v7838_v10 = vld [vmem:[%s11179_s1 + $0x614] ss:$8 sps:$4 sm:$0xff]  }
 0x154   :  { %5815 = vmatpush1.bf16.msra.mxu0 %v7761_v11  ;;  %5324 = vmatprep.subr.bf16.mxu1 %v7766_v12  ;;  %v9814_v11 = vrot.slane %v1044_v5, %v8646_v49  ;;  %v7836_v12 = vld [vmem:[%s11179_s1 + $0x610] ss:$8 sps:$4 sm:$0xff]   ;;  %v7919_v5 = vld [vmem:[%s11179_s1 + $0x12e4] ss:$8 sps:$4 sm:$0xff]  }
 0x155   :  { %5816 = vmatprep.subr.bf16.mxu0 %v7769_v13  ;;  %v7839_v13 = vld [vmem:[%s11179_s1 + $0x1210] ss:$8 sps:$4 sm:$0xff]  }
 0x157   :  { %5325 = vmatpush1.bf16.msra.mxu1 %v7764_v14  ;;  %v7844_v14 = vld [vmem:[%s11179_s1 + $0x624] ss:$8 sps:$4 sm:$0xff]  }
 0x158   :  { %5817 = vmatpush1.bf16.msra.mxu0 %v7767_v15  ;;  %5326 = vmatprep.subr.bf16.mxu1 %v7772_v18  ;;  %v7847_v15 = vld [vmem:[%s11179_s1 + $0x1224] ss:$8 sps:$4 sm:$0xff]   ;;  %v7842_v18 = vld [vmem:[%s11179_s1 + $0x620] ss:$8 sps:$4 sm:$0xff]  }
 0x159   :  { %5818 = vmatprep.subr.bf16.mxu0 %v7775_v19  ;;  %v7845_v19 = vld [vmem:[%s11179_s1 + $0x1220] ss:$8 sps:$4 sm:$0xff]  }
 0x15b   :  { %5327 = vmatpush1.bf16.msra.mxu1 %v7770_v20  ;;  %v7850_v20 = vld [vmem:[%s11179_s1 + $0x634] ss:$8 sps:$4 sm:$0xff]  }
 0x15c   :  { %5819 = vmatpush1.bf16.msra.mxu0 %v7773_v21  ;;  %5328 = vmatprep.subr.bf16.mxu1 %v7778_v22  ;;  %v7853_v21 = vld [vmem:[%s11179_s1 + $0x1234] ss:$8 sps:$4 sm:$0xff]   ;;  %v7848_v22 = vld [vmem:[%s11179_s1 + $0x630] ss:$8 sps:$4 sm:$0xff]  }
 0x15d   :  { %5820 = vmatprep.subr.bf16.mxu0 %v7781_v52  ;;  %v7851_v52 = vld [vmem:[%s11179_s1 + $0x1230] ss:$8 sps:$4 sm:$0xff]  }
 0x15f   :  { %5329 = vmatpush1.bf16.msra.mxu1 %v7776_v24  ;;  %v7856_v24 = vld [vmem:[%s11179_s1 + $0x644] ss:$8 sps:$4 sm:$0xff]  }
 0x160   :  { %5821 = vmatpush1.bf16.msra.mxu0 %v7779_v25  ;;  %5330 = vmatprep.subr.bf16.mxu1 %v7784_v26  ;;  %v7859_v25 = vld [vmem:[%s11179_s1 + $0x1244] ss:$8 sps:$4 sm:$0xff]   ;;  %v7854_v26 = vld [vmem:[%s11179_s1 + $0x640] ss:$8 sps:$4 sm:$0xff]  }
 0x161   :  { %5822 = vmatprep.subr.bf16.mxu0 %v7787_v27  ;;  %v7857_v27 = vld [vmem:[%s11179_s1 + $0x1240] ss:$8 sps:$4 sm:$0xff]  }
 0x163   :  { %5331 = vmatpush1.bf16.msra.mxu1 %v7782_v28  ;;  %v7862_v28 = vld [vmem:[%s11179_s1 + $0x654] ss:$8 sps:$4 sm:$0xff]  }
 0x164   :  { %5823 = vmatpush1.bf16.msra.mxu0 %v7785_v29  ;;  %5332 = vmatprep.subr.bf16.mxu1 %v7790_v30  ;;  %v7865_v29 = vld [vmem:[%s11179_s1 + $0x1254] ss:$8 sps:$4 sm:$0xff]   ;;  %v7860_v30 = vld [vmem:[%s11179_s1 + $0x650] ss:$8 sps:$4 sm:$0xff]  }
 0x165   :  { %5824 = vmatprep.subr.bf16.mxu0 %v7793_v31  ;;  %v7863_v31 = vld [vmem:[%s11179_s1 + $0x1250] ss:$8 sps:$4 sm:$0xff]  }
 0x167   :  { %5333 = vmatpush1.bf16.msra.mxu1 %v7788_v32  ;;  %v7868_v32 = vld [vmem:[%s11179_s1 + $0x664] ss:$8 sps:$4 sm:$0xff]  }
 0x168   :  { %5825 = vmatpush1.bf16.msra.mxu0 %v7791_v33  ;;  %5334 = vmatprep.subr.bf16.mxu1 %v7796_v34  ;;  %v7871_v33 = vld [vmem:[%s11179_s1 + $0x1264] ss:$8 sps:$4 sm:$0xff]   ;;  %v7866_v34 = vld [vmem:[%s11179_s1 + $0x660] ss:$8 sps:$4 sm:$0xff]  }
 0x169   :  { %5826 = vmatprep.subr.bf16.mxu0 %v7799_v16  ;;  %v7869_v16 = vld [vmem:[%s11179_s1 + $0x1260] ss:$8 sps:$4 sm:$0xff]  }
 0x16b   :  { %5335 = vmatpush1.bf16.msra.mxu1 %v7794_v36  ;;  %v7874_v36 = vld [vmem:[%s11179_s1 + $0x674] ss:$8 sps:$4 sm:$0xff]  }
 0x16c   :  { %5827 = vmatpush1.bf16.msra.mxu0 %v7797_v37  ;;  %5336 = vmatprep.subr.bf16.mxu1 %v7802_v56  ;;  %v7877_v37 = vld [vmem:[%s11179_s1 + $0x1274] ss:$8 sps:$4 sm:$0xff]   ;;  %v7872_v56 = vld [vmem:[%s11179_s1 + $0x670] ss:$8 sps:$4 sm:$0xff]  }
 0x16d   :  { %5828 = vmatprep.subr.bf16.mxu0 %v7805_v23  ;;  %v7875_v23 = vld [vmem:[%s11179_s1 + $0x1270] ss:$8 sps:$4 sm:$0xff]  }
 0x16f   :  { %5337 = vmatpush1.bf16.msra.mxu1 %v7800_v43  ;;  %v7880_v43 = vld [vmem:[%s11179_s1 + $0x684] ss:$8 sps:$4 sm:$0xff]  }
 0x170   :  { %5829 = vmatpush1.bf16.msra.mxu0 %v7803_v44  ;;  %5338 = vmatprep.subr.bf16.mxu1 %v7808_v45  ;;  %v7883_v44 = vld [vmem:[%s11179_s1 + $0x1284] ss:$8 sps:$4 sm:$0xff]   ;;  %v7878_v45 = vld [vmem:[%s11179_s1 + $0x680] ss:$8 sps:$4 sm:$0xff]  }
 0x171   :  { %5830 = vmatprep.subr.bf16.mxu0 %v7811_v46  ;;  %v7881_v46 = vld [vmem:[%s11179_s1 + $0x1280] ss:$8 sps:$4 sm:$0xff]  }
 0x173   :  { %5339 = vmatpush1.bf16.msra.mxu1 %v7806_v17  ;;  %v7886_v17 = vld [vmem:[%s11179_s1 + $0x694] ss:$8 sps:$4 sm:$0xff]  }
 0x174   :  { %5831 = vmatpush1.bf16.msra.mxu0 %v7809_v35  ;;  %5340 = vmatprep.subr.bf16.mxu1 %v7814_v47  ;;  %v7889_v35 = vld [vmem:[%s11179_s1 + $0x1294] ss:$8 sps:$4 sm:$0xff]   ;;  %v7884_v47 = vld [vmem:[%s11179_s1 + $0x690] ss:$8 sps:$4 sm:$0xff]  }
 0x175   :  { %5832 = vmatprep.subr.bf16.mxu0 %v7817_v48  ;;  %v7887_v48 = vld [vmem:[%s11179_s1 + $0x1290] ss:$8 sps:$4 sm:$0xff]  }
 0x177   :  { %5341 = vmatpush1.bf16.msra.mxu1 %v7812_v50  ;;  %v7892_v50 = vld [vmem:[%s11179_s1 + $0x6a4] ss:$8 sps:$4 sm:$0xff]  }
 0x178   :  { %5833 = vmatpush1.bf16.msra.mxu0 %v7815_v51  ;;  %5342 = vmatprep.subr.bf16.mxu1 %v7820_v53  ;;  %v7895_v51 = vld [vmem:[%s11179_s1 + $0x12a4] ss:$8 sps:$4 sm:$0xff]   ;;  %v7890_v53 = vld [vmem:[%s11179_s1 + $0x6a0] ss:$8 sps:$4 sm:$0xff]  }
 0x179   :  { %5834 = vmatprep.subr.bf16.mxu0 %v7823_v54  ;;  %v7893_v54 = vld [vmem:[%s11179_s1 + $0x12a0] ss:$8 sps:$4 sm:$0xff]  }
 0x17b   :  { %5343 = vmatpush1.bf16.msra.mxu1 %v7818_v40  ;;  %v7904_v40 = vld [vmem:[%s11179_s1 + $0x6c4] ss:$8 sps:$4 sm:$0xff]  }
 0x17c   :  { %5835 = vmatpush1.bf16.msra.mxu0 %v7821_v41  ;;  %5344 = vmatprep.subr.bf16.mxu1 %v7826_v62  ;;  %v7907_v41 = vld [vmem:[%s11179_s1 + $0x12c4] ss:$8 sps:$4 sm:$0xff]   ;;  %v7902_v62 = vld [vmem:[%s11179_s1 + $0x6c0] ss:$8 sps:$4 sm:$0xff]  }
 0x17d   :  { %5836 = vmatprep.subr.bf16.mxu0 %v7829_v63  ;;  %v7905_v63 = vld [vmem:[%s11179_s1 + $0x12c0] ss:$8 sps:$4 sm:$0xff]  }
 0x17f   :  { %5345 = vmatpush1.bf16.msra.mxu1 %v7824_v55  ;;  %v7910_v55 = vld [vmem:[%s11179_s1 + $0x6d4] ss:$8 sps:$4 sm:$0xff]  }
 0x180   :  { %5837 = vmatpush1.bf16.msra.mxu0 %v7827_v38  ;;  %5355 = vmatprep.subr.bf16.mxu1 %v7832_v2  ;;  %v7913_v38 = vld [vmem:[%s11179_s1 + $0x12d4] ss:$8 sps:$4 sm:$0xff]   ;;  %v7908_v2 = vld [vmem:[%s11179_s1 + $0x6d0] ss:$8 sps:$4 sm:$0xff]  }
 0x181   :  { %5847 = vmatprep.subr.bf16.mxu0 %v7835_v3  ;;  %v7911_v3 = vld [vmem:[%s11179_s1 + $0x12d0] ss:$8 sps:$4 sm:$0xff]  }
 0x182   :  { %5347 = vmatmul.mubr.bf16.vlgmr.msra.gmra.mrb[0].mxu1 %v926_v6  ;;  %v7914_v6 = vld [vmem:[%s11179_s1 + $0x6e0] ss:$8 sps:$4 sm:$0xff]  }
 0x183   :  { %5839 = vmatmul.mubr.bf16.vlgmr.msra.gmra.mrb[0].mxu0 %v1073_v7  ;;  %5356 = vmatpush1.bf16.msra.mxu1 %v7830_v8  ;;  %v7917_v7 = vld [vmem:[%s11179_s1 + $0x12e0] ss:$8 sps:$4 sm:$0xff]   ;;  %v7922_v8 = vld [vmem:[%s11179_s1 + $0x6f4] ss:$8 sps:$4 sm:$0xff]  }
 0x184   :  { %5848 = vmatpush1.bf16.msra.mxu0 %v7833_v9  ;;  %5357 = vmatprep.subr.bf16.mxu1 %v7838_v10  ;;  %v7925_v9 = vld [vmem:[%s11179_s1 + $0x12f4] ss:$8 sps:$4 sm:$0xff]   ;;  %v7920_v10 = vld [vmem:[%s11179_s1 + $0x6f0] ss:$8 sps:$4 sm:$0xff]  }
 0x185   :  { %5849 = vmatprep.subr.bf16.mxu0 %v7841_v58  ;;  %5387 = vmatprep.mubr.bf16.mxu1 %v9811_v59  ;;  %v7923_v58 = vld [vmem:[%s11179_s1 + $0x12f0] ss:$8 sps:$4 sm:$0xff]  }
 0x186   :  { %5879 = vmatprep.mubr.bf16.mxu0 %v9814_v11 }
 0x187   :  { %5358 = vmatpush1.bf16.msra.mxu1 %v7836_v12  ;;  %v7929_v12 = vld [vmem:[%s11179_s1 + $0x704] ss:$8 sps:$4 sm:$0xff]  }
 0x188   :  { %5850 = vmatpush1.bf16.msra.mxu0 %v7839_v13  ;;  %5359 = vmatprep.subr.bf16.mxu1 %v7844_v14  ;;  %v7933_v13 = vld [vmem:[%s11179_s1 + $0x1304] ss:$8 sps:$4 sm:$0xff]   ;;  %v10000_v14 = vrot.slane %v9773_v0, %v8646_v49  ;;  %v7936_v0 = vld [vmem:[%s11179_s1 + $0x714] ss:$8 sps:$4 sm:$0xff]  }
 0x189   :  { %5851 = vmatprep.subr.bf16.mxu0 %v7847_v15  ;;  %v10004_v15 = vrot.slane %v9776_v1, %v8646_v49  ;;  %v7939_v1 = vld [vmem:[%s11179_s1 + $0x1314] ss:$8 sps:$4 sm:$0xff]  }
 0x18b   :  { %5360 = vmatpush1.bf16.msra.mxu1 %v7842_v18  ;;  %v7927_v18 = vld [vmem:[%s11179_s1 + $0x700] ss:$8 sps:$4 sm:$0xff]  }
 0x18c   :  { %5852 = vmatpush1.bf16.msra.mxu0 %v7845_v19  ;;  %5361 = vmatprep.subr.bf16.mxu1 %v7850_v20  ;;  %v7931_v19 = vld [vmem:[%s11179_s1 + $0x1300] ss:$8 sps:$4 sm:$0xff]   ;;  %v929_v20 = vcombine.high %v9811_v59, %v9811_v59  ;;  %v7942_v59 = vld [vmem:[%s11179_s1 + $0x724] ss:$8 sps:$4 sm:$0xff]  }
 0x18d   :  { %5853 = vmatprep.subr.bf16.mxu0 %v7853_v21  ;;  %v1076_v21 = vcombine.high %v9814_v11, %v9814_v11  ;;  %v7945_v11 = vld [vmem:[%s11179_s1 + $0x1324] ss:$8 sps:$4 sm:$0xff]  }
 0x18f   :  { %5362 = vmatpush1.bf16.msra.mxu1 %v7848_v22  ;;  %v7934_v22 = vld [vmem:[%s11179_s1 + $0x710] ss:$8 sps:$4 sm:$0xff]  }
 0x190   :  { %5854 = vmatpush1.bf16.msra.mxu0 %v7851_v52  ;;  %5363 = vmatprep.subr.bf16.mxu1 %v7856_v24  ;;  %v7937_v52 = vld [vmem:[%s11179_s1 + $0x1310] ss:$8 sps:$4 sm:$0xff]   ;;  %v7940_v24 = vld [vmem:[%s11179_s1 + $0x720] ss:$8 sps:$4 sm:$0xff]  }
 0x191   :  { %5855 = vmatprep.subr.bf16.mxu0 %v7859_v25  ;;  %v7943_v25 = vld [vmem:[%s11179_s1 + $0x1320] ss:$8 sps:$4 sm:$0xff]  }
 0x193   :  { %5364 = vmatpush1.bf16.msra.mxu1 %v7854_v26  ;;  %v7948_v26 = vld [vmem:[%s11179_s1 + $0x734] ss:$8 sps:$4 sm:$0xff]  }
 0x194   :  { %5856 = vmatpush1.bf16.msra.mxu0 %v7857_v27  ;;  %5365 = vmatprep.subr.bf16.mxu1 %v7862_v28  ;;  %v7951_v27 = vld [vmem:[%s11179_s1 + $0x1334] ss:$8 sps:$4 sm:$0xff]   ;;  %v7946_v28 = vld [vmem:[%s11179_s1 + $0x730] ss:$8 sps:$4 sm:$0xff]  }
 0x195   :  { %5857 = vmatprep.subr.bf16.mxu0 %v7865_v29  ;;  %v7949_v29 = vld [vmem:[%s11179_s1 + $0x1330] ss:$8 sps:$4 sm:$0xff]  }
 0x197   :  { %5366 = vmatpush1.bf16.msra.mxu1 %v7860_v30  ;;  %v7954_v30 = vld [vmem:[%s11179_s1 + $0x744] ss:$8 sps:$4 sm:$0xff]  }
 0x198   :  { %5858 = vmatpush1.bf16.msra.mxu0 %v7863_v31  ;;  %5367 = vmatprep.subr.bf16.mxu1 %v7868_v32  ;;  %v7957_v31 = vld [vmem:[%s11179_s1 + $0x1344] ss:$8 sps:$4 sm:$0xff]   ;;  %v7952_v32 = vld [vmem:[%s11179_s1 + $0x740] ss:$8 sps:$4 sm:$0xff]  }
 0x199   :  { %5859 = vmatprep.subr.bf16.mxu0 %v7871_v33  ;;  %v7955_v33 = vld [vmem:[%s11179_s1 + $0x1340] ss:$8 sps:$4 sm:$0xff]  }
 0x19b   :  { %5368 = vmatpush1.bf16.msra.mxu1 %v7866_v34  ;;  %v7960_v34 = vld [vmem:[%s11179_s1 + $0x754] ss:$8 sps:$4 sm:$0xff]  }
 0x19c   :  { %5860 = vmatpush1.bf16.msra.mxu0 %v7869_v16  ;;  %5369 = vmatprep.subr.bf16.mxu1 %v7874_v36  ;;  %v7963_v16 = vld [vmem:[%s11179_s1 + $0x1354] ss:$8 sps:$4 sm:$0xff]   ;;  %v7958_v36 = vld [vmem:[%s11179_s1 + $0x750] ss:$8 sps:$4 sm:$0xff]  }
 0x19d   :  { %5861 = vmatprep.subr.bf16.mxu0 %v7877_v37  ;;  %v7961_v37 = vld [vmem:[%s11179_s1 + $0x1350] ss:$8 sps:$4 sm:$0xff]  }
 0x19f   :  { %5370 = vmatpush1.bf16.msra.mxu1 %v7872_v56  ;;  %v7966_v56 = vld [vmem:[%s11179_s1 + $0x764] ss:$8 sps:$4 sm:$0xff]  }
 0x1a0   :  { %5862 = vmatpush1.bf16.msra.mxu0 %v7875_v23  ;;  %5371 = vmatprep.subr.bf16.mxu1 %v7880_v43  ;;  %v7969_v23 = vld [vmem:[%s11179_s1 + $0x1364] ss:$8 sps:$4 sm:$0xff]   ;;  %v7964_v43 = vld [vmem:[%s11179_s1 + $0x760] ss:$8 sps:$4 sm:$0xff]  }
 0x1a1   :  { %5863 = vmatprep.subr.bf16.mxu0 %v7883_v44  ;;  %v7967_v44 = vld [vmem:[%s11179_s1 + $0x1360] ss:$8 sps:$4 sm:$0xff]  }
 0x1a3   :  { %5372 = vmatpush1.bf16.msra.mxu1 %v7878_v45  ;;  %v7972_v45 = vld [vmem:[%s11179_s1 + $0x774] ss:$8 sps:$4 sm:$0xff]  }
 0x1a4   :  { %5864 = vmatpush1.bf16.msra.mxu0 %v7881_v46  ;;  %5373 = vmatprep.subr.bf16.mxu1 %v7886_v17  ;;  %v7975_v46 = vld [vmem:[%s11179_s1 + $0x1374] ss:$8 sps:$4 sm:$0xff]  }
 0x1a5   :  { %5865 = vmatprep.subr.bf16.mxu0 %v7889_v35 }
 0x1a7   :  { %5374 = vmatpush1.bf16.msra.mxu1 %v7884_v47 }
 0x1a8   :  { %5866 = vmatpush1.bf16.msra.mxu0 %v7887_v48  ;;  %5375 = vmatprep.subr.bf16.mxu1 %v7892_v50 }
 0x1a9   :  { %5867 = vmatprep.subr.bf16.mxu0 %v7895_v51 }
 0x1ab   :  { %5376 = vmatpush1.bf16.msra.mxu1 %v7890_v53 }
 0x1ac   :  { %5868 = vmatpush1.bf16.msra.mxu0 %v7893_v54  ;;  %5377 = vmatprep.subr.bf16.mxu1 %v7898_v39 }
 0x1ad   :  { %5869 = vmatprep.subr.bf16.mxu0 %v7901_v57 }
 0x1af   :  { %5378 = vmatpush1.bf16.msra.mxu1 %v7896_v60 }
 0x1b0   :  { %5870 = vmatpush1.bf16.msra.mxu0 %v7899_v61  ;;  %5379 = vmatprep.subr.bf16.mxu1 %v7904_v40 }
 0x1b1   :  { %5871 = vmatprep.subr.bf16.mxu0 %v7907_v41 }
 0x1b3   :  { %5380 = vmatpush1.bf16.msra.mxu1 %v7902_v62 }
 0x1b4   :  { %5872 = vmatpush1.bf16.msra.mxu0 %v7905_v63  ;;  %5381 = vmatprep.subr.bf16.mxu1 %v7910_v55 }
 0x1b5   :  { %5873 = vmatprep.subr.bf16.mxu0 %v7913_v38 }
 0x1b7   :  { %5382 = vmatpush1.bf16.msra.mxu1 %v7908_v2 }
 0x1b8   :  { %5874 = vmatpush1.bf16.msra.mxu0 %v7911_v3  ;;  %5383 = vmatprep.subr.bf16.mxu1 %v7916_v4 }
 0x1b9   :  { %5875 = vmatprep.subr.bf16.mxu0 %v7919_v5 }
 0x1bb   :  { %5384 = vmatpush1.bf16.msra.mxu1 %v7914_v6 }
 0x1bc   :  { %5876 = vmatpush1.bf16.msra.mxu0 %v7917_v7  ;;  %5385 = vmatprep.subr.bf16.mxu1 %v7922_v8 }
 0x1bd   :  { %5877 = vmatprep.subr.bf16.mxu0 %v7925_v9 }
 0x1bf   :  { %5386 = vmatpush1.bf16.msra.mxu1 %v7920_v10 }
 0x1c0   :  { %5878 = vmatpush1.bf16.msra.mxu0 %v7923_v58  ;;  %5396 = vmatprep.subr.bf16.mxu1 %v7929_v12 }
 0x1c1   :  { %5888 = vmatprep.subr.bf16.mxu0 %v7933_v13 }
 0x1c2   :  { %5388 = vmatmul.mubr.bf16.vlgmr.msra.gmra.mrb[0].mxu1 %v10000_v14 }
 0x1c3   :  { %5880 = vmatmul.mubr.bf16.vlgmr.msra.gmra.mrb[0].mxu0 %v10004_v15  ;;  %5397 = vmatpush1.bf16.msra.mxu1 %v7927_v18 }
 0x1c4   :  { %5889 = vmatpush1.bf16.msra.mxu0 %v7931_v19  ;;  %5398 = vmatprep.subr.bf16.mxu1 %v7936_v0 }
 0x1c5   :  { %5890 = vmatprep.subr.bf16.mxu0 %v7939_v1  ;;  %5428 = vmatprep.mubr.bf16.mxu1 %v929_v20 }
 0x1c6   :  { %5920 = vmatprep.mubr.bf16.mxu0 %v1076_v21 }
 0x1c7   :  { %5399 = vmatpush1.bf16.msra.mxu1 %v7934_v22 }
 0x1c8   :  { %5891 = vmatpush1.bf16.msra.mxu0 %v7937_v52  ;;  %5400 = vmatprep.subr.bf16.mxu1 %v7942_v59 }
 0x1c9   :  { %5892 = vmatprep.subr.bf16.mxu0 %v7945_v11 }
 0x1cb   :  { %5401 = vmatpush1.bf16.msra.mxu1 %v7940_v24 }
 0x1cc   :  { %5893 = vmatpush1.bf16.msra.mxu0 %v7943_v25  ;;  %5402 = vmatprep.subr.bf16.mxu1 %v7948_v26 }
 0x1cd   :  { %5894 = vmatprep.subr.bf16.mxu0 %v7951_v27 }
 0x1cf   :  { %5403 = vmatpush1.bf16.msra.mxu1 %v7946_v28 }
 0x1d0   :  { %5895 = vmatpush1.bf16.msra.mxu0 %v7949_v29  ;;  %5404 = vmatprep.subr.bf16.mxu1 %v7954_v30 }
 0x1d1   :  { %5896 = vmatprep.subr.bf16.mxu0 %v7957_v31 }
 0x1d3   :  { %5405 = vmatpush1.bf16.msra.mxu1 %v7952_v32 }
 0x1d4   :  { %5897 = vmatpush1.bf16.msra.mxu0 %v7955_v33  ;;  %5406 = vmatprep.subr.bf16.mxu1 %v7960_v34 }
 0x1d5   :  { %5898 = vmatprep.subr.bf16.mxu0 %v7963_v16 }
 0x1d7   :  { %5407 = vmatpush1.bf16.msra.mxu1 %v7958_v36 }
 0x1d8   :  { %5899 = vmatpush1.bf16.msra.mxu0 %v7961_v37  ;;  %5408 = vmatprep.subr.bf16.mxu1 %v7966_v56 }
 0x1d9   :  { %5900 = vmatprep.subr.bf16.mxu0 %v7969_v23 }
 0x1da   :  { %10 = vsyncpa [#allocation3], 0  ;;  %v7970_v17 = vld [vmem:[%s11179_s1 + $0x770] ss:$8 sps:$4 sm:$0xff]   ;;  %v7978_v47 = vld [vmem:[%s11179_s1 + $0x784] ss:$8 sps:$4 sm:$0xff]   ;;  %v927_v26 = vcombine.high %v10000_v14, %v10000_v14  ;;  %v1074_v27 = vcombine.high %v10004_v15, %v10004_v15 }
 0x1db   :  { %5409 = vmatpush1.bf16.msra.mxu1 %v7964_v43  ;;  %v7973_v35 = vld [vmem:[%s11179_s1 + $0x1370] ss:$8 sps:$4 sm:$0xff]   ;;  %v7981_v48 = vld [vmem:[%s11179_s1 + $0x1384] ss:$8 sps:$4 sm:$0xff]   ;;  %v7976_v50 = vld [vmem:[%s11179_s1 + $0x780] ss:$8 sps:$4 sm:$0xff]  }
 0x1dc   :  { %5901 = vmatpush1.bf16.msra.mxu0 %v7967_v44  ;;  %5410 = vmatprep.subr.bf16.mxu1 %v7972_v45  ;;  %v7979_v51 = vld [vmem:[%s11179_s1 + $0x1380] ss:$8 sps:$4 sm:$0xff]   ;;  %v7984_v53 = vld [vmem:[%s11179_s1 + $0x794] ss:$8 sps:$4 sm:$0xff]   ;;  %v7982_v39 = vld [vmem:[%s11179_s1 + $0x790] ss:$8 sps:$4 sm:$0xff]  }
 0x1dd   :  { %5902 = vmatprep.subr.bf16.mxu0 %v7975_v46  ;;  %v7987_v54 = vld [vmem:[%s11179_s1 + $0x1394] ss:$8 sps:$4 sm:$0xff]   ;;  %v7985_v57 = vld [vmem:[%s11179_s1 + $0x1390] ss:$8 sps:$4 sm:$0xff]   ;;  %v7990_v60 = vld [vmem:[%s11179_s1 + $0x7a4] ss:$8 sps:$4 sm:$0xff]  }
 0x1de   :  { %v7993_v61 = vld [vmem:[%s11179_s1 + $0x13a4] ss:$8 sps:$4 sm:$0xff]   ;;  %v7988_v40 = vld [vmem:[%s11179_s1 + $0x7a0] ss:$8 sps:$4 sm:$0xff]   ;;  %v7996_v62 = vld [vmem:[%s11179_s1 + $0x7b4] ss:$8 sps:$4 sm:$0xff]  }
 0x1df   :  { %5411 = vmatpush1.bf16.msra.mxu1 %v7970_v17  ;;  %v7991_v41 = vld [vmem:[%s11179_s1 + $0x13a0] ss:$8 sps:$4 sm:$0xff]   ;;  %v7999_v63 = vld [vmem:[%s11179_s1 + $0x13b4] ss:$8 sps:$4 sm:$0xff]   ;;  %v7994_v55 = vld [vmem:[%s11179_s1 + $0x7b0] ss:$8 sps:$4 sm:$0xff]  }
 0x1e0   :  { %5903 = vmatpush1.bf16.msra.mxu0 %v7973_v35  ;;  %5412 = vmatprep.subr.bf16.mxu1 %v7978_v47  ;;  %v7997_v38 = vld [vmem:[%s11179_s1 + $0x13b0] ss:$8 sps:$4 sm:$0xff]   ;;  %v8002_v2 = vld [vmem:[%s11179_s1 + $0x7c4] ss:$8 sps:$4 sm:$0xff]   ;;  %v8000_v4 = vld [vmem:[%s11179_s1 + $0x7c0] ss:$8 sps:$4 sm:$0xff]  }
 0x1e1   :  { %5904 = vmatprep.subr.bf16.mxu0 %v7981_v48  ;;  %v8005_v3 = vld [vmem:[%s11179_s1 + $0x13c4] ss:$8 sps:$4 sm:$0xff]   ;;  %v8003_v5 = vld [vmem:[%s11179_s1 + $0x13c0] ss:$8 sps:$4 sm:$0xff]   ;;  %v8008_v6 = vld [vmem:[%s11179_s1 + $0x7d4] ss:$8 sps:$4 sm:$0xff]  }
 0x1e2   :  { %v8011_v7 = vld [vmem:[%s11179_s1 + $0x13d4] ss:$8 sps:$4 sm:$0xff]   ;;  %v8006_v8 = vld [vmem:[%s11179_s1 + $0x7d0] ss:$8 sps:$4 sm:$0xff]   ;;  %v8014_v10 = vld [vmem:[%s11179_s1 + $0x7e4] ss:$8 sps:$4 sm:$0xff]  }
 0x1e3   :  { %5413 = vmatpush1.bf16.msra.mxu1 %v7976_v50  ;;  %v8009_v9 = vld [vmem:[%s11179_s1 + $0x13d0] ss:$8 sps:$4 sm:$0xff]   ;;  %v8017_v58 = vld [vmem:[%s11179_s1 + $0x13e4] ss:$8 sps:$4 sm:$0xff]   ;;  %v8012_v18 = vld [vmem:[%s11179_s1 + $0x7e0] ss:$8 sps:$4 sm:$0xff]  }
 0x1e4   :  { %5905 = vmatpush1.bf16.msra.mxu0 %v7979_v51  ;;  %5414 = vmatprep.subr.bf16.mxu1 %v7984_v53  ;;  %v10183_v12 = vld [vmem:[%s11178_s0 + $0x10] sm:$0xff]  ;;  %v10188_v13 = vld [vmem:[%s11178_s0 + $0x28] sm:$0xff]  ;;  %vm6313_vm0 = vcmask 517120  }
 0x1e5   :  { %5906 = vmatprep.subr.bf16.mxu0 %v7987_v54  ;;  %v8015_v19 = vld [vmem:[%s11179_s1 + $0x13e0] ss:$8 sps:$4 sm:$0xff]   ;;  %v8020_v0 = vld [vmem:[%s11179_s1 + $0x7f4] ss:$8 sps:$4 sm:$0xff]   ;;  %v10204_v20 = vrot.slane %v10183_v12, %v8646_v49  ;;  %v10208_v21 = vrot.slane %v10188_v13, %v8646_v49  ;;  %v8018_v22 = vld [vmem:[%s11179_s1 + $0x7f0] ss:$8 sps:$4 sm:$0xff]  }
 0x1e6   :  { %v8023_v1 = vld [vmem:[%s11179_s1 + $0x13f4] ss:$8 sps:$4 sm:$0xff]   ;;  %v8021_v52 = vld [vmem:[%s11179_s1 + $0x13f0] ss:$8 sps:$4 sm:$0xff]   ;;  %v8026_v59 = vld [vmem:[%s11179_s1 + $0x804] ss:$8 sps:$4 sm:$0xff]  }
 0x1e7   :  { %5415 = vmatpush1.bf16.msra.mxu1 %v7982_v39  ;;  %v8029_v11 = vld [vmem:[%s11179_s1 + $0x1404] ss:$8 sps:$4 sm:$0xff]   ;;  %v945_v24 = vcombine.high %v10204_v20, %v10204_v20  ;;  %v1092_v25 = vcombine.high %v10208_v21, %v10208_v21  ;;  %v8024_v28 = vld [vmem:[%s11179_s1 + $0x800] ss:$8 sps:$4 sm:$0xff]   ;;  %v8032_v30 = vld [vmem:[%s11179_s1 + $0x814] ss:$8 sps:$4 sm:$0xff]  }
 0x1e8   :  { %5907 = vmatpush1.bf16.msra.mxu0 %v7985_v57  ;;  %5416 = vmatprep.subr.bf16.mxu1 %v7990_v60  ;;  %v8027_v29 = vld [vmem:[%s11179_s1 + $0x1400] ss:$8 sps:$4 sm:$0xff]   ;;  %v8035_v14 = vld [vmem:[%s11179_s1 + $0x1414] ss:$8 sps:$4 sm:$0xff]   ;;  %v8030_v32 = vld [vmem:[%s11179_s1 + $0x810] ss:$8 sps:$4 sm:$0xff]  }
 0x1e9   :  { %5908 = vmatprep.subr.bf16.mxu0 %v7993_v61  ;;  %v10243_v15 = vrot.slane %v945_v24, %v8646_v49  ;;  %v10246_v31 = vrot.slane %v1092_v25, %v8646_v49  ;;  %v8033_v33 = vld [vmem:[%s11179_s1 + $0x1410] ss:$8 sps:$4 sm:$0xff]   ;;  %v8038_v34 = vld [vmem:[%s11179_s1 + $0x824] ss:$8 sps:$4 sm:$0xff]   ;;  %v8036_v36 = vld [vmem:[%s11179_s1 + $0x820] ss:$8 sps:$4 sm:$0xff]  }
 0x1ea   :  { %v8041_v16 = vld [vmem:[%s11179_s1 + $0x1424] ss:$8 sps:$4 sm:$0xff]   ;;  %v8039_v37 = vld [vmem:[%s11179_s1 + $0x1420] ss:$8 sps:$4 sm:$0xff]   ;;  %v8044_v56 = vld [vmem:[%s11179_s1 + $0x834] ss:$8 sps:$4 sm:$0xff]  }
 0x1eb   :  { %5417 = vmatpush1.bf16.msra.mxu1 %v7988_v40  ;;  %v8047_v23 = vld [vmem:[%s11179_s1 + $0x1434] ss:$8 sps:$4 sm:$0xff]   ;;  %v8042_v43 = vld [vmem:[%s11179_s1 + $0x830] ss:$8 sps:$4 sm:$0xff]   ;;  %v8050_v45 = vld [vmem:[%s11179_s1 + $0x844] ss:$8 sps:$4 sm:$0xff]  }
 0x1ec   :  { %5909 = vmatpush1.bf16.msra.mxu0 %v7991_v41  ;;  %5418 = vmatprep.subr.bf16.mxu1 %v7996_v62  ;;  %v8045_v44 = vld [vmem:[%s11179_s1 + $0x1430] ss:$8 sps:$4 sm:$0xff]   ;;  %v8053_v46 = vld [vmem:[%s11179_s1 + $0x1444] ss:$8 sps:$4 sm:$0xff]   ;;  %v8048_v17 = vld [vmem:[%s11179_s1 + $0x840] ss:$8 sps:$4 sm:$0xff]  }
 0x1ed   :  { %5910 = vmatprep.subr.bf16.mxu0 %v7999_v63  ;;  %v8051_v35 = vld [vmem:[%s11179_s1 + $0x1440] ss:$8 sps:$4 sm:$0xff]   ;;  %v8056_v47 = vld [vmem:[%s11179_s1 + $0x854] ss:$8 sps:$4 sm:$0xff]   ;;  %v8054_v50 = vld [vmem:[%s11179_s1 + $0x850] ss:$8 sps:$4 sm:$0xff]  }
 0x1ee   :  { %v8059_v48 = vld [vmem:[%s11179_s1 + $0x1454] ss:$8 sps:$4 sm:$0xff]   ;;  %v8057_v51 = vld [vmem:[%s11179_s1 + $0x1450] ss:$8 sps:$4 sm:$0xff]   ;;  %v8062_v53 = vld [vmem:[%s11179_s1 + $0x864] ss:$8 sps:$4 sm:$0xff]  }
 0x1ef   :  { %5419 = vmatpush1.bf16.msra.mxu1 %v7994_v55  ;;  %v8065_v54 = vld [vmem:[%s11179_s1 + $0x1464] ss:$8 sps:$4 sm:$0xff]   ;;  %v8060_v39 = vld [vmem:[%s11179_s1 + $0x860] ss:$8 sps:$4 sm:$0xff]   ;;  %v8068_v60 = vld [vmem:[%s11179_s1 + $0x874] ss:$8 sps:$4 sm:$0xff]  }
 0x1f0   :  { %5911 = vmatpush1.bf16.msra.mxu0 %v7997_v38  ;;  %5420 = vmatprep.subr.bf16.mxu1 %v8002_v2  ;;  %v8063_v57 = vld [vmem:[%s11179_s1 + $0x1460] ss:$8 sps:$4 sm:$0xff]   ;;  %v8071_v61 = vld [vmem:[%s11179_s1 + $0x1474] ss:$8 sps:$4 sm:$0xff]   ;;  %v8066_v40 = vld [vmem:[%s11179_s1 + $0x870] ss:$8 sps:$4 sm:$0xff]  }
 0x1f1   :  { %5912 = vmatprep.subr.bf16.mxu0 %v8005_v3  ;;  %v8069_v41 = vld [vmem:[%s11179_s1 + $0x1470] ss:$8 sps:$4 sm:$0xff]   ;;  %v8074_v62 = vld [vmem:[%s11179_s1 + $0x884] ss:$8 sps:$4 sm:$0xff]   ;;  %v8072_v55 = vld [vmem:[%s11179_s1 + $0x880] ss:$8 sps:$4 sm:$0xff]  }
 0x1f2   :  { %v8077_v63 = vld [vmem:[%s11179_s1 + $0x1484] ss:$8 sps:$4 sm:$0xff]   ;;  %v8075_v38 = vld [vmem:[%s11179_s1 + $0x1480] ss:$8 sps:$4 sm:$0xff]   ;;  %v8080_v2 = vld [vmem:[%s11179_s1 + $0x894] ss:$8 sps:$4 sm:$0xff]  }
 0x1f3   :  { %5421 = vmatpush1.bf16.msra.mxu1 %v8000_v4  ;;  %v8083_v3 = vld [vmem:[%s11179_s1 + $0x1494] ss:$8 sps:$4 sm:$0xff]   ;;  %v8078_v4 = vld [vmem:[%s11179_s1 + $0x890] ss:$8 sps:$4 sm:$0xff]  }
 0x1f4   :  { %5913 = vmatpush1.bf16.msra.mxu0 %v8003_v5  ;;  %5422 = vmatprep.subr.bf16.mxu1 %v8008_v6  ;;  %v8081_v5 = vld [vmem:[%s11179_s1 + $0x1490] ss:$8 sps:$4 sm:$0xff]   ;;  %v8086_v6 = vld [vmem:[%s11179_s1 + $0x8a4] ss:$8 sps:$4 sm:$0xff]  }
 0x1f5   :  { %5914 = vmatprep.subr.bf16.mxu0 %v8011_v7  ;;  %v8089_v7 = vld [vmem:[%s11179_s1 + $0x14a4] ss:$8 sps:$4 sm:$0xff]   ;;  %v8102_v24 = vld [vmem:[%s11179_s1 + $0x8d0] ss:$8 sps:$4 sm:$0xff]  }
 0x1f6   :  { %v8105_v25 = vld [vmem:[%s11179_s1 + $0x14d0] ss:$8 sps:$4 sm:$0xff]  }
 0x1f7   :  { %5423 = vmatpush1.bf16.msra.mxu1 %v8006_v8  ;;  %v8084_v8 = vld [vmem:[%s11179_s1 + $0x8a0] ss:$8 sps:$4 sm:$0xff]  }
 0x1f8   :  { %5915 = vmatpush1.bf16.msra.mxu0 %v8009_v9  ;;  %5424 = vmatprep.subr.bf16.mxu1 %v8014_v10  ;;  %v8087_v9 = vld [vmem:[%s11179_s1 + $0x14a0] ss:$8 sps:$4 sm:$0xff]   ;;  %v8092_v10 = vld [vmem:[%s11179_s1 + $0x8b4] ss:$8 sps:$4 sm:$0xff]  }
 0x1f9   :  { %5916 = vmatprep.subr.bf16.mxu0 %v8017_v58  ;;  %v8095_v58 = vld [vmem:[%s11179_s1 + $0x14b4] ss:$8 sps:$4 sm:$0xff]  }
 0x1fb   :  { %5425 = vmatpush1.bf16.msra.mxu1 %v8012_v18  ;;  %v8090_v18 = vld [vmem:[%s11179_s1 + $0x8b0] ss:$8 sps:$4 sm:$0xff]  }
 0x1fc   :  { %5917 = vmatpush1.bf16.msra.mxu0 %v8015_v19  ;;  %5426 = vmatprep.subr.bf16.mxu1 %v8020_v0  ;;  %v8093_v19 = vld [vmem:[%s11179_s1 + $0x14b0] ss:$8 sps:$4 sm:$0xff]   ;;  %v8098_v0 = vld [vmem:[%s11179_s1 + $0x8c4] ss:$8 sps:$4 sm:$0xff]  }
 0x1fd   :  { %5918 = vmatprep.subr.bf16.mxu0 %v8023_v1  ;;  %v8101_v1 = vld [vmem:[%s11179_s1 + $0x14c4] ss:$8 sps:$4 sm:$0xff]  }
 0x1ff   :  { %5427 = vmatpush1.bf16.msra.mxu1 %v8018_v22  ;;  %v8096_v22 = vld [vmem:[%s11179_s1 + $0x8c0] ss:$8 sps:$4 sm:$0xff]  }
 0x200   :  { %5919 = vmatpush1.bf16.msra.mxu0 %v8021_v52  ;;  %5437 = vmatprep.subr.bf16.mxu1 %v8026_v59  ;;  %v8099_v52 = vld [vmem:[%s11179_s1 + $0x14c0] ss:$8 sps:$4 sm:$0xff]   ;;  %v8104_v59 = vld [vmem:[%s11179_s1 + $0x8d4] ss:$8 sps:$4 sm:$0xff]  }
 0x201   :  { %5929 = vmatprep.subr.bf16.mxu0 %v8029_v11  ;;  %v8107_v11 = vld [vmem:[%s11179_s1 + $0x14d4] ss:$8 sps:$4 sm:$0xff]  }
 0x202   :  { %5429 = vmatmul.mubr.bf16.vlgmr.msra.gmra.mrb[0].mxu1 %v927_v26  ;;  %v8110_v26 = vld [vmem:[%s11179_s1 + $0x8e4] ss:$8 sps:$4 sm:$0xff]  }
 0x203   :  { %5921 = vmatmul.mubr.bf16.vlgmr.msra.gmra.mrb[0].mxu0 %v1074_v27  ;;  %5438 = vmatpush1.bf16.msra.mxu1 %v8024_v28  ;;  %v8113_v27 = vld [vmem:[%s11179_s1 + $0x14e4] ss:$8 sps:$4 sm:$0xff]   ;;  %v8108_v28 = vld [vmem:[%s11179_s1 + $0x8e0] ss:$8 sps:$4 sm:$0xff]  }
 0x204   :  { %5930 = vmatpush1.bf16.msra.mxu0 %v8027_v29  ;;  %5439 = vmatprep.subr.bf16.mxu1 %v8032_v30  ;;  %v8111_v29 = vld [vmem:[%s11179_s1 + $0x14e0] ss:$8 sps:$4 sm:$0xff]   ;;  %v8116_v30 = vld [vmem:[%s11179_s1 + $0x8f4] ss:$8 sps:$4 sm:$0xff]  }
 0x205   :  { %5931 = vmatprep.subr.bf16.mxu0 %v8035_v14  ;;  %5469 = vmatprep.mubr.bf16.mxu1 %v10243_v15  ;;  %v8119_v14 = vld [vmem:[%s11179_s1 + $0x14f4] ss:$8 sps:$4 sm:$0xff]  }
 0x206   :  { %5961 = vmatprep.mubr.bf16.mxu0 %v10246_v31 }
 0x207   :  { %5440 = vmatpush1.bf16.msra.mxu1 %v8030_v32  ;;  %v8114_v32 = vld [vmem:[%s11179_s1 + $0x8f0] ss:$8 sps:$4 sm:$0xff]  }
 0x208   :  { %5932 = vmatpush1.bf16.msra.mxu0 %v8033_v33  ;;  %5441 = vmatprep.subr.bf16.mxu1 %v8038_v34  ;;  %v8117_v33 = vld [vmem:[%s11179_s1 + $0x14f0] ss:$8 sps:$4 sm:$0xff]   ;;  %v8122_v34 = vld [vmem:[%s11179_s1 + $0x904] ss:$8 sps:$4 sm:$0xff]  }
 0x209   :  { %5933 = vmatprep.subr.bf16.mxu0 %v8041_v16  ;;  %v8125_v16 = vld [vmem:[%s11179_s1 + $0x1504] ss:$8 sps:$4 sm:$0xff]  }
 0x20b   :  { %5442 = vmatpush1.bf16.msra.mxu1 %v8036_v36  ;;  %v10432_v36 = vrot.slane %v10204_v20, %v8646_v49  ;;  %v8128_v20 = vld [vmem:[%s11179_s1 + $0x914] ss:$8 sps:$4 sm:$0xff]  }
 0x20c   :  { %5934 = vmatpush1.bf16.msra.mxu0 %v8039_v37  ;;  %5443 = vmatprep.subr.bf16.mxu1 %v8044_v56  ;;  %v10436_v37 = vrot.slane %v10208_v21, %v8646_v49  ;;  %v8120_v56 = vld [vmem:[%s11179_s1 + $0x900] ss:$8 sps:$4 sm:$0xff]   ;;  %v8131_v21 = vld [vmem:[%s11179_s1 + $0x1514] ss:$8 sps:$4 sm:$0xff]  }
 0x20d   :  { %5935 = vmatprep.subr.bf16.mxu0 %v8047_v23  ;;  %v8123_v23 = vld [vmem:[%s11179_s1 + $0x1500] ss:$8 sps:$4 sm:$0xff]  }
 0x20f   :  { %5444 = vmatpush1.bf16.msra.mxu1 %v8042_v43  ;;  %v977_v43 = vcombine.high %v10243_v15, %v10243_v15  ;;  %v8134_v15 = vld [vmem:[%s11179_s1 + $0x924] ss:$8 sps:$4 sm:$0xff]  }
 0x210   :  { %5936 = vmatpush1.bf16.msra.mxu0 %v8045_v44  ;;  %5445 = vmatprep.subr.bf16.mxu1 %v8050_v45  ;;  %v1124_v44 = vcombine.high %v10246_v31, %v10246_v31  ;;  %v8126_v45 = vld [vmem:[%s11179_s1 + $0x910] ss:$8 sps:$4 sm:$0xff]   ;;  %v8137_v31 = vld [vmem:[%s11179_s1 + $0x1524] ss:$8 sps:$4 sm:$0xff]  }
 0x211   :  { %5937 = vmatprep.subr.bf16.mxu0 %v8053_v46  ;;  %v8129_v46 = vld [vmem:[%s11179_s1 + $0x1510] ss:$8 sps:$4 sm:$0xff]  }
 0x213   :  { %5446 = vmatpush1.bf16.msra.mxu1 %v8048_v17  ;;  %v8132_v17 = vld [vmem:[%s11179_s1 + $0x920] ss:$8 sps:$4 sm:$0xff]  }
 0x214   :  { %5938 = vmatpush1.bf16.msra.mxu0 %v8051_v35  ;;  %5447 = vmatprep.subr.bf16.mxu1 %v8056_v47  ;;  %v8135_v35 = vld [vmem:[%s11179_s1 + $0x1520] ss:$8 sps:$4 sm:$0xff]   ;;  %v8140_v47 = vld [vmem:[%s11179_s1 + $0x934] ss:$8 sps:$4 sm:$0xff]  }
 0x215   :  { %5939 = vmatprep.subr.bf16.mxu0 %v8059_v48  ;;  %v8143_v48 = vld [vmem:[%s11179_s1 + $0x1534] ss:$8 sps:$4 sm:$0xff]  }
 0x217   :  { %5448 = vmatpush1.bf16.msra.mxu1 %v8054_v50  ;;  %v8138_v50 = vld [vmem:[%s11179_s1 + $0x930] ss:$8 sps:$4 sm:$0xff]  }
 0x218   :  { %5940 = vmatpush1.bf16.msra.mxu0 %v8057_v51  ;;  %5449 = vmatprep.subr.bf16.mxu1 %v8062_v53  ;;  %v8141_v51 = vld [vmem:[%s11179_s1 + $0x1530] ss:$8 sps:$4 sm:$0xff]   ;;  %v8146_v53 = vld [vmem:[%s11179_s1 + $0x944] ss:$8 sps:$4 sm:$0xff]  }
 0x219   :  { %5941 = vmatprep.subr.bf16.mxu0 %v8065_v54  ;;  %v8149_v54 = vld [vmem:[%s11179_s1 + $0x1544] ss:$8 sps:$4 sm:$0xff]  }
 0x21b   :  { %5450 = vmatpush1.bf16.msra.mxu1 %v8060_v39  ;;  %v8144_v39 = vld [vmem:[%s11179_s1 + $0x940] ss:$8 sps:$4 sm:$0xff]  }
 0x21c   :  { %5942 = vmatpush1.bf16.msra.mxu0 %v8063_v57  ;;  %5451 = vmatprep.subr.bf16.mxu1 %v8068_v60  ;;  %v8147_v57 = vld [vmem:[%s11179_s1 + $0x1540] ss:$8 sps:$4 sm:$0xff]   ;;  %v8152_v60 = vld [vmem:[%s11179_s1 + $0x954] ss:$8 sps:$4 sm:$0xff]  }
 0x21d   :  { %5943 = vmatprep.subr.bf16.mxu0 %v8071_v61  ;;  %v8155_v61 = vld [vmem:[%s11179_s1 + $0x1554] ss:$8 sps:$4 sm:$0xff]  }
 0x21f   :  { %5452 = vmatpush1.bf16.msra.mxu1 %v8066_v40  ;;  %v8150_v40 = vld [vmem:[%s11179_s1 + $0x950] ss:$8 sps:$4 sm:$0xff]  }
 0x220   :  { %5944 = vmatpush1.bf16.msra.mxu0 %v8069_v41  ;;  %5453 = vmatprep.subr.bf16.mxu1 %v8074_v62  ;;  %v8153_v41 = vld [vmem:[%s11179_s1 + $0x1550] ss:$8 sps:$4 sm:$0xff]   ;;  %v8158_v62 = vld [vmem:[%s11179_s1 + $0x964] ss:$8 sps:$4 sm:$0xff]  }
 0x221   :  { %5945 = vmatprep.subr.bf16.mxu0 %v8077_v63  ;;  %v8161_v63 = vld [vmem:[%s11179_s1 + $0x1564] ss:$8 sps:$4 sm:$0xff]  }
 0x223   :  { %5454 = vmatpush1.bf16.msra.mxu1 %v8072_v55  ;;  %v8156_v55 = vld [vmem:[%s11179_s1 + $0x960] ss:$8 sps:$4 sm:$0xff]  }
 0x224   :  { %5946 = vmatpush1.bf16.msra.mxu0 %v8075_v38  ;;  %5455 = vmatprep.subr.bf16.mxu1 %v8080_v2  ;;  %v8159_v38 = vld [vmem:[%s11179_s1 + $0x1560] ss:$8 sps:$4 sm:$0xff]   ;;  %v8164_v2 = vld [vmem:[%s11179_s1 + $0x974] ss:$8 sps:$4 sm:$0xff]  }
 0x225   :  { %5947 = vmatprep.subr.bf16.mxu0 %v8083_v3  ;;  %v8167_v3 = vld [vmem:[%s11179_s1 + $0x1574] ss:$8 sps:$4 sm:$0xff]  }
 0x227   :  { %5456 = vmatpush1.bf16.msra.mxu1 %v8078_v4  ;;  %v8162_v4 = vld [vmem:[%s11179_s1 + $0x970] ss:$8 sps:$4 sm:$0xff]  }
 0x228   :  { %5948 = vmatpush1.bf16.msra.mxu0 %v8081_v5  ;;  %5457 = vmatprep.subr.bf16.mxu1 %v8086_v6  ;;  %v8165_v5 = vld [vmem:[%s11179_s1 + $0x1570] ss:$8 sps:$4 sm:$0xff]   ;;  %v8170_v6 = vld [vmem:[%s11179_s1 + $0x984] ss:$8 sps:$4 sm:$0xff]  }
 0x229   :  { %5949 = vmatprep.subr.bf16.mxu0 %v8089_v7  ;;  %v8173_v7 = vld [vmem:[%s11179_s1 + $0x1584] ss:$8 sps:$4 sm:$0xff]  }
 0x22b   :  { %5458 = vmatpush1.bf16.msra.mxu1 %v8084_v8  ;;  %v8168_v8 = vld [vmem:[%s11179_s1 + $0x980] ss:$8 sps:$4 sm:$0xff]  }
 0x22c   :  { %5950 = vmatpush1.bf16.msra.mxu0 %v8087_v9  ;;  %5459 = vmatprep.subr.bf16.mxu1 %v8092_v10  ;;  %v8171_v9 = vld [vmem:[%s11179_s1 + $0x1580] ss:$8 sps:$4 sm:$0xff]   ;;  %v8176_v10 = vld [vmem:[%s11179_s1 + $0x994] ss:$8 sps:$4 sm:$0xff]  }
 0x22d   :  { %5951 = vmatprep.subr.bf16.mxu0 %v8095_v58  ;;  %v8179_v58 = vld [vmem:[%s11179_s1 + $0x1594] ss:$8 sps:$4 sm:$0xff]  }
 0x22f   :  { %5460 = vmatpush1.bf16.msra.mxu1 %v8090_v18  ;;  %v8174_v18 = vld [vmem:[%s11179_s1 + $0x990] ss:$8 sps:$4 sm:$0xff]  }
 0x230   :  { %5952 = vmatpush1.bf16.msra.mxu0 %v8093_v19  ;;  %5461 = vmatprep.subr.bf16.mxu1 %v8098_v0  ;;  %v8177_v19 = vld [vmem:[%s11179_s1 + $0x1590] ss:$8 sps:$4 sm:$0xff]   ;;  %v8182_v0 = vld [vmem:[%s11179_s1 + $0x9a4] ss:$8 sps:$4 sm:$0xff]  }
 0x231   :  { %5953 = vmatprep.subr.bf16.mxu0 %v8101_v1  ;;  %v8185_v1 = vld [vmem:[%s11179_s1 + $0x15a4] ss:$8 sps:$4 sm:$0xff]  }
 0x233   :  { %5462 = vmatpush1.bf16.msra.mxu1 %v8096_v22  ;;  %v8180_v22 = vld [vmem:[%s11179_s1 + $0x9a0] ss:$8 sps:$4 sm:$0xff]  }
 0x234   :  { %5954 = vmatpush1.bf16.msra.mxu0 %v8099_v52  ;;  %5463 = vmatprep.subr.bf16.mxu1 %v8104_v59  ;;  %v8183_v52 = vld [vmem:[%s11179_s1 + $0x15a0] ss:$8 sps:$4 sm:$0xff]   ;;  %v8188_v59 = vld [vmem:[%s11179_s1 + $0x9b4] ss:$8 sps:$4 sm:$0xff]  }
 0x235   :  { %5955 = vmatprep.subr.bf16.mxu0 %v8107_v11  ;;  %v8191_v11 = vld [vmem:[%s11179_s1 + $0x15b4] ss:$8 sps:$4 sm:$0xff]  }
 0x237   :  { %5464 = vmatpush1.bf16.msra.mxu1 %v8102_v24  ;;  %v8186_v24 = vld [vmem:[%s11179_s1 + $0x9b0] ss:$8 sps:$4 sm:$0xff]  }
 0x238   :  { %5956 = vmatpush1.bf16.msra.mxu0 %v8105_v25  ;;  %5465 = vmatprep.subr.bf16.mxu1 %v8110_v26  ;;  %v8189_v25 = vld [vmem:[%s11179_s1 + $0x15b0] ss:$8 sps:$4 sm:$0xff]   ;;  %v8194_v26 = vld [vmem:[%s11179_s1 + $0x9c4] ss:$8 sps:$4 sm:$0xff]  }
 0x239   :  { %5957 = vmatprep.subr.bf16.mxu0 %v8113_v27  ;;  %v8197_v27 = vld [vmem:[%s11179_s1 + $0x15c4] ss:$8 sps:$4 sm:$0xff]  }
 0x23b   :  { %5466 = vmatpush1.bf16.msra.mxu1 %v8108_v28  ;;  %v8192_v28 = vld [vmem:[%s11179_s1 + $0x9c0] ss:$8 sps:$4 sm:$0xff]  }
 0x23c   :  { %5958 = vmatpush1.bf16.msra.mxu0 %v8111_v29  ;;  %5467 = vmatprep.subr.bf16.mxu1 %v8116_v30  ;;  %v8195_v29 = vld [vmem:[%s11179_s1 + $0x15c0] ss:$8 sps:$4 sm:$0xff]   ;;  %v8200_v30 = vld [vmem:[%s11179_s1 + $0x9d4] ss:$8 sps:$4 sm:$0xff]  }
 0x23d   :  { %5959 = vmatprep.subr.bf16.mxu0 %v8119_v14  ;;  %v8203_v14 = vld [vmem:[%s11179_s1 + $0x15d4] ss:$8 sps:$4 sm:$0xff]  }
 0x23f   :  { %5468 = vmatpush1.bf16.msra.mxu1 %v8114_v32  ;;  %v8198_v32 = vld [vmem:[%s11179_s1 + $0x9d0] ss:$8 sps:$4 sm:$0xff]  }
 0x240   :  { %5960 = vmatpush1.bf16.msra.mxu0 %v8117_v33  ;;  %5478 = vmatprep.subr.bf16.mxu1 %v8122_v34  ;;  %v8201_v33 = vld [vmem:[%s11179_s1 + $0x15d0] ss:$8 sps:$4 sm:$0xff]   ;;  %v8206_v34 = vld [vmem:[%s11179_s1 + $0x9e4] ss:$8 sps:$4 sm:$0xff]  }
 0x241   :  { %5970 = vmatprep.subr.bf16.mxu0 %v8125_v16  ;;  %v8209_v16 = vld [vmem:[%s11179_s1 + $0x15e4] ss:$8 sps:$4 sm:$0xff]  }
 0x242   :  { %5470 = vmatmul.mubr.bf16.vlgmr.msra.gmra.mrb[0].mxu1 %v10432_v36 }
 0x243   :  { %5962 = vmatmul.mubr.bf16.vlgmr.msra.gmra.mrb[0].mxu0 %v10436_v37  ;;  %5479 = vmatpush1.bf16.msra.mxu1 %v8120_v56  ;;  %v930_v56 = vcombine.high %v10183_v12, %v10183_v12  ;;  %v8215_v12 = vld [vmem:[%s11179_s1 + $0x15f4] ss:$8 sps:$4 sm:$0xff]  }
 0x244   :  { %5971 = vmatpush1.bf16.msra.mxu0 %v8123_v23  ;;  %5480 = vmatprep.subr.bf16.mxu1 %v8128_v20  ;;  %v1077_v23 = vcombine.high %v10188_v13, %v10188_v13  ;;  %v8204_v20 = vld [vmem:[%s11179_s1 + $0x9e0] ss:$8 sps:$4 sm:$0xff]  }
 0x245   :  { %5972 = vmatprep.subr.bf16.mxu0 %v8131_v21  ;;  %5510 = vmatprep.mubr.bf16.mxu1 %v977_v43  ;;  %v8207_v21 = vld [vmem:[%s11179_s1 + $0x15e0] ss:$8 sps:$4 sm:$0xff]   ;;  %v8212_v43 = vld [vmem:[%s11179_s1 + $0x9f4] ss:$8 sps:$4 sm:$0xff]   ;;  %v10629_v13 = vrot.slane %v930_v56, %v8646_v49  ;;  %v8282_v56 = vld [vmem:[%s11179_s1 + $0xab0] ss:$8 sps:$4 sm:$0xff]  }
 0x246   :  { %6002 = vmatprep.mubr.bf16.mxu0 %v1124_v44  ;;  %v10632_v44 = vrot.slane %v1077_v23, %v8646_v49  ;;  %v8285_v23 = vld [vmem:[%s11179_s1 + $0x16b0] ss:$8 sps:$4 sm:$0xff]  }
 0x247   :  { %5481 = vmatpush1.bf16.msra.mxu1 %v8126_v45  ;;  %v8210_v45 = vld [vmem:[%s11179_s1 + $0x9f0] ss:$8 sps:$4 sm:$0xff]  }
 0x248   :  { %5973 = vmatpush1.bf16.msra.mxu0 %v8129_v46  ;;  %5482 = vmatprep.subr.bf16.mxu1 %v8134_v15  ;;  %v8213_v46 = vld [vmem:[%s11179_s1 + $0x15f0] ss:$8 sps:$4 sm:$0xff]   ;;  %v8218_v15 = vld [vmem:[%s11179_s1 + $0xa04] ss:$8 sps:$4 sm:$0xff]  }
 0x249   :  { %5974 = vmatprep.subr.bf16.mxu0 %v8137_v31  ;;  %v8221_v31 = vld [vmem:[%s11179_s1 + $0x1604] ss:$8 sps:$4 sm:$0xff]  }
 0x24b   :  { %5483 = vmatpush1.bf16.msra.mxu1 %v8132_v17  ;;  %v946_v17 = vcombine.high %v10629_v13, %v10629_v13 }
 0x24c   :  { %5975 = vmatpush1.bf16.msra.mxu0 %v8135_v35  ;;  %5484 = vmatprep.subr.bf16.mxu1 %v8140_v47  ;;  %v1093_v35 = vcombine.high %v10632_v44, %v10632_v44  ;;  %v975_v47 = vcombine.high %v10432_v36, %v10432_v36  ;;  %v8227_v36 = vld [vmem:[%s11179_s1 + $0x1614] ss:$8 sps:$4 sm:$0xff]  }
 0x24d   :  { %5976 = vmatprep.subr.bf16.mxu0 %v8143_v48  ;;  %v1122_v48 = vcombine.high %v10436_v37, %v10436_v37  ;;  %v10667_v37 = vrot.slane %v946_v17, %v8646_v49  ;;  %v8302_v17 = vld [vmem:[%s11179_s1 + $0xae4] ss:$8 sps:$4 sm:$0xff]  }
 0x24f   :  { %5485 = vmatpush1.bf16.msra.mxu1 %v8138_v50  ;;  %v8216_v50 = vld [vmem:[%s11179_s1 + $0xa00] ss:$8 sps:$4 sm:$0xff]  }
 0x250   :  { %5977 = vmatpush1.bf16.msra.mxu0 %v8141_v51  ;;  %5486 = vmatprep.subr.bf16.mxu1 %v8146_v53  ;;  %v8219_v51 = vld [vmem:[%s11179_s1 + $0x1600] ss:$8 sps:$4 sm:$0xff]   ;;  %v8224_v53 = vld [vmem:[%s11179_s1 + $0xa14] ss:$8 sps:$4 sm:$0xff]  }
 0x251   :  { %5978 = vmatprep.subr.bf16.mxu0 %v8149_v54  ;;  %v10670_v54 = vrot.slane %v1093_v35, %v8646_v49  ;;  %v8305_v35 = vld [vmem:[%s11179_s1 + $0x16e4] ss:$8 sps:$4 sm:$0xff]  }
 0x253   :  { %5487 = vmatpush1.bf16.msra.mxu1 %v8144_v39  ;;  %v8222_v39 = vld [vmem:[%s11179_s1 + $0xa10] ss:$8 sps:$4 sm:$0xff]  }
 0x254   :  { %5979 = vmatpush1.bf16.msra.mxu0 %v8147_v57  ;;  %5488 = vmatprep.subr.bf16.mxu1 %v8152_v60  ;;  %v8225_v57 = vld [vmem:[%s11179_s1 + $0x1610] ss:$8 sps:$4 sm:$0xff]   ;;  %v8230_v60 = vld [vmem:[%s11179_s1 + $0xa24] ss:$8 sps:$4 sm:$0xff]  }
 0x255   :  { %5980 = vmatprep.subr.bf16.mxu0 %v8155_v61  ;;  %v8233_v61 = vld [vmem:[%s11179_s1 + $0x1624] ss:$8 sps:$4 sm:$0xff]  }
 0x257   :  { %5489 = vmatpush1.bf16.msra.mxu1 %v8150_v40  ;;  %v8228_v40 = vld [vmem:[%s11179_s1 + $0xa20] ss:$8 sps:$4 sm:$0xff]  }
 0x258   :  { %5981 = vmatpush1.bf16.msra.mxu0 %v8153_v41  ;;  %5490 = vmatprep.subr.bf16.mxu1 %v8158_v62  ;;  %v8231_v41 = vld [vmem:[%s11179_s1 + $0x1620] ss:$8 sps:$4 sm:$0xff]   ;;  %v8236_v62 = vld [vmem:[%s11179_s1 + $0xa34] ss:$8 sps:$4 sm:$0xff]  }
 0x259   :  { %5982 = vmatprep.subr.bf16.mxu0 %v8161_v63  ;;  %v8239_v63 = vld [vmem:[%s11179_s1 + $0x1634] ss:$8 sps:$4 sm:$0xff]  }
 0x25b   :  { %5491 = vmatpush1.bf16.msra.mxu1 %v8156_v55  ;;  %v8234_v55 = vld [vmem:[%s11179_s1 + $0xa30] ss:$8 sps:$4 sm:$0xff]  }
 0x25c   :  { %5983 = vmatpush1.bf16.msra.mxu0 %v8159_v38  ;;  %5492 = vmatprep.subr.bf16.mxu1 %v8164_v2  ;;  %v8237_v38 = vld [vmem:[%s11179_s1 + $0x1630] ss:$8 sps:$4 sm:$0xff]   ;;  %v8242_v2 = vld [vmem:[%s11179_s1 + $0xa44] ss:$8 sps:$4 sm:$0xff]  }
 0x25d   :  { %5984 = vmatprep.subr.bf16.mxu0 %v8167_v3  ;;  %v8245_v3 = vld [vmem:[%s11179_s1 + $0x1644] ss:$8 sps:$4 sm:$0xff]  }
 0x25f   :  { %5493 = vmatpush1.bf16.msra.mxu1 %v8162_v4  ;;  %v8240_v4 = vld [vmem:[%s11179_s1 + $0xa40] ss:$8 sps:$4 sm:$0xff]  }
 0x260   :  { %5985 = vmatpush1.bf16.msra.mxu0 %v8165_v5  ;;  %5494 = vmatprep.subr.bf16.mxu1 %v8170_v6  ;;  %v8243_v5 = vld [vmem:[%s11179_s1 + $0x1640] ss:$8 sps:$4 sm:$0xff]   ;;  %v8248_v6 = vld [vmem:[%s11179_s1 + $0xa54] ss:$8 sps:$4 sm:$0xff]  }
 0x261   :  { %5986 = vmatprep.subr.bf16.mxu0 %v8173_v7  ;;  %v8251_v7 = vld [vmem:[%s11179_s1 + $0x1654] ss:$8 sps:$4 sm:$0xff]  }
 0x263   :  { %5495 = vmatpush1.bf16.msra.mxu1 %v8168_v8  ;;  %v8246_v8 = vld [vmem:[%s11179_s1 + $0xa50] ss:$8 sps:$4 sm:$0xff]  }
 0x264   :  { %5987 = vmatpush1.bf16.msra.mxu0 %v8171_v9  ;;  %5496 = vmatprep.subr.bf16.mxu1 %v8176_v10  ;;  %v8249_v9 = vld [vmem:[%s11179_s1 + $0x1650] ss:$8 sps:$4 sm:$0xff]   ;;  %v8254_v10 = vld [vmem:[%s11179_s1 + $0xa64] ss:$8 sps:$4 sm:$0xff]  }
 0x265   :  { %5988 = vmatprep.subr.bf16.mxu0 %v8179_v58  ;;  %v8257_v58 = vld [vmem:[%s11179_s1 + $0x1664] ss:$8 sps:$4 sm:$0xff]  }
 0x267   :  { %5497 = vmatpush1.bf16.msra.mxu1 %v8174_v18  ;;  %v8252_v18 = vld [vmem:[%s11179_s1 + $0xa60] ss:$8 sps:$4 sm:$0xff]  }
 0x268   :  { %5989 = vmatpush1.bf16.msra.mxu0 %v8177_v19  ;;  %5498 = vmatprep.subr.bf16.mxu1 %v8182_v0  ;;  %v8255_v19 = vld [vmem:[%s11179_s1 + $0x1660] ss:$8 sps:$4 sm:$0xff]   ;;  %v8260_v0 = vld [vmem:[%s11179_s1 + $0xa74] ss:$8 sps:$4 sm:$0xff]  }
 0x269   :  { %5990 = vmatprep.subr.bf16.mxu0 %v8185_v1  ;;  %v8263_v1 = vld [vmem:[%s11179_s1 + $0x1674] ss:$8 sps:$4 sm:$0xff]  }
 0x26b   :  { %5499 = vmatpush1.bf16.msra.mxu1 %v8180_v22  ;;  %v8258_v22 = vld [vmem:[%s11179_s1 + $0xa70] ss:$8 sps:$4 sm:$0xff]  }
 0x26c   :  { %5991 = vmatpush1.bf16.msra.mxu0 %v8183_v52  ;;  %5500 = vmatprep.subr.bf16.mxu1 %v8188_v59  ;;  %v8261_v52 = vld [vmem:[%s11179_s1 + $0x1670] ss:$8 sps:$4 sm:$0xff]   ;;  %v8266_v59 = vld [vmem:[%s11179_s1 + $0xa84] ss:$8 sps:$4 sm:$0xff]  }
 0x26d   :  { %5992 = vmatprep.subr.bf16.mxu0 %v8191_v11  ;;  %v8269_v11 = vld [vmem:[%s11179_s1 + $0x1684] ss:$8 sps:$4 sm:$0xff]  }
 0x26f   :  { %5501 = vmatpush1.bf16.msra.mxu1 %v8186_v24  ;;  %v8264_v24 = vld [vmem:[%s11179_s1 + $0xa80] ss:$8 sps:$4 sm:$0xff]  }
 0x270   :  { %5993 = vmatpush1.bf16.msra.mxu0 %v8189_v25  ;;  %5502 = vmatprep.subr.bf16.mxu1 %v8194_v26  ;;  %v8267_v25 = vld [vmem:[%s11179_s1 + $0x1680] ss:$8 sps:$4 sm:$0xff]   ;;  %v8272_v26 = vld [vmem:[%s11179_s1 + $0xa94] ss:$8 sps:$4 sm:$0xff]  }
 0x271   :  { %5994 = vmatprep.subr.bf16.mxu0 %v8197_v27  ;;  %v8275_v27 = vld [vmem:[%s11179_s1 + $0x1694] ss:$8 sps:$4 sm:$0xff]  }
 0x273   :  { %5503 = vmatpush1.bf16.msra.mxu1 %v8192_v28  ;;  %v8270_v28 = vld [vmem:[%s11179_s1 + $0xa90] ss:$8 sps:$4 sm:$0xff]  }
 0x274   :  { %5995 = vmatpush1.bf16.msra.mxu0 %v8195_v29  ;;  %5504 = vmatprep.subr.bf16.mxu1 %v8200_v30  ;;  %v8273_v29 = vld [vmem:[%s11179_s1 + $0x1690] ss:$8 sps:$4 sm:$0xff]   ;;  %v8278_v30 = vld [vmem:[%s11179_s1 + $0xaa4] ss:$8 sps:$4 sm:$0xff]  }
 0x275   :  { %5996 = vmatprep.subr.bf16.mxu0 %v8203_v14  ;;  %v8281_v14 = vld [vmem:[%s11179_s1 + $0x16a4] ss:$8 sps:$4 sm:$0xff]  }
 0x277   :  { %5505 = vmatpush1.bf16.msra.mxu1 %v8198_v32  ;;  %v8276_v32 = vld [vmem:[%s11179_s1 + $0xaa0] ss:$8 sps:$4 sm:$0xff]  }
 0x278   :  { %5997 = vmatpush1.bf16.msra.mxu0 %v8201_v33  ;;  %5506 = vmatprep.subr.bf16.mxu1 %v8206_v34  ;;  %v8279_v33 = vld [vmem:[%s11179_s1 + $0x16a0] ss:$8 sps:$4 sm:$0xff]   ;;  %v8284_v34 = vld [vmem:[%s11179_s1 + $0xab4] ss:$8 sps:$4 sm:$0xff]  }
 0x279   :  { %5998 = vmatprep.subr.bf16.mxu0 %v8209_v16  ;;  %v8287_v16 = vld [vmem:[%s11179_s1 + $0x16b4] ss:$8 sps:$4 sm:$0xff]  }
 0x27b   :  { %5507 = vmatpush1.bf16.msra.mxu1 %v8204_v20  ;;  %v8290_v20 = vld [vmem:[%s11179_s1 + $0xac4] ss:$8 sps:$4 sm:$0xff]  }
 0x27c   :  { %5999 = vmatpush1.bf16.msra.mxu0 %v8207_v21  ;;  %5508 = vmatprep.subr.bf16.mxu1 %v8212_v43  ;;  %v8293_v21 = vld [vmem:[%s11179_s1 + $0x16c4] ss:$8 sps:$4 sm:$0xff]   ;;  %v8288_v43 = vld [vmem:[%s11179_s1 + $0xac0] ss:$8 sps:$4 sm:$0xff]  }
 0x27d   :  { %6000 = vmatprep.subr.bf16.mxu0 %v8215_v12  ;;  %v8291_v12 = vld [vmem:[%s11179_s1 + $0x16c0] ss:$8 sps:$4 sm:$0xff]  }
 0x27f   :  { %5509 = vmatpush1.bf16.msra.mxu1 %v8210_v45  ;;  %v8296_v45 = vld [vmem:[%s11179_s1 + $0xad4] ss:$8 sps:$4 sm:$0xff]  }
 0x280   :  { %6001 = vmatpush1.bf16.msra.mxu0 %v8213_v46  ;;  %5519 = vmatprep.subr.bf16.mxu1 %v8218_v15  ;;  %v8299_v46 = vld [vmem:[%s11179_s1 + $0x16d4] ss:$8 sps:$4 sm:$0xff]   ;;  %v8294_v15 = vld [vmem:[%s11179_s1 + $0xad0] ss:$8 sps:$4 sm:$0xff]  }
 0x281   :  { %6011 = vmatprep.subr.bf16.mxu0 %v8221_v31  ;;  %v8297_v31 = vld [vmem:[%s11179_s1 + $0x16d0] ss:$8 sps:$4 sm:$0xff]  }
 0x282   :  { %5511 = vmatmul.mubr.bf16.vlgmr.msra.gmra.mrb[0].mxu1 %v975_v47  ;;  %v8300_v47 = vld [vmem:[%s11179_s1 + $0xae0] ss:$8 sps:$4 sm:$0xff]  }
 0x283   :  { %6003 = vmatmul.mubr.bf16.vlgmr.msra.gmra.mrb[0].mxu0 %v1122_v48  ;;  %5520 = vmatpush1.bf16.msra.mxu1 %v8216_v50  ;;  %v8303_v48 = vld [vmem:[%s11179_s1 + $0x16e0] ss:$8 sps:$4 sm:$0xff]   ;;  %v8308_v50 = vld [vmem:[%s11179_s1 + $0xaf4] ss:$8 sps:$4 sm:$0xff]  }
 0x284   :  { %6012 = vmatpush1.bf16.msra.mxu0 %v8219_v51  ;;  %5521 = vmatprep.subr.bf16.mxu1 %v8224_v53  ;;  %v8311_v51 = vld [vmem:[%s11179_s1 + $0x16f4] ss:$8 sps:$4 sm:$0xff]   ;;  %v8306_v53 = vld [vmem:[%s11179_s1 + $0xaf0] ss:$8 sps:$4 sm:$0xff]  }
 0x285   :  { %6013 = vmatprep.subr.bf16.mxu0 %v8227_v36  ;;  %5551 = vmatprep.mubr.bf16.mxu1 %v10667_v37  ;;  %v8309_v36 = vld [vmem:[%s11179_s1 + $0x16f0] ss:$8 sps:$4 sm:$0xff]  }
 0x286   :  { %6043 = vmatprep.mubr.bf16.mxu0 %v10670_v54 }
 0x287   :  { %5522 = vmatpush1.bf16.msra.mxu1 %v8222_v39  ;;  %v8315_v39 = vld [vmem:[%s11179_s1 + $0xb04] ss:$8 sps:$4 sm:$0xff]  }
 0x288   :  { %6014 = vmatpush1.bf16.msra.mxu0 %v8225_v57  ;;  %5523 = vmatprep.subr.bf16.mxu1 %v8230_v60  ;;  %v8319_v57 = vld [vmem:[%s11179_s1 + $0x1704] ss:$8 sps:$4 sm:$0xff]   ;;  %v10856_v60 = vrot.slane %v10629_v13, %v8646_v49  ;;  %v8322_v13 = vld [vmem:[%s11179_s1 + $0xb14] ss:$8 sps:$4 sm:$0xff]  }
 0x289   :  { %6015 = vmatprep.subr.bf16.mxu0 %v8233_v61  ;;  %v10860_v61 = vrot.slane %v10632_v44, %v8646_v49  ;;  %v8325_v44 = vld [vmem:[%s11179_s1 + $0x1714] ss:$8 sps:$4 sm:$0xff]  }
 0x28b   :  { %5524 = vmatpush1.bf16.msra.mxu1 %v8228_v40  ;;  %v8313_v40 = vld [vmem:[%s11179_s1 + $0xb00] ss:$8 sps:$4 sm:$0xff]  }
 0x28c   :  { %6016 = vmatpush1.bf16.msra.mxu0 %v8231_v41  ;;  %5525 = vmatprep.subr.bf16.mxu1 %v8236_v62  ;;  %v8317_v41 = vld [vmem:[%s11179_s1 + $0x1700] ss:$8 sps:$4 sm:$0xff]   ;;  %v978_v62 = vcombine.high %v10667_v37, %v10667_v37  ;;  %v8328_v37 = vld [vmem:[%s11179_s1 + $0xb24] ss:$8 sps:$4 sm:$0xff]  }
 0x28d   :  { %6017 = vmatprep.subr.bf16.mxu0 %v8239_v63  ;;  %v1125_v63 = vcombine.high %v10670_v54, %v10670_v54  ;;  %v8331_v54 = vld [vmem:[%s11179_s1 + $0x1724] ss:$8 sps:$4 sm:$0xff]  }
 0x28f   :  { %5526 = vmatpush1.bf16.msra.mxu1 %v8234_v55  ;;  %v8320_v55 = vld [vmem:[%s11179_s1 + $0xb10] ss:$8 sps:$4 sm:$0xff]  }
 0x290   :  { %6018 = vmatpush1.bf16.msra.mxu0 %v8237_v38  ;;  %5527 = vmatprep.subr.bf16.mxu1 %v8242_v2  ;;  %v8323_v38 = vld [vmem:[%s11179_s1 + $0x1710] ss:$8 sps:$4 sm:$0xff]   ;;  %v8326_v2 = vld [vmem:[%s11179_s1 + $0xb20] ss:$8 sps:$4 sm:$0xff]  }
 0x291   :  { %6019 = vmatprep.subr.bf16.mxu0 %v8245_v3  ;;  %v8329_v3 = vld [vmem:[%s11179_s1 + $0x1720] ss:$8 sps:$4 sm:$0xff]  }
 0x293   :  { %5528 = vmatpush1.bf16.msra.mxu1 %v8240_v4  ;;  %v8334_v4 = vld [vmem:[%s11179_s1 + $0xb34] ss:$8 sps:$4 sm:$0xff]  }
 0x294   :  { %6020 = vmatpush1.bf16.msra.mxu0 %v8243_v5  ;;  %5529 = vmatprep.subr.bf16.mxu1 %v8248_v6  ;;  %v8337_v5 = vld [vmem:[%s11179_s1 + $0x1734] ss:$8 sps:$4 sm:$0xff]   ;;  %v8332_v6 = vld [vmem:[%s11179_s1 + $0xb30] ss:$8 sps:$4 sm:$0xff]  }
 0x295   :  { %6021 = vmatprep.subr.bf16.mxu0 %v8251_v7  ;;  %v8335_v7 = vld [vmem:[%s11179_s1 + $0x1730] ss:$8 sps:$4 sm:$0xff]  }
 0x297   :  { %5530 = vmatpush1.bf16.msra.mxu1 %v8246_v8  ;;  %v8340_v8 = vld [vmem:[%s11179_s1 + $0xb44] ss:$8 sps:$4 sm:$0xff]  }
 0x298   :  { %6022 = vmatpush1.bf16.msra.mxu0 %v8249_v9  ;;  %5531 = vmatprep.subr.bf16.mxu1 %v8254_v10  ;;  %v8343_v9 = vld [vmem:[%s11179_s1 + $0x1744] ss:$8 sps:$4 sm:$0xff]   ;;  %v8338_v10 = vld [vmem:[%s11179_s1 + $0xb40] ss:$8 sps:$4 sm:$0xff]  }
 0x299   :  { %6023 = vmatprep.subr.bf16.mxu0 %v8257_v58  ;;  %v8341_v58 = vld [vmem:[%s11179_s1 + $0x1740] ss:$8 sps:$4 sm:$0xff]  }
 0x29b   :  { %5532 = vmatpush1.bf16.msra.mxu1 %v8252_v18  ;;  %v8346_v18 = vld [vmem:[%s11179_s1 + $0xb54] ss:$8 sps:$4 sm:$0xff]  }
 0x29c   :  { %6024 = vmatpush1.bf16.msra.mxu0 %v8255_v19  ;;  %5533 = vmatprep.subr.bf16.mxu1 %v8260_v0  ;;  %v8349_v19 = vld [vmem:[%s11179_s1 + $0x1754] ss:$8 sps:$4 sm:$0xff]   ;;  %v8344_v0 = vld [vmem:[%s11179_s1 + $0xb50] ss:$8 sps:$4 sm:$0xff]  }
 0x29d   :  { %6025 = vmatprep.subr.bf16.mxu0 %v8263_v1  ;;  %v8347_v1 = vld [vmem:[%s11179_s1 + $0x1750] ss:$8 sps:$4 sm:$0xff]  }
 0x29f   :  { %5534 = vmatpush1.bf16.msra.mxu1 %v8258_v22  ;;  %v8352_v22 = vld [vmem:[%s11179_s1 + $0xb64] ss:$8 sps:$4 sm:$0xff]  }
 0x2a0   :  { %6026 = vmatpush1.bf16.msra.mxu0 %v8261_v52  ;;  %5535 = vmatprep.subr.bf16.mxu1 %v8266_v59  ;;  %v8355_v52 = vld [vmem:[%s11179_s1 + $0x1764] ss:$8 sps:$4 sm:$0xff]   ;;  %v8350_v59 = vld [vmem:[%s11179_s1 + $0xb60] ss:$8 sps:$4 sm:$0xff]  }
 0x2a1   :  { %6027 = vmatprep.subr.bf16.mxu0 %v8269_v11  ;;  %v8353_v11 = vld [vmem:[%s11179_s1 + $0x1760] ss:$8 sps:$4 sm:$0xff]  }
 0x2a3   :  { %5536 = vmatpush1.bf16.msra.mxu1 %v8264_v24  ;;  %v8358_v24 = vld [vmem:[%s11179_s1 + $0xb74] ss:$8 sps:$4 sm:$0xff]  }
 0x2a4   :  { %6028 = vmatpush1.bf16.msra.mxu0 %v8267_v25  ;;  %5537 = vmatprep.subr.bf16.mxu1 %v8272_v26  ;;  %v8361_v25 = vld [vmem:[%s11179_s1 + $0x1774] ss:$8 sps:$4 sm:$0xff]   ;;  %v8356_v26 = vld [vmem:[%s11179_s1 + $0xb70] ss:$8 sps:$4 sm:$0xff]  }
 0x2a5   :  { %6029 = vmatprep.subr.bf16.mxu0 %v8275_v27  ;;  %v8359_v27 = vld [vmem:[%s11179_s1 + $0x1770] ss:$8 sps:$4 sm:$0xff]  }
 0x2a7   :  { %5538 = vmatpush1.bf16.msra.mxu1 %v8270_v28  ;;  %v8364_v28 = vld [vmem:[%s11179_s1 + $0xb84] ss:$8 sps:$4 sm:$0xff]  }
 0x2a8   :  { %6030 = vmatpush1.bf16.msra.mxu0 %v8273_v29  ;;  %5539 = vmatprep.subr.bf16.mxu1 %v8278_v30  ;;  %v8367_v29 = vld [vmem:[%s11179_s1 + $0x1784] ss:$8 sps:$4 sm:$0xff]   ;;  %v8362_v30 = vld [vmem:[%s11179_s1 + $0xb80] ss:$8 sps:$4 sm:$0xff]  }
 0x2a9   :  { %6031 = vmatprep.subr.bf16.mxu0 %v8281_v14  ;;  %v8365_v14 = vld [vmem:[%s11179_s1 + $0x1780] ss:$8 sps:$4 sm:$0xff]  }
 0x2ab   :  { %5540 = vmatpush1.bf16.msra.mxu1 %v8276_v32  ;;  %v8370_v32 = vld [vmem:[%s11179_s1 + $0xb94] ss:$8 sps:$4 sm:$0xff]  }
 0x2ac   :  { %6032 = vmatpush1.bf16.msra.mxu0 %v8279_v33  ;;  %5541 = vmatprep.subr.bf16.mxu1 %v8284_v34  ;;  %v8373_v33 = vld [vmem:[%s11179_s1 + $0x1794] ss:$8 sps:$4 sm:$0xff]   ;;  %v8368_v34 = vld [vmem:[%s11179_s1 + $0xb90] ss:$8 sps:$4 sm:$0xff]  }
 0x2ad   :  { %6033 = vmatprep.subr.bf16.mxu0 %v8287_v16  ;;  %v8371_v16 = vld [vmem:[%s11179_s1 + $0x1790] ss:$8 sps:$4 sm:$0xff]  }
 0x2af   :  { %5542 = vmatpush1.bf16.msra.mxu1 %v8282_v56  ;;  %v8376_v56 = vld [vmem:[%s11179_s1 + $0xba4] ss:$8 sps:$4 sm:$0xff]  }
 0x2b0   :  { %6034 = vmatpush1.bf16.msra.mxu0 %v8285_v23  ;;  %5543 = vmatprep.subr.bf16.mxu1 %v8290_v20  ;;  %v8379_v23 = vld [vmem:[%s11179_s1 + $0x17a4] ss:$8 sps:$4 sm:$0xff]   ;;  %v8374_v20 = vld [vmem:[%s11179_s1 + $0xba0] ss:$8 sps:$4 sm:$0xff]  }
 0x2b1   :  { %6035 = vmatprep.subr.bf16.mxu0 %v8293_v21  ;;  %v8377_v21 = vld [vmem:[%s11179_s1 + $0x17a0] ss:$8 sps:$4 sm:$0xff]  }
 0x2b3   :  { %5544 = vmatpush1.bf16.msra.mxu1 %v8288_v43  ;;  %v8382_v43 = vld [vmem:[%s11179_s1 + $0xbb4] ss:$8 sps:$4 sm:$0xff]  }
 0x2b4   :  { %6036 = vmatpush1.bf16.msra.mxu0 %v8291_v12  ;;  %5545 = vmatprep.subr.bf16.mxu1 %v8296_v45  ;;  %v8385_v12 = vld [vmem:[%s11179_s1 + $0x17b4] ss:$8 sps:$4 sm:$0xff]   ;;  %v8380_v45 = vld [vmem:[%s11179_s1 + $0xbb0] ss:$8 sps:$4 sm:$0xff]  }
 0x2b5   :  { %6037 = vmatprep.subr.bf16.mxu0 %v8299_v46  ;;  %v8383_v46 = vld [vmem:[%s11179_s1 + $0x17b0] ss:$8 sps:$4 sm:$0xff]  }
 0x2b7   :  { %5546 = vmatpush1.bf16.msra.mxu1 %v8294_v15  ;;  %v8388_v15 = vld [vmem:[%s11179_s1 + $0xbc4] ss:$8 sps:$4 sm:$0xff]  }
 0x2b8   :  { %6038 = vmatpush1.bf16.msra.mxu0 %v8297_v31  ;;  %5547 = vmatprep.subr.bf16.mxu1 %v8302_v17  ;;  %v8391_v31 = vld [vmem:[%s11179_s1 + $0x17c4] ss:$8 sps:$4 sm:$0xff]   ;;  %v8386_v17 = vld [vmem:[%s11179_s1 + $0xbc0] ss:$8 sps:$4 sm:$0xff]  }
 0x2b9   :  { %6039 = vmatprep.subr.bf16.mxu0 %v8305_v35  ;;  %v8389_v35 = vld [vmem:[%s11179_s1 + $0x17c0] ss:$8 sps:$4 sm:$0xff]  }
 0x2bb   :  { %5548 = vmatpush1.bf16.msra.mxu1 %v8300_v47  ;;  %v8394_v47 = vld [vmem:[%s11179_s1 + $0xbd4] ss:$8 sps:$4 sm:$0xff]  }
 0x2bc   :  { %6040 = vmatpush1.bf16.msra.mxu0 %v8303_v48  ;;  %5549 = vmatprep.subr.bf16.mxu1 %v8308_v50  ;;  %v8397_v48 = vld [vmem:[%s11179_s1 + $0x17d4] ss:$8 sps:$4 sm:$0xff]   ;;  %v8392_v50 = vld [vmem:[%s11179_s1 + $0xbd0] ss:$8 sps:$4 sm:$0xff]  }
 0x2bd   :  { %6041 = vmatprep.subr.bf16.mxu0 %v8311_v51  ;;  %v8395_v51 = vld [vmem:[%s11179_s1 + $0x17d0] ss:$8 sps:$4 sm:$0xff]  }
 0x2bf   :  { %5550 = vmatpush1.bf16.msra.mxu1 %v8306_v53  ;;  %v8400_v53 = vld [vmem:[%s11179_s1 + $0xbe4] ss:$8 sps:$4 sm:$0xff]  }
 0x2c0   :  { %6042 = vmatpush1.bf16.msra.mxu0 %v8309_v36  ;;  %5560 = vmatprep.subr.bf16.mxu1 %v8315_v39  ;;  %v8403_v36 = vld [vmem:[%s11179_s1 + $0x17e4] ss:$8 sps:$4 sm:$0xff]   ;;  %v8398_v39 = vld [vmem:[%s11179_s1 + $0xbe0] ss:$8 sps:$4 sm:$0xff]  }
 0x2c1   :  { %6052 = vmatprep.subr.bf16.mxu0 %v8319_v57  ;;  %v8401_v57 = vld [vmem:[%s11179_s1 + $0x17e0] ss:$8 sps:$4 sm:$0xff]  }
 0x2c2   :  { %5552 = vmatmul.mubr.bf16.vlgmr.msra.gmra.mrb[0].mxu1 %v10856_v60 }
 0x2c3   :  { %6044 = vmatmul.mubr.bf16.vlgmr.msra.gmra.mrb[0].mxu0 %v10860_v61  ;;  %5561 = vmatpush1.bf16.msra.mxu1 %v8313_v40  ;;  %v8406_v40 = vld [vmem:[%s11179_s1 + $0xbf4] ss:$8 sps:$4 sm:$0xff]  }
 0x2c4   :  { %6053 = vmatpush1.bf16.msra.mxu0 %v8317_v41  ;;  %5562 = vmatprep.subr.bf16.mxu1 %v8322_v13  ;;  %v8409_v41 = vld [vmem:[%s11179_s1 + $0x17f4] ss:$8 sps:$4 sm:$0xff]   ;;  %v8404_v13 = vld [vmem:[%s11179_s1 + $0xbf0] ss:$8 sps:$4 sm:$0xff]  }
 0x2c5   :  { %6054 = vmatprep.subr.bf16.mxu0 %v8325_v44  ;;  %5592 = vmatprep.mubr.bf16.mxu1 %v978_v62  ;;  %v8407_v44 = vld [vmem:[%s11179_s1 + $0x17f0] ss:$8 sps:$4 sm:$0xff]   ;;  %v8412_v62 = vld [vmem:[%s11179_s1 + $0x1804] ss:$8 sps:$4 sm:$0xff]  }
 0x2c6   :  { %6084 = vmatprep.mubr.bf16.mxu0 %v1125_v63  ;;  %v976_v63 = vcombine.high %v10856_v60, %v10856_v60  ;;  %v8413_v60 = vld [vmem:[%s11179_s1 + $0x1810] ss:$8 sps:$4 sm:$0xff]  }
 0x2c7   :  { %5563 = vmatpush1.bf16.msra.mxu1 %v8320_v55  ;;  %v1123_v55 = vcombine.high %v10860_v61, %v10860_v61  ;;  %v8418_v61 = vld [vmem:[%s11179_s1 + $0x1824] ss:$8 sps:$4 sm:$0xff]  }
 0x2c8   :  { %6055 = vmatpush1.bf16.msra.mxu0 %v8323_v38  ;;  %5564 = vmatprep.subr.bf16.mxu1 %v8328_v37  ;;  %v8410_v38 = vld [vmem:[%s11179_s1 + $0x1800] ss:$8 sps:$4 sm:$0xff]   ;;  %v8415_v37 = vld [vmem:[%s11179_s1 + $0x1814] ss:$8 sps:$4 sm:$0xff]  }
 0x2c9   :  { %6056 = vmatprep.subr.bf16.mxu0 %v8331_v54  ;;  %v8479_v54 = vmov 0  }
 0x2cb   :  { %5565 = vmatpush1.bf16.msra.mxu1 %v8326_v2  ;;  %v8416_v2 = vld [vmem:[%s11179_s1 + $0x1820] ss:$8 sps:$4 sm:$0xff]  }
 0x2cc   :  { %6057 = vmatpush1.bf16.msra.mxu0 %v8329_v3  ;;  %5566 = vmatprep.subr.bf16.mxu1 %v8334_v4  ;;  %v8421_v3 = vld [vmem:[%s11179_s1 + $0x1834] ss:$8 sps:$4 sm:$0xff]   ;;  %v8419_v4 = vld [vmem:[%s11179_s1 + $0x1830] ss:$8 sps:$4 sm:$0xff]  }
 0x2cd   :  { %6058 = vmatprep.subr.bf16.mxu0 %v8337_v5  ;;  %v8424_v5 = vld [vmem:[%s11179_s1 + $0x1844] ss:$8 sps:$4 sm:$0xff]  }
 0x2cf   :  { %5567 = vmatpush1.bf16.msra.mxu1 %v8332_v6  ;;  %v8422_v6 = vld [vmem:[%s11179_s1 + $0x1840] ss:$8 sps:$4 sm:$0xff]  }
 0x2d0   :  { %6059 = vmatpush1.bf16.msra.mxu0 %v8335_v7  ;;  %5568 = vmatprep.subr.bf16.mxu1 %v8340_v8  ;;  %v8427_v7 = vld [vmem:[%s11179_s1 + $0x1854] ss:$8 sps:$4 sm:$0xff]   ;;  %v8425_v8 = vld [vmem:[%s11179_s1 + $0x1850] ss:$8 sps:$4 sm:$0xff]  }
 0x2d1   :  { %6060 = vmatprep.subr.bf16.mxu0 %v8343_v9  ;;  %v8430_v9 = vld [vmem:[%s11179_s1 + $0x1864] ss:$8 sps:$4 sm:$0xff]  }
 0x2d3   :  { %5569 = vmatpush1.bf16.msra.mxu1 %v8338_v10  ;;  %v8428_v10 = vld [vmem:[%s11179_s1 + $0x1860] ss:$8 sps:$4 sm:$0xff]  }
 0x2d4   :  { %6061 = vmatpush1.bf16.msra.mxu0 %v8341_v58  ;;  %5570 = vmatprep.subr.bf16.mxu1 %v8346_v18  ;;  %v8433_v58 = vld [vmem:[%s11179_s1 + $0x1874] ss:$8 sps:$4 sm:$0xff]   ;;  %v8431_v18 = vld [vmem:[%s11179_s1 + $0x1870] ss:$8 sps:$4 sm:$0xff]   ;;  %s8480_s1 = smov [#allocation2]  }
 0x2d5   :  { %6062 = vmatprep.subr.bf16.mxu0 %v8349_v19  ;;  %v6329_v19 = vld.sshfl [vmem:[%s11178_s0 + $0x30] sm:$0x1 pattern:$0x75316420]  ;;  %s6321_s10 = sshll.u32 %s8480_s1, 4  ;;  %s6322_s10 = int_to_ptr.vmem [resolvable:$true] %s6321_s10 }
 0x2d6   :  { %s8454_s11 = scalar_lea.vmem %s6322_s10, 32  ;;  %p8459_p1 = scmp.lt.s32.totalorder %s6322_s10, %s6322_s10 }
 0x2d7   :  { %5571 = vmatpush1.bf16.msra.mxu1 %v8344_v0  ;;  %v1139_v0 = vrot.slane %v6329_v19, %v8646_v49  ;;  %v8437_v49 = vld [vmem:[%s11181_s3 + $0x8] sm:$0xff]   ;;  %p8455_p0 = scmp.ne.s32.totalorder %s6322_s10, %s8454_s11  ;;  %p8460_p2 = scmp.lt.s32.totalorder %s8454_s11, %s8454_s11 }
 0x2d8   :  { %6063 = vmatpush1.bf16.msra.mxu0 %v8347_v1  ;;  %5572 = vmatprep.subr.bf16.mxu1 %v8352_v22  ;;  %v8434_v1 = vld [vmem:[%s11181_s3 + $0x40] sm:$0xff]  }
 0x2d9   :  { %6064 = vmatprep.subr.bf16.mxu0 %v8355_v52  ;;  %v8435_v22 = vld [vmem:[%s11181_s3] sm:$0xff]   ;;  %v8436_v52 = vld [vmem:[%s11181_s3 + $0x48] sm:$0xff]   ;;  %p8461_p3 = por %p8460_p2, %p8459_p1 }
 0x2db   :  { %5573 = vmatpush1.bf16.msra.mxu1 %v8350_v59  ;;  %v8438_v59 = vld [vmem:[%s11181_s3 + $0x50] sm:$0xff]   ;;  %p8462_p4 = pnand %p8461_p3, %p8455_p0 }
 0x2dc   :  { %6065 = vmatpush1.bf16.msra.mxu0 %v8353_v11  ;;  %5574 = vmatprep.subr.bf16.mxu1 %v8358_v24  ;;  %v8439_v11 = vld [vmem:[%s11181_s3 + $0x10] sm:$0xff]   ;;  %v8440_v24 = vld [vmem:[%s11181_s3 + $0x58] sm:$0xff]  }
 0x2dd   :  { %6066 = vmatprep.subr.bf16.mxu0 %v8361_v25  ;;  %v8441_v25 = vld [vmem:[%s11181_s3 + $0x18] sm:$0xff]  }
 0x2df   :  { %5575 = vmatpush1.bf16.msra.mxu1 %v8356_v26  ;;  %v8442_v26 = vld [vmem:[%s11181_s3 + $0x60] sm:$0xff]  }
 0x2e0   :  { %6067 = vmatpush1.bf16.msra.mxu0 %v8359_v27  ;;  %5576 = vmatprep.subr.bf16.mxu1 %v8364_v28  ;;  %v8443_v27 = vld [vmem:[%s11181_s3 + $0x20] sm:$0xff]   ;;  %v8444_v28 = vld [vmem:[%s11181_s3 + $0x68] sm:$0xff]  }
 0x2e1   :  { %6068 = vmatprep.subr.bf16.mxu0 %v8367_v29  ;;  %v8445_v29 = vld [vmem:[%s11181_s3 + $0x28] sm:$0xff]  }
 0x2e3   :  { %5577 = vmatpush1.bf16.msra.mxu1 %v8362_v30  ;;  %v8446_v30 = vld [vmem:[%s11181_s3 + $0x70] sm:$0xff]  }
 0x2e4   :  { %6069 = vmatpush1.bf16.msra.mxu0 %v8365_v14  ;;  %5578 = vmatprep.subr.bf16.mxu1 %v8370_v32  ;;  %v8447_v14 = vld [vmem:[%s11181_s3 + $0x30] sm:$0xff]   ;;  %v8448_v32 = vld [vmem:[%s11181_s3 + $0x78] sm:$0xff]  }
 0x2e5   :  { %6070 = vmatprep.subr.bf16.mxu0 %v8373_v33  ;;  %v8449_v33 = vld [vmem:[%s11181_s3 + $0x38] sm:$0xff]  }
 0x2e7   :  { %5579 = vmatpush1.bf16.msra.mxu1 %v8368_v34 }
 0x2e8   :  { %6071 = vmatpush1.bf16.msra.mxu0 %v8371_v16  ;;  %5580 = vmatprep.subr.bf16.mxu1 %v8376_v56 }
 0x2e9   :  { %6072 = vmatprep.subr.bf16.mxu0 %v8379_v23 }
 0x2eb   :  { %5581 = vmatpush1.bf16.msra.mxu1 %v8374_v20  ;;  %v817_v20 = vsub.s32 0, %v8628_v42 }
 0x2ec   :  { %6073 = vmatpush1.bf16.msra.mxu0 %v8377_v21  ;;  %5582 = vmatprep.subr.bf16.mxu1 %v8382_v43  ;;  %v813_v21 = vld [vmem:[%s11180_s2] sm:$0x3]  ;;  %v821_v43 = vsub.s32 1, %v8628_v42 }
 0x2ed   :  { %6074 = vmatprep.subr.bf16.mxu0 %v8385_v12  ;;  %v818_v12 = vrot.slane %v813_v21, %v817_v20  ;;  %v7114_v42 = vld [vmem:[%s11182_s4] ss:$0 sm:$0xff] }
 0x2ef   :  { %5583 = vmatpush1.bf16.msra.mxu1 %v8380_v45  ;;  %v822_v45 = vrot.slane %v813_v21, %v821_v43 }
 0x2f0   :  { %6075 = vmatpush1.bf16.msra.mxu0 %v8383_v46  ;;  %5584 = vmatprep.subr.bf16.mxu1 %v8388_v15 }
 0x2f1   :  { %6076 = vmatprep.subr.bf16.mxu0 %v8391_v31 }
 0x2f3   :  { %5585 = vmatpush1.bf16.msra.mxu1 %v8386_v17 }
 0x2f4   :  { %6077 = vmatpush1.bf16.msra.mxu0 %v8389_v35  ;;  %5586 = vmatprep.subr.bf16.mxu1 %v8394_v47 }
 0x2f5   :  { %6078 = vmatprep.subr.bf16.mxu0 %v8397_v48 }
 0x2f7   :  { %5587 = vmatpush1.bf16.msra.mxu1 %v8392_v50 }
 0x2f8   :  { %6079 = vmatpush1.bf16.msra.mxu0 %v8395_v51  ;;  %5588 = vmatprep.subr.bf16.mxu1 %v8400_v53 }
 0x2f9   :  { %6080 = vmatprep.subr.bf16.mxu0 %v8403_v36 }
 0x2fb   :  { %5589 = vmatpush1.bf16.msra.mxu1 %v8398_v39 }
 0x2fc   :  { %6081 = vmatpush1.bf16.msra.mxu0 %v8401_v57  ;;  %5590 = vmatprep.subr.bf16.mxu1 %v8406_v40 }
 0x2fd   :  { %6082 = vmatprep.subr.bf16.mxu0 %v8409_v41 }
 0x2ff   :  { %5591 = vmatpush1.bf16.msra.mxu1 %v8404_v13 }
 0x300   :  { %6083 = vmatpush1.bf16.msra.mxu0 %v8407_v44  ;;  %7131 = vmatprep.subr.bf16.mxu1 %v8434_v1 }
 0x301   :  { %6093 = vmatprep.subr.bf16.mxu0 %v8412_v62 }
 0x302   :  { %5593 = vmatmul.mubr.bf16.vlgmr.msra.gmra.mrb[0].mxu1 %v976_v63 }
 0x303   :  { %6085 = vmatmul.mubr.bf16.vlgmr.msra.gmra.mrb[0].mxu0 %v1123_v55  ;;  %7132 = vmatpush3.bf16.msra.mxu1 %v8435_v22 }
 0x304   :  { %6094 = vmatpush1.bf16.msra.mxu0 %v8410_v38  ;;  %6125 = vmatprep.mubr.bf16.mxu0 %v8479_v54 }
 0x305   :  { %6095 = vmatprep.subr.bf16.mxu0 %v8415_v37  ;;  %7133 = vmatprep.subr.bf16.mxu1 %v8436_v52 }
 0x307   :  { %7134 = vmatpush3.bf16.msra.mxu1 %v8437_v49 }
 0x308   :  { %6096 = vmatpush1.bf16.msra.mxu0 %v8413_v60  ;;  %7135 = vmatprep.subr.bf16.mxu1 %v8438_v59 }
 0x309   :  { %6097 = vmatprep.subr.bf16.mxu0 %v8418_v61 }
 0x30b   :  { %7136 = vmatpush3.bf16.msra.mxu1 %v8439_v11 }
 0x30c   :  { %6098 = vmatpush1.bf16.msra.mxu0 %v8416_v2  ;;  %7137 = vmatprep.subr.bf16.mxu1 %v8440_v24 }
 0x30d   :  { %6099 = vmatprep.subr.bf16.mxu0 %v8421_v3 }
 0x30f   :  { %7138 = vmatpush3.bf16.msra.mxu1 %v8441_v25 }
 0x310   :  { %6100 = vmatpush1.bf16.msra.mxu0 %v8419_v4  ;;  %7139 = vmatprep.subr.bf16.mxu1 %v8442_v26 }
 0x311   :  { %6101 = vmatprep.subr.bf16.mxu0 %v8424_v5 }
 0x313   :  { %7140 = vmatpush3.bf16.msra.mxu1 %v8443_v27 }
 0x314   :  { %6102 = vmatpush1.bf16.msra.mxu0 %v8422_v6  ;;  %7141 = vmatprep.subr.bf16.mxu1 %v8444_v28 }
 0x315   :  { %6103 = vmatprep.subr.bf16.mxu0 %v8427_v7 }
 0x317   :  { %7142 = vmatpush3.bf16.msra.mxu1 %v8445_v29 }
 0x318   :  { %6104 = vmatpush1.bf16.msra.mxu0 %v8425_v8  ;;  %7143 = vmatprep.subr.bf16.mxu1 %v8446_v30 }
 0x319   :  { %6105 = vmatprep.subr.bf16.mxu0 %v8430_v9 }
 0x31b   :  { %7144 = vmatpush3.bf16.msra.mxu1 %v8447_v14 }
 0x31c   :  { %6106 = vmatpush1.bf16.msra.mxu0 %v8428_v10  ;;  %7145 = vmatprep.subr.bf16.mxu1 %v8448_v32 }
 0x31d   :  { %6107 = vmatprep.subr.bf16.mxu0 %v8433_v58 }
 0x31f   :  { %7146 = vmatpush3.bf16.msra.mxu1 %v8449_v33 }
 0x320   :  { %6108 = vmatpush1.bf16.msra.mxu0 %v8431_v18 }
 0x323   :  { %6126 = vmatmul.mubr.bf16.vlgmr.msra.gmra.mrb[0].mxu0 %v1139_v0 }
 0x3d5   :  { %v5594_v34 = vpop.f32.mrb[0].mxu1 }
 0x3d6   :  { %v5596_v16 = vpop.f32.mrb[1].mxu1  ;;  %v7153_v46 = vadd.f32 %v5594_v34, %v818_v12 }
 0x3d7   :  { %v5598_v56 = vpop.f32.mrb[2].mxu1  ;;  %v7155_v15 = vadd.f32 %v5596_v16, %v822_v45 }
 0x3d8   :  { %v5599_v23 = vpop.f32.mrb[3].mxu1 }
 0x3f6   :  { %v6127_v31 = vpop.f32.mrb[0].mxu0 }
 0x3f7   :  { %v7154_v17 = vadd.f32 %v7153_v46, %v6127_v31  ;;  %v6129_v35 = vpop.f32.mrb[1].mxu0 }
 0x3f8   :  { %v7156_v47 = vadd.f32 %v7155_v15, %v6129_v35  ;;  %v6131_v48 = vpop.f32.mrb[2].mxu0 }
 0x3f9   :  { %v6134_v50 = vmax.f32 %v7154_v17, 0.0  ;;  %v6132_v51 = vpop.f32.mrb[3].mxu0 }
 0x3fa   :  { %v6135_v53 = vmax.f32 %v7156_v47, 0.0 }
 0x3fb   :  { %v6136_v39 = vpack.c.bf16 %v6134_v50, %v6134_v50 }
 0x3fc   :  { %v6137_v36 = vpack.c.bf16 %v6135_v53, %v6135_v53 }
 0x3fe   :  { %6305 = vmatprep.mubr.bf16.mxu1 %v6137_v36 }
 0x3ff   :  { %6306 = vmatmul.mubr.bf16.vlgmr.msra.gmra.mrb[4].mxu1 %v6136_v39 }
 0x4d2   :  { %v7147_v57 = vpop.f32.mrb[4].mxu1 }
 0x4d3   :  { %v7148_v40 = vpop.f32.mrb[5].mxu1 }
 0x4d4   :  { %v7149_v41 = vadd.f32 %v7148_v40, %v7147_v57  ;;  %v7150_v13 = vpop.f32.mrb[6].mxu1 }
 0x4d5   :  { %v7151_v44 = vpop.f32.mrb[7].mxu1 }
 0x4d6   :  { %v6308_v62 = vadd.f32 %v7149_v41, %v7114_v42 }
 0x4d8   :  { %6314 = vst.msk [vmem:[#allocation2] sm:$0x3] %vm6313_vm0, %v6308_v62 }
 0x4d9   :  { %8465 = shalt.err (!%p8462_p4)
}
 0x4da   :  { %s8466_s4 = scalar_lea.hbm %s11183_s5, 32 }
 0x4db   :  { %p8467_p5 = scmp.ne.s32.totalorder %s11183_s5, %s8466_s4  ;;  %p8470_p6 = scmp.lt.u32.totalorder %s8466_s4, %s11183_s5 }
 0x4dd   :  { %p8472_p7 = pnand %p8470_p6, %p8467_p5 }
 0x4df   :  { %8475 = shalt.err (!%p8472_p7)
}
 0x4e0   :  { %6324 = dma.vmem_to_hbm [thread:$0]  %s6322_s10, 32, %s11183_s5, [#allocation3]  }
 0x4e1   :  { %8476 = dma.done.wait [#allocation3], 32  }
 0x4e2   :  { %8477 = vsyncadd [#allocation3], 4294967264 }
 0x4e3   :  { %6328 = vsyncpa [#allocation3], 1 }

</bundles_post_ra>
